<compile_context>
chip_gen: v6e
topology: v6e:2x2x1
jax: 0.10.0
libtpu: 0.0.40
codegen_flags: <defaults>
</compile_context>

<pallas_src>
import numpy as np
import jax
import jax.numpy as jnp
from jax.experimental import pallas as pl
from jax.experimental.pallas import tpu as pltpu


# ------------------------------ fused Pallas kernel ------------------------------ #

def mnist_fused_kernel(x_ref, t1_ref, b1_ref, t2_ref, b2_ref, t3_ref, b3_ref,
                       w1r_ref, fc1b_ref, w2t_ref, fc2b_ref, o_ref, pad2):
    f32 = jnp.float32
    bf16 = jnp.bfloat16

    # ---- conv1: 1->16, 5x5, pad=2 (outputs already in conv2's padded-x lane frame) ----
    xb = x_ref[...].astype(bf16)                              # (32, 32) pre-padded image
    acc1 = jnp.zeros((28, 512), f32)
    for kh in range(5):
        acc1 = acc1 + jnp.dot(xb[kh:kh + 28, :], t1_ref[kh],
                              preferred_element_type=f32)
    a1 = jnp.maximum(acc1 + b1_ref[...], 0.0)                 # (28, 512); x-pad lanes stay 0

    # y-padding rows for conv2 via VMEM scratch (rows 0:2 / 30:32 zero, 2:30 = conv1 output)
    zrows = jnp.zeros((2, 512), f32)
    pad2[0:2, :] = zrows
    pad2[30:32, :] = zrows
    pad2[2:30, :] = a1

    # ---- conv2: 16->16, 5x5, pad=2 ----
    acc2 = jnp.zeros((28, 448), f32)
    for kh in range(5):
        acc2 = acc2 + jnp.dot(pad2[kh:kh + 28, :].astype(bf16), t2_ref[kh],
                              preferred_element_type=f32)
    a2 = jnp.maximum(acc2 + b2_ref[...], 0.0).astype(bf16)    # (28, 448)

    # ---- conv3: 16->8, 5x5, valid; output lanes = (x%2)*96 + (x//2)*8 + co ----
    acc3 = jnp.zeros((24, 192), f32)
    for kh in range(5):
        acc3 = acc3 + jnp.dot(a2[kh:kh + 24, :], t3_ref[kh],
                              preferred_element_type=f32)
    a3 = jnp.maximum(acc3 + b3_ref[...], 0.0)                 # (24, 192)

    # ---- 2x2 max-pool: x-pairs via phase-split lane halves, y-pairs via row slices ----
    mx = jnp.maximum(a3[:, 0:96], a3[:, 96:192])              # (24, 96): lane = xo*8 + co

    # ---- fc1 (CHW flatten folded into w1r) + fc2 ----
    h = fc1b_ref[...]                                         # (1, 240) f32
    for yo in range(12):
        row = jnp.maximum(mx[2 * yo:2 * yo + 1, :],
                          mx[2 * yo + 1:2 * yo + 2, :])       # (1, 96) pooled row yo
        h = h + jnp.dot(row.astype(bf16), w1r_ref[yo],
                        preferred_element_type=f32)
    o_ref[...] = jnp.dot(h, w2t_ref[...], preferred_element_type=f32) + fc2b_ref[...]


# ------------------------------ host-side weight prep ------------------------------ #

def prepare_params(params):
    """One-time host prep: fold conv weights into row-band block-Toeplitz matrices, fold
    padding / phase-split / CHW-flatten permutations into weights, cast matmul operands bf16."""

    def toeplitz(w, wp, wo, ncols, col_of):
        w = np.asarray(w, np.float32)                         # (Cout, Cin, KH, KW)
        cout, cin, nkh, nkw = w.shape
        t = np.zeros((nkh, wp * cin, ncols), np.float32)
        for kh in range(nkh):
            for x in range(wo):
                base = col_of(x)
                for kw in range(nkw):
                    cp = x + kw                               # (padded) input column
                    t[kh, cp * cin:(cp + 1) * cin, base:base + cout] = w[:, :, kh, kw].T
        return t

    # conv1 output lanes live directly in conv2's padded-x frame: lane = (x+2)*16 + co
    t1 = toeplitz(params["conv1_w"], 32, 28, 512, lambda x: (x + 2) * 16)
    # conv2: lane = x*16 + co
    t2 = toeplitz(params["conv2_w"], 32, 28, 448, lambda x: x * 16)
    # conv3: phase-split lanes (makes the 2x2 pool a pair of lane slices)
    t3 = toeplitz(params["conv3_w"], 28, 24, 192, lambda x: (x % 2) * 96 + (x // 2) * 8)

    b1 = np.asarray(params["conv1_b"], np.float32)
    b1row = np.zeros(512, np.float32)
    for x in range(28):
        b1row[(x + 2) * 16:(x + 3) * 16] = b1                 # zero on the folded x-pad lanes
    b2row = np.tile(np.asarray(params["conv2_b"], np.float32), 28)   # (448,)
    b3row = np.tile(np.asarray(params["conv3_b"], np.float32), 24)   # (192,)

    # fc1: fold PyTorch's CHW flatten (idx = co*144 + yo*12 + xo) + pooled (lane = xo*8+co) layout
    fc1_w = np.asarray(params["fc1_w"], np.float32)           # (240, 1152)
    w1rows = np.transpose(fc1_w.reshape(240, 8, 12, 12), (2, 3, 1, 0)).reshape(12, 96, 240)

    w2t = np.asarray(params["fc2_w"], np.float32).T           # (240, 10)

    return {
        "t1": jnp.asarray(t1, jnp.bfloat16),
        "b1row": jnp.asarray(b1row).reshape(1, 512),
        "t2": jnp.asarray(t2, jnp.bfloat16),
        "b2row": jnp.asarray(b2row).reshape(1, 448),
        "t3": jnp.asarray(t3, jnp.bfloat16),
        "b3row": jnp.asarray(b3row).reshape(1, 192),
        "w1rows": jnp.asarray(w1rows, jnp.bfloat16),
        "fc1b": jnp.asarray(params["fc1_b"], jnp.float32).reshape(1, 240),
        "w2t": jnp.asarray(w2t),
        "fc2b": jnp.asarray(params["fc2_b"], jnp.float32).reshape(1, 10),
    }


# ------------------------------ forward wrapper ------------------------------ #

def mnist_convnet_forward(x_nchw, prep):
    # TODO(synk): nn.AlphaDropout is identity at inference; training-mode alpha dropout not implemented.
    N = x_nchw.shape[0]
    x = x_nchw.reshape(N, 28, 28).astype(jnp.float32)
    xpad = jnp.pad(x, ((0, 0), (2, 2), (2, 2)))               # conv1's padding (tiny, one op)

    flops = N * 2 * (5 * 28 * 32 * 512 + 5 * 28 * 512 * 448
                     + 5 * 24 * 448 * 192 + 12 * 96 * 240 + 240 * 10)
    bytes_accessed = (xpad.size * 4 + N * 10 * 4
                      + sum(int(np.prod(v.shape)) * v.dtype.itemsize for v in prep.values()))

    out = pl.pallas_call(
        mnist_fused_kernel,
        out_shape=jax.ShapeDtypeStruct((N, 1, 10), jnp.float32),
        grid=(N,),
        in_specs=[
            pl.BlockSpec((None, 32, 32), lambda n: (n, 0, 0)),    # per-image padded input
            pl.BlockSpec((5, 32, 512), lambda n: (0, 0, 0)),      # conv1 Toeplitz (bf16)
            pl.BlockSpec((1, 512), lambda n: (0, 0)),
            pl.BlockSpec((5, 512, 448), lambda n: (0, 0, 0)),     # conv2 Toeplitz (bf16)
            pl.BlockSpec((1, 448), lambda n: (0, 0)),
            pl.BlockSpec((5, 448, 192), lambda n: (0, 0, 0)),     # conv3 Toeplitz (bf16)
            pl.BlockSpec((1, 192), lambda n: (0, 0)),
            pl.BlockSpec((12, 96, 240), lambda n: (0, 0, 0)),     # fc1 with flatten folded (bf16)
            pl.BlockSpec((1, 240), lambda n: (0, 0)),
            pl.BlockSpec((240, 10), lambda n: (0, 0)),            # fc2
            pl.BlockSpec((1, 10), lambda n: (0, 0)),
        ],
        out_specs=pl.BlockSpec((None, 1, 10), lambda n: (n, 0, 0)),
        scratch_shapes=[pltpu.VMEM((32, 512), jnp.float32)],      # conv2's y-padded input
        compiler_params=pltpu.CompilerParams(
            dimension_semantics=("parallel",),
            vmem_limit_bytes=32 * 1024 * 1024),
        cost_estimate=pl.CostEstimate(flops=int(flops), transcendentals=0,
                                      bytes_accessed=int(bytes_accessed)),
    )(xpad, prep["t1"], prep["b1row"], prep["t2"], prep["b2row"],
      prep["t3"], prep["b3row"], prep["w1rows"], prep["fc1b"],
      prep["w2t"], prep["fc2b"])
    return out.reshape(N, 10)


# ------------------------------ params / reference ------------------------------ #

def init_params(key):
    def uinit(k, shape, fan_in):
        bound = 1.0 / np.sqrt(fan_in)
        return jax.random.uniform(k, shape, jnp.float32, -bound, bound)
    ks = jax.random.split(key, 10)
    return {
        "conv1_w": uinit(ks[0], (16, 1, 5, 5), 1 * 25),
        "conv1_b": uinit(ks[1], (16,), 1 * 25),
        "conv2_w": uinit(ks[2], (16, 16, 5, 5), 16 * 25),
        "conv2_b": uinit(ks[3], (16,), 16 * 25),
        "conv3_w": uinit(ks[4], (8, 16, 5, 5), 16 * 25),
        "conv3_b": uinit(ks[5], (8,), 16 * 25),
        "fc1_w": uinit(ks[6], (240, 1152), 1152),
        "fc1_b": uinit(ks[7], (240,), 1152),
        "fc2_w": uinit(ks[8], (10, 240), 240),
        "fc2_b": uinit(ks[9], (10,), 240),
    }


def reference_forward(x_nchw, p):
    """Pure-JAX/XLA reference with identical semantics (for sanity checking)."""
    x = jnp.transpose(x_nchw, (0, 2, 3, 1)).astype(jnp.float32)

    def conv(x, w, b, pad):
        y = jax.lax.conv_general_dilated(
            x, jnp.transpose(w, (2, 3, 1, 0)), (1, 1),
            [(pad, pad), (pad, pad)],
            dimension_numbers=("NHWC", "HWIO", "NHWC"))
        return jax.nn.relu(y + b[None, None, None, :])

    x = conv(x, p["conv1_w"], p["conv1_b"], 2)
    x = conv(x, p["conv2_w"], p["conv2_b"], 2)
    x = conv(x, p["conv3_w"], p["conv3_b"], 0)
    N = x.shape[0]
    x = x.reshape(N, 12, 2, 12, 2, 8).max(axis=(2, 4))
    x = jnp.transpose(x, (0, 3, 1, 2)).reshape(N, 8 * 12 * 12)
    x = x @ p["fc1_w"].T + p["fc1_b"]
    x = x @ p["fc2_w"].T + p["fc2_b"]
    return x


# ------------------------------ main ------------------------------ #

if __name__ == "__main__":
    key = jax.random.PRNGKey(0)
    pkey, xkey = jax.random.split(key)
    params = init_params(pkey)
    prep = prepare_params(params)          # one-time host-side weight folding

    # MNIST-shaped input (batch=2, NCHW 1x28x28) -- required by fc1 = Linear(8*12*12, 240)
    x = jax.random.normal(xkey, (2, 1, 28, 28), jnp.float32)

    fwd = jax.jit(mnist_convnet_forward)
    out = jax.block_until_ready(fwd(x, prep))
    assert out.shape == (2, 10), out.shape

    ref = reference_forward(x, params)
    np.testing.assert_allclose(np.asarray(out), np.asarray(ref), rtol=3e-2, atol=3e-2)

    print("KERNEL_OK")
</pallas_src>

<mosaic_0001>
module attributes {stable_mosaic.version = 11 : i64} {
  func.func @mnist_fused_kernel(%arg0: i32, %arg1: memref<1x32x32xf32, #tpu.memory_space<vmem>>, %arg2: memref<5x32x512xbf16, #tpu.memory_space<vmem>>, %arg3: memref<1x512xf32, #tpu.memory_space<vmem>>, %arg4: memref<5x512x448xbf16, #tpu.memory_space<vmem>>, %arg5: memref<1x448xf32, #tpu.memory_space<vmem>>, %arg6: memref<5x448x192xbf16, #tpu.memory_space<vmem>>, %arg7: memref<1x192xf32, #tpu.memory_space<vmem>>, %arg8: memref<12x96x240xbf16, #tpu.memory_space<vmem>>, %arg9: memref<1x240xf32, #tpu.memory_space<vmem>>, %arg10: memref<240x10xf32, #tpu.memory_space<vmem>>, %arg11: memref<1x10xf32, #tpu.memory_space<vmem>>, %arg12: memref<1x1x10xf32, #tpu.memory_space<vmem>>, %arg13: memref<32x512xf32, #tpu.memory_space<vmem>>) attributes {dimension_semantics = [#tpu.dimension_semantics<parallel>], iteration_bounds = array<i64: 2>, scalar_prefetch = 0 : i64, scratch_operands = 1 : i64, tpu.core_type = #tpu.core_type<tc>, window_params = [{transform_indices = @transform_0, window_bounds = array<i64: 1, 32, 32>}, {pipeline_mode = #tpu.pipeline_mode<synchronous>, transform_indices = @transform_1, window_bounds = array<i64: 5, 32, 512>}, {pipeline_mode = #tpu.pipeline_mode<synchronous>, transform_indices = @transform_2, window_bounds = array<i64: 1, 512>}, {pipeline_mode = #tpu.pipeline_mode<synchronous>, transform_indices = @transform_3, window_bounds = array<i64: 5, 512, 448>}, {pipeline_mode = #tpu.pipeline_mode<synchronous>, transform_indices = @transform_4, window_bounds = array<i64: 1, 448>}, {pipeline_mode = #tpu.pipeline_mode<synchronous>, transform_indices = @transform_5, window_bounds = array<i64: 5, 448, 192>}, {pipeline_mode = #tpu.pipeline_mode<synchronous>, transform_indices = @transform_6, window_bounds = array<i64: 1, 192>}, {pipeline_mode = #tpu.pipeline_mode<synchronous>, transform_indices = @transform_7, window_bounds = array<i64: 12, 96, 240>}, {pipeline_mode = #tpu.pipeline_mode<synchronous>, transform_indices = @transform_8, window_bounds = array<i64: 1, 240>}, {pipeline_mode = #tpu.pipeline_mode<synchronous>, transform_indices = @transform_9, window_bounds = array<i64: 240, 10>}, {pipeline_mode = #tpu.pipeline_mode<synchronous>, transform_indices = @transform_10, window_bounds = array<i64: 1, 10>}, {transform_indices = @transform_11, window_bounds = array<i64: 1, 1, 10>}]} {
    %c0 = arith.constant 0 : index
    %c0_0 = arith.constant 0 : index
    %c0_1 = arith.constant 0 : index
    %0 = vector.load %arg1[%c0, %c0_0, %c0_1] : memref<1x32x32xf32, #tpu.memory_space<vmem>>, vector<1x32x32xf32>
    %1 = vector.shape_cast %0 : vector<1x32x32xf32> to vector<32x32xf32>
    %2 = arith.truncf %1 : vector<32x32xf32> to vector<32x32xbf16>
    %cst = arith.constant 0.000000e+00 : f32
    %3 = vector.broadcast %cst : f32 to vector<28x512xf32>
    %4 = vector.extract_strided_slice %2 {offsets = [0, 0], sizes = [28, 32], strides = [1, 1]} : vector<32x32xbf16> to vector<28x32xbf16>
    %c0_2 = arith.constant 0 : index
    %c0_3 = arith.constant 0 : index
    %c0_4 = arith.constant 0 : index
    %5 = vector.load %arg2[%c0_2, %c0_3, %c0_4] : memref<5x32x512xbf16, #tpu.memory_space<vmem>>, vector<1x32x512xbf16>
    %6 = vector.shape_cast %5 : vector<1x32x512xbf16> to vector<32x512xbf16>
    %cst_5 = arith.constant dense<0.000000e+00> : vector<28x512xf32>
    %7 = tpu.matmul %4, %6, %cst_5 {dimension_numbers = #tpu.dot_dimension_numbers<[1], [0], [0], [1], [0, 0, 1, 1], [], []>} : vector<28x32xbf16>, vector<32x512xbf16>, vector<28x512xf32> -> vector<28x512xf32>
    %8 = arith.addf %3, %7 : vector<28x512xf32>
    %9 = vector.extract_strided_slice %2 {offsets = [1, 0], sizes = [28, 32], strides = [1, 1]} : vector<32x32xbf16> to vector<28x32xbf16>
    %c1 = arith.constant 1 : index
    %c0_6 = arith.constant 0 : index
    %c0_7 = arith.constant 0 : index
    %10 = vector.load %arg2[%c1, %c0_6, %c0_7] : memref<5x32x512xbf16, #tpu.memory_space<vmem>>, vector<1x32x512xbf16>
    %11 = vector.shape_cast %10 : vector<1x32x512xbf16> to vector<32x512xbf16>
    %cst_8 = arith.constant dense<0.000000e+00> : vector<28x512xf32>
    %12 = tpu.matmul %9, %11, %cst_8 {dimension_numbers = #tpu.dot_dimension_numbers<[1], [0], [0], [1], [0, 0, 1, 1], [], []>} : vector<28x32xbf16>, vector<32x512xbf16>, vector<28x512xf32> -> vector<28x512xf32>
    %13 = arith.addf %8, %12 : vector<28x512xf32>
    %14 = vector.extract_strided_slice %2 {offsets = [2, 0], sizes = [28, 32], strides = [1, 1]} : vector<32x32xbf16> to vector<28x32xbf16>
    %c2 = arith.constant 2 : index
    %c0_9 = arith.constant 0 : index
    %c0_10 = arith.constant 0 : index
    %15 = vector.load %arg2[%c2, %c0_9, %c0_10] : memref<5x32x512xbf16, #tpu.memory_space<vmem>>, vector<1x32x512xbf16>
    %16 = vector.shape_cast %15 : vector<1x32x512xbf16> to vector<32x512xbf16>
    %cst_11 = arith.constant dense<0.000000e+00> : vector<28x512xf32>
    %17 = tpu.matmul %14, %16, %cst_11 {dimension_numbers = #tpu.dot_dimension_numbers<[1], [0], [0], [1], [0, 0, 1, 1], [], []>} : vector<28x32xbf16>, vector<32x512xbf16>, vector<28x512xf32> -> vector<28x512xf32>
    %18 = arith.addf %13, %17 : vector<28x512xf32>
    %19 = vector.extract_strided_slice %2 {offsets = [3, 0], sizes = [28, 32], strides = [1, 1]} : vector<32x32xbf16> to vector<28x32xbf16>
    %c3 = arith.constant 3 : index
    %c0_12 = arith.constant 0 : index
    %c0_13 = arith.constant 0 : index
    %20 = vector.load %arg2[%c3, %c0_12, %c0_13] : memref<5x32x512xbf16, #tpu.memory_space<vmem>>, vector<1x32x512xbf16>
    %21 = vector.shape_cast %20 : vector<1x32x512xbf16> to vector<32x512xbf16>
    %cst_14 = arith.constant dense<0.000000e+00> : vector<28x512xf32>
    %22 = tpu.matmul %19, %21, %cst_14 {dimension_numbers = #tpu.dot_dimension_numbers<[1], [0], [0], [1], [0, 0, 1, 1], [], []>} : vector<28x32xbf16>, vector<32x512xbf16>, vector<28x512xf32> -> vector<28x512xf32>
    %23 = arith.addf %18, %22 : vector<28x512xf32>
    %24 = vector.extract_strided_slice %2 {offsets = [4, 0], sizes = [28, 32], strides = [1, 1]} : vector<32x32xbf16> to vector<28x32xbf16>
    %c4 = arith.constant 4 : index
    %c0_15 = arith.constant 0 : index
    %c0_16 = arith.constant 0 : index
    %25 = vector.load %arg2[%c4, %c0_15, %c0_16] : memref<5x32x512xbf16, #tpu.memory_space<vmem>>, vector<1x32x512xbf16>
    %26 = vector.shape_cast %25 : vector<1x32x512xbf16> to vector<32x512xbf16>
    %cst_17 = arith.constant dense<0.000000e+00> : vector<28x512xf32>
    %27 = tpu.matmul %24, %26, %cst_17 {dimension_numbers = #tpu.dot_dimension_numbers<[1], [0], [0], [1], [0, 0, 1, 1], [], []>} : vector<28x32xbf16>, vector<32x512xbf16>, vector<28x512xf32> -> vector<28x512xf32>
    %28 = arith.addf %23, %27 : vector<28x512xf32>
    %c0_18 = arith.constant 0 : index
    %c0_19 = arith.constant 0 : index
    %29 = vector.load %arg3[%c0_18, %c0_19] : memref<1x512xf32, #tpu.memory_space<vmem>>, vector<1x512xf32>
    %30 = vector.broadcast %29 : vector<1x512xf32> to vector<28x512xf32>
    %31 = arith.addf %28, %30 : vector<28x512xf32>
    %cst_20 = arith.constant 0.000000e+00 : f32
    %32 = vector.broadcast %cst_20 : f32 to vector<28x512xf32>
    %33 = arith.maximumf %31, %32 : vector<28x512xf32>
    %cst_21 = arith.constant 0.000000e+00 : f32
    %34 = vector.broadcast %cst_21 : f32 to vector<2x512xf32>
    %c0_22 = arith.constant 0 : index
    %c0_23 = arith.constant 0 : index
    %35 = vector.load %arg13[%c0_22, %c0_23] : memref<32x512xf32, #tpu.memory_space<vmem>>, vector<2x512xf32>
    tpu.vector_store %arg13[%c0_22, %c0_23], %34 {strides = array<i32>} : memref<32x512xf32, #tpu.memory_space<vmem>>, vector<2x512xf32>,
    %c30 = arith.constant 30 : index
    %c0_24 = arith.constant 0 : index
    %36 = vector.load %arg13[%c30, %c0_24] : memref<32x512xf32, #tpu.memory_space<vmem>>, vector<2x512xf32>
    tpu.vector_store %arg13[%c30, %c0_24], %34 {strides = array<i32>} : memref<32x512xf32, #tpu.memory_space<vmem>>, vector<2x512xf32>,
    %c2_25 = arith.constant 2 : index
    %c0_26 = arith.constant 0 : index
    %37 = vector.load %arg13[%c2_25, %c0_26] : memref<32x512xf32, #tpu.memory_space<vmem>>, vector<28x512xf32>
    tpu.vector_store %arg13[%c2_25, %c0_26], %33 {strides = array<i32>} : memref<32x512xf32, #tpu.memory_space<vmem>>, vector<28x512xf32>,
    %cst_27 = arith.constant 0.000000e+00 : f32
    %38 = vector.broadcast %cst_27 : f32 to vector<28x448xf32>
    %c0_28 = arith.constant 0 : index
    %c0_29 = arith.constant 0 : index
    %39 = vector.load %arg13[%c0_28, %c0_29] : memref<32x512xf32, #tpu.memory_space<vmem>>, vector<28x512xf32>
    %40 = arith.truncf %39 : vector<28x512xf32> to vector<28x512xbf16>
    %c0_30 = arith.constant 0 : index
    %c0_31 = arith.constant 0 : index
    %c0_32 = arith.constant 0 : index
    %41 = vector.load %arg4[%c0_30, %c0_31, %c0_32] : memref<5x512x448xbf16, #tpu.memory_space<vmem>>, vector<1x512x448xbf16>
    %42 = vector.shape_cast %41 : vector<1x512x448xbf16> to vector<512x448xbf16>
    %cst_33 = arith.constant dense<0.000000e+00> : vector<28x448xf32>
    %43 = tpu.matmul %40, %42, %cst_33 {dimension_numbers = #tpu.dot_dimension_numbers<[1], [0], [0], [1], [0, 0, 1, 1], [], []>} : vector<28x512xbf16>, vector<512x448xbf16>, vector<28x448xf32> -> vector<28x448xf32>
    %44 = arith.addf %38, %43 : vector<28x448xf32>
    %c1_34 = arith.constant 1 : index
    %c0_35 = arith.constant 0 : index
    %45 = vector.load %arg13[%c1_34, %c0_35] : memref<32x512xf32, #tpu.memory_space<vmem>>, vector<28x512xf32>
    %46 = arith.truncf %45 : vector<28x512xf32> to vector<28x512xbf16>
    %c1_36 = arith.constant 1 : index
    %c0_37 = arith.constant 0 : index
    %c0_38 = arith.constant 0 : index
    %47 = vector.load %arg4[%c1_36, %c0_37, %c0_38] : memref<5x512x448xbf16, #tpu.memory_space<vmem>>, vector<1x512x448xbf16>
    %48 = vector.shape_cast %47 : vector<1x512x448xbf16> to vector<512x448xbf16>
    %cst_39 = arith.constant dense<0.000000e+00> : vector<28x448xf32>
    %49 = tpu.matmul %46, %48, %cst_39 {dimension_numbers = #tpu.dot_dimension_numbers<[1], [0], [0], [1], [0, 0, 1, 1], [], []>} : vector<28x512xbf16>, vector<512x448xbf16>, vector<28x448xf32> -> vector<28x448xf32>
    %50 = arith.addf %44, %49 : vector<28x448xf32>
    %c2_40 = arith.constant 2 : index
    %c0_41 = arith.constant 0 : index
    %51 = vector.load %arg13[%c2_40, %c0_41] : memref<32x512xf32, #tpu.memory_space<vmem>>, vector<28x512xf32>
    %52 = arith.truncf %51 : vector<28x512xf32> to vector<28x512xbf16>
    %c2_42 = arith.constant 2 : index
    %c0_43 = arith.constant 0 : index
    %c0_44 = arith.constant 0 : index
    %53 = vector.load %arg4[%c2_42, %c0_43, %c0_44] : memref<5x512x448xbf16, #tpu.memory_space<vmem>>, vector<1x512x448xbf16>
    %54 = vector.shape_cast %53 : vector<1x512x448xbf16> to vector<512x448xbf16>
    %cst_45 = arith.constant dense<0.000000e+00> : vector<28x448xf32>
    %55 = tpu.matmul %52, %54, %cst_45 {dimension_numbers = #tpu.dot_dimension_numbers<[1], [0], [0], [1], [0, 0, 1, 1], [], []>} : vector<28x512xbf16>, vector<512x448xbf16>, vector<28x448xf32> -> vector<28x448xf32>
    %56 = arith.addf %50, %55 : vector<28x448xf32>
    %c3_46 = arith.constant 3 : index
    %c0_47 = arith.constant 0 : index
    %57 = vector.load %arg13[%c3_46, %c0_47] : memref<32x512xf32, #tpu.memory_space<vmem>>, vector<28x512xf32>
    %58 = arith.truncf %57 : vector<28x512xf32> to vector<28x512xbf16>
    %c3_48 = arith.constant 3 : index
    %c0_49 = arith.constant 0 : index
    %c0_50 = arith.constant 0 : index
    %59 = vector.load %arg4[%c3_48, %c0_49, %c0_50] : memref<5x512x448xbf16, #tpu.memory_space<vmem>>, vector<1x512x448xbf16>
    %60 = vector.shape_cast %59 : vector<1x512x448xbf16> to vector<512x448xbf16>
    %cst_51 = arith.constant dense<0.000000e+00> : vector<28x448xf32>
    %61 = tpu.matmul %58, %60, %cst_51 {dimension_numbers = #tpu.dot_dimension_numbers<[1], [0], [0], [1], [0, 0, 1, 1], [], []>} : vector<28x512xbf16>, vector<512x448xbf16>, vector<28x448xf32> -> vector<28x448xf32>
    %62 = arith.addf %56, %61 : vector<28x448xf32>
    %c4_52 = arith.constant 4 : index
    %c0_53 = arith.constant 0 : index
    %63 = vector.load %arg13[%c4_52, %c0_53] : memref<32x512xf32, #tpu.memory_space<vmem>>, vector<28x512xf32>
    %64 = arith.truncf %63 : vector<28x512xf32> to vector<28x512xbf16>
    %c4_54 = arith.constant 4 : index
    %c0_55 = arith.constant 0 : index
    %c0_56 = arith.constant 0 : index
    %65 = vector.load %arg4[%c4_54, %c0_55, %c0_56] : memref<5x512x448xbf16, #tpu.memory_space<vmem>>, vector<1x512x448xbf16>
    %66 = vector.shape_cast %65 : vector<1x512x448xbf16> to vector<512x448xbf16>
    %cst_57 = arith.constant dense<0.000000e+00> : vector<28x448xf32>
    %67 = tpu.matmul %64, %66, %cst_57 {dimension_numbers = #tpu.dot_dimension_numbers<[1], [0], [0], [1], [0, 0, 1, 1], [], []>} : vector<28x512xbf16>, vector<512x448xbf16>, vector<28x448xf32> -> vector<28x448xf32>
    %68 = arith.addf %62, %67 : vector<28x448xf32>
    %c0_58 = arith.constant 0 : index
    %c0_59 = arith.constant 0 : index
    %69 = vector.load %arg5[%c0_58, %c0_59] : memref<1x448xf32, #tpu.memory_space<vmem>>, vector<1x448xf32>
    %70 = vector.broadcast %69 : vector<1x448xf32> to vector<28x448xf32>
    %71 = arith.addf %68, %70 : vector<28x448xf32>
    %cst_60 = arith.constant 0.000000e+00 : f32
    %72 = vector.broadcast %cst_60 : f32 to vector<28x448xf32>
    %73 = arith.maximumf %71, %72 : vector<28x448xf32>
    %74 = arith.truncf %73 : vector<28x448xf32> to vector<28x448xbf16>
    %cst_61 = arith.constant 0.000000e+00 : f32
    %75 = vector.broadcast %cst_61 : f32 to vector<24x192xf32>
    %76 = vector.extract_strided_slice %74 {offsets = [0, 0], sizes = [24, 448], strides = [1, 1]} : vector<28x448xbf16> to vector<24x448xbf16>
    %c0_62 = arith.constant 0 : index
    %c0_63 = arith.constant 0 : index
    %c0_64 = arith.constant 0 : index
    %77 = vector.load %arg6[%c0_62, %c0_63, %c0_64] : memref<5x448x192xbf16, #tpu.memory_space<vmem>>, vector<1x448x192xbf16>
    %78 = vector.shape_cast %77 : vector<1x448x192xbf16> to vector<448x192xbf16>
    %cst_65 = arith.constant dense<0.000000e+00> : vector<24x192xf32>
    %79 = tpu.matmul %76, %78, %cst_65 {dimension_numbers = #tpu.dot_dimension_numbers<[1], [0], [0], [1], [0, 0, 1, 1], [], []>} : vector<24x448xbf16>, vector<448x192xbf16>, vector<24x192xf32> -> vector<24x192xf32>
    %80 = arith.addf %75, %79 : vector<24x192xf32>
    %81 = vector.extract_strided_slice %74 {offsets = [1, 0], sizes = [24, 448], strides = [1, 1]} : vector<28x448xbf16> to vector<24x448xbf16>
    %c1_66 = arith.constant 1 : index
    %c0_67 = arith.constant 0 : index
    %c0_68 = arith.constant 0 : index
    %82 = vector.load %arg6[%c1_66, %c0_67, %c0_68] : memref<5x448x192xbf16, #tpu.memory_space<vmem>>, vector<1x448x192xbf16>
    %83 = vector.shape_cast %82 : vector<1x448x192xbf16> to vector<448x192xbf16>
    %cst_69 = arith.constant dense<0.000000e+00> : vector<24x192xf32>
    %84 = tpu.matmul %81, %83, %cst_69 {dimension_numbers = #tpu.dot_dimension_numbers<[1], [0], [0], [1], [0, 0, 1, 1], [], []>} : vector<24x448xbf16>, vector<448x192xbf16>, vector<24x192xf32> -> vector<24x192xf32>
    %85 = arith.addf %80, %84 : vector<24x192xf32>
    %86 = vector.extract_strided_slice %74 {offsets = [2, 0], sizes = [24, 448], strides = [1, 1]} : vector<28x448xbf16> to vector<24x448xbf16>
    %c2_70 = arith.constant 2 : index
    %c0_71 = arith.constant 0 : index
    %c0_72 = arith.constant 0 : index
    %87 = vector.load %arg6[%c2_70, %c0_71, %c0_72] : memref<5x448x192xbf16, #tpu.memory_space<vmem>>, vector<1x448x192xbf16>
    %88 = vector.shape_cast %87 : vector<1x448x192xbf16> to vector<448x192xbf16>
    %cst_73 = arith.constant dense<0.000000e+00> : vector<24x192xf32>
    %89 = tpu.matmul %86, %88, %cst_73 {dimension_numbers = #tpu.dot_dimension_numbers<[1], [0], [0], [1], [0, 0, 1, 1], [], []>} : vector<24x448xbf16>, vector<448x192xbf16>, vector<24x192xf32> -> vector<24x192xf32>
    %90 = arith.addf %85, %89 : vector<24x192xf32>
    %91 = vector.extract_strided_slice %74 {offsets = [3, 0], sizes = [24, 448], strides = [1, 1]} : vector<28x448xbf16> to vector<24x448xbf16>
    %c3_74 = arith.constant 3 : index
    %c0_75 = arith.constant 0 : index
    %c0_76 = arith.constant 0 : index
    %92 = vector.load %arg6[%c3_74, %c0_75, %c0_76] : memref<5x448x192xbf16, #tpu.memory_space<vmem>>, vector<1x448x192xbf16>
    %93 = vector.shape_cast %92 : vector<1x448x192xbf16> to vector<448x192xbf16>
    %cst_77 = arith.constant dense<0.000000e+00> : vector<24x192xf32>
    %94 = tpu.matmul %91, %93, %cst_77 {dimension_numbers = #tpu.dot_dimension_numbers<[1], [0], [0], [1], [0, 0, 1, 1], [], []>} : vector<24x448xbf16>, vector<448x192xbf16>, vector<24x192xf32> -> vector<24x192xf32>
    %95 = arith.addf %90, %94 : vector<24x192xf32>
    %96 = vector.extract_strided_slice %74 {offsets = [4, 0], sizes = [24, 448], strides = [1, 1]} : vector<28x448xbf16> to vector<24x448xbf16>
    %c4_78 = arith.constant 4 : index
    %c0_79 = arith.constant 0 : index
    %c0_80 = arith.constant 0 : index
    %97 = vector.load %arg6[%c4_78, %c0_79, %c0_80] : memref<5x448x192xbf16, #tpu.memory_space<vmem>>, vector<1x448x192xbf16>
    %98 = vector.shape_cast %97 : vector<1x448x192xbf16> to vector<448x192xbf16>
    %cst_81 = arith.constant dense<0.000000e+00> : vector<24x192xf32>
    %99 = tpu.matmul %96, %98, %cst_81 {dimension_numbers = #tpu.dot_dimension_numbers<[1], [0], [0], [1], [0, 0, 1, 1], [], []>} : vector<24x448xbf16>, vector<448x192xbf16>, vector<24x192xf32> -> vector<24x192xf32>
    %100 = arith.addf %95, %99 : vector<24x192xf32>
    %c0_82 = arith.constant 0 : index
    %c0_83 = arith.constant 0 : index
    %101 = vector.load %arg7[%c0_82, %c0_83] : memref<1x192xf32, #tpu.memory_space<vmem>>, vector<1x192xf32>
    %102 = vector.broadcast %101 : vector<1x192xf32> to vector<24x192xf32>
    %103 = arith.addf %100, %102 : vector<24x192xf32>
    %cst_84 = arith.constant 0.000000e+00 : f32
    %104 = vector.broadcast %cst_84 : f32 to vector<24x192xf32>
    %105 = arith.maximumf %103, %104 : vector<24x192xf32>
    %106 = vector.extract_strided_slice %105 {offsets = [0, 0], sizes = [24, 96], strides = [1, 1]} : vector<24x192xf32> to vector<24x96xf32>
    %107 = vector.extract_strided_slice %105 {offsets = [0, 96], sizes = [24, 96], strides = [1, 1]} : vector<24x192xf32> to vector<24x96xf32>
    %108 = arith.maximumf %106, %107 : vector<24x96xf32>
    %c0_85 = arith.constant 0 : index
    %c0_86 = arith.constant 0 : index
    %109 = vector.load %arg9[%c0_85, %c0_86] : memref<1x240xf32, #tpu.memory_space<vmem>>, vector<1x240xf32>
    %110 = vector.extract_strided_slice %108 {offsets = [0, 0], sizes = [1, 96], strides = [1, 1]} : vector<24x96xf32> to vector<1x96xf32>
    %111 = vector.extract_strided_slice %108 {offsets = [1, 0], sizes = [1, 96], strides = [1, 1]} : vector<24x96xf32> to vector<1x96xf32>
    %112 = arith.maximumf %110, %111 : vector<1x96xf32>
    %113 = arith.truncf %112 : vector<1x96xf32> to vector<1x96xbf16>
    %c0_87 = arith.constant 0 : index
    %c0_88 = arith.constant 0 : index
    %c0_89 = arith.constant 0 : index
    %114 = vector.load %arg8[%c0_87, %c0_88, %c0_89] : memref<12x96x240xbf16, #tpu.memory_space<vmem>>, vector<1x96x240xbf16>
    %115 = vector.shape_cast %114 : vector<1x96x240xbf16> to vector<96x240xbf16>
    %cst_90 = arith.constant dense<0.000000e+00> : vector<1x240xf32>
    %116 = tpu.matmul %113, %115, %cst_90 {dimension_numbers = #tpu.dot_dimension_numbers<[1], [0], [0], [1], [0, 0, 1, 1], [], []>} : vector<1x96xbf16>, vector<96x240xbf16>, vector<1x240xf32> -> vector<1x240xf32>
    %117 = arith.addf %109, %116 : vector<1x240xf32>
    %118 = vector.extract_strided_slice %108 {offsets = [2, 0], sizes = [1, 96], strides = [1, 1]} : vector<24x96xf32> to vector<1x96xf32>
    %119 = vector.extract_strided_slice %108 {offsets = [3, 0], sizes = [1, 96], strides = [1, 1]} : vector<24x96xf32> to vector<1x96xf32>
    %120 = arith.maximumf %118, %119 : vector<1x96xf32>
    %121 = arith.truncf %120 : vector<1x96xf32> to vector<1x96xbf16>
    %c1_91 = arith.constant 1 : index
    %c0_92 = arith.constant 0 : index
    %c0_93 = arith.constant 0 : index
    %122 = vector.load %arg8[%c1_91, %c0_92, %c0_93] : memref<12x96x240xbf16, #tpu.memory_space<vmem>>, vector<1x96x240xbf16>
    %123 = vector.shape_cast %122 : vector<1x96x240xbf16> to vector<96x240xbf16>
    %cst_94 = arith.constant dense<0.000000e+00> : vector<1x240xf32>
    %124 = tpu.matmul %121, %123, %cst_94 {dimension_numbers = #tpu.dot_dimension_numbers<[1], [0], [0], [1], [0, 0, 1, 1], [], []>} : vector<1x96xbf16>, vector<96x240xbf16>, vector<1x240xf32> -> vector<1x240xf32>
    %125 = arith.addf %117, %124 : vector<1x240xf32>
    %126 = vector.extract_strided_slice %108 {offsets = [4, 0], sizes = [1, 96], strides = [1, 1]} : vector<24x96xf32> to vector<1x96xf32>
    %127 = vector.extract_strided_slice %108 {offsets = [5, 0], sizes = [1, 96], strides = [1, 1]} : vector<24x96xf32> to vector<1x96xf32>
    %128 = arith.maximumf %126, %127 : vector<1x96xf32>
    %129 = arith.truncf %128 : vector<1x96xf32> to vector<1x96xbf16>
    %c2_95 = arith.constant 2 : index
    %c0_96 = arith.constant 0 : index
    %c0_97 = arith.constant 0 : index
    %130 = vector.load %arg8[%c2_95, %c0_96, %c0_97] : memref<12x96x240xbf16, #tpu.memory_space<vmem>>, vector<1x96x240xbf16>
    %131 = vector.shape_cast %130 : vector<1x96x240xbf16> to vector<96x240xbf16>
    %cst_98 = arith.constant dense<0.000000e+00> : vector<1x240xf32>
    %132 = tpu.matmul %129, %131, %cst_98 {dimension_numbers = #tpu.dot_dimension_numbers<[1], [0], [0], [1], [0, 0, 1, 1], [], []>} : vector<1x96xbf16>, vector<96x240xbf16>, vector<1x240xf32> -> vector<1x240xf32>
    %133 = arith.addf %125, %132 : vector<1x240xf32>
    %134 = vector.extract_strided_slice %108 {offsets = [6, 0], sizes = [1, 96], strides = [1, 1]} : vector<24x96xf32> to vector<1x96xf32>
    %135 = vector.extract_strided_slice %108 {offsets = [7, 0], sizes = [1, 96], strides = [1, 1]} : vector<24x96xf32> to vector<1x96xf32>
    %136 = arith.maximumf %134, %135 : vector<1x96xf32>
    %137 = arith.truncf %136 : vector<1x96xf32> to vector<1x96xbf16>
    %c3_99 = arith.constant 3 : index
    %c0_100 = arith.constant 0 : index
    %c0_101 = arith.constant 0 : index
    %138 = vector.load %arg8[%c3_99, %c0_100, %c0_101] : memref<12x96x240xbf16, #tpu.memory_space<vmem>>, vector<1x96x240xbf16>
    %139 = vector.shape_cast %138 : vector<1x96x240xbf16> to vector<96x240xbf16>
    %cst_102 = arith.constant dense<0.000000e+00> : vector<1x240xf32>
    %140 = tpu.matmul %137, %139, %cst_102 {dimension_numbers = #tpu.dot_dimension_numbers<[1], [0], [0], [1], [0, 0, 1, 1], [], []>} : vector<1x96xbf16>, vector<96x240xbf16>, vector<1x240xf32> -> vector<1x240xf32>
    %141 = arith.addf %133, %140 : vector<1x240xf32>
    %142 = vector.extract_strided_slice %108 {offsets = [8, 0], sizes = [1, 96], strides = [1, 1]} : vector<24x96xf32> to vector<1x96xf32>
    %143 = vector.extract_strided_slice %108 {offsets = [9, 0], sizes = [1, 96], strides = [1, 1]} : vector<24x96xf32> to vector<1x96xf32>
    %144 = arith.maximumf %142, %143 : vector<1x96xf32>
    %145 = arith.truncf %144 : vector<1x96xf32> to vector<1x96xbf16>
    %c4_103 = arith.constant 4 : index
    %c0_104 = arith.constant 0 : index
    %c0_105 = arith.constant 0 : index
    %146 = vector.load %arg8[%c4_103, %c0_104, %c0_105] : memref<12x96x240xbf16, #tpu.memory_space<vmem>>, vector<1x96x240xbf16>
    %147 = vector.shape_cast %146 : vector<1x96x240xbf16> to vector<96x240xbf16>
    %cst_106 = arith.constant dense<0.000000e+00> : vector<1x240xf32>
    %148 = tpu.matmul %145, %147, %cst_106 {dimension_numbers = #tpu.dot_dimension_numbers<[1], [0], [0], [1], [0, 0, 1, 1], [], []>} : vector<1x96xbf16>, vector<96x240xbf16>, vector<1x240xf32> -> vector<1x240xf32>
    %149 = arith.addf %141, %148 : vector<1x240xf32>
    %150 = vector.extract_strided_slice %108 {offsets = [10, 0], sizes = [1, 96], strides = [1, 1]} : vector<24x96xf32> to vector<1x96xf32>
    %151 = vector.extract_strided_slice %108 {offsets = [11, 0], sizes = [1, 96], strides = [1, 1]} : vector<24x96xf32> to vector<1x96xf32>
    %152 = arith.maximumf %150, %151 : vector<1x96xf32>
    %153 = arith.truncf %152 : vector<1x96xf32> to vector<1x96xbf16>
    %c5 = arith.constant 5 : index
    %c0_107 = arith.constant 0 : index
    %c0_108 = arith.constant 0 : index
    %154 = vector.load %arg8[%c5, %c0_107, %c0_108] : memref<12x96x240xbf16, #tpu.memory_space<vmem>>, vector<1x96x240xbf16>
    %155 = vector.shape_cast %154 : vector<1x96x240xbf16> to vector<96x240xbf16>
    %cst_109 = arith.constant dense<0.000000e+00> : vector<1x240xf32>
    %156 = tpu.matmul %153, %155, %cst_109 {dimension_numbers = #tpu.dot_dimension_numbers<[1], [0], [0], [1], [0, 0, 1, 1], [], []>} : vector<1x96xbf16>, vector<96x240xbf16>, vector<1x240xf32> -> vector<1x240xf32>
    %157 = arith.addf %149, %156 : vector<1x240xf32>
    %158 = vector.extract_strided_slice %108 {offsets = [12, 0], sizes = [1, 96], strides = [1, 1]} : vector<24x96xf32> to vector<1x96xf32>
    %159 = vector.extract_strided_slice %108 {offsets = [13, 0], sizes = [1, 96], strides = [1, 1]} : vector<24x96xf32> to vector<1x96xf32>
    %160 = arith.maximumf %158, %159 : vector<1x96xf32>
    %161 = arith.truncf %160 : vector<1x96xf32> to vector<1x96xbf16>
    %c6 = arith.constant 6 : index
    %c0_110 = arith.constant 0 : index
    %c0_111 = arith.constant 0 : index
    %162 = vector.load %arg8[%c6, %c0_110, %c0_111] : memref<12x96x240xbf16, #tpu.memory_space<vmem>>, vector<1x96x240xbf16>
    %163 = vector.shape_cast %162 : vector<1x96x240xbf16> to vector<96x240xbf16>
    %cst_112 = arith.constant dense<0.000000e+00> : vector<1x240xf32>
    %164 = tpu.matmul %161, %163, %cst_112 {dimension_numbers = #tpu.dot_dimension_numbers<[1], [0], [0], [1], [0, 0, 1, 1], [], []>} : vector<1x96xbf16>, vector<96x240xbf16>, vector<1x240xf32> -> vector<1x240xf32>
    %165 = arith.addf %157, %164 : vector<1x240xf32>
    %166 = vector.extract_strided_slice %108 {offsets = [14, 0], sizes = [1, 96], strides = [1, 1]} : vector<24x96xf32> to vector<1x96xf32>
    %167 = vector.extract_strided_slice %108 {offsets = [15, 0], sizes = [1, 96], strides = [1, 1]} : vector<24x96xf32> to vector<1x96xf32>
    %168 = arith.maximumf %166, %167 : vector<1x96xf32>
    %169 = arith.truncf %168 : vector<1x96xf32> to vector<1x96xbf16>
    %c7 = arith.constant 7 : index
    %c0_113 = arith.constant 0 : index
    %c0_114 = arith.constant 0 : index
    %170 = vector.load %arg8[%c7, %c0_113, %c0_114] : memref<12x96x240xbf16, #tpu.memory_space<vmem>>, vector<1x96x240xbf16>
    %171 = vector.shape_cast %170 : vector<1x96x240xbf16> to vector<96x240xbf16>
    %cst_115 = arith.constant dense<0.000000e+00> : vector<1x240xf32>
    %172 = tpu.matmul %169, %171, %cst_115 {dimension_numbers = #tpu.dot_dimension_numbers<[1], [0], [0], [1], [0, 0, 1, 1], [], []>} : vector<1x96xbf16>, vector<96x240xbf16>, vector<1x240xf32> -> vector<1x240xf32>
    %173 = arith.addf %165, %172 : vector<1x240xf32>
    %174 = vector.extract_strided_slice %108 {offsets = [16, 0], sizes = [1, 96], strides = [1, 1]} : vector<24x96xf32> to vector<1x96xf32>
    %175 = vector.extract_strided_slice %108 {offsets = [17, 0], sizes = [1, 96], strides = [1, 1]} : vector<24x96xf32> to vector<1x96xf32>
    %176 = arith.maximumf %174, %175 : vector<1x96xf32>
    %177 = arith.truncf %176 : vector<1x96xf32> to vector<1x96xbf16>
    %c8 = arith.constant 8 : index
    %c0_116 = arith.constant 0 : index
    %c0_117 = arith.constant 0 : index
    %178 = vector.load %arg8[%c8, %c0_116, %c0_117] : memref<12x96x240xbf16, #tpu.memory_space<vmem>>, vector<1x96x240xbf16>
    %179 = vector.shape_cast %178 : vector<1x96x240xbf16> to vector<96x240xbf16>
    %cst_118 = arith.constant dense<0.000000e+00> : vector<1x240xf32>
    %180 = tpu.matmul %177, %179, %cst_118 {dimension_numbers = #tpu.dot_dimension_numbers<[1], [0], [0], [1], [0, 0, 1, 1], [], []>} : vector<1x96xbf16>, vector<96x240xbf16>, vector<1x240xf32> -> vector<1x240xf32>
    %181 = arith.addf %173, %180 : vector<1x240xf32>
    %182 = vector.extract_strided_slice %108 {offsets = [18, 0], sizes = [1, 96], strides = [1, 1]} : vector<24x96xf32> to vector<1x96xf32>
    %183 = vector.extract_strided_slice %108 {offsets = [19, 0], sizes = [1, 96], strides = [1, 1]} : vector<24x96xf32> to vector<1x96xf32>
    %184 = arith.maximumf %182, %183 : vector<1x96xf32>
    %185 = arith.truncf %184 : vector<1x96xf32> to vector<1x96xbf16>
    %c9 = arith.constant 9 : index
    %c0_119 = arith.constant 0 : index
    %c0_120 = arith.constant 0 : index
    %186 = vector.load %arg8[%c9, %c0_119, %c0_120] : memref<12x96x240xbf16, #tpu.memory_space<vmem>>, vector<1x96x240xbf16>
    %187 = vector.shape_cast %186 : vector<1x96x240xbf16> to vector<96x240xbf16>
    %cst_121 = arith.constant dense<0.000000e+00> : vector<1x240xf32>
    %188 = tpu.matmul %185, %187, %cst_121 {dimension_numbers = #tpu.dot_dimension_numbers<[1], [0], [0], [1], [0, 0, 1, 1], [], []>} : vector<1x96xbf16>, vector<96x240xbf16>, vector<1x240xf32> -> vector<1x240xf32>
    %189 = arith.addf %181, %188 : vector<1x240xf32>
    %190 = vector.extract_strided_slice %108 {offsets = [20, 0], sizes = [1, 96], strides = [1, 1]} : vector<24x96xf32> to vector<1x96xf32>
    %191 = vector.extract_strided_slice %108 {offsets = [21, 0], sizes = [1, 96], strides = [1, 1]} : vector<24x96xf32> to vector<1x96xf32>
    %192 = arith.maximumf %190, %191 : vector<1x96xf32>
    %193 = arith.truncf %192 : vector<1x96xf32> to vector<1x96xbf16>
    %c10 = arith.constant 10 : index
    %c0_122 = arith.constant 0 : index
    %c0_123 = arith.constant 0 : index
    %194 = vector.load %arg8[%c10, %c0_122, %c0_123] : memref<12x96x240xbf16, #tpu.memory_space<vmem>>, vector<1x96x240xbf16>
    %195 = vector.shape_cast %194 : vector<1x96x240xbf16> to vector<96x240xbf16>
    %cst_124 = arith.constant dense<0.000000e+00> : vector<1x240xf32>
    %196 = tpu.matmul %193, %195, %cst_124 {dimension_numbers = #tpu.dot_dimension_numbers<[1], [0], [0], [1], [0, 0, 1, 1], [], []>} : vector<1x96xbf16>, vector<96x240xbf16>, vector<1x240xf32> -> vector<1x240xf32>
    %197 = arith.addf %189, %196 : vector<1x240xf32>
    %198 = vector.extract_strided_slice %108 {offsets = [22, 0], sizes = [1, 96], strides = [1, 1]} : vector<24x96xf32> to vector<1x96xf32>
    %199 = vector.extract_strided_slice %108 {offsets = [23, 0], sizes = [1, 96], strides = [1, 1]} : vector<24x96xf32> to vector<1x96xf32>
    %200 = arith.maximumf %198, %199 : vector<1x96xf32>
    %201 = arith.truncf %200 : vector<1x96xf32> to vector<1x96xbf16>
    %c11 = arith.constant 11 : index
    %c0_125 = arith.constant 0 : index
    %c0_126 = arith.constant 0 : index
    %202 = vector.load %arg8[%c11, %c0_125, %c0_126] : memref<12x96x240xbf16, #tpu.memory_space<vmem>>, vector<1x96x240xbf16>
    %203 = vector.shape_cast %202 : vector<1x96x240xbf16> to vector<96x240xbf16>
    %cst_127 = arith.constant dense<0.000000e+00> : vector<1x240xf32>
    %204 = tpu.matmul %201, %203, %cst_127 {dimension_numbers = #tpu.dot_dimension_numbers<[1], [0], [0], [1], [0, 0, 1, 1], [], []>} : vector<1x96xbf16>, vector<96x240xbf16>, vector<1x240xf32> -> vector<1x240xf32>
    %205 = arith.addf %197, %204 : vector<1x240xf32>
    %c0_128 = arith.constant 0 : index
    %c0_129 = arith.constant 0 : index
    %206 = vector.load %arg10[%c0_128, %c0_129] : memref<240x10xf32, #tpu.memory_space<vmem>>, vector<240x10xf32>
    %cst_130 = arith.constant dense<0.000000e+00> : vector<1x10xf32>
    %207 = tpu.matmul %205, %206, %cst_130 {dimension_numbers = #tpu.dot_dimension_numbers<[1], [0], [0], [1], [0, 0, 1, 1], [], []>} : vector<1x240xf32>, vector<240x10xf32>, vector<1x10xf32> -> vector<1x10xf32>
    %c0_131 = arith.constant 0 : index
    %c0_132 = arith.constant 0 : index
    %208 = vector.load %arg11[%c0_131, %c0_132] : memref<1x10xf32, #tpu.memory_space<vmem>>, vector<1x10xf32>
    %209 = arith.addf %207, %208 : vector<1x10xf32>
    %c0_133 = arith.constant 0 : index
    %c0_134 = arith.constant 0 : index
    %c0_135 = arith.constant 0 : index
    %210 = vector.load %arg12[%c0_133, %c0_134, %c0_135] : memref<1x1x10xf32, #tpu.memory_space<vmem>>, vector<1x1x10xf32>
    %211 = vector.shape_cast %210 : vector<1x1x10xf32> to vector<1x10xf32>
    %212 = vector.shape_cast %209 : vector<1x10xf32> to vector<1x1x10xf32>
    tpu.vector_store %arg12[%c0_133, %c0_134, %c0_135], %212 {strides = array<i32>} : memref<1x1x10xf32, #tpu.memory_space<vmem>>, vector<1x1x10xf32>,
    return
  }
  func.func @transform_0(%arg0: i32) -> (i32, i32, i32) {
    %c0_i32 = arith.constant 0 : i32
    %c0_i32_0 = arith.constant 0 : i32
    %c0_i32_1 = arith.constant 0 : i32
    return %arg0, %c0_i32, %c0_i32_0 : i32, i32, i32
  }
  func.func @transform_1(%arg0: i32) -> (i32, i32, i32) {
    %c0_i32 = arith.constant 0 : i32
    %c0_i32_0 = arith.constant 0 : i32
    %c0_i32_1 = arith.constant 0 : i32
    %c0_i32_2 = arith.constant 0 : i32
    return %c0_i32, %c0_i32_0, %c0_i32_1 : i32, i32, i32
  }
  func.func @transform_2(%arg0: i32) -> (i32, i32) {
    %c0_i32 = arith.constant 0 : i32
    %c0_i32_0 = arith.constant 0 : i32
    %c0_i32_1 = arith.constant 0 : i32
    return %c0_i32, %c0_i32_0 : i32, i32
  }
  func.func @transform_3(%arg0: i32) -> (i32, i32, i32) {
    %c0_i32 = arith.constant 0 : i32
    %c0_i32_0 = arith.constant 0 : i32
    %c0_i32_1 = arith.constant 0 : i32
    %c0_i32_2 = arith.constant 0 : i32
    return %c0_i32, %c0_i32_0, %c0_i32_1 : i32, i32, i32
  }
  func.func @transform_4(%arg0: i32) -> (i32, i32) {
    %c0_i32 = arith.constant 0 : i32
    %c0_i32_0 = arith.constant 0 : i32
    %c0_i32_1 = arith.constant 0 : i32
    return %c0_i32, %c0_i32_0 : i32, i32
  }
  func.func @transform_5(%arg0: i32) -> (i32, i32, i32) {
    %c0_i32 = arith.constant 0 : i32
    %c0_i32_0 = arith.constant 0 : i32
    %c0_i32_1 = arith.constant 0 : i32
    %c0_i32_2 = arith.constant 0 : i32
    return %c0_i32, %c0_i32_0, %c0_i32_1 : i32, i32, i32
  }
  func.func @transform_6(%arg0: i32) -> (i32, i32) {
    %c0_i32 = arith.constant 0 : i32
    %c0_i32_0 = arith.constant 0 : i32
    %c0_i32_1 = arith.constant 0 : i32
    return %c0_i32, %c0_i32_0 : i32, i32
  }
  func.func @transform_7(%arg0: i32) -> (i32, i32, i32) {
    %c0_i32 = arith.constant 0 : i32
    %c0_i32_0 = arith.constant 0 : i32
    %c0_i32_1 = arith.constant 0 : i32
    %c0_i32_2 = arith.constant 0 : i32
    return %c0_i32, %c0_i32_0, %c0_i32_1 : i32, i32, i32
  }
  func.func @transform_8(%arg0: i32) -> (i32, i32) {
    %c0_i32 = arith.constant 0 : i32
    %c0_i32_0 = arith.constant 0 : i32
    %c0_i32_1 = arith.constant 0 : i32
    return %c0_i32, %c0_i32_0 : i32, i32
  }
  func.func @transform_9(%arg0: i32) -> (i32, i32) {
    %c0_i32 = arith.constant 0 : i32
    %c0_i32_0 = arith.constant 0 : i32
    %c0_i32_1 = arith.constant 0 : i32
    return %c0_i32, %c0_i32_0 : i32, i32
  }
  func.func @transform_10(%arg0: i32) -> (i32, i32) {
    %c0_i32 = arith.constant 0 : i32
    %c0_i32_0 = arith.constant 0 : i32
    %c0_i32_1 = arith.constant 0 : i32
    return %c0_i32, %c0_i32_0 : i32, i32
  }
  func.func @transform_11(%arg0: i32) -> (i32, i32, i32) {
    %c0_i32 = arith.constant 0 : i32
    %c0_i32_0 = arith.constant 0 : i32
    %c0_i32_1 = arith.constant 0 : i32
    return %arg0, %c0_i32, %c0_i32_0 : i32, i32, i32
  }
}

</mosaic_0001>

<bundles_post_ra>
// kernel: mnist_convnet_forward.1
= control target key start
LH: loop header
LB: loop body
LE: loop exit
PB: predicated region body
PF: predicated region fallthrough
CT: control target
= control target key end

     0   :  { %16 = vsyncpa [#allocation4], 0  ;;  %s19486_s0 = inlined_call_operand.vmem [shape: f32[2,32,32], index: 0, kind: input, shape index: {}]   ;;  %s19487_s1 = inlined_call_operand.vmem [shape: bf16[5,32,512], index: 1, kind: input, shape index: {}]   ;;  %s19488_s2 = inlined_call_operand.vmem [shape: f32[1,512], index: 2, kind: input, shape index: {}]   ;;  %s19489_s3 = inlined_call_operand.vmem [shape: bf16[5,512,448], index: 3, kind: input, shape index: {}]   ;;  %s19490_s4 = inlined_call_operand.vmem [shape: f32[1,448], index: 4, kind: input, shape index: {}]   ;;  %s19491_s5 = inlined_call_operand.vmem [shape: bf16[5,448,192], index: 5, kind: input, shape index: {}]   ;;  %s19492_s6 = inlined_call_operand.vmem [shape: f32[1,192], index: 6, kind: input, shape index: {}]   ;;  %s19493_s7 = inlined_call_operand.vmem [shape: bf16[12,96,240], index: 7, kind: input, shape index: {}]   ;;  %s19494_s8 = inlined_call_operand.vmem [shape: f32[1,240], index: 8, kind: input, shape index: {}]   ;;  %s19495_s9 = inlined_call_operand.vmem [shape: f32[240,10], index: 9, kind: input, shape index: {}]   ;;  %s19496_s10 = inlined_call_operand.vmem [shape: f32[1,10], index: 10, kind: input, shape index: {}]   ;;  %s19497_s11 = inlined_call_operand.hbm [shape: f32[2,1,10], index: 11, kind: output, shape index: {}]  }
   0x1   :  { %18 = vsyncpa [#allocation4 + $0x1], 0  ;;  %s14912_s17 = smov 0   ;;  %s14914_s18 = smov 0  }
   0x2   :  { %s14916_s19 = smov 0   ;;  %s14918_s20 = smov 0  }
   0x3 LB: > { %19509 = sst [smem:[#allocation6_spill]] %s14841_s19  ;;  %s14933_s21 = sadd.s32 4294967295, %s14845_s20   ;;  %s14845_s20 = sphi %s14918_s20, %s19534_s20   ;;  %s14841_s19 = sphi %s14916_s19, %s19536_s19   ;;  %s14837_s18 = sphi %s14914_s18, %s19538_s18   ;;  %s14833_s17 = sphi %s14912_s17, %s19537_s17  }
   0x4   : > { %s10997_s22 = sadd.s32 4294967294, %s14845_s20   ;;  %s14937_s23 = sadd.s32 1, %s14845_s20  }
   0x5   : > { %19510 = sst [smem:[#allocation7_spill]] %s14937_s23  ;;  %s267_s24 = sadd.s32 1, %s14841_s19 }
   0x6   : > { %s264_s25 = ssub.s32 %s14845_s20, %s14937_s23  ;;  %p277_p0 = scmp.ne.s32.totalorder %s14841_s19, %s14837_s18 }
   0x7   : > { %p265_p1 = scmp.eq.s32.totalorder %s264_s25, 0  ;;  %p278_p2 = scmp.eq.s32.totalorder %s14933_s21, 1 }
   0x8   : > { %p283_p3 = scmp.ne.s32.totalorder %s14837_s18, %s14833_s17  ;;  %p284_p4 = scmp.eq.s32.totalorder %s10997_s22, 1 }
   0x9   : > { %s14948_s26 = scalar_select %p265_p1, %s14841_s19, %s267_s24  }
   0xa   : > { %p14950_p5 = por %p278_p2, %p277_p0  ;;  %p14954_p6 = por %p284_p4, %p283_p3 }
   0xb   : > { %19511 = sst [smem:[#allocation8_spill]] %s14948_s26  ;;  %p11000_p7 = scmp.ge.s32.totalorder %s14845_s20, 1 }
   0xc   : > { %p340_p8 = scmp.lt.s32.totalorder %s14845_s20, 3 }
   0xe   : > { %p341_p9 = pnand %p11000_p7, %p340_p8 }
  0x10   : > { %344 = sbr.rel (%p341_p9) target bundleno = 2239 (0x8bf), region = 64 }
  0x15   : > { %v13112_v0 = vld [vmem:[%s19487_s1 + $0x2c] ss:$16 sps:$4 sm:$0xff]   ;;  %p379_p10 = scmp.lt.s32.totalorder %s14933_s21, 1  ;;  %v13114_v1 = vld [vmem:[%s19487_s1 + $0x28] ss:$16 sps:$4 sm:$0xff]   ;;  %v19503_v2 = vmov 0  }
  0x16   : > { %706 = vmatprep.mubr.bf16.mxu1 %v19503_v2  ;;  %503 = vmatprep.mubr.bf16.mxu0 %v19503_v2  ;;  %v13115_v3 = vld [vmem:[%s19487_s1 + $0x64] ss:$16 sps:$4 sm:$0xff]   ;;  %v13117_v4 = vld [vmem:[%s19487_s1 + $0xc] ss:$16 sps:$4 sm:$0xff]   ;;  %v13119_v5 = vld [vmem:[%s19487_s1 + $0x60] ss:$16 sps:$4 sm:$0xff]  }
  0x17   : > { %686 = vmatprep.subr.bf16.mxu1 %v13112_v0  ;;  %s380_s16 = scalar_select %p379_p10, %s14933_s21, 1  ;;  %v13120_v6 = vld [vmem:[%s19487_s1 + $0x8] ss:$16 sps:$4 sm:$0xff]   ;;  %483 = vmatprep.subr.bf16.mxu0 %v13115_v3  ;;  %v13121_v7 = vld [vmem:[%s19487_s1 + $0x44] ss:$16 sps:$4 sm:$0xff]   ;;  %vm464_vm0 = vcmask 261120  }
  0x18   : > { %687 = vmatpush1.bf16.msra.mxu1 %v13114_v1  ;;  %484 = vmatpush1.bf16.msra.mxu0 %v13119_v5  ;;  %v13123_v8 = vld [vmem:[%s19487_s1 + $0x40] ss:$16 sps:$4 sm:$0xff]   ;;  %v13126_v14 = vld [vmem:[%s19487_s1 + $0x6c] ss:$16 sps:$4 sm:$0xff]   ;;  %v13127_v16 = vld [vmem:[%s19487_s1 + $0xa8] ss:$16 sps:$4 sm:$0xff]  }
  0x19   : > { %s13053_s14 = sshll.u32 %s380_s16, 5  ;;  %688 = vmatprep.subr.bf16.mxu1 %v13117_v4  ;;  %485 = vmatprep.subr.bf16.mxu0 %v13121_v7  ;;  %v13129_v19 = vld [vmem:[%s19487_s1 + $0xac] ss:$16 sps:$4 sm:$0xff]   ;;  %vm408_vm1 = vsmask.f32 7424  ;;  %vm738_vm2 = vcmask 1046528  }
  0x1a   : > { %s383_s22 = scalar_lea.vmem %s19486_s0, %s13053_s14  ;;  %v13133_v23 = vld [vmem:[%s19487_s1 + $0x88] ss:$16 sps:$4 sm:$0xff]   ;;  %v13135_v24 = vld [vmem:[%s19487_s1 + $0x8c] ss:$16 sps:$4 sm:$0xff]   ;;  %v13138_v32 = vld [vmem:[%s19487_s1 + $0x24] ss:$16 sps:$4 sm:$0xff]  }
  0x1b   : > { %v385_v9 = vld [vmem:[%s383_s22] sm:$0xff]  ;;  %v386_v10 = vld [vmem:[%s383_s22 + $0x8] sm:$0xff]  ;;  %v387_v11 = vld [vmem:[%s383_s22 + $0x10] sm:$0xff]  ;;  %vm919_vm3 = vsmask.f32 6400  ;;  %vm1104_vm4 = vcmask 1045504  }
  0x1c   : > { %689 = vmatpush1.bf16.msra.mxu1 %v13120_v6  ;;  %v388_v12 = vld [vmem:[%s383_s22 + $0x18] sm:$0xff]  ;;  %v14991_v13 = vpack.c.bf16 %v386_v10, %v385_v9  ;;  %486 = vmatpush1.bf16.msra.mxu0 %v13123_v8  ;;  %v13136_v39 = vld [vmem:[%s19487_s1 + $0x20] ss:$16 sps:$4 sm:$0xff]   ;;  %v13144_v41 = vld [vmem:[%s19487_s1 + $0x4] ss:$16 sps:$4 sm:$0xff]   ;;  %vm1354_vm5 = vcmask 1041408  }
  0x1d   : > { %v14996_v15 = vpack.c.bf16 %v388_v12, %v387_v11  ;;  %536 = vmatprep.subr.bf16.mxu0 %v13126_v14  ;;  %853 = vmatprep.subr.bf16.mxu1 %v13129_v19  ;;  %v13124_v25 = vld [vmem:[%s19487_s1 + $0x68] ss:$16 sps:$4 sm:$0xff]   ;;  %v13132_v27 = vld [vmem:[%s19487_s1 + $0x4c] ss:$16 sps:$4 sm:$0xff]   ;;  %v13142_v47 = vld [vmem:[%s19487_s1] ss:$16 sps:$4 sm:$0xff]  }
  0x1e   : > { %v410_v17 = vshrl.u32 %v14991_v13, 16  ;;  %v412_v18 = vshll.u32 %v14991_v13, 16  ;;  %v13141_v29 = vld [vmem:[%s19487_s1 + $0xec] ss:$16 sps:$4 sm:$0xff]   ;;  %v13130_v31 = vld [vmem:[%s19487_s1 + $0x48] ss:$16 sps:$4 sm:$0xff]  }
  0x1f   : > { %11033 = vmatmul.mubr.msk.bf16.vlgmr.msra.gmra.mxu1 %vm464_vm0, %v14991_v13  ;;  %v417_v20 = vshll.u32 %v14996_v15, 16  ;;  %v421_v30 = vshrl.u32 %v14996_v15, 16  ;;  %v739_v33 = vrot.slane %v14991_v13, 1  ;;  %v15040_v34 = vrot.slane %v14996_v15, 1  ;;  %v13139_v37 = vld [vmem:[%s19487_s1 + $0xe8] ss:$16 sps:$4 sm:$0xff]  }
  0x20   : > { %v414_v21 = vrot.slane %v412_v18, 1  ;;  %716 = vmatprep.mubr.bf16.mxu1 %v19503_v2  ;;  %854 = vmatpush1.bf16.msra.mxu1 %v13127_v16  ;;  %v13147_v38 = vld [vmem:[%s19487_s1 + $0xcc] ss:$16 sps:$4 sm:$0xff]   ;;  %v13145_v40 = vld [vmem:[%s19487_s1 + $0xc8] ss:$16 sps:$4 sm:$0xff]   ;;  %v920_v43 = vrot.slane %v410_v17, 1 }
  0x21   : > { %v419_v22 = vrot.slane %v417_v20, 1  ;;  %855 = vmatprep.subr.bf16.mxu1 %v13135_v24  ;;  %v15044_v36 = vsel %vm738_vm2, %v739_v33, %v15040_v34  ;;  %v13153_v42 = vld [vmem:[%s19487_s1 + $0x12c] ss:$16 sps:$4 sm:$0xff]   ;;  %v921_v44 = vrot.slane %v412_v18, 2  ;;  %v924_v45 = vrot.slane %v417_v20, 2  ;;  %s14849_s23 = smov 32  }
  0x22   : > { %v415_v26 = vor.u32 %v414_v21, %v410_v17  ;;  %v923_v46 = vrot.slane %v421_v30, 1  ;;  %v13150_v48 = vld [vmem:[%s19487_s1 + $0xa4] ss:$16 sps:$4 sm:$0xff]   ;;  %v13151_v51 = vld [vmem:[%s19487_s1 + $0x128] ss:$16 sps:$4 sm:$0xff]   ;;  %v1105_v59 = vrot.slane %v14991_v13, 2 }
  0x23   : > { %v423_v35 = vor.u32 %v421_v30, %v419_v22  ;;  %v922_v49 = vor.u32 %v921_v44, %v920_v43  ;;  %v13159_v52 = vld [vmem:[%s19487_s1 + $0x10c] ss:$16 sps:$4 sm:$0xff]   ;;  %v13157_v54 = vld [vmem:[%s19487_s1 + $0x108] ss:$16 sps:$4 sm:$0xff]   ;;  %v13148_v55 = vld [vmem:[%s19487_s1 + $0xa0] ss:$16 sps:$4 sm:$0xff]  }
  0x24   : > { %v420_v28 = vsel %vm408_vm1, %v415_v26, %v419_v22  ;;  %856 = vmatpush1.bf16.msra.mxu1 %v13133_v23  ;;  %v925_v50 = vor.u32 %v924_v45, %v923_v46  ;;  %v13156_v56 = vld [vmem:[%s19487_s1 + $0x84] ss:$16 sps:$4 sm:$0xff]   ;;  %v13154_v57 = vld [vmem:[%s19487_s1 + $0x80] ss:$16 sps:$4 sm:$0xff]   ;;  %v1106_v60 = vrot.slane %v14996_v15, 2  ;;  %vm7176_vm6 = vcmask 523264  }
  0x25   : > { %11019 = vmatmul.mubr.msk.bf16.vlgmr.msra.gmra.mxu0 %vm464_vm0, %v420_v28  ;;  %1038 = vmatprep.subr.bf16.mxu1 %v13141_v29  ;;  %v13162_v58 = vld [vmem:[%s19487_s1 + $0xe4] ss:$16 sps:$4 sm:$0xff]   ;;  %v13160_v62 = vld [vmem:[%s19487_s1 + $0xe0] ss:$16 sps:$4 sm:$0xff]   ;;  %vm9231_vm7 = vcmask 785408   ;;  %vm10854_vm8 = vcmask 916480  }
  0x26   : > { %537 = vmatpush1.bf16.msra.mxu0 %v13124_v25  ;;  %513 = vmatprep.mubr.bf16.mxu0 %v19503_v2  ;;  %v926_v53 = vsel %vm919_vm3, %v922_v49, %v925_v50  ;;  %v1107_v61 = vsel %vm1104_vm4, %v1105_v59, %v1106_v60  ;;  %v13165_v63 = vld [vmem:[%s19487_s1 + $0xc4] ss:$16 sps:$4 sm:$0xff]   ;;  %v13163_v0 = vld [vmem:[%s19487_s1 + $0xc0] ss:$16 sps:$4 sm:$0xff]   ;;  %v19501_v25 = vmov 0.0   ;;  %s377_s24 = sand.u32 1, %s14837_s18  }
  0x27   : > { %11034 = vmatmul.mubr.msk.bf16.gmra.mxu1 %vm464_vm0, %v14996_v15  ;;  %538 = vmatprep.subr.bf16.mxu0 %v13132_v27  ;;  %v13168_v1 = vld [vmem:[%s19487_s1 + $0x124] ss:$16 sps:$4 sm:$0xff]   ;;  %v13166_v3 = vld [vmem:[%s19487_s1 + $0x120] ss:$16 sps:$4 sm:$0xff]   ;;  %1333 = vst [vmem:[#allocation2 + $0x18] sm:$0x3] %v19501_v25 }
  0x28   : > { %873 = vmatprep.mubr.bf16.mxu1 %v19503_v2  ;;  %v13171_v4 = vld [vmem:[%s19487_s1 + $0x104] ss:$16 sps:$4 sm:$0xff]   ;;  %v13169_v5 = vld [vmem:[%s19487_s1 + $0x100] ss:$16 sps:$4 sm:$0xff]   ;;  %1330 = vst [vmem:[#allocation2 + $0x70] sm:$0x3] %v19501_v25 }
  0x29   : > { %v13174_v6 = vld [vmem:[%s19489_s3 + $0x6e4] ss:$16 sps:$4 sm:$0xff]   ;;  %v13172_v7 = vld [vmem:[%s19489_s3 + $0x6e0] ss:$16 sps:$4 sm:$0xff]   ;;  %1331 = vst [vmem:[#allocation2] sm:$0x3] %v19501_v25 }
  0x2a   : > { %539 = vmatpush1.bf16.msra.mxu0 %v13130_v31  ;;  %v13177_v8 = vld [vmem:[%s19489_s3 + $0x6c4] ss:$16 sps:$4 sm:$0xff]   ;;  %v13175_v9 = vld [vmem:[%s19489_s3 + $0x6c0] ss:$16 sps:$4 sm:$0xff]   ;;  %1332 = vst [vmem:[#allocation2 + $0x38] sm:$0x3] %v19501_v25 }
  0x2b   : > { %633 = vmatprep.subr.bf16.mxu0 %v13138_v32  ;;  %v13180_v10 = vld [vmem:[%s19489_s3 + $0x6a4] ss:$16 sps:$4 sm:$0xff]   ;;  %v13178_v11 = vld [vmem:[%s19489_s3 + $0x6a0] ss:$16 sps:$4 sm:$0xff]   ;;  %1334 = vst [vmem:[#allocation2 + $0x30] sm:$0xc0] %v19501_v25 }
  0x2c   : > { %v13183_v12 = vld [vmem:[%s19489_s3 + $0x684] ss:$16 sps:$4 sm:$0xff]   ;;  %v13187_v17 = vld [vmem:[%s19489_s3 + $0x640] ss:$16 sps:$4 sm:$0xff]   ;;  %1335 = vst [vmem:[#allocation2 + $0x48] sm:$0xc0] %v19501_v25 }
  0x2d   : > { %11020 = vmatmul.mubr.msk.bf16.gmra.mxu0 %vm464_vm0, %v423_v35  ;;  %v13186_v14 = vld [vmem:[%s19489_s3 + $0x664] ss:$16 sps:$4 sm:$0xff]   ;;  %v13190_v19 = vld [vmem:[%s19489_s3 + $0x620] ss:$16 sps:$4 sm:$0xff]   ;;  %1336 = vst [vmem:[#allocation2 + $0x8] sm:$0xc0] %v19501_v25 }
  0x2e   : > { %556 = vmatprep.mubr.bf16.mxu0 %v19503_v2  ;;  %v13189_v16 = vld [vmem:[%s19489_s3 + $0x644] ss:$16 sps:$4 sm:$0xff]   ;;  %v13193_v21 = vld [vmem:[%s19489_s3 + $0x600] ss:$16 sps:$4 sm:$0xff]   ;;  %1337 = vst [vmem:[#allocation2 + $0x28] sm:$0xc0] %v19501_v25 }
  0x2f   : > { %11053 = vmatmul.mubr.msk.bf16.vlgmr.msra.gmra.mxu1 %vm464_vm0, %v15044_v36  ;;  %v13192_v18 = vld [vmem:[%s19489_s3 + $0x624] ss:$16 sps:$4 sm:$0xff]   ;;  %v13196_v23 = vld [vmem:[%s19489_s3 + $0x7e0] ss:$16 sps:$4 sm:$0xff]   ;;  %s13050_s19 = sshll.u32 %s14933_s21, 4  ;;  %s378_s25 = scalar_lea.vmem [#allocation3], %s377_s24 }
  0x30   : > { %883 = vmatprep.mubr.bf16.mxu1 %v19503_v2  ;;  %1039 = vmatpush1.bf16.msra.mxu1 %v13139_v37  ;;  %v13195_v20 = vld [vmem:[%s19489_s3 + $0x604] ss:$16 sps:$4 sm:$0xff]   ;;  %v13199_v26 = vld [vmem:[%s19489_s3 + $0x7c0] ss:$16 sps:$4 sm:$0xff]   ;;  %vm10927_vm9 = vcmask 73728   ;;  %s19451_s12 = scalar_lea.hbm %s19497_s11, %s13050_s19  ;;  %s10930_s13 = scalar_lea.sflag [#allocation4], %s377_s24 }
  0x31   : > { %1040 = vmatprep.subr.bf16.mxu1 %v13147_v38  ;;  %v13198_v22 = vld [vmem:[%s19489_s3 + $0x7e4] ss:$16 sps:$4 sm:$0xff]   ;;  %v13205_v30 = vld [vmem:[%s19489_s3 + $0x7a0] ss:$16 sps:$4 sm:$0xff]   ;;  %s14851_s21 = smov [#allocation3]  }
  0x32   : > { %v13201_v24 = vld [vmem:[%s19489_s3 + $0x7c4] ss:$16 sps:$4 sm:$0xff]   ;;  %v13208_v32 = vld [vmem:[%s19489_s3 + $0x4c0] ss:$16 sps:$4 sm:$0xff]   ;;  %s14789_s15 = sshll.u32 %s14851_s21, 4  ;;  %s14790_s15 = int_to_ptr.vmem [resolvable:$false] %s14789_s15 }
  0x33   : > { %v13204_v27 = vld [vmem:[%s19489_s3 + $0x4e4] ss:$16 sps:$4 sm:$0xff]   ;;  %v13217_v38 = vld [vmem:[%s19489_s3 + $0x760] ss:$16 sps:$4 sm:$0xff]   ;;  %s14791_s22 = scalar_lea.vmem %s14790_s15, 32 }
  0x34   : > { %1041 = vmatpush1.bf16.msra.mxu1 %v13145_v40  ;;  %v13207_v29 = vld [vmem:[%s19489_s3 + $0x7a4] ss:$16 sps:$4 sm:$0xff]   ;;  %v13220_v40 = vld [vmem:[%s19489_s3 + $0x480] ss:$16 sps:$4 sm:$0xff]  }
  0x35   : > { %11021 = vmatmul.mubr.msk.bf16.vlgmr.msra.gmra.mxu0 %vm464_vm0, %v420_v28  ;;  %1219 = vmatprep.subr.bf16.mxu1 %v13153_v42  ;;  %v13202_v28 = vld [vmem:[%s19489_s3 + $0x4e0] ss:$16 sps:$4 sm:$0xff]   ;;  %v13210_v31 = vld [vmem:[%s19489_s3 + $0x4c4] ss:$16 sps:$4 sm:$0xff]  }
  0x36   : > { %634 = vmatpush1.bf16.msra.mxu0 %v13136_v39  ;;  %566 = vmatprep.mubr.bf16.mxu0 %v19503_v2  ;;  %v13213_v33 = vld [vmem:[%s19489_s3 + $0x784] ss:$16 sps:$4 sm:$0xff]   ;;  %v13223_v42 = vld [vmem:[%s19489_s3 + $0x740] ss:$16 sps:$4 sm:$0xff]  }
  0x37   : > { %11054 = vmatmul.mubr.msk.bf16.gmra.mxu1 %vm464_vm0, %v15040_v34  ;;  %635 = vmatprep.subr.bf16.mxu0 %v13144_v41  ;;  %v13219_v37 = vld [vmem:[%s19489_s3 + $0x764] ss:$16 sps:$4 sm:$0xff]   ;;  %v13226_v44 = vld [vmem:[%s19489_s3 + $0x460] ss:$16 sps:$4 sm:$0xff]  }
  0x38   : > { %1058 = vmatprep.mubr.bf16.mxu1 %v19503_v2  ;;  %v13222_v39 = vld [vmem:[%s19489_s3 + $0x484] ss:$16 sps:$4 sm:$0xff]   ;;  %v13229_v46 = vld [vmem:[%s19489_s3 + $0x720] ss:$16 sps:$4 sm:$0xff]  }
  0x39   : > { %v13225_v41 = vld [vmem:[%s19489_s3 + $0x744] ss:$16 sps:$4 sm:$0xff]   ;;  %v13256_v59 = vld [vmem:[%s19489_s3 + $0x5c0] ss:$16 sps:$4 sm:$0xff]  }
  0x3a   : > { %636 = vmatpush1.bf16.msra.mxu0 %v13142_v47  ;;  %v13228_v43 = vld [vmem:[%s19489_s3 + $0x464] ss:$16 sps:$4 sm:$0xff]  }
  0x3b   : > { %800 = vmatprep.subr.bf16.mxu0 %v13150_v48  ;;  %v13231_v45 = vld [vmem:[%s19489_s3 + $0x724] ss:$16 sps:$4 sm:$0xff]   ;;  %v13232_v48 = vld [vmem:[%s19489_s3 + $0x440] ss:$16 sps:$4 sm:$0xff]  }
  0x3c   : > { %v13234_v47 = vld [vmem:[%s19489_s3 + $0x444] ss:$16 sps:$4 sm:$0xff]  }
  0x3d   : > { %11022 = vmatmul.mubr.msk.bf16.gmra.mxu0 %vm464_vm0, %v423_v35  ;;  %v13216_v35 = vld [vmem:[%s19489_s3 + $0x4a4] ss:$16 sps:$4 sm:$0xff]  }
  0x3e   : > { %653 = vmatprep.mubr.bf16.mxu0 %v19503_v2  ;;  %v13237_v49 = vld [vmem:[%s19489_s3 + $0x704] ss:$16 sps:$4 sm:$0xff]  }
  0x3f   : > { %11073 = vmatmul.mubr.msk.bf16.vlgmr.msra.gmra.mxu1 %vm464_vm0, %v926_v53 }
  0x40   : > { %1068 = vmatprep.mubr.bf16.mxu1 %v19503_v2  ;;  %1220 = vmatpush1.bf16.msra.mxu1 %v13151_v51  ;;  %v13240_v51 = vld [vmem:[%s19489_s3 + $0x424] ss:$16 sps:$4 sm:$0xff]  }
  0x41   : > { %1221 = vmatprep.subr.bf16.mxu1 %v13159_v52  ;;  %v13238_v52 = vld [vmem:[%s19489_s3 + $0x420] ss:$16 sps:$4 sm:$0xff]  }
  0x44   : > { %1222 = vmatpush1.bf16.msra.mxu1 %v13157_v54  ;;  %v13246_v54 = vld [vmem:[%s19489_s3 + $0x404] ss:$16 sps:$4 sm:$0xff]  }
  0x45   : > { %11031 = vmatmul.mubr.msk.bf16.vlgmr.msra.gmra.mxu0 %vm464_vm0, %v14991_v13  ;;  %2473 = vmatprep.subr.bf16.mxu1 %v13174_v6  ;;  %v13181_v13 = vld [vmem:[%s19489_s3 + $0x680] ss:$16 sps:$4 sm:$0xff]   ;;  %v13288_v6 = vld [vmem:[%s19489_s3 + $0x524] ss:$16 sps:$4 sm:$0xff]  }
  0x46   : > { %801 = vmatpush1.bf16.msra.mxu0 %v13148_v55  ;;  %663 = vmatprep.mubr.bf16.mxu0 %v19503_v2  ;;  %v13244_v55 = vld [vmem:[%s19489_s3 + $0x400] ss:$16 sps:$4 sm:$0xff]  }
  0x47   : > { %11074 = vmatmul.mubr.msk.bf16.gmra.mxu1 %vm464_vm0, %v925_v50  ;;  %802 = vmatprep.subr.bf16.mxu0 %v13156_v56  ;;  %v13252_v56 = vld [vmem:[%s19489_s3 + $0x5e4] ss:$16 sps:$4 sm:$0xff]  }
  0x48   : > { %1239 = vmatprep.mubr.bf16.mxu1 %v19503_v2 }
  0x4a   : > { %803 = vmatpush1.bf16.msra.mxu0 %v13154_v57  ;;  %v13250_v57 = vld [vmem:[%s19489_s3 + $0x5e0] ss:$16 sps:$4 sm:$0xff]  }
  0x4b   : > { %985 = vmatprep.subr.bf16.mxu0 %v13162_v58  ;;  %v13258_v58 = vld [vmem:[%s19489_s3 + $0x5c4] ss:$16 sps:$4 sm:$0xff]  }
  0x4d   : > { %11032 = vmatmul.mubr.msk.bf16.gmra.mxu0 %vm464_vm0, %v14996_v15  ;;  %v13184_v15 = vld [vmem:[%s19489_s3 + $0x660] ss:$16 sps:$4 sm:$0xff]  }
  0x4e   : > { %820 = vmatprep.mubr.bf16.mxu0 %v19503_v2 }
  0x4f   : > { %11093 = vmatmul.mubr.msk.bf16.vlgmr.msra.gmra.mxu1 %vm464_vm0, %v1107_v61 }
  0x50   : > { %1249 = vmatprep.mubr.bf16.mxu1 %v19503_v2  ;;  %2474 = vmatpush1.bf16.msra.mxu1 %v13172_v7  ;;  %v13292_v7 = vld [vmem:[%s19489_s3 + $0x500] ss:$16 sps:$4 sm:$0xff]  }
  0x51   : > { %2475 = vmatprep.subr.bf16.mxu1 %v13177_v8  ;;  %v13294_v8 = vld [vmem:[%s19489_s3 + $0x504] ss:$16 sps:$4 sm:$0xff]  }
  0x54   : > { %2476 = vmatpush1.bf16.msra.mxu1 %v13175_v9  ;;  %v13300_v9 = vld [vmem:[%s19489_s3 + $0x4ec] ss:$16 sps:$4 sm:$0xff]  }
  0x55   : > { %11051 = vmatmul.mubr.msk.bf16.vlgmr.msra.gmra.mxu0 %vm464_vm0, %v15044_v36  ;;  %2477 = vmatprep.subr.bf16.mxu1 %v13180_v10  ;;  %v13214_v36 = vld [vmem:[%s19489_s3 + $0x4a0] ss:$16 sps:$4 sm:$0xff]  }
  0x56   : > { %986 = vmatpush1.bf16.msra.mxu0 %v13160_v62  ;;  %830 = vmatprep.mubr.bf16.mxu0 %v19503_v2  ;;  %v13270_v62 = vld [vmem:[%s19489_s3 + $0x584] ss:$16 sps:$4 sm:$0xff]  }
  0x57   : > { %11094 = vmatmul.mubr.msk.bf16.gmra.mxu1 %vm464_vm0, %v1106_v60  ;;  %987 = vmatprep.subr.bf16.mxu0 %v13165_v63  ;;  %v13268_v63 = vld [vmem:[%s19489_s3 + $0x580] ss:$16 sps:$4 sm:$0xff]  }
  0x58   : > { %2478 = vmatpush1.bf16.msra.mxu1 %v13178_v11 }
  0x59   : > { %2479 = vmatprep.subr.bf16.mxu1 %v13183_v12 }
  0x5a   : > { %988 = vmatpush1.bf16.msra.mxu0 %v13163_v0  ;;  %v13276_v0 = vld [vmem:[%s19489_s3 + $0x564] ss:$16 sps:$4 sm:$0xff]  }
  0x5b   : > { %1166 = vmatprep.subr.bf16.mxu0 %v13168_v1  ;;  %v13274_v1 = vld [vmem:[%s19489_s3 + $0x560] ss:$16 sps:$4 sm:$0xff]  }
  0x5c   : > { %2480 = vmatpush1.bf16.msra.mxu1 %v13181_v13 }
  0x5d   : > { %11052 = vmatmul.mubr.msk.bf16.gmra.mxu0 %vm464_vm0, %v15040_v34  ;;  %2481 = vmatprep.subr.bf16.mxu1 %v13186_v14  ;;  %v13211_v34 = vld [vmem:[%s19489_s3 + $0x780] ss:$16 sps:$4 sm:$0xff]  }
  0x5e   : > { %1005 = vmatprep.mubr.bf16.mxu0 %v19503_v2 }
  0x60   : > { %2482 = vmatpush1.bf16.msra.mxu1 %v13184_v15 }
  0x61   : > { %2483 = vmatprep.subr.bf16.mxu1 %v13189_v16 }
  0x64   : > { %2484 = vmatpush1.bf16.msra.mxu1 %v13187_v17 }
  0x65   : > { %11071 = vmatmul.mubr.msk.bf16.vlgmr.msra.gmra.mxu0 %vm464_vm0, %v926_v53  ;;  %2485 = vmatprep.subr.bf16.mxu1 %v13192_v18  ;;  %v13243_v53 = vld [vmem:[%s19489_s3 + $0x6ec] ss:$16 sps:$4 sm:$0xff]  }
  0x66   : > { %1167 = vmatpush1.bf16.msra.mxu0 %v13166_v3  ;;  %1015 = vmatprep.mubr.bf16.mxu0 %v19503_v2  ;;  %v13280_v3 = vld [vmem:[%s19489_s3 + $0x540] ss:$16 sps:$4 sm:$0xff]  }
  0x67   : > { %1168 = vmatprep.subr.bf16.mxu0 %v13171_v4  ;;  %v13282_v4 = vld [vmem:[%s19489_s3 + $0x544] ss:$16 sps:$4 sm:$0xff]  }
  0x68   : > { %2486 = vmatpush1.bf16.msra.mxu1 %v13190_v19 }
  0x69   : > { %2487 = vmatprep.subr.bf16.mxu1 %v13195_v20 }
  0x6a   : > { %1169 = vmatpush1.bf16.msra.mxu0 %v13169_v5  ;;  %v13286_v5 = vld [vmem:[%s19489_s3 + $0x520] ss:$16 sps:$4 sm:$0xff]  }
  0x6b   : > { %2420 = vmatprep.subr.bf16.mxu0 %v13204_v27 }
  0x6c   : > { %2488 = vmatpush1.bf16.msra.mxu1 %v13193_v21 }
  0x6d   : > { %11072 = vmatmul.mubr.msk.bf16.gmra.mxu0 %vm464_vm0, %v925_v50  ;;  %2489 = vmatprep.subr.bf16.mxu1 %v13198_v22  ;;  %v13235_v50 = vld [vmem:[%s19489_s3 + $0x700] ss:$16 sps:$4 sm:$0xff]  }
  0x6e   : > { %1186 = vmatprep.mubr.bf16.mxu0 %v19503_v2 }
  0x70   : > { %2490 = vmatpush2.bf16.msra.mxu1 %v13196_v23 }
  0x71   : > { %2491 = vmatprep.subr.bf16.mxu1 %v13201_v24 }
  0x74   : > { %2492 = vmatpush2.bf16.msra.mxu1 %v13199_v26 }
  0x75   : > { %11091 = vmatmul.mubr.msk.bf16.vlgmr.msra.gmra.mxu0 %vm464_vm0, %v1107_v61  ;;  %2493 = vmatprep.subr.bf16.mxu1 %v13207_v29  ;;  %v13262_v61 = vld [vmem:[%s19489_s3 + $0x5a0] ss:$16 sps:$4 sm:$0xff]  }
  0x76   : > { %1196 = vmatprep.mubr.bf16.mxu0 %v19503_v2  ;;  %2421 = vmatpush1.bf16.msra.mxu0 %v13202_v28  ;;  %v14218_v2 = vld [vmem:[%s19491_s5 + $0x2f4] ss:$8 sps:$4 sm:$0xff]  }
  0x77   : > { %2422 = vmatprep.subr.bf16.mxu0 %v13210_v31 }
  0x78   : > { %2494 = vmatpush2.bf16.msra.mxu1 %v13205_v30 }
  0x79   : > { %2495 = vmatprep.subr.bf16.mxu1 %v13213_v33 }
  0x7a   : > { %2423 = vmatpush1.bf16.msra.mxu0 %v13208_v32 }
  0x7b   : > { %2424 = vmatprep.subr.bf16.mxu0 %v13216_v35 }
  0x7c   : > { %2496 = vmatpush2.bf16.msra.mxu1 %v13211_v34 }
  0x7d   : > { %11092 = vmatmul.mubr.msk.bf16.gmra.mxu0 %vm464_vm0, %v1106_v60  ;;  %2497 = vmatprep.subr.bf16.mxu1 %v13219_v37  ;;  %v13264_v60 = vld [vmem:[%s19489_s3 + $0x5a4] ss:$16 sps:$4 sm:$0xff]  }
  0x7e   : > { %2425 = vmatpush1.bf16.msra.mxu0 %v13214_v36 }
  0x7f   : > { %2426 = vmatprep.subr.bf16.mxu0 %v13222_v39 }
  0x80   : > { %2498 = vmatpush2.bf16.msra.mxu1 %v13217_v38 }
  0x81   : > { %2499 = vmatprep.subr.bf16.mxu1 %v13225_v41 }
  0x82   : > { %2427 = vmatpush1.bf16.msra.mxu0 %v13220_v40 }
  0x83   : > { %2428 = vmatprep.subr.bf16.mxu0 %v13228_v43 }
  0x84   : > { %2500 = vmatpush2.bf16.msra.mxu1 %v13223_v42 }
  0x85   : > { %2501 = vmatprep.subr.bf16.mxu1 %v13231_v45 }
  0x86   : > { %2429 = vmatpush1.bf16.msra.mxu0 %v13226_v44  ;;  %v1278_v44 = vlaneseq }
  0x87   : > { %2430 = vmatprep.subr.bf16.mxu0 %v13234_v47 }
  0x88   : > { %2502 = vmatpush2.bf16.msra.mxu1 %v13229_v46 }
  0x89   : > { %2503 = vmatprep.subr.bf16.mxu1 %v13237_v49  ;;  %v15386_v49 = vshrl.u32 %v1278_v44, 7 }
  0x8a   : > { %2431 = vmatpush1.bf16.msra.mxu0 %v13232_v48 }
  0x8b   : > { %2432 = vmatprep.subr.bf16.mxu0 %v13240_v51  ;;  %19514 = vst [vmem:[#allocation9_spill] sm:$0xff] %v15386_v49 }
  0x8c   : > { %2504 = vmatpush2.bf16.msra.mxu1 %v13235_v50 }
  0x8d   : > { %2579 = vmatprep.subr.bf16.mxu1 %v13243_v53 }
  0x8e   : > { %2433 = vmatpush1.bf16.msra.mxu0 %v13238_v52 }
  0x8f   : > { %2434 = vmatprep.subr.bf16.mxu0 %v13246_v54 }
  0x92   : > { %2435 = vmatpush1.bf16.msra.mxu0 %v13244_v55 }
  0x93   : > { %2436 = vmatprep.subr.bf16.mxu0 %v13252_v56  ;;  %v15395_v56 = vld [vmem:[%s19488_s2] sm:$0xf] }
  0x96   : > { %2437 = vmatpush2.bf16.msra.mxu0 %v13250_v57  ;;  %v19506_v57 = vsub.s32 2, %v15386_v49 }
  0x97   : > { %2438 = vmatprep.subr.bf16.mxu0 %v13258_v58 }
  0x9a   : > { %2439 = vmatpush2.bf16.msra.mxu0 %v13256_v59 }
  0x9b   : > { %2440 = vmatprep.subr.bf16.mxu0 %v13264_v60  ;;  %v19505_v60 = vsub.s32 3, %v15386_v49 }
  0x9e   : > { %2441 = vmatpush2.bf16.msra.mxu0 %v13262_v61 }
  0x9f   : > { %2442 = vmatprep.subr.bf16.mxu0 %v13270_v62 }
  0xa2   : > { %2443 = vmatpush2.bf16.msra.mxu0 %v13268_v63 }
  0xa3   : > { %2444 = vmatprep.subr.bf16.mxu0 %v13276_v0 }
  0xa6   : > { %2445 = vmatpush2.bf16.msra.mxu0 %v13274_v1 }
  0xa7   : > { %2446 = vmatprep.subr.bf16.mxu0 %v13282_v4  ;;  %v15406_v4 = vrot.slane %v15395_v56, %v19506_v57 }
  0xaa   : > { %2447 = vmatpush2.bf16.msra.mxu0 %v13280_v3 }
  0xab   : > { %2448 = vmatprep.subr.bf16.mxu0 %v13288_v6 }
  0xae   : > { %2449 = vmatpush2.bf16.msra.mxu0 %v13286_v5 }
  0xaf   : > { %2450 = vmatprep.subr.bf16.mxu0 %v13294_v8  ;;  %v15413_v8 = vrot.slane %v15395_v56, %v19505_v60 }
  0xb2   : > { %2451 = vmatpush2.bf16.msra.mxu0 %v13292_v7 }
  0xb3   : > { %2526 = vmatprep.subr.bf16.mxu0 %v13300_v9 }
  0xdf   : > { %v708_v10 = vpop.f32.mrf.mxu1 }
  0xe1   : > { %v710_v11 = vpop.f32.mrf.mxu1 }
  0xe3   : > { %v712_v12 = vpop.f32.mrf.mxu1 }
  0xe5   : > { %v15360_v13 = vpop.f32.mrf.mxu0  ;;  %v714_v14 = vpop.f32.mrf.mxu1 }
  0xe7   : > { %v15362_v15 = vpop.f32.mrf.mxu0  ;;  %v718_v16 = vpop.f32.mrf.mxu1 }
  0xe9   : > { %v15364_v17 = vpop.f32.mrf.mxu0  ;;  %v720_v18 = vpop.f32.mrf.mxu1 }
  0xeb   : > { %v15366_v19 = vpop.f32.mrf.mxu0  ;;  %v15368_v20 = vpop.f32.mrf.mxu1 }
  0xed   : > { %v15370_v21 = vpop.f32.mrf.mxu0  ;;  %v15372_v22 = vpop.f32.mrf.mxu1 }
  0xef   : > { %v15374_v23 = vpop.f32.mrf.mxu0  ;;  %v875_v24 = vpop.f32.mrf.mxu1 }
  0xf1   : > { %v15376_v26 = vpop.f32.mrf.mxu0  ;;  %v877_v27 = vpop.f32.mrf.mxu1 }
  0xf3   : > { %v15378_v28 = vpop.f32.mrf.mxu0  ;;  %v879_v29 = vpop.f32.mrf.mxu1 }
  0xf5   : > { %v558_v30 = vpop.f32.mrf.mxu0  ;;  %v881_v31 = vpop.f32.mrf.mxu1 }
  0xf6   : > { %v709_v52 = vadd.f32 %v708_v10, %v558_v30 }
  0xf7   : > { %v560_v32 = vpop.f32.mrf.mxu0  ;;  %v885_v33 = vpop.f32.mrf.mxu1 }
  0xf8   : > { %v711_v55 = vadd.f32 %v710_v11, %v560_v32  ;;  %v896_v62 = vadd.f32 %v875_v24, %v709_v52 }
  0xf9   : > { %v562_v34 = vpop.f32.mrf.mxu0  ;;  %v887_v35 = vpop.f32.mrf.mxu1 }
  0xfa   : > { %v713_v61 = vadd.f32 %v712_v12, %v562_v34  ;;  %v897_v3 = vadd.f32 %v877_v27, %v711_v55 }
  0xfb   : > { %v564_v36 = vpop.f32.mrf.mxu0  ;;  %v15380_v37 = vpop.f32.mrf.mxu1 }
  0xfc   : > { %v715_v5 = vadd.f32 %v714_v14, %v564_v36  ;;  %v900_v11 = vadd.f32 %v879_v29, %v713_v61 }
  0xfd   : > { %v568_v38 = vpop.f32.mrf.mxu0  ;;  %v15382_v39 = vpop.f32.mrf.mxu1 }
  0xfe   : > { %v719_v9 = vadd.f32 %v718_v16, %v568_v38  ;;  %v901_v36 = vadd.f32 %v881_v31, %v715_v5 }
  0xff   : > { %v570_v40 = vpop.f32.mrf.mxu0  ;;  %v1060_v41 = vpop.f32.mrf.mxu1 }
 0x100   : > { %v1081_v1 = vadd.f32 %v1060_v41, %v896_v62  ;;  %v721_v24 = vadd.f32 %v720_v18, %v570_v40  ;;  %v904_v52 = vadd.f32 %v885_v33, %v719_v9 }
 0x101   : > { %v572_v42 = vpop.f32.mrf.mxu0  ;;  %v1062_v43 = vpop.f32.mrf.mxu1 }
 0x102   : > { %v1082_v10 = vadd.f32 %v1062_v43, %v897_v3  ;;  %v723_v29 = vadd.f32 %v15368_v20, %v572_v42  ;;  %v905_v40 = vadd.f32 %v887_v35, %v721_v24 }
 0x103   : > { %v574_v45 = vpop.f32.mrf.mxu0  ;;  %v1064_v46 = vpop.f32.mrf.mxu1 }
 0x104   : > { %v1085_v32 = vadd.f32 %v1064_v46, %v900_v11  ;;  %v725_v18 = vadd.f32 %v15372_v22, %v574_v45  ;;  %v908_v22 = vadd.f32 %v15380_v37, %v723_v29 }
 0x105   : > { %v15384_v47 = vpop.f32.mrf.mxu0  ;;  %v1066_v48 = vpop.f32.mrf.mxu1 }
 0x106   : > { %v1086_v38 = vadd.f32 %v1066_v48, %v901_v36 }
 0x107   : > { %v15388_v50 = vpop.f32.mrf.mxu0  ;;  %v1070_v51 = vpop.f32.mrf.mxu1 }
 0x108   : > { %v1089_v61 = vadd.f32 %v1070_v51, %v904_v52  ;;  %v909_v51 = vadd.f32 %v15382_v39, %v725_v18 }
 0x109   : > { %v15390_v53 = vpop.f32.mrf.mxu0  ;;  %v1072_v54 = vpop.f32.mrf.mxu1 }
 0x10a   : > { %v1090_v9 = vadd.f32 %v1072_v54, %v905_v40 }
 0x10b   : > { %v15398_v58 = vpop.f32.mrf.mxu0  ;;  %v1074_v59 = vpop.f32.mrf.mxu1 }
 0x10c   : > { %v1093_v54 = vadd.f32 %v1074_v59, %v908_v22 }
 0x10d   : > { %v15401_v63 = vpop.f32.mrf.mxu0  ;;  %v1076_v0 = vpop.f32.mrf.mxu1 }
 0x10f   : > { %v15408_v6 = vpop.f32.mrf.mxu0  ;;  %v1241_v7 = vpop.f32.mrf.mxu1 }
 0x110   : > { %v1262_v12 = vadd.f32 %v1241_v7, %v1081_v1 }
 0x111   : > { %v15415_v27 = vpop.f32.mrf.mxu0  ;;  %v1243_v30 = vpop.f32.mrf.mxu1 }
 0x112   : > { %v1300_v34 = vadd.f32 %v15406_v4, %v1262_v12  ;;  %v1263_v14 = vadd.f32 %v1243_v30, %v1082_v10 }
 0x113   : > { %v15418_v41 = vpop.f32.mrf.mxu0  ;;  %v1245_v44 = vpop.f32.mrf.mxu1 }
 0x114   : > { %v1316_v55 = vmax.f32 %v1300_v34, 0.0  ;;  %v1301_v62 = vadd.f32 %v15413_v8, %v1263_v14  ;;  %v1266_v16 = vadd.f32 %v1245_v44, %v1085_v32  ;;  %v1094_v14 = vadd.f32 %v1076_v0, %v909_v51 }
 0x115   : > { %v15423_v43 = vpop.f32.mrf.mxu0  ;;  %v1247_v46 = vpop.f32.mrf.mxu1 }
 0x116   : > { %v1357_v1 = vrot.slane %v1316_v55, 6  ;;  %v1317_v31 = vmax.f32 %v1301_v62, 0.0  ;;  %v1304_v3 = vadd.f32 %v15406_v4, %v1266_v16  ;;  %v1267_v5 = vadd.f32 %v1247_v46, %v1086_v38 }
 0x117   : > { %v15426_v33 = vpop.f32.mrf.mxu0  ;;  %v1251_v7 = vpop.f32.mrf.mxu1 }
 0x118   : > { %1401 = vst [vmem:[#allocation2 + $0x38] sm:$0xfc] %v1357_v1  ;;  %v1358_v10 = vrot.slane %v1317_v31, 6  ;;  %v1320_v20 = vmax.f32 %v1304_v3, 0.0  ;;  %v1270_v42 = vadd.f32 %v1251_v7, %v1089_v61  ;;  %v1305_v35 = vadd.f32 %v15413_v8, %v1267_v5 }
 0x119   : > { %v15430_v45 = vpop.f32.mrf.mxu0  ;;  %v1253_v48 = vpop.f32.mrf.mxu1 }
 0x11a   : > { %1402 = vst [vmem:[#allocation2 + $0x18] sm:$0xfc] %v1358_v10  ;;  %v1363_v11 = vrot.slane %v1320_v20, 6  ;;  %v1308_v12 = vadd.f32 %v15406_v4, %v1270_v42  ;;  %v1271_v24 = vadd.f32 %v1253_v48, %v1090_v9  ;;  %v1321_v30 = vmax.f32 %v1305_v35, 0.0 }
 0x11b   : > { %v15434_v32 = vpop.f32.mrf.mxu0  ;;  %v1255_v34 = vpop.f32.mrf.mxu1 }
 0x11c   : > { %v1364_v37 = vsel %vm1354_vm5, %v1357_v1, %v1363_v11  ;;  %v1324_v36 = vmax.f32 %v1308_v12, 0.0  ;;  %v1309_v44 = vadd.f32 %v15413_v8, %v1271_v24  ;;  %v1365_v52 = vrot.slane %v1321_v30, 6 }
 0x11d   : > { %1405 = vst [vmem:[#allocation2 + $0x10] sm:$0xff] %v1364_v37  ;;  %v1274_v55 = vadd.f32 %v1255_v34, %v1093_v54  ;;  %v15438_v39 = vpop.f32.mrf.mxu0  ;;  %v1257_v62 = vpop.f32.mrf.mxu1 }
 0x11e   : > { %v1371_v16 = vrot.slane %v1324_v36, 6  ;;  %v1325_v29 = vmax.f32 %v1309_v44, 0.0  ;;  %v1275_v18 = vadd.f32 %v1257_v62, %v1094_v14  ;;  %v15441_v59 = vsel %vm1354_vm5, %v1358_v10, %v1365_v52 }
 0x11f   : > { %v1312_v38 = vadd.f32 %v15406_v4, %v1274_v55  ;;  %v15444_v0 = vpop.f32.mrf.mxu0  ;;  %1406 = vst [vmem:[#allocation2 + $0x78] sm:$0xff] %v15441_v59  ;;  %v1569_v22 = vld [vmem:[#allocation2 + $0x38] sm:$0xfe] }
 0x120   : > { %v1372_v40 = vsel %vm1354_vm5, %v1363_v11, %v1371_v16  ;;  %v1373_v46 = vrot.slane %v1325_v29, 6  ;;  %v1313_v61 = vadd.f32 %v15413_v8, %v1275_v18  ;;  %v1577_v51 = vpack.c.bf16 %v1364_v37, %v1569_v22 }
 0x121   : > { %1409 = vst [vmem:[#allocation2 + $0x58] sm:$0xff] %v1372_v40  ;;  %v1328_v1 = vmax.f32 %v1312_v38, 0.0  ;;  %v15449_v31 = vpop.f32.mrf.mxu0  ;;  %v1570_v10 = vld [vmem:[#allocation2 + $0x18] sm:$0xfe]  ;;  %v15470_v38 = vsub.s32 1, %v15386_v49 }
 0x122   : > { %v1374_v3 = vsel %vm1354_vm5, %v1365_v52, %v1373_v46  ;;  %v1329_v5 = vmax.f32 %v1313_v61, 0.0  ;;  %v1578_v48 = vpack.c.bf16 %v15441_v59, %v1570_v10  ;;  %v1739_v54 = vshll.u32 %v1577_v51, 16  ;;  %v13241_v10 = vld [vmem:[%s19489_s3 + $0x6e8] ss:$16 sps:$4 sm:$0xff]  }
 0x123   : > { %1410 = vst [vmem:[#allocation2 + $0x68] sm:$0xff] %v1374_v3  ;;  %v1379_v7 = vrot.slane %v1328_v1, 6  ;;  %v15452_v9 = vpop.f32.mrf.mxu0  ;;  %v15462_v52 = vsub.s32 0, %v15386_v49  ;;  %v658_v61 = vadd.f32 %v15388_v50, %v15362_v15  ;;  %v660_v15 = vadd.f32 %v15390_v53, %v15364_v17  ;;  %v13249_v17 = vld [vmem:[%s19489_s3 + $0x6cc] ss:$16 sps:$4 sm:$0xff]  }
 0x124   : > { %v1381_v4 = vrot.slane %v1329_v5, 6  ;;  %v1751_v24 = vshll.u32 %v1578_v48, 16  ;;  %v1741_v37 = vrot.slane %v1739_v54, 1 }
 0x125   : > { %v1380_v20 = vsel %vm1354_vm5, %v1371_v16, %v1379_v7  ;;  %v1007_v42 = vpop.f32.mrf.mxu0  ;;  %v656_v16 = vadd.f32 %v15384_v47, %v15360_v13  ;;  %v15479_v13 = vrot.slane %v15395_v56, %v15462_v52  ;;  %v895_v50 = vadd.f32 %v15426_v33, %v658_v61 }
 0x126   : > { %1413 = vst [vmem:[#allocation2 + $0x8] sm:$0x3f] %v1380_v20  ;;  %v1382_v8 = vsel %vm1354_vm5, %v1373_v46, %v1381_v4  ;;  %v1753_v62 = vrot.slane %v1751_v24, 1  ;;  %v898_v53 = vadd.f32 %v15430_v45, %v660_v15 }
 0x127   : > { %1414 = vst [vmem:[#allocation2 + $0x28] sm:$0x3f] %v1382_v8  ;;  %v1009_v35 = vpop.f32.mrf.mxu0  ;;  %v894_v1 = vadd.f32 %v15423_v43, %v656_v16  ;;  %v662_v8 = vadd.f32 %v15398_v58, %v15366_v19 }
 0x128   : > { %v1080_v33 = vadd.f32 %v1009_v35, %v895_v50 }
 0x129   : > { %v1011_v11 = vpop.f32.mrf.mxu0  ;;  %v1079_v43 = vadd.f32 %v1007_v42, %v894_v1  ;;  %v899_v58 = vadd.f32 %v15434_v32, %v662_v8  ;;  %v13255_v32 = vld [vmem:[%s19489_s3 + $0x6ac] ss:$16 sps:$4 sm:$0xff]  }
 0x12b   : > { %v1013_v12 = vpop.f32.mrf.mxu0 }
 0x12c   : > { %v1084_v16 = vadd.f32 %v1013_v12, %v899_v58  ;;  %v670_v12 = vadd.f32 %v15415_v27, %v15376_v26 }
 0x12d   : > { %v1017_v30 = vpop.f32.mrf.mxu0  ;;  %v1573_v34 = vld [vmem:[#allocation2 + $0x8] sm:$0x1f] }
 0x12e   : > { %v1574_v14 = vld [vmem:[#allocation2 + $0x28] sm:$0x1f]  ;;  %v15457_v36 = vpack.c.bf16 %v1573_v34, %v1372_v40  ;;  %v1749_v40 = vshrl.u32 %v1578_v48, 16  ;;  %v906_v26 = vadd.f32 %v15449_v31, %v670_v12 }
 0x12f   : > { %v15459_v44 = vpop.f32.mrf.mxu0  ;;  %v1582_v55 = vpack.c.bf16 %v1574_v14, %v1374_v3  ;;  %v1737_v3 = vshrl.u32 %v1577_v51, 16  ;;  %v15491_v51 = vrot.slane %v15395_v56, %v15470_v38  ;;  %v666_v56 = vadd.f32 %v15401_v63, %v15370_v21  ;;  %v13247_v14 = vld [vmem:[%s19489_s3 + $0x6c8] ss:$16 sps:$4 sm:$0xff]  }
 0x130   : > { %v1744_v29 = vshll.u32 %v15457_v36, 16  ;;  %v1754_v47 = vor.u32 %v1753_v62, %v1749_v40  ;;  %v668_v62 = vadd.f32 %v15408_v6, %v15374_v23  ;;  %v13253_v23 = vld [vmem:[%s19489_s3 + $0x6a8] ss:$16 sps:$4 sm:$0xff]   ;;  %v1766_v6 = vshrl.u32 %v15457_v36, 16  ;;  %v13261_v36 = vld [vmem:[%s19489_s3 + $0x68c] ss:$16 sps:$4 sm:$0xff]  }
 0x131   : > { %v15467_v18 = vpop.f32.mrf.mxu0  ;;  %v1756_v46 = vshll.u32 %v1582_v55, 16  ;;  %v1769_v20 = vshrl.u32 %v1582_v55, 16  ;;  %v1742_v22 = vor.u32 %v1741_v37, %v1737_v3  ;;  %v1083_v55 = vadd.f32 %v1011_v11, %v898_v53 }
 0x132   : > { %v1746_v5 = vrot.slane %v1744_v29, 1  ;;  %v902_v21 = vadd.f32 %v15438_v39, %v666_v56  ;;  %v903_v40 = vadd.f32 %v15444_v0, %v668_v62  ;;  %v672_v0 = vadd.f32 %v15418_v41, %v15378_v28  ;;  %v13259_v41 = vld [vmem:[%s19489_s3 + $0x688] ss:$16 sps:$4 sm:$0xff]  }
 0x133   : > { %v15475_v7 = vpop.f32.mrf.mxu0  ;;  %v1758_v4 = vrot.slane %v1756_v46, 1 }
 0x134   : > { %v15501_v19 = vsel %vm408_vm1, %v1742_v22, %v1746_v5  ;;  %v1087_v46 = vadd.f32 %v1017_v30, %v902_v21  ;;  %v1088_v30 = vadd.f32 %v15459_v44, %v903_v40  ;;  %v907_v28 = vadd.f32 %v15452_v9, %v672_v0  ;;  %v13291_v0 = vld [vmem:[%s19489_s3 + $0x7ec] ss:$16 sps:$4 sm:$0xff]  }
 0x135   : > { %v1188_v48 = vpop.f32.mrf.mxu0  ;;  %v1759_v24 = vsel %vm408_vm1, %v1754_v47, %v1758_v4  ;;  %v15494_v54 = vor.u32 %v1769_v20, %v1758_v4 }
 0x136   : > { %v1260_v42 = vadd.f32 %v1188_v48, %v1079_v43  ;;  %2505 = vmatprep.mubr.bf16.mxu1 %v1759_v24  ;;  %v1091_v48 = vadd.f32 %v15467_v18, %v906_v26  ;;  %v1092_v31 = vadd.f32 %v15475_v7, %v907_v28  ;;  %v13265_v18 = vld [vmem:[%s19489_s3 + $0x668] ss:$16 sps:$4 sm:$0xff]  }
 0x137   : > { %v1190_v34 = vpop.f32.mrf.mxu0  ;;  %2506 = vmatmul.mubr.bf16.vlgmr.msra.gmra.mxu1 %v15501_v19 }
 0x138   : > { %v1298_v45 = vadd.f32 %v15479_v13, %v1260_v42  ;;  %v1261_v35 = vadd.f32 %v1190_v34, %v1080_v33  ;;  %2580 = vmatpush1.bf16.msra.mxu1 %v13241_v10  ;;  %2515 = vmatprep.mubr.bf16.mxu1 %v15494_v54  ;;  %v15530_v10 = vor.u32 %v1766_v6, %v1746_v5  ;;  %v13277_v6 = vld [vmem:[%s19489_s3 + $0x628] ss:$16 sps:$4 sm:$0xff]  }
 0x139   : > { %v1192_v63 = vpop.f32.mrf.mxu0  ;;  %2581 = vmatprep.subr.bf16.mxu1 %v13249_v17  ;;  %v13267_v17 = vld [vmem:[%s19489_s3 + $0x66c] ss:$16 sps:$4 sm:$0xff]  }
 0x13a   : > { %v1314_v37 = vmax.f32 %v1298_v45, 0.0  ;;  %v1299_v11 = vadd.f32 %v15491_v51, %v1261_v35  ;;  %v1264_v29 = vadd.f32 %v1192_v63, %v1083_v55  ;;  %v13273_v35 = vld [vmem:[%s19489_s3 + $0x64c] ss:$16 sps:$4 sm:$0xff]  }
 0x13b   : > { %v1194_v61 = vpop.f32.mrf.mxu0 }
 0x13c   : > { %v1355_v39 = vrot.slane %v1314_v37, 6  ;;  %v1315_v1 = vmax.f32 %v1299_v11, 0.0  ;;  %v1302_v3 = vadd.f32 %v15479_v13, %v1264_v29  ;;  %v1265_v47 = vadd.f32 %v1194_v61, %v1084_v16  ;;  %2582 = vmatpush1.bf16.msra.mxu1 %v13247_v14  ;;  %v13279_v29 = vld [vmem:[%s19489_s3 + $0x62c] ss:$16 sps:$4 sm:$0xff]  }
 0x13d   : > { %v1198_v4 = vpop.f32.mrf.mxu0  ;;  %2583 = vmatprep.subr.bf16.mxu1 %v13255_v32 }
 0x13e   : > { %1399 = vst [vmem:[#allocation2 + $0x70] sm:$0xfc] %v1355_v39  ;;  %v1356_v20 = vrot.slane %v1315_v1, 6  ;;  %v1318_v15 = vmax.f32 %v1302_v3, 0.0  ;;  %v1303_v50 = vadd.f32 %v15491_v51, %v1265_v47  ;;  %v1268_v43 = vadd.f32 %v1198_v4, %v1087_v46  ;;  %v13285_v1 = vld [vmem:[%s19489_s3 + $0x60c] ss:$16 sps:$4 sm:$0xff]  }
 0x13f   : > { %v1200_v27 = vpop.f32.mrf.mxu0  ;;  %2516 = vmatmul.mubr.bf16.gmra.mxu1 %v15530_v10  ;;  %v13283_v47 = vld [vmem:[%s19489_s3 + $0x608] ss:$16 sps:$4 sm:$0xff]  }
 0x140   : > { %1400 = vst [vmem:[#allocation2] sm:$0xfc] %v1356_v20  ;;  %v1359_v44 = vrot.slane %v1318_v15, 6  ;;  %v1319_v5 = vmax.f32 %v1303_v50, 0.0  ;;  %v1306_v22 = vadd.f32 %v15479_v13, %v1268_v43  ;;  %v1269_v8 = vadd.f32 %v1200_v27, %v1088_v30  ;;  %2584 = vmatpush1.bf16.msra.mxu1 %v13253_v23  ;;  %2611 = vmatprep.mubr.bf16.mxu1 %v1759_v24  ;;  %v13297_v43 = vld [vmem:[%s19489_s3 + $0x7cc] ss:$16 sps:$4 sm:$0xff]  }
 0x141   : > { %v1202_v9 = vpop.f32.mrf.mxu0  ;;  %2585 = vmatprep.subr.bf16.mxu1 %v13261_v36  ;;  %v13289_v36 = vld [vmem:[%s19489_s3 + $0x7e8] ss:$16 sps:$4 sm:$0xff]  }
 0x142   : > { %v1360_v53 = vsel %vm1354_vm5, %v1355_v39, %v1359_v44  ;;  %v1361_v33 = vrot.slane %v1319_v5, 6  ;;  %v1322_v42 = vmax.f32 %v1306_v22, 0.0  ;;  %v1307_v56 = vadd.f32 %v15491_v51, %v1269_v8  ;;  %v13295_v22 = vld [vmem:[%s19489_s3 + $0x7c8] ss:$16 sps:$4 sm:$0xff]  }
 0x143   : > { %1403 = vst [vmem:[#allocation2 + $0x20] sm:$0xff] %v1360_v53  ;;  %v1272_v58 = vadd.f32 %v1202_v9, %v1091_v48  ;;  %v1204_v34 = vpop.f32.mrf.mxu0 }
 0x144   : > { %v15554_v7 = vsel %vm1354_vm5, %v1356_v20, %v1361_v33  ;;  %v1367_v24 = vrot.slane %v1322_v42, 6  ;;  %v1323_v14 = vmax.f32 %v1307_v56, 0.0  ;;  %v1273_v55 = vadd.f32 %v1204_v34, %v1092_v31  ;;  %2586 = vmatpush1.bf16.msra.mxu1 %v13259_v41  ;;  %v13306_v34 = vld [vmem:[%s19489_s3 + $0x4cc] ss:$16 sps:$4 sm:$0xff]  }
 0x145   : > { %1404 = vst [vmem:[#allocation2 + $0x60] sm:$0xff] %v15554_v7  ;;  %v1310_v45 = vadd.f32 %v15479_v13, %v1272_v58  ;;  %2587 = vmatprep.subr.bf16.mxu1 %v13267_v17  ;;  %v13271_v13 = vld [vmem:[%s19489_s3 + $0x648] ss:$16 sps:$4 sm:$0xff]   ;;  %v1567_v40 = vld [vmem:[#allocation2 + $0x70] sm:$0xfe] }
 0x146   : > { %v1368_v62 = vsel %vm1354_vm5, %v1359_v44, %v1367_v24  ;;  %v1369_v21 = vrot.slane %v1323_v14, 6  ;;  %v1311_v63 = vadd.f32 %v15491_v51, %v1273_v55  ;;  %v1575_v39 = vpack.c.bf16 %v1360_v53, %v1567_v40  ;;  %v13303_v53 = vld [vmem:[%s19489_s3 + $0x7ac] ss:$16 sps:$4 sm:$0xff]   ;;  %v13304_v14 = vld [vmem:[%s19489_s3 + $0x4c8] ss:$16 sps:$4 sm:$0xff]  }
 0x147   : > { %1407 = vst [vmem:[#allocation2 + $0x40] sm:$0xff] %v1368_v62  ;;  %v1326_v32 = vmax.f32 %v1310_v45, 0.0  ;;  %v1568_v51 = vld [vmem:[#allocation2] sm:$0xfe]  ;;  %v13307_v55 = vld [vmem:[%s19489_s3 + $0x788] ss:$16 sps:$4 sm:$0xff]  }
 0x148   : > { %v1370_v16 = vsel %vm1354_vm5, %v1361_v33, %v1369_v21  ;;  %v1327_v37 = vmax.f32 %v1311_v63, 0.0  ;;  %2588 = vmatpush1.bf16.msra.mxu1 %v13265_v18  ;;  %v1576_v3 = vpack.c.bf16 %v15554_v7, %v1568_v51  ;;  %v1715_v12 = vshll.u32 %v1575_v39, 16  ;;  %v13298_v33 = vld [vmem:[%s19489_s3 + $0x4e8] ss:$16 sps:$4 sm:$0xff]   ;;  %v13312_v45 = vld [vmem:[%s19489_s3 + $0x4ac] ss:$16 sps:$4 sm:$0xff]  }
 0x149   : > { %1408 = vst [vmem:[#allocation2 + $0x50] sm:$0xff] %v1370_v16  ;;  %v1375_v11 = vrot.slane %v1326_v32, 6  ;;  %2589 = vmatprep.subr.bf16.mxu1 %v13273_v35  ;;  %v1713_v27 = vshrl.u32 %v1575_v39, 16  ;;  %v13301_v18 = vld [vmem:[%s19489_s3 + $0x7a8] ss:$16 sps:$4 sm:$0xff]  }
 0x14a   : > { %v1377_v46 = vrot.slane %v1327_v37, 6  ;;  %v1727_v30 = vshll.u32 %v1576_v3, 16  ;;  %v1717_v50 = vrot.slane %v1715_v12, 1  ;;  %v1725_v44 = vshrl.u32 %v1576_v3, 16  ;;  %v13318_v32 = vld [vmem:[%s19489_s3 + $0x48c] ss:$16 sps:$4 sm:$0xff]  }
 0x14b   : > { %v1376_v61 = vsel %vm1354_vm5, %v1367_v24, %v1375_v11  ;;  %v13309_v24 = vld [vmem:[%s19489_s3 + $0x78c] ss:$16 sps:$4 sm:$0xff]   ;;  %v13319_v11 = vld [vmem:[%s19489_s3 + $0x748] ss:$16 sps:$4 sm:$0xff]   ;;  %v13339_v3 = vld [vmem:[%s19489_s3 + $0x2e4] ss:$16 sps:$4 sm:$0xff]  }
 0x14c   : > { %1411 = vst [vmem:[#allocation2 + $0x30] sm:$0x3f] %v1376_v61  ;;  %v1378_v23 = vsel %vm1354_vm5, %v1369_v21, %v1377_v46  ;;  %2590 = vmatpush1.bf16.msra.mxu1 %v13271_v13  ;;  %v1729_v28 = vrot.slane %v1727_v30, 1  ;;  %v1718_v8 = vor.u32 %v1717_v50, %v1713_v27  ;;  %v13310_v21 = vld [vmem:[%s19489_s3 + $0x4a8] ss:$16 sps:$4 sm:$0xff]  }
 0x14d   : > { %1412 = vst [vmem:[#allocation2 + $0x48] sm:$0x3f] %v1378_v23  ;;  %2591 = vmatprep.subr.bf16.mxu1 %v13279_v29  ;;  %v13321_v37 = vld [vmem:[%s19489_s3 + $0x74c] ss:$16 sps:$4 sm:$0xff]   ;;  %v13316_v13 = vld [vmem:[%s19489_s3 + $0x488] ss:$16 sps:$4 sm:$0xff]  }
 0x14e   : > { %v1730_v31 = vor.u32 %v1729_v28, %v1725_v44  ;;  %v13324_v29 = vld [vmem:[%s19489_s3 + $0x46c] ss:$16 sps:$4 sm:$0xff]   ;;  %v13322_v46 = vld [vmem:[%s19489_s3 + $0x468] ss:$16 sps:$4 sm:$0xff]   ;;  %v13337_v12 = vld [vmem:[%s19489_s3 + $0x2e0] ss:$16 sps:$4 sm:$0xff]  }
 0x14f   : > { %v13327_v40 = vld [vmem:[%s19489_s3 + $0x72c] ss:$16 sps:$4 sm:$0xff]   ;;  %v13325_v51 = vld [vmem:[%s19489_s3 + $0x728] ss:$16 sps:$4 sm:$0xff]   ;;  %v13345_v30 = vld [vmem:[%s19489_s3 + $0x2c4] ss:$16 sps:$4 sm:$0xff]  }
 0x150   : > { %2592 = vmatpush1.bf16.msra.mxu1 %v13277_v6  ;;  %v13330_v61 = vld [vmem:[%s19489_s3 + $0x44c] ss:$16 sps:$4 sm:$0xff]   ;;  %v13328_v6 = vld [vmem:[%s19489_s3 + $0x448] ss:$16 sps:$4 sm:$0xff]   ;;  %v13349_v50 = vld [vmem:[%s19489_s3 + $0x2a0] ss:$16 sps:$4 sm:$0xff]  }
 0x151   : > { %2593 = vmatprep.subr.bf16.mxu1 %v13285_v1  ;;  %v13333_v23 = vld [vmem:[%s19489_s3 + $0x70c] ss:$16 sps:$4 sm:$0xff]   ;;  %v13331_v39 = vld [vmem:[%s19489_s3 + $0x708] ss:$16 sps:$4 sm:$0xff]   ;;  %v13357_v28 = vld [vmem:[%s19489_s3 + $0x284] ss:$16 sps:$4 sm:$0xff]  }
 0x152   : > { %v13336_v1 = vld [vmem:[%s19489_s3 + $0x42c] ss:$16 sps:$4 sm:$0xff]  }
 0x153   : > { %v1571_v4 = vld [vmem:[#allocation2 + $0x30] sm:$0x1f]  ;;  %v13360_v44 = vld [vmem:[%s19489_s3 + $0x5ac] ss:$16 sps:$4 sm:$0xff]  }
 0x154   : > { %2594 = vmatpush1.bf16.msra.mxu1 %v13283_v47  ;;  %v1572_v20 = vld [vmem:[#allocation2 + $0x48] sm:$0x1f]  ;;  %v1579_v15 = vpack.c.bf16 %v1571_v4, %v1368_v62 }
 0x155   : > { %2595 = vmatprep.subr.bf16.mxu1 %v13291_v0  ;;  %v1580_v26 = vpack.c.bf16 %v1572_v20, %v1370_v16  ;;  %v13315_v62 = vld [vmem:[%s19489_s3 + $0x76c] ss:$16 sps:$4 sm:$0xff]   ;;  %v13313_v16 = vld [vmem:[%s19489_s3 + $0x768] ss:$16 sps:$4 sm:$0xff]  }
 0x156   : > { %v1720_v41 = vshll.u32 %v1579_v15, 16  ;;  %v1760_v35 = vshrl.u32 %v1579_v15, 16  ;;  %v13334_v47 = vld [vmem:[%s19489_s3 + $0x428] ss:$16 sps:$4 sm:$0xff]   ;;  %v13342_v0 = vld [vmem:[%s19489_s3 + $0x40c] ss:$16 sps:$4 sm:$0xff]  }
 0x157   : > { %v1732_v5 = vshll.u32 %v1580_v26, 16  ;;  %v1763_v17 = vshrl.u32 %v1580_v26, 16  ;;  %v13340_v4 = vld [vmem:[%s19489_s3 + $0x408] ss:$16 sps:$4 sm:$0xff]   ;;  %v13348_v20 = vld [vmem:[%s19489_s3 + $0x5ec] ss:$16 sps:$4 sm:$0xff]  }
 0x158   : > { %2596 = vmatpush2.bf16.msra.mxu1 %v13289_v36  ;;  %v1722_v48 = vrot.slane %v1720_v41, 1  ;;  %v13343_v36 = vld [vmem:[%s19489_s3 + $0x2c0] ss:$16 sps:$4 sm:$0xff]   ;;  %v13346_v15 = vld [vmem:[%s19489_s3 + $0x5e8] ss:$16 sps:$4 sm:$0xff]  }
 0x159   : > { %2597 = vmatprep.subr.bf16.mxu1 %v13297_v43  ;;  %v1734_v9 = vrot.slane %v1732_v5, 1  ;;  %v1418_v43 = vld [vmem:[#allocation2 + $0x18] sm:$0xff]  ;;  %v13355_v41 = vld [vmem:[%s19489_s3 + $0x280] ss:$16 sps:$4 sm:$0xff]   ;;  %v13363_v5 = vld [vmem:[%s19489_s3 + $0x264] ss:$16 sps:$4 sm:$0xff]  }
 0x15a   : > { %v15601_v42 = vsel %vm408_vm1, %v1718_v8, %v1722_v48  ;;  %v15632_v63 = vor.u32 %v1760_v35, %v1722_v48  ;;  %v13352_v26 = vld [vmem:[%s19489_s3 + $0x5c8] ss:$16 sps:$4 sm:$0xff]   ;;  %v15722_v27 = vpack.c.bf16 %v15441_v59, %v1418_v43  ;;  %v13369_v8 = vld [vmem:[%s19489_s3 + $0x244] ss:$16 sps:$4 sm:$0xff]   ;;  %v13385_v35 = vld [vmem:[%s19489_s3 + $0x3e0] ss:$16 sps:$4 sm:$0xff]  }
 0x15b   : > { %v1735_v56 = vsel %vm408_vm1, %v1730_v31, %v1734_v9  ;;  %v15604_v58 = vor.u32 %v1763_v17, %v1734_v9  ;;  %v13358_v59 = vld [vmem:[%s19489_s3 + $0x5a8] ss:$16 sps:$4 sm:$0xff]   ;;  %v13367_v31 = vld [vmem:[%s19489_s3 + $0x240] ss:$16 sps:$4 sm:$0xff]   ;;  %v13372_v9 = vld [vmem:[%s19489_s3 + $0x56c] ss:$16 sps:$4 sm:$0xff]  }
 0x15c   : > { %2452 = vmatprep.mubr.bf16.mxu0 %v1735_v56  ;;  %2598 = vmatpush2.bf16.msra.mxu1 %v13295_v22  ;;  %v13366_v22 = vld [vmem:[%s19489_s3 + $0x58c] ss:$16 sps:$4 sm:$0xff]   ;;  %v13364_v48 = vld [vmem:[%s19489_s3 + $0x588] ss:$16 sps:$4 sm:$0xff]   ;;  %v13375_v17 = vld [vmem:[%s19489_s3 + $0x224] ss:$16 sps:$4 sm:$0xff]  }
 0x15d   : > { %2453 = vmatmul.mubr.bf16.vlgmr.msra.gmra.mxu0 %v15601_v42  ;;  %2599 = vmatprep.subr.bf16.mxu1 %v13303_v53  ;;  %v13370_v53 = vld [vmem:[%s19489_s3 + $0x568] ss:$16 sps:$4 sm:$0xff]  }
 0x15e   : > { %2527 = vmatpush1.bf16.msra.mxu0 %v13298_v33  ;;  %2462 = vmatprep.mubr.bf16.mxu0 %v15604_v58  ;;  %v13373_v33 = vld [vmem:[%s19489_s3 + $0x220] ss:$16 sps:$4 sm:$0xff]   ;;  %v1417_v43 = vld [vmem:[#allocation2 + $0x38] sm:$0xff] }
 0x15f   : > { %2528 = vmatprep.subr.bf16.mxu0 %v13306_v34  ;;  %v13381_v34 = vld [vmem:[%s19489_s3 + $0x204] ss:$16 sps:$4 sm:$0xff]  }
 0x160   : > { %2600 = vmatpush2.bf16.msra.mxu1 %v13301_v18  ;;  %v13376_v18 = vld [vmem:[%s19489_s3 + $0x548] ss:$16 sps:$4 sm:$0xff]  }
 0x161   : > { %2601 = vmatprep.subr.bf16.mxu1 %v13309_v24  ;;  %v13379_v24 = vld [vmem:[%s19489_s3 + $0x200] ss:$16 sps:$4 sm:$0xff]  }
 0x162   : > { %2529 = vmatpush1.bf16.msra.mxu0 %v13304_v14  ;;  %v13384_v14 = vld [vmem:[%s19489_s3 + $0x52c] ss:$16 sps:$4 sm:$0xff]  }
 0x163   : > { %2530 = vmatprep.subr.bf16.mxu0 %v13312_v45  ;;  %v13382_v45 = vld [vmem:[%s19489_s3 + $0x528] ss:$16 sps:$4 sm:$0xff]  }
 0x164   : > { %2602 = vmatpush2.bf16.msra.mxu1 %v13307_v55  ;;  %v13387_v55 = vld [vmem:[%s19489_s3 + $0x3e4] ss:$16 sps:$4 sm:$0xff]  }
 0x165   : > { %2463 = vmatmul.mubr.bf16.gmra.mxu0 %v15632_v63  ;;  %2603 = vmatprep.subr.bf16.mxu1 %v13315_v62  ;;  %v13390_v62 = vld [vmem:[%s19489_s3 + $0x50c] ss:$16 sps:$4 sm:$0xff]  }
 0x166   : > { %2531 = vmatpush1.bf16.msra.mxu0 %v13310_v21  ;;  %2558 = vmatprep.mubr.bf16.mxu0 %v1735_v56  ;;  %v13378_v56 = vld [vmem:[%s19489_s3 + $0x54c] ss:$16 sps:$4 sm:$0xff]   ;;  %v13393_v21 = vld [vmem:[%s19489_s3 + $0x3c4] ss:$16 sps:$4 sm:$0xff]  }
 0x167   : > { %2532 = vmatprep.subr.bf16.mxu0 %v13318_v32  ;;  %v13388_v32 = vld [vmem:[%s19489_s3 + $0x508] ss:$16 sps:$4 sm:$0xff]  }
 0x168   : > { %2604 = vmatpush2.bf16.msra.mxu1 %v13313_v16  ;;  %v13391_v16 = vld [vmem:[%s19489_s3 + $0x3c0] ss:$16 sps:$4 sm:$0xff]  }
 0x169   : > { %2605 = vmatprep.subr.bf16.mxu1 %v13321_v37  ;;  %v13396_v37 = vld [vmem:[%s19489_s3 + $0xe4] ss:$16 sps:$4 sm:$0xff]  }
 0x16a   : > { %2533 = vmatpush1.bf16.msra.mxu0 %v13316_v13  ;;  %v13399_v13 = vld [vmem:[%s19489_s3 + $0x3a4] ss:$16 sps:$4 sm:$0xff]  }
 0x16b   : > { %2534 = vmatprep.subr.bf16.mxu0 %v13324_v29  ;;  %v13397_v29 = vld [vmem:[%s19489_s3 + $0x3a0] ss:$16 sps:$4 sm:$0xff]  }
 0x16c   : > { %2606 = vmatpush2.bf16.msra.mxu1 %v13319_v11  ;;  %v13394_v11 = vld [vmem:[%s19489_s3 + $0xe0] ss:$16 sps:$4 sm:$0xff]  }
 0x16d   : > { %2607 = vmatprep.subr.bf16.mxu1 %v13327_v40  ;;  %v13402_v40 = vld [vmem:[%s19489_s3 + $0xc4] ss:$16 sps:$4 sm:$0xff]  }
 0x16e   : > { %2535 = vmatpush1.bf16.msra.mxu0 %v13322_v46  ;;  %v13400_v46 = vld [vmem:[%s19489_s3 + $0xc0] ss:$16 sps:$4 sm:$0xff]  }
 0x16f   : > { %2536 = vmatprep.subr.bf16.mxu0 %v13330_v61  ;;  %v13403_v61 = vld [vmem:[%s19489_s3 + $0x380] ss:$16 sps:$4 sm:$0xff]  }
 0x170   : > { %2608 = vmatpush2.bf16.msra.mxu1 %v13325_v51  ;;  %v13405_v51 = vld [vmem:[%s19489_s3 + $0x384] ss:$16 sps:$4 sm:$0xff]  }
 0x171   : > { %2609 = vmatprep.subr.bf16.mxu1 %v13333_v23  ;;  %v13406_v23 = vld [vmem:[%s19489_s3 + $0xa0] ss:$16 sps:$4 sm:$0xff]  }
 0x172   : > { %2537 = vmatpush1.bf16.msra.mxu0 %v13328_v6  ;;  %v1416_v6 = vld [vmem:[#allocation2] sm:$0xff] }
 0x173   : > { %2538 = vmatprep.subr.bf16.mxu0 %v13336_v1  ;;  %v15840_v1 = vpack.c.bf16 %v15554_v7, %v1416_v6  ;;  %v13420_v7 = vld [vmem:[%s19489_s3 + $0x64] ss:$16 sps:$4 sm:$0xff]  }
 0x174   : > { %2610 = vmatpush2.bf16.msra.mxu1 %v13331_v39  ;;  %v13414_v39 = vld [vmem:[%s19489_s3 + $0x84] ss:$16 sps:$4 sm:$0xff]  }
 0x175   : > { %3325 = vmatprep.subr.bf16.mxu1 %v13339_v3  ;;  %v13409_v3 = vld [vmem:[%s19489_s3 + $0x360] ss:$16 sps:$4 sm:$0xff]   ;;  %v13480_v6 = vld [vmem:[%s19489_s3 + $0x124] ss:$16 sps:$4 sm:$0xff]  }
 0x176   : > { %2539 = vmatpush1.bf16.msra.mxu0 %v13334_v47  ;;  %v13412_v47 = vld [vmem:[%s19489_s3 + $0x80] ss:$16 sps:$4 sm:$0xff]  }
 0x177   : > { %2612 = vmatmul.mubr.bf16.vlgmr.msra.gmra.mxu1 %v15501_v19  ;;  %2540 = vmatprep.subr.bf16.mxu0 %v13342_v0  ;;  %v13351_v19 = vld [vmem:[%s19489_s3 + $0x2a4] ss:$16 sps:$4 sm:$0xff]   ;;  %v13418_v0 = vld [vmem:[%s19489_s3 + $0x60] ss:$16 sps:$4 sm:$0xff]  }
 0x178   : > { %2621 = vmatprep.mubr.bf16.mxu1 %v15494_v54  ;;  %3326 = vmatpush1.bf16.msra.mxu1 %v13337_v12  ;;  %v13354_v54 = vld [vmem:[%s19489_s3 + $0x5cc] ss:$16 sps:$4 sm:$0xff]   ;;  %v13417_v12 = vld [vmem:[%s19489_s3 + $0x344] ss:$16 sps:$4 sm:$0xff]  }
 0x179   : > { %3327 = vmatprep.subr.bf16.mxu1 %v13345_v30  ;;  %v13423_v30 = vld [vmem:[%s19489_s3 + $0x324] ss:$16 sps:$4 sm:$0xff]  }
 0x17a   : > { %2541 = vmatpush1.bf16.msra.mxu0 %v13340_v4  ;;  %v13426_v4 = vld [vmem:[%s19489_s3 + $0x44] ss:$16 sps:$4 sm:$0xff]  }
 0x17b   : > { %2542 = vmatprep.subr.bf16.mxu0 %v13348_v20  ;;  %v13429_v20 = vld [vmem:[%s19489_s3 + $0x304] ss:$16 sps:$4 sm:$0xff]  }
 0x17c   : > { %3328 = vmatpush1.bf16.msra.mxu1 %v13343_v36  ;;  %v13421_v36 = vld [vmem:[%s19489_s3 + $0x320] ss:$16 sps:$4 sm:$0xff]  }
 0x17d   : > { %3329 = vmatprep.subr.bf16.mxu1 %v13351_v19  ;;  %v13427_v19 = vld [vmem:[%s19489_s3 + $0x300] ss:$16 sps:$4 sm:$0xff]  }
 0x17e   : > { %2543 = vmatpush2.bf16.msra.mxu0 %v13346_v15  ;;  %v13424_v15 = vld [vmem:[%s19489_s3 + $0x40] ss:$16 sps:$4 sm:$0xff]  }
 0x17f   : > { %2622 = vmatmul.mubr.bf16.gmra.mxu1 %v15530_v10  ;;  %2544 = vmatprep.subr.bf16.mxu0 %v13354_v54  ;;  %v13361_v10 = vld [vmem:[%s19489_s3 + $0x260] ss:$16 sps:$4 sm:$0xff]   ;;  %v13435_v54 = vld [vmem:[%s19489_s3 + $0x2ec] ss:$16 sps:$4 sm:$0xff]  }
 0x180   : > { %3330 = vmatpush1.bf16.msra.mxu1 %v13349_v50  ;;  %3357 = vmatprep.mubr.bf16.mxu1 %v15722_v27  ;;  %v13432_v50 = vld [vmem:[%s19489_s3 + $0x24] ss:$16 sps:$4 sm:$0xff]  }
 0x181   : > { %3331 = vmatprep.subr.bf16.mxu1 %v13357_v28  ;;  %v13430_v28 = vld [vmem:[%s19489_s3 + $0x20] ss:$16 sps:$4 sm:$0xff]  }
 0x182   : > { %2545 = vmatpush2.bf16.msra.mxu0 %v13352_v26  ;;  %v1430_v26 = vld [vmem:[#allocation2 + $0x28] sm:$0xf] }
 0x183   : > { %2546 = vmatprep.subr.bf16.mxu0 %v13360_v44  ;;  %v13438_v44 = vld [vmem:[%s19489_s3 + $0x4] ss:$16 sps:$4 sm:$0xff]  }
 0x184   : > { %3332 = vmatpush1.bf16.msra.mxu1 %v13355_v41  ;;  %v13433_v41 = vld [vmem:[%s19489_s3 + $0x2e8] ss:$16 sps:$4 sm:$0xff]  }
 0x185   : > { %3333 = vmatprep.subr.bf16.mxu1 %v13363_v5  ;;  %v13441_v5 = vld [vmem:[%s19489_s3 + $0x2cc] ss:$16 sps:$4 sm:$0xff]  }
 0x186   : > { %2547 = vmatpush2.bf16.msra.mxu0 %v13358_v59  ;;  %v13436_v59 = vld [vmem:[%s19489_s3] ss:$16 sps:$4 sm:$0xff]  }
 0x187   : > { %2548 = vmatprep.subr.bf16.mxu0 %v13366_v22 }
 0x188   : > { %3334 = vmatpush1.bf16.msra.mxu1 %v13361_v10  ;;  %v14768_v10 = vld [vmem:[#allocation2 + $0x10] sm:$0xff] }
 0x189   : > { %3335 = vmatprep.subr.bf16.mxu1 %v13369_v8  ;;  %v15901_v22 = vpack.c.bf16 %v14768_v10, %v1417_v43  ;;  %v15903_v8 = vld [vmem:[#allocation2 + $0x68] sm:$0xff] }
 0x18a   : > { %2549 = vmatpush2.bf16.msra.mxu0 %v13364_v48  ;;  %v15906_v48 = vpack.c.bf16 %v1430_v26, %v15903_v8  ;;  %v13501_v43 = vld [vmem:[%s19489_s3 + $0x38c] ss:$16 sps:$4 sm:$0xff]   ;;  %v16039_v26 = vld [vmem:[#allocation2 + $0x50] sm:$0xff] }
 0x18b   : > { %2550 = vmatprep.subr.bf16.mxu0 %v13372_v9  ;;  %v13444_v9 = vld [vmem:[%s19489_s3 + $0x1e4] ss:$16 sps:$4 sm:$0xff]   ;;  %v13507_v10 = vld [vmem:[%s19489_s3 + $0x36c] ss:$16 sps:$4 sm:$0xff]  }
 0x18c   : > { %3336 = vmatpush1.bf16.msra.mxu1 %v13367_v31  ;;  %v13439_v31 = vld [vmem:[%s19489_s3 + $0x2c8] ss:$16 sps:$4 sm:$0xff]  }
 0x18d   : > { %3337 = vmatprep.subr.bf16.mxu1 %v13375_v17  ;;  %v13442_v17 = vld [vmem:[%s19489_s3 + $0x1e0] ss:$16 sps:$4 sm:$0xff]  }
 0x18e   : > { %2551 = vmatpush2.bf16.msra.mxu0 %v13370_v53  ;;  %v1429_v53 = vld [vmem:[#allocation2 + $0x8] sm:$0xf] }
 0x18f   : > { %2552 = vmatprep.subr.bf16.mxu0 %v13378_v56  ;;  %v13445_v56 = vld [vmem:[%s19489_s3 + $0x2a8] ss:$16 sps:$4 sm:$0xff]  }
 0x190   : > { %3338 = vmatpush1.bf16.msra.mxu1 %v13373_v33  ;;  %v13447_v33 = vld [vmem:[%s19489_s3 + $0x2ac] ss:$16 sps:$4 sm:$0xff]  }
 0x191   : > { %3339 = vmatprep.subr.bf16.mxu1 %v13381_v34  ;;  %v13450_v34 = vld [vmem:[%s19489_s3 + $0x1c4] ss:$16 sps:$4 sm:$0xff]  }
 0x192   : > { %2553 = vmatpush2.bf16.msra.mxu0 %v13376_v18  ;;  %v13448_v18 = vld [vmem:[%s19489_s3 + $0x1c0] ss:$16 sps:$4 sm:$0xff]  }
 0x193   : > { %2554 = vmatprep.subr.bf16.mxu0 %v13384_v14  ;;  %v15934_v14 = vld [vmem:[#allocation2 + $0x58] sm:$0xff] }
 0x194   : > { %3340 = vmatpush1.bf16.msra.mxu1 %v13379_v24  ;;  %v13453_v24 = vld [vmem:[%s19489_s3 + $0x28c] ss:$16 sps:$4 sm:$0xff]  }
 0x195   : > { %3341 = vmatprep.subr.bf16.mxu1 %v13387_v55  ;;  %v15937_v55 = vpack.c.bf16 %v1429_v53, %v15934_v14 }
 0x196   : > { %2555 = vmatpush2.bf16.msra.mxu0 %v13382_v45  ;;  %v13451_v45 = vld [vmem:[%s19489_s3 + $0x288] ss:$16 sps:$4 sm:$0xff]  }
 0x197   : > { %2556 = vmatprep.subr.bf16.mxu0 %v13390_v62  ;;  %v13454_v62 = vld [vmem:[%s19489_s3 + $0x1a0] ss:$16 sps:$4 sm:$0xff]  }
 0x198   : > { %3342 = vmatpush2.bf16.msra.mxu1 %v13385_v35  ;;  %v13456_v35 = vld [vmem:[%s19489_s3 + $0x1a4] ss:$16 sps:$4 sm:$0xff]  }
 0x199   : > { %3343 = vmatprep.subr.bf16.mxu1 %v13393_v21  ;;  %v13459_v21 = vld [vmem:[%s19489_s3 + $0x26c] ss:$16 sps:$4 sm:$0xff]  }
 0x19a   : > { %2557 = vmatpush2.bf16.msra.mxu0 %v13388_v32  ;;  %v13457_v32 = vld [vmem:[%s19489_s3 + $0x268] ss:$16 sps:$4 sm:$0xff]  }
 0x19b   : > { %3272 = vmatprep.subr.bf16.mxu0 %v13396_v37  ;;  %v13460_v37 = vld [vmem:[%s19489_s3 + $0x180] ss:$16 sps:$4 sm:$0xff]  }
 0x19c   : > { %3344 = vmatpush2.bf16.msra.mxu1 %v13391_v16  ;;  %v13462_v16 = vld [vmem:[%s19489_s3 + $0x184] ss:$16 sps:$4 sm:$0xff]  }
 0x19d   : > { %2559 = vmatmul.mubr.bf16.vlgmr.msra.gmra.mxu0 %v15601_v42  ;;  %3345 = vmatprep.subr.bf16.mxu1 %v13399_v13  ;;  %v13408_v42 = vld [vmem:[%s19489_s3 + $0xa4] ss:$16 sps:$4 sm:$0xff]   ;;  %v13463_v13 = vld [vmem:[%s19489_s3 + $0x248] ss:$16 sps:$4 sm:$0xff]  }
 0x19e   : > { %2568 = vmatprep.mubr.bf16.mxu0 %v15604_v58  ;;  %3273 = vmatpush1.bf16.msra.mxu0 %v13394_v11  ;;  %v13411_v58 = vld [vmem:[%s19489_s3 + $0x364] ss:$16 sps:$4 sm:$0xff]  }
 0x19f   : > { %3274 = vmatprep.subr.bf16.mxu0 %v13402_v40  ;;  %v13468_v11 = vld [vmem:[%s19489_s3 + $0x164] ss:$16 sps:$4 sm:$0xff]   ;;  %v13466_v40 = vld [vmem:[%s19489_s3 + $0x160] ss:$16 sps:$4 sm:$0xff]  }
 0x1a0   : > { %3346 = vmatpush2.bf16.msra.mxu1 %v13397_v29  ;;  %v13471_v29 = vld [vmem:[%s19489_s3 + $0x22c] ss:$16 sps:$4 sm:$0xff]  }
 0x1a1   : > { %3347 = vmatprep.subr.bf16.mxu1 %v13405_v51  ;;  %v13474_v51 = vld [vmem:[%s19489_s3 + $0x144] ss:$16 sps:$4 sm:$0xff]  }
 0x1a2   : > { %3275 = vmatpush1.bf16.msra.mxu0 %v13400_v46  ;;  %v13469_v46 = vld [vmem:[%s19489_s3 + $0x228] ss:$16 sps:$4 sm:$0xff]  }
 0x1a3   : > { %3276 = vmatprep.subr.bf16.mxu0 %v13408_v42  ;;  %v13472_v42 = vld [vmem:[%s19489_s3 + $0x140] ss:$16 sps:$4 sm:$0xff]  }
 0x1a4   : > { %3348 = vmatpush2.bf16.msra.mxu1 %v13403_v61  ;;  %v13477_v61 = vld [vmem:[%s19489_s3 + $0x20c] ss:$16 sps:$4 sm:$0xff]  }
 0x1a5   : > { %2569 = vmatmul.mubr.bf16.gmra.mxu0 %v15632_v63  ;;  %3349 = vmatprep.subr.bf16.mxu1 %v13411_v58  ;;  %v13415_v63 = vld [vmem:[%s19489_s3 + $0x340] ss:$16 sps:$4 sm:$0xff]   ;;  %v13483_v58 = vld [vmem:[%s19489_s3 + $0x3ec] ss:$16 sps:$4 sm:$0xff]  }
 0x1a6   : > { %3277 = vmatpush1.bf16.msra.mxu0 %v13406_v23  ;;  %3304 = vmatprep.mubr.bf16.mxu0 %v15840_v1  ;;  %v13475_v23 = vld [vmem:[%s19489_s3 + $0x208] ss:$16 sps:$4 sm:$0xff]  }
 0x1a7   : > { %3278 = vmatprep.subr.bf16.mxu0 %v13414_v39  ;;  %v13478_v39 = vld [vmem:[%s19489_s3 + $0x120] ss:$16 sps:$4 sm:$0xff]  }
 0x1a8   : > { %3350 = vmatpush2.bf16.msra.mxu1 %v13409_v3  ;;  %v13481_v3 = vld [vmem:[%s19489_s3 + $0x3e8] ss:$16 sps:$4 sm:$0xff]  }
 0x1a9   : > { %3351 = vmatprep.subr.bf16.mxu1 %v13417_v12  ;;  %v13489_v12 = vld [vmem:[%s19489_s3 + $0x3cc] ss:$16 sps:$4 sm:$0xff]  }
 0x1aa   : > { %3279 = vmatpush1.bf16.msra.mxu0 %v13412_v47  ;;  %v13486_v47 = vld [vmem:[%s19489_s3 + $0x104] ss:$16 sps:$4 sm:$0xff]  }
 0x1ab   : > { %3280 = vmatprep.subr.bf16.mxu0 %v13420_v7  ;;  %v13484_v7 = vld [vmem:[%s19489_s3 + $0x100] ss:$16 sps:$4 sm:$0xff]  }
 0x1ac   : > { %3352 = vmatpush2.bf16.msra.mxu1 %v13415_v63  ;;  %v13487_v63 = vld [vmem:[%s19489_s3 + $0x3c8] ss:$16 sps:$4 sm:$0xff]  }
 0x1ad   : > { %3353 = vmatprep.subr.bf16.mxu1 %v13423_v30  ;;  %v13492_v30 = vld [vmem:[%s19489_s3 + $0xec] ss:$16 sps:$4 sm:$0xff]  }
 0x1ae   : > { %3281 = vmatpush1.bf16.msra.mxu0 %v13418_v0  ;;  %v1415_v0 = vld [vmem:[#allocation2 + $0x70] sm:$0xff] }
 0x1af   : > { %3282 = vmatprep.subr.bf16.mxu0 %v13426_v4  ;;  %v1428_v4 = vld [vmem:[#allocation2 + $0x48] sm:$0xf] }
 0x1b0   : > { %3354 = vmatpush2.bf16.msra.mxu1 %v13421_v36  ;;  %v13495_v36 = vld [vmem:[%s19489_s3 + $0x3ac] ss:$16 sps:$4 sm:$0xff]  }
 0x1b1   : > { %3355 = vmatprep.subr.bf16.mxu1 %v13429_v20  ;;  %v13490_v20 = vld [vmem:[%s19489_s3 + $0xe8] ss:$16 sps:$4 sm:$0xff]  }
 0x1b2   : > { %3283 = vmatpush1.bf16.msra.mxu0 %v13424_v15  ;;  %v13493_v15 = vld [vmem:[%s19489_s3 + $0x3a8] ss:$16 sps:$4 sm:$0xff]  }
 0x1b3   : > { %3284 = vmatprep.subr.bf16.mxu0 %v13432_v50  ;;  %v16031_v50 = vld [vmem:[#allocation2 + $0x20] sm:$0xff] }
 0x1b4   : > { %3356 = vmatpush2.bf16.msra.mxu1 %v13427_v19  ;;  %v13498_v19 = vld [vmem:[%s19489_s3 + $0xcc] ss:$16 sps:$4 sm:$0xff]  }
 0x1b5   : > { %3431 = vmatprep.subr.bf16.mxu1 %v13435_v54  ;;  %v16034_v54 = vpack.c.bf16 %v16031_v50, %v1415_v0 }
 0x1b6   : > { %3285 = vmatpush1.bf16.msra.mxu0 %v13430_v28  ;;  %v16042_v28 = vpack.c.bf16 %v1428_v4, %v16039_v26  ;;  %v13552_v4 = vld [vmem:[%s19489_s3 + $0x1ac] ss:$16 sps:$4 sm:$0xff]  }
 0x1b7   : > { %3358 = vmatmul.mubr.bf16.vlgmr.msra.gmra.mxu1 %v15901_v22  ;;  %3286 = vmatprep.subr.bf16.mxu0 %v13438_v44  ;;  %v1427_v44 = vld [vmem:[#allocation2 + $0x30] sm:$0xf] }
 0x1b8   : > { %3367 = vmatprep.mubr.bf16.mxu1 %v15906_v48  ;;  %3432 = vmatpush1.bf16.msra.mxu1 %v13433_v41  ;;  %v13496_v41 = vld [vmem:[%s19489_s3 + $0xc8] ss:$16 sps:$4 sm:$0xff]  }
 0x1b9   : > { %3433 = vmatprep.subr.bf16.mxu1 %v13441_v5  ;;  %v13504_v5 = vld [vmem:[%s19489_s3 + $0xac] ss:$16 sps:$4 sm:$0xff]  }
 0x1ba   : > { %3287 = vmatpush1.bf16.msra.mxu0 %v13436_v59  ;;  %v13499_v59 = vld [vmem:[%s19489_s3 + $0x388] ss:$16 sps:$4 sm:$0xff]  }
 0x1bb   : > { %3288 = vmatprep.subr.bf16.mxu0 %v13444_v9  ;;  %v13510_v9 = vld [vmem:[%s19489_s3 + $0x8c] ss:$16 sps:$4 sm:$0xff]  }
 0x1bc   : > { %3434 = vmatpush1.bf16.msra.mxu1 %v13439_v31  ;;  %v13502_v31 = vld [vmem:[%s19489_s3 + $0xa8] ss:$16 sps:$4 sm:$0xff]  }
 0x1bd   : > { %3435 = vmatprep.subr.bf16.mxu1 %v13447_v33  ;;  %v13505_v33 = vld [vmem:[%s19489_s3 + $0x368] ss:$16 sps:$4 sm:$0xff]  }
 0x1be   : > { %3289 = vmatpush2.bf16.msra.mxu0 %v13442_v17  ;;  %v16064_v17 = vld [vmem:[#allocation2 + $0x40] sm:$0xff] }
 0x1bf   : > { %3368 = vmatmul.mubr.bf16.gmra.mxu1 %v15937_v55  ;;  %3290 = vmatprep.subr.bf16.mxu0 %v13450_v34  ;;  %v16067_v53 = vpack.c.bf16 %v1427_v44, %v16064_v17  ;;  %v13508_v34 = vld [vmem:[%s19489_s3 + $0x88] ss:$16 sps:$4 sm:$0xff]   ;;  %v13564_v44 = vld [vmem:[%s19489_s3 + $0x16c] ss:$16 sps:$4 sm:$0xff]  }
 0x1c0   : > { %3436 = vmatpush1.bf16.msra.mxu1 %v13445_v56  ;;  %3463 = vmatprep.mubr.bf16.mxu1 %v15722_v27  ;;  %v13465_v27 = vld [vmem:[%s19489_s3 + $0x24c] ss:$16 sps:$4 sm:$0xff]  }
 0x1c1   : > { %3437 = vmatprep.subr.bf16.mxu1 %v13453_v24  ;;  %v13513_v56 = vld [vmem:[%s19489_s3 + $0x34c] ss:$16 sps:$4 sm:$0xff]   ;;  %v13511_v24 = vld [vmem:[%s19489_s3 + $0x348] ss:$16 sps:$4 sm:$0xff]  }
 0x1c2   : > { %3291 = vmatpush2.bf16.msra.mxu0 %v13448_v18  ;;  %v13516_v18 = vld [vmem:[%s19489_s3 + $0x6c] ss:$16 sps:$4 sm:$0xff]  }
 0x1c3   : > { %3292 = vmatprep.subr.bf16.mxu0 %v13456_v35  ;;  %v13522_v35 = vld [vmem:[%s19489_s3 + $0x4c] ss:$16 sps:$4 sm:$0xff]  }
 0x1c4   : > { %3438 = vmatpush1.bf16.msra.mxu1 %v13451_v45  ;;  %v13519_v45 = vld [vmem:[%s19489_s3 + $0x32c] ss:$16 sps:$4 sm:$0xff]  }
 0x1c5   : > { %3439 = vmatprep.subr.bf16.mxu1 %v13459_v21  ;;  %v13525_v21 = vld [vmem:[%s19489_s3 + $0x30c] ss:$16 sps:$4 sm:$0xff]  }
 0x1c6   : > { %3293 = vmatpush2.bf16.msra.mxu0 %v13454_v62  ;;  %v13517_v62 = vld [vmem:[%s19489_s3 + $0x328] ss:$16 sps:$4 sm:$0xff]  }
 0x1c7   : > { %3294 = vmatprep.subr.bf16.mxu0 %v13462_v16  ;;  %v13523_v16 = vld [vmem:[%s19489_s3 + $0x308] ss:$16 sps:$4 sm:$0xff]  }
 0x1c8   : > { %3440 = vmatpush1.bf16.msra.mxu1 %v13457_v32  ;;  %v13520_v32 = vld [vmem:[%s19489_s3 + $0x48] ss:$16 sps:$4 sm:$0xff]  }
 0x1c9   : > { %3441 = vmatprep.subr.bf16.mxu1 %v13465_v27  ;;  %v13528_v27 = vld [vmem:[%s19489_s3 + $0x2c] ss:$16 sps:$4 sm:$0xff]  }
 0x1ca   : > { %3295 = vmatpush2.bf16.msra.mxu0 %v13460_v37  ;;  %v13531_v37 = vld [vmem:[%s19489_s3 + $0xae4] ss:$16 sps:$4 sm:$0xff]  }
 0x1cb   : > { %3296 = vmatprep.subr.bf16.mxu0 %v13468_v11  ;;  %v13529_v11 = vld [vmem:[%s19489_s3 + $0xae0] ss:$16 sps:$4 sm:$0xff]  }
 0x1cc   : > { %3442 = vmatpush1.bf16.msra.mxu1 %v13463_v13  ;;  %v13526_v13 = vld [vmem:[%s19489_s3 + $0x28] ss:$16 sps:$4 sm:$0xff]  }
 0x1cd   : > { %3443 = vmatprep.subr.bf16.mxu1 %v13471_v29  ;;  %v13534_v29 = vld [vmem:[%s19489_s3 + $0xc] ss:$16 sps:$4 sm:$0xff]  }
 0x1ce   : > { %3297 = vmatpush2.bf16.msra.mxu0 %v13466_v40  ;;  %v3491_v40 = vld [vmem:[#allocation2 + $0x28] sm:$0x3f] }
 0x1cf   : > { %3298 = vmatprep.subr.bf16.mxu0 %v13474_v51  ;;  %v13532_v51 = vld [vmem:[%s19489_s3 + $0x8] ss:$16 sps:$4 sm:$0xff]  }
 0x1d0   : > { %3444 = vmatpush1.bf16.msra.mxu1 %v13469_v46  ;;  %v13537_v46 = vld [vmem:[%s19489_s3 + $0xac4] ss:$16 sps:$4 sm:$0xff]  }
 0x1d1   : > { %3445 = vmatprep.subr.bf16.mxu1 %v13477_v61  ;;  %v3487_v61 = vld [vmem:[#allocation2 + $0x18] sm:$0xfc] }
 0x1d2   : > { %3299 = vmatpush2.bf16.msra.mxu0 %v13472_v42  ;;  %v13535_v42 = vld [vmem:[%s19489_s3 + $0xac0] ss:$16 sps:$4 sm:$0xff]  }
 0x1d3   : > { %3300 = vmatprep.subr.bf16.mxu0 %v13480_v6  ;;  %v3499_v6 = vpack.c.bf16 %v3491_v40, %v15903_v8  ;;  %v13541_v8 = vld [vmem:[%s19489_s3 + $0xaa0] ss:$16 sps:$4 sm:$0xff]  }
 0x1d4   : > { %3446 = vmatpush1.bf16.msra.mxu1 %v13475_v23  ;;  %v13540_v23 = vld [vmem:[%s19489_s3 + $0x1ec] ss:$16 sps:$4 sm:$0xff]   ;;  %v13589_v40 = vld [vmem:[%s19489_s3 + $0xba0] ss:$16 sps:$4 sm:$0xff]  }
 0x1d5   : > { %3447 = vmatprep.subr.bf16.mxu1 %v13483_v58  ;;  %v13538_v58 = vld [vmem:[%s19489_s3 + $0x1e8] ss:$16 sps:$4 sm:$0xff]  }
 0x1d6   : > { %3301 = vmatpush2.bf16.msra.mxu0 %v13478_v39  ;;  %v16143_v39 = vld [vmem:[#allocation2 + $0x78] sm:$0xff] }
 0x1d7   : > { %3302 = vmatprep.subr.bf16.mxu0 %v13486_v47  ;;  %v16152_v47 = vrot.slane %v3499_v6, 1 }
 0x1d8   : > { %3448 = vmatpush2.bf16.msra.mxu1 %v13481_v3  ;;  %v3495_v3 = vpack.c.bf16 %v16143_v39, %v3487_v61  ;;  %v13597_v61 = vld [vmem:[%s19489_s3 + $0xb84] ss:$16 sps:$4 sm:$0xff]  }
 0x1d9   : > { %3449 = vmatprep.subr.bf16.mxu1 %v13489_v12  ;;  %v13544_v12 = vld [vmem:[%s19489_s3 + $0x1c8] ss:$16 sps:$4 sm:$0xff]  }
 0x1da   : > { %3303 = vmatpush2.bf16.msra.mxu0 %v13484_v7  ;;  %v13549_v7 = vld [vmem:[%s19489_s3 + $0xa84] ss:$16 sps:$4 sm:$0xff]  }
 0x1db   : > { %3378 = vmatprep.subr.bf16.mxu0 %v13492_v30  ;;  %v13547_v30 = vld [vmem:[%s19489_s3 + $0xa80] ss:$16 sps:$4 sm:$0xff]  }
 0x1dc   : > { %3450 = vmatpush2.bf16.msra.mxu1 %v13487_v63  ;;  %v3646_v63 = vrot.slane %v3495_v3, 1 }
 0x1dd   : > { %3305 = vmatmul.mubr.bf16.vlgmr.msra.gmra.mxu0 %v16034_v54  ;;  %3451 = vmatprep.subr.bf16.mxu1 %v13495_v36  ;;  %v13555_v36 = vld [vmem:[%s19489_s3 + $0xa64] ss:$16 sps:$4 sm:$0xff]  }
 0x1de   : > { %3314 = vmatprep.mubr.bf16.mxu0 %v16042_v28  ;;  %3379 = vmatpush1.bf16.msra.mxu0 %v13490_v20  ;;  %v16163_v0 = vsel %vm738_vm2, %v3646_v63, %v16152_v47  ;;  %v13553_v20 = vld [vmem:[%s19489_s3 + $0xa60] ss:$16 sps:$4 sm:$0xff]  }
 0x1df   : > { %3380 = vmatprep.subr.bf16.mxu0 %v13498_v19  ;;  %v13561_v19 = vld [vmem:[%s19489_s3 + $0xa44] ss:$16 sps:$4 sm:$0xff]  }
 0x1e0   : > { %3452 = vmatpush2.bf16.msra.mxu1 %v13493_v15  ;;  %v13558_v15 = vld [vmem:[%s19489_s3 + $0x18c] ss:$16 sps:$4 sm:$0xff]  }
 0x1e1   : > { %3453 = vmatprep.subr.bf16.mxu1 %v13501_v43  ;;  %v13556_v43 = vld [vmem:[%s19489_s3 + $0x188] ss:$16 sps:$4 sm:$0xff]  }
 0x1e2   : > { %3381 = vmatpush1.bf16.msra.mxu0 %v13496_v41  ;;  %v13559_v41 = vld [vmem:[%s19489_s3 + $0xa40] ss:$16 sps:$4 sm:$0xff]  }
 0x1e3   : > { %3382 = vmatprep.subr.bf16.mxu0 %v13504_v5  ;;  %v13567_v5 = vld [vmem:[%s19489_s3 + $0xa24] ss:$16 sps:$4 sm:$0xff]  }
 0x1e4   : > { %3454 = vmatpush2.bf16.msra.mxu1 %v13499_v59  ;;  %v13562_v59 = vld [vmem:[%s19489_s3 + $0x168] ss:$16 sps:$4 sm:$0xff]  }
 0x1e5   : > { %3315 = vmatmul.mubr.bf16.gmra.mxu0 %v16067_v53  ;;  %3455 = vmatprep.subr.bf16.mxu1 %v13507_v10  ;;  %v13565_v10 = vld [vmem:[%s19489_s3 + $0xa20] ss:$16 sps:$4 sm:$0xff]  }
 0x1e6   : > { %3383 = vmatpush1.bf16.msra.mxu0 %v13502_v31  ;;  %3410 = vmatprep.mubr.bf16.mxu0 %v15840_v1  ;;  %v13514_v1 = vld [vmem:[%s19489_s3 + $0x68] ss:$16 sps:$4 sm:$0xff]   ;;  %v13570_v31 = vld [vmem:[%s19489_s3 + $0x14c] ss:$16 sps:$4 sm:$0xff]  }
 0x1e7   : > { %3384 = vmatprep.subr.bf16.mxu0 %v13510_v9  ;;  %v13573_v9 = vld [vmem:[%s19489_s3 + $0xa04] ss:$16 sps:$4 sm:$0xff]  }
 0x1e8   : > { %3456 = vmatpush2.bf16.msra.mxu1 %v13505_v33  ;;  %v13568_v33 = vld [vmem:[%s19489_s3 + $0x148] ss:$16 sps:$4 sm:$0xff]  }
 0x1e9   : > { %3457 = vmatprep.subr.bf16.mxu1 %v13513_v56  ;;  %v13571_v56 = vld [vmem:[%s19489_s3 + $0xa00] ss:$16 sps:$4 sm:$0xff]  }
 0x1ea   : > { %3385 = vmatpush1.bf16.msra.mxu0 %v13508_v34  ;;  %v13576_v34 = vld [vmem:[%s19489_s3 + $0x12c] ss:$16 sps:$4 sm:$0xff]  }
 0x1eb   : > { %3386 = vmatprep.subr.bf16.mxu0 %v13516_v18  ;;  %v13579_v18 = vld [vmem:[%s19489_s3 + $0xbe4] ss:$16 sps:$4 sm:$0xff]  }
 0x1ec   : > { %3458 = vmatpush2.bf16.msra.mxu1 %v13511_v24 }
 0x1ed   : > { %3459 = vmatprep.subr.bf16.mxu1 %v13519_v45  ;;  %v13574_v45 = vld [vmem:[%s19489_s3 + $0x128] ss:$16 sps:$4 sm:$0xff]  }
 0x1ee   : > { %3387 = vmatpush1.bf16.msra.mxu0 %v13514_v1  ;;  %v13577_v1 = vld [vmem:[%s19489_s3 + $0xbe0] ss:$16 sps:$4 sm:$0xff]  }
 0x1ef   : > { %3388 = vmatprep.subr.bf16.mxu0 %v13522_v35  ;;  %v13582_v35 = vld [vmem:[%s19489_s3 + $0x10c] ss:$16 sps:$4 sm:$0xff]  }
 0x1f0   : > { %3460 = vmatpush2.bf16.msra.mxu1 %v13517_v62  ;;  %v13585_v62 = vld [vmem:[%s19489_s3 + $0xbc4] ss:$16 sps:$4 sm:$0xff]  }
 0x1f1   : > { %3461 = vmatprep.subr.bf16.mxu1 %v13525_v21 }
 0x1f2   : > { %3389 = vmatpush1.bf16.msra.mxu0 %v13520_v32  ;;  %v13580_v32 = vld [vmem:[%s19489_s3 + $0x108] ss:$16 sps:$4 sm:$0xff]  }
 0x1f3   : > { %3390 = vmatprep.subr.bf16.mxu0 %v13528_v27  ;;  %v13588_v27 = vld [vmem:[%s19489_s3 + $0x8e4] ss:$16 sps:$4 sm:$0xff]  }
 0x1f4   : > { %3462 = vmatpush2.bf16.msra.mxu1 %v13523_v16  ;;  %v13583_v16 = vld [vmem:[%s19489_s3 + $0xbc0] ss:$16 sps:$4 sm:$0xff]  }
 0x1f5   : > { %4350 = vmatprep.subr.bf16.mxu1 %v13531_v37  ;;  %v13591_v37 = vld [vmem:[%s19489_s3 + $0xba4] ss:$16 sps:$4 sm:$0xff]  }
 0x1f6   : > { %3391 = vmatpush1.bf16.msra.mxu0 %v13526_v13  ;;  %v13586_v13 = vld [vmem:[%s19489_s3 + $0x8e0] ss:$16 sps:$4 sm:$0xff]  }
 0x1f7   : > { %3464 = vmatmul.mubr.bf16.vlgmr.msra.gmra.mxu1 %v15901_v22  ;;  %3392 = vmatprep.subr.bf16.mxu0 %v13534_v29  ;;  %v13543_v22 = vld [vmem:[%s19489_s3 + $0xaa4] ss:$16 sps:$4 sm:$0xff]   ;;  %v2507_v24 = vpop.f32.mrf.mxu1 }
 0x1f8   : > { %3473 = vmatprep.mubr.bf16.mxu1 %v15906_v48  ;;  %4351 = vmatpush1.bf16.msra.mxu1 %v13529_v11  ;;  %v13546_v48 = vld [vmem:[%s19489_s3 + $0x1cc] ss:$16 sps:$4 sm:$0xff]  }
 0x1f9   : > { %4352 = vmatprep.subr.bf16.mxu1 %v13537_v46  ;;  %v2509_v21 = vpop.f32.mrf.mxu1  ;;  %v3489_v11 = vld [vmem:[#allocation2 + $0x48] sm:$0x3f]  ;;  %v13594_v46 = vld [vmem:[%s19489_s3 + $0x8c4] ss:$16 sps:$4 sm:$0xff]  }
 0x1fa   : > { %3393 = vmatpush1.bf16.msra.mxu0 %v13532_v51  ;;  %v3485_v51 = vld [vmem:[#allocation2] sm:$0xfc] }
 0x1fb   : > { %3394 = vmatprep.subr.bf16.mxu0 %v13540_v23  ;;  %v2511_v29 = vpop.f32.mrf.mxu1 }
 0x1fc   : > { %4353 = vmatpush1.bf16.msra.mxu1 %v13535_v42  ;;  %v13592_v42 = vld [vmem:[%s19489_s3 + $0x8c0] ss:$16 sps:$4 sm:$0xff]  }
 0x1fd   : > { %4354 = vmatprep.subr.bf16.mxu1 %v13543_v22  ;;  %v16262_v23 = vpop.f32.mrf.mxu1  ;;  %v3497_v22 = vpack.c.bf16 %v3489_v11, %v16039_v26  ;;  %v13603_v26 = vld [vmem:[%s19489_s3 + $0xb64] ss:$16 sps:$4 sm:$0xff]  }
 0x1fe   : > { %3395 = vmatpush2.bf16.msra.mxu0 %v13538_v58  ;;  %v13600_v58 = vld [vmem:[%s19489_s3 + $0x8a4] ss:$16 sps:$4 sm:$0xff]  }
 0x1ff   : > { %3474 = vmatmul.mubr.bf16.gmra.mxu1 %v15937_v55  ;;  %3396 = vmatprep.subr.bf16.mxu0 %v13546_v48  ;;  %v13550_v55 = vld [vmem:[%s19489_s3 + $0x1a8] ss:$16 sps:$4 sm:$0xff]   ;;  %v16272_v48 = vld [vmem:[#allocation2 + $0x60] sm:$0xff]  ;;  %v2517_v63 = vpop.f32.mrf.mxu1  ;;  %v16347_v11 = vld [vmem:[#allocation2 + $0x10] sm:$0xff] }
 0x200   : > { %4355 = vmatpush1.bf16.msra.mxu1 %v13541_v8  ;;  %4382 = vmatprep.mubr.bf16.mxu1 %v16163_v0 }
 0x201   : > { %4356 = vmatprep.subr.bf16.mxu1 %v13549_v7  ;;  %v13595_v7 = vld [vmem:[%s19489_s3 + $0xb80] ss:$16 sps:$4 sm:$0xff]  }
 0x202   : > { %3397 = vmatpush2.bf16.msra.mxu0 %v13544_v12  ;;  %v3493_v12 = vpack.c.bf16 %v16272_v48, %v3485_v51  ;;  %v13625_v51 = vld [vmem:[%s19489_s3 + $0xae8] ss:$16 sps:$4 sm:$0xff]  }
 0x203   : > { %3398 = vmatprep.subr.bf16.mxu0 %v13552_v4 }
 0x204   : > { %4357 = vmatpush1.bf16.msra.mxu1 %v13547_v30  ;;  %v16283_v30 = vrot.slane %v3497_v22, 1 }
 0x205   : > { %4358 = vmatprep.subr.bf16.mxu1 %v13555_v36  ;;  %v13606_v36 = vld [vmem:[%s19489_s3 + $0x884] ss:$16 sps:$4 sm:$0xff]  }
 0x206   : > { %3399 = vmatpush2.bf16.msra.mxu0 %v13550_v55  ;;  %v13598_v55 = vld [vmem:[%s19489_s3 + $0x8a0] ss:$16 sps:$4 sm:$0xff]  }
 0x207   : > { %3400 = vmatprep.subr.bf16.mxu0 %v13558_v15  ;;  %v3640_v15 = vrot.slane %v3493_v12, 1  ;;  %v13636_v12 = vld [vmem:[%s19489_s3 + $0x9e4] ss:$16 sps:$4 sm:$0xff]  }
 0x208   : > { %4359 = vmatpush1.bf16.msra.mxu1 %v13553_v20 }
 0x209   : > { %4360 = vmatprep.subr.bf16.mxu1 %v13561_v19  ;;  %v13601_v19 = vld [vmem:[%s19489_s3 + $0xb60] ss:$16 sps:$4 sm:$0xff]  }
 0x20a   : > { %3401 = vmatpush2.bf16.msra.mxu0 %v13556_v43  ;;  %v13609_v43 = vld [vmem:[%s19489_s3 + $0xb44] ss:$16 sps:$4 sm:$0xff]  }
 0x20b   : > { %3402 = vmatprep.subr.bf16.mxu0 %v13564_v44 }
 0x20c   : > { %4361 = vmatpush1.bf16.msra.mxu1 %v13559_v41  ;;  %v2519_v41 = vpop.f32.mrf.mxu1 }
 0x20d   : > { %4362 = vmatprep.subr.bf16.mxu1 %v13567_v5  ;;  %v16304_v5 = vsel %vm738_vm2, %v3640_v15, %v16283_v30  ;;  %v13648_v15 = vld [vmem:[%s19489_s3 + $0x9a4] ss:$16 sps:$4 sm:$0xff]  }
 0x20e   : > { %3403 = vmatpush2.bf16.msra.mxu0 %v13562_v59 }
 0x20f   : > { %3404 = vmatprep.subr.bf16.mxu0 %v13570_v31  ;;  %v13612_v31 = vld [vmem:[%s19489_s3 + $0x864] ss:$16 sps:$4 sm:$0xff]  }
 0x210   : > { %4363 = vmatpush1.bf16.msra.mxu1 %v13565_v10  ;;  %v13604_v10 = vld [vmem:[%s19489_s3 + $0x880] ss:$16 sps:$4 sm:$0xff]  }
 0x211   : > { %4364 = vmatprep.subr.bf16.mxu1 %v13573_v9 }
 0x212   : > { %3405 = vmatpush2.bf16.msra.mxu0 %v13568_v33  ;;  %v13607_v33 = vld [vmem:[%s19489_s3 + $0xb40] ss:$16 sps:$4 sm:$0xff]  }
 0x213   : > { %3406 = vmatprep.subr.bf16.mxu0 %v13576_v34  ;;  %v3490_v34 = vld [vmem:[#allocation2 + $0x8] sm:$0x3f] }
 0x214   : > { %4365 = vmatpush1.bf16.msra.mxu1 %v13571_v56  ;;  %v13615_v56 = vld [vmem:[%s19489_s3 + $0xb24] ss:$16 sps:$4 sm:$0xff]  }
 0x215   : > { %4366 = vmatprep.subr.bf16.mxu1 %v13579_v18  ;;  %v2521_v18 = vpop.f32.mrf.mxu1 }
 0x216   : > { %3407 = vmatpush2.bf16.msra.mxu0 %v13574_v45 }
 0x217   : > { %3408 = vmatprep.subr.bf16.mxu0 %v13582_v35  ;;  %v13618_v35 = vld [vmem:[%s19489_s3 + $0x844] ss:$16 sps:$4 sm:$0xff]  }
 0x218   : > { %4367 = vmatpush2.bf16.msra.mxu1 %v13577_v1  ;;  %v13610_v1 = vld [vmem:[%s19489_s3 + $0x860] ss:$16 sps:$4 sm:$0xff]  }
 0x219   : > { %4368 = vmatprep.subr.bf16.mxu1 %v13585_v62  ;;  %v3486_v62 = vld [vmem:[#allocation2 + $0x38] sm:$0xfc] }
 0x21a   : > { %3409 = vmatpush2.bf16.msra.mxu0 %v13580_v32  ;;  %v13621_v32 = vld [vmem:[%s19489_s3 + $0xb04] ss:$16 sps:$4 sm:$0xff]  }
 0x21b   : > { %4297 = vmatprep.subr.bf16.mxu0 %v13588_v27  ;;  %v13616_v27 = vld [vmem:[%s19489_s3 + $0x840] ss:$16 sps:$4 sm:$0xff]  }
 0x21c   : > { %4369 = vmatpush2.bf16.msra.mxu1 %v13583_v16  ;;  %v3498_v16 = vpack.c.bf16 %v3490_v34, %v15934_v14  ;;  %v13627_v14 = vld [vmem:[%s19489_s3 + $0xaec] ss:$16 sps:$4 sm:$0xff]   ;;  %v13658_v34 = vld [vmem:[%s19489_s3 + $0x960] ss:$16 sps:$4 sm:$0xff]  }
 0x21d   : > { %3411 = vmatmul.mubr.bf16.vlgmr.msra.gmra.mxu0 %v16034_v54  ;;  %v2454_v6 = vpop.f32.mrf.mxu0  ;;  %4370 = vmatprep.subr.bf16.mxu1 %v13591_v37  ;;  %v13624_v37 = vld [vmem:[%s19489_s3 + $0x824] ss:$16 sps:$4 sm:$0xff]  }
 0x21e   : > { %v16269_v3 = vadd.f32 %v2507_v24, %v2454_v6  ;;  %3420 = vmatprep.mubr.bf16.mxu0 %v16042_v28  ;;  %4298 = vmatpush1.bf16.msra.mxu0 %v13586_v13  ;;  %v13619_v13 = vld [vmem:[%s19489_s3 + $0xb00] ss:$16 sps:$4 sm:$0xff]  }
 0x21f   : > { %v2456_v8 = vpop.f32.mrf.mxu0  ;;  %4299 = vmatprep.subr.bf16.mxu0 %v13594_v46  ;;  %v13622_v46 = vld [vmem:[%s19489_s3 + $0x820] ss:$16 sps:$4 sm:$0xff]  }
 0x220   : > { %v16275_v54 = vadd.f32 %v2509_v21, %v2456_v8  ;;  %4371 = vmatpush2.bf16.msra.mxu1 %v13589_v40  ;;  %v13613_v21 = vld [vmem:[%s19489_s3 + $0xb20] ss:$16 sps:$4 sm:$0xff]   ;;  %v16353_v40 = vrot.slane %v3498_v16, 1  ;;  %v13631_v8 = vld [vmem:[%s19489_s3 + $0xac8] ss:$16 sps:$4 sm:$0xff]  }
 0x221   : > { %v2458_v28 = vpop.f32.mrf.mxu0  ;;  %4372 = vmatprep.subr.bf16.mxu1 %v13597_v61  ;;  %v13630_v61 = vld [vmem:[%s19489_s3 + $0x804] ss:$16 sps:$4 sm:$0xff]  }
 0x222   : > { %v16285_v4 = vadd.f32 %v2511_v29, %v2458_v28  ;;  %4300 = vmatpush1.bf16.msra.mxu0 %v13592_v42  ;;  %v3494_v29 = vpack.c.bf16 %v16347_v11, %v3486_v62  ;;  %v13633_v42 = vld [vmem:[%s19489_s3 + $0xacc] ss:$16 sps:$4 sm:$0xff]   ;;  %v13637_v28 = vld [vmem:[%s19489_s3 + $0xaa8] ss:$16 sps:$4 sm:$0xff]   ;;  %v16450_v62 = vpop.f32.mrf.mxu1 }
 0x223   : > { %v16293_v20 = vpop.f32.mrf.mxu0  ;;  %4301 = vmatprep.subr.bf16.mxu0 %v13600_v58  ;;  %v13628_v58 = vld [vmem:[%s19489_s3 + $0x800] ss:$16 sps:$4 sm:$0xff]  }
 0x224   : > { %4373 = vmatpush2.bf16.msra.mxu1 %v13595_v7  ;;  %v3643_v6 = vrot.slane %v3494_v29, 1  ;;  %v13639_v7 = vld [vmem:[%s19489_s3 + $0xaac] ss:$16 sps:$4 sm:$0xff]   ;;  %v13678_v29 = vld [vmem:[%s19489_s3 + $0x904] ss:$16 sps:$4 sm:$0xff]  }
 0x225   : > { %3421 = vmatmul.mubr.bf16.gmra.mxu0 %v16067_v53  ;;  %v2464_v44 = vpop.f32.mrf.mxu0  ;;  %4374 = vmatprep.subr.bf16.mxu1 %v13603_v26  ;;  %v13634_v26 = vld [vmem:[%s19489_s3 + $0x9e0] ss:$16 sps:$4 sm:$0xff]  }
 0x226   : > { %v16306_v59 = vadd.f32 %v2517_v63, %v2464_v44  ;;  %4302 = vmatpush1.bf16.msra.mxu0 %v13598_v55  ;;  %4329 = vmatprep.mubr.bf16.mxu0 %v16304_v5  ;;  %v16372_v22 = vsel %vm738_vm2, %v3643_v6, %v16353_v40  ;;  %v13642_v63 = vld [vmem:[%s19489_s3 + $0x9c4] ss:$16 sps:$4 sm:$0xff]   ;;  %v13645_v55 = vld [vmem:[%s19489_s3 + $0xa8c] ss:$16 sps:$4 sm:$0xff]   ;;  %v13676_v6 = vld [vmem:[%s19489_s3 + $0x900] ss:$16 sps:$4 sm:$0xff]  }
 0x227   : > { %v2466_v53 = vpop.f32.mrf.mxu0  ;;  %4303 = vmatprep.subr.bf16.mxu0 %v13606_v36  ;;  %v13640_v36 = vld [vmem:[%s19489_s3 + $0x9c0] ss:$16 sps:$4 sm:$0xff]   ;;  %v13654_v44 = vld [vmem:[%s19489_s3 + $0x984] ss:$16 sps:$4 sm:$0xff]  }
 0x228   : > { %v16315_v9 = vadd.f32 %v2519_v41, %v2466_v53  ;;  %4375 = vmatpush2.bf16.msra.mxu1 %v13601_v19  ;;  %v13643_v19 = vld [vmem:[%s19489_s3 + $0xa88] ss:$16 sps:$4 sm:$0xff]   ;;  %v13646_v41 = vld [vmem:[%s19489_s3 + $0x9a0] ss:$16 sps:$4 sm:$0xff]   ;;  %v13660_v53 = vld [vmem:[%s19489_s3 + $0x964] ss:$16 sps:$4 sm:$0xff]  }
 0x229   : > { %v2468_v24 = vpop.f32.mrf.mxu0  ;;  %4376 = vmatprep.subr.bf16.mxu1 %v13609_v43  ;;  %v13651_v43 = vld [vmem:[%s19489_s3 + $0xa6c] ss:$16 sps:$4 sm:$0xff]  }
 0x22a   : > { %v16323_v45 = vadd.f32 %v2521_v18, %v2468_v24  ;;  %4304 = vmatpush1.bf16.msra.mxu0 %v13604_v10  ;;  %v13657_v10 = vld [vmem:[%s19489_s3 + $0xa4c] ss:$16 sps:$4 sm:$0xff]   ;;  %v13666_v18 = vld [vmem:[%s19489_s3 + $0x944] ss:$16 sps:$4 sm:$0xff]   ;;  %v13661_v24 = vld [vmem:[%s19489_s3 + $0xa28] ss:$16 sps:$4 sm:$0xff]  }
 0x22b   : > { %4305 = vmatprep.subr.bf16.mxu0 %v13612_v31  ;;  %v13652_v31 = vld [vmem:[%s19489_s3 + $0x980] ss:$16 sps:$4 sm:$0xff]  }
 0x22c   : > { %4377 = vmatpush2.bf16.msra.mxu1 %v13607_v33  ;;  %v13655_v33 = vld [vmem:[%s19489_s3 + $0xa48] ss:$16 sps:$4 sm:$0xff]  }
 0x22d   : > { %4378 = vmatprep.subr.bf16.mxu1 %v13615_v56  ;;  %v13663_v56 = vld [vmem:[%s19489_s3 + $0xa2c] ss:$16 sps:$4 sm:$0xff]  }
 0x22e   : > { %4306 = vmatpush1.bf16.msra.mxu0 %v13610_v1  ;;  %v13669_v1 = vld [vmem:[%s19489_s3 + $0xa0c] ss:$16 sps:$4 sm:$0xff]  }
 0x22f   : > { %4307 = vmatprep.subr.bf16.mxu0 %v13618_v35  ;;  %v13664_v35 = vld [vmem:[%s19489_s3 + $0x940] ss:$16 sps:$4 sm:$0xff]  }
 0x230   : > { %4379 = vmatpush2.bf16.msra.mxu1 %v13613_v21  ;;  %v13672_v21 = vld [vmem:[%s19489_s3 + $0x924] ss:$16 sps:$4 sm:$0xff]  }
 0x231   : > { %4380 = vmatprep.subr.bf16.mxu1 %v13621_v32  ;;  %v13667_v32 = vld [vmem:[%s19489_s3 + $0xa08] ss:$16 sps:$4 sm:$0xff]  }
 0x232   : > { %4308 = vmatpush1.bf16.msra.mxu0 %v13616_v27  ;;  %v13675_v27 = vld [vmem:[%s19489_s3 + $0xbec] ss:$16 sps:$4 sm:$0xff]  }
 0x233   : > { %4309 = vmatprep.subr.bf16.mxu0 %v13624_v37  ;;  %v3488_v37 = vld [vmem:[#allocation2 + $0x30] sm:$0x3f] }
 0x234   : > { %4381 = vmatpush2.bf16.msra.mxu1 %v13619_v13  ;;  %v13670_v13 = vld [vmem:[%s19489_s3 + $0x920] ss:$16 sps:$4 sm:$0xff]  }
 0x235   : > { %4456 = vmatprep.subr.bf16.mxu1 %v13627_v14  ;;  %v3484_v14 = vld [vmem:[#allocation2 + $0x70] sm:$0xfc] }
 0x236   : > { %4310 = vmatpush1.bf16.msra.mxu0 %v13622_v46  ;;  %v13673_v46 = vld [vmem:[%s19489_s3 + $0xbe8] ss:$16 sps:$4 sm:$0xff]  }
 0x237   : > { %4383 = vmatmul.mubr.bf16.vlgmr.msra.gmra.mxu1 %v16372_v22  ;;  %4311 = vmatprep.subr.bf16.mxu0 %v13630_v61  ;;  %v2613_v16 = vpop.f32.mrf.mxu1 }
 0x238   : > { %4392 = vmatprep.mubr.bf16.mxu1 %v16152_v47  ;;  %4457 = vmatpush1.bf16.msra.mxu1 %v13625_v51  ;;  %v3496_v51 = vpack.c.bf16 %v3488_v37, %v16064_v17  ;;  %v13679_v17 = vld [vmem:[%s19489_s3 + $0xbc8] ss:$16 sps:$4 sm:$0xff]   ;;  %v13705_v37 = vld [vmem:[%s19489_s3 + $0xb4c] ss:$16 sps:$4 sm:$0xff]  }
 0x239   : > { %4458 = vmatprep.subr.bf16.mxu1 %v13633_v42  ;;  %v2615_v61 = vpop.f32.mrf.mxu1  ;;  %v13681_v42 = vld [vmem:[%s19489_s3 + $0xbcc] ss:$16 sps:$4 sm:$0xff]  }
 0x23a   : > { %4312 = vmatpush1.bf16.msra.mxu0 %v13628_v58  ;;  %v3492_v58 = vpack.c.bf16 %v16031_v50, %v3484_v14 }
 0x23b   : > { %4313 = vmatprep.subr.bf16.mxu0 %v13636_v12  ;;  %v16484_v12 = vrot.slane %v3496_v51, 1 }
 0x23c   : > { %4459 = vmatpush1.bf16.msra.mxu1 %v13631_v8  ;;  %v13684_v8 = vld [vmem:[%s19489_s3 + $0x8ec] ss:$16 sps:$4 sm:$0xff]   ;;  %v3637_v50 = vrot.slane %v3492_v58, 1 }
 0x23d   : > { %4460 = vmatprep.subr.bf16.mxu1 %v13639_v7  ;;  %v2617_v7 = vpop.f32.mrf.mxu1 }
 0x23e   : > { %4314 = vmatpush2.bf16.msra.mxu0 %v13634_v26  ;;  %v13687_v26 = vld [vmem:[%s19489_s3 + $0xbac] ss:$16 sps:$4 sm:$0xff]  }
 0x23f   : > { %4393 = vmatmul.mubr.bf16.gmra.mxu1 %v16353_v40  ;;  %4315 = vmatprep.subr.bf16.mxu0 %v13642_v63  ;;  %v13682_v63 = vld [vmem:[%s19489_s3 + $0x8e8] ss:$16 sps:$4 sm:$0xff]  }
 0x240   : > { %4461 = vmatpush1.bf16.msra.mxu1 %v13637_v28  ;;  %4488 = vmatprep.mubr.bf16.mxu1 %v16163_v0  ;;  %v13649_v0 = vld [vmem:[%s19489_s3 + $0xa68] ss:$16 sps:$4 sm:$0xff]   ;;  %v16492_v28 = vpop.f32.mrf.mxu0 }
 0x241   : > { %4462 = vmatprep.subr.bf16.mxu1 %v13645_v55  ;;  %v13690_v55 = vld [vmem:[%s19489_s3 + $0x8cc] ss:$16 sps:$4 sm:$0xff]  }
 0x242   : > { %4316 = vmatpush2.bf16.msra.mxu0 %v13640_v36  ;;  %v16499_v36 = vsel %vm738_vm2, %v3637_v50, %v16484_v12  ;;  %v13717_v50 = vld [vmem:[%s19489_s3 + $0xb0c] ss:$16 sps:$4 sm:$0xff]  }
 0x243   : > { %4317 = vmatprep.subr.bf16.mxu0 %v13648_v15  ;;  %v13685_v15 = vld [vmem:[%s19489_s3 + $0xba8] ss:$16 sps:$4 sm:$0xff]  }
 0x244   : > { %4463 = vmatpush1.bf16.msra.mxu1 %v13643_v19  ;;  %v16504_v19 = vpop.f32.mrf.mxu1 }
 0x245   : > { %4464 = vmatprep.subr.bf16.mxu1 %v13651_v43 }
 0x246   : > { %4318 = vmatpush2.bf16.msra.mxu0 %v13646_v41  ;;  %v13693_v41 = vld [vmem:[%s19489_s3 + $0xb8c] ss:$16 sps:$4 sm:$0xff]  }
 0x247   : > { %4319 = vmatprep.subr.bf16.mxu0 %v13654_v44 }
 0x248   : > { %4465 = vmatpush1.bf16.msra.mxu1 %v13649_v0  ;;  %v13688_v0 = vld [vmem:[%s19489_s3 + $0x8c8] ss:$16 sps:$4 sm:$0xff]  }
 0x249   : > { %4466 = vmatprep.subr.bf16.mxu1 %v13657_v10 }
 0x24a   : > { %4320 = vmatpush2.bf16.msra.mxu0 %v13652_v31  ;;  %v13696_v31 = vld [vmem:[%s19489_s3 + $0x8ac] ss:$16 sps:$4 sm:$0xff]  }
 0x24b   : > { %4321 = vmatprep.subr.bf16.mxu0 %v13660_v53 }
 0x24c   : > { %4467 = vmatpush1.bf16.msra.mxu1 %v13655_v33  ;;  %v13691_v33 = vld [vmem:[%s19489_s3 + $0xb88] ss:$16 sps:$4 sm:$0xff]  }
 0x24d   : > { %4468 = vmatprep.subr.bf16.mxu1 %v13663_v56  ;;  %v2623_v56 = vpop.f32.mrf.mxu1 }
 0x24e   : > { %4322 = vmatpush2.bf16.msra.mxu0 %v13658_v34 }
 0x24f   : > { %4323 = vmatprep.subr.bf16.mxu0 %v13666_v18  ;;  %v13699_v18 = vld [vmem:[%s19489_s3 + $0xb6c] ss:$16 sps:$4 sm:$0xff]  }
 0x250   : > { %4469 = vmatpush1.bf16.msra.mxu1 %v13661_v24 }
 0x251   : > { %4470 = vmatprep.subr.bf16.mxu1 %v13669_v1  ;;  %v13694_v1 = vld [vmem:[%s19489_s3 + $0x8a8] ss:$16 sps:$4 sm:$0xff]  }
 0x252   : > { %4324 = vmatpush2.bf16.msra.mxu0 %v13664_v35 }
 0x253   : > { %4325 = vmatprep.subr.bf16.mxu0 %v13672_v21  ;;  %v13702_v21 = vld [vmem:[%s19489_s3 + $0x88c] ss:$16 sps:$4 sm:$0xff]  }
 0x254   : > { %4471 = vmatpush1.bf16.msra.mxu1 %v13667_v32  ;;  %v13697_v32 = vld [vmem:[%s19489_s3 + $0xb68] ss:$16 sps:$4 sm:$0xff]  }
 0x255   : > { %4472 = vmatprep.subr.bf16.mxu1 %v13675_v27 }
 0x256   : > { %4326 = vmatpush2.bf16.msra.mxu0 %v13670_v13 }
 0x257   : > { %4327 = vmatprep.subr.bf16.mxu0 %v13678_v29  ;;  %v13700_v29 = vld [vmem:[%s19489_s3 + $0x888] ss:$16 sps:$4 sm:$0xff]  }
 0x258   : > { %4473 = vmatpush2.bf16.msra.mxu1 %v13673_v46  ;;  %v13708_v46 = vld [vmem:[%s19489_s3 + $0x86c] ss:$16 sps:$4 sm:$0xff]  }
 0x259   : > { %4474 = vmatprep.subr.bf16.mxu1 %v13681_v42 }
 0x25a   : > { %4328 = vmatpush2.bf16.msra.mxu0 %v13676_v6 }
 0x25b   : > { %4403 = vmatprep.subr.bf16.mxu0 %v13684_v8  ;;  %v13706_v8 = vld [vmem:[%s19489_s3 + $0x868] ss:$16 sps:$4 sm:$0xff]  }
 0x25c   : > { %4475 = vmatpush2.bf16.msra.mxu1 %v13679_v17  ;;  %v13714_v17 = vld [vmem:[%s19489_s3 + $0x84c] ss:$16 sps:$4 sm:$0xff]  }
 0x25d   : > { %v2560_v43 = vpop.f32.mrf.mxu0  ;;  %4330 = vmatmul.mubr.bf16.vlgmr.msra.gmra.mxu0 %v16499_v36  ;;  %4476 = vmatprep.subr.bf16.mxu1 %v13687_v26  ;;  %v4532_v26 = vld [vmem:[#allocation2 + $0x28] sm:$0x7f] }
 0x25e   : > { %v16510_v44 = vadd.f32 %v2613_v16, %v2560_v43  ;;  %4339 = vmatprep.mubr.bf16.mxu0 %v16283_v30  ;;  %4404 = vmatpush1.bf16.msra.mxu0 %v13682_v63  ;;  %v2625_v16 = vpop.f32.mrf.mxu1  ;;  %v13712_v63 = vld [vmem:[%s19489_s3 + $0x848] ss:$16 sps:$4 sm:$0xff]  }
 0x25f   : > { %v2562_v10 = vpop.f32.mrf.mxu0  ;;  %4405 = vmatprep.subr.bf16.mxu0 %v13690_v55  ;;  %v4528_v55 = vld [vmem:[#allocation2 + $0x18] sm:$0xf8]  ;;  %v16581_v43 = vld [vmem:[#allocation2 + $0x68] sm:$0xff] }
 0x260   : > { %v16519_v53 = vadd.f32 %v2615_v61, %v2562_v10  ;;  %4477 = vmatpush2.bf16.msra.mxu1 %v13685_v15  ;;  %v13703_v61 = vld [vmem:[%s19489_s3 + $0xb48] ss:$16 sps:$4 sm:$0xff]   ;;  %v2627_v42 = vpop.f32.mrf.mxu1  ;;  %v13720_v15 = vld [vmem:[%s19489_s3 + $0x82c] ss:$16 sps:$4 sm:$0xff]   ;;  %v13723_v10 = vld [vmem:[%s19489_s3 + $0xee4] ss:$16 sps:$4 sm:$0xff]  }
 0x261   : > { %v2564_v34 = vpop.f32.mrf.mxu0  ;;  %4478 = vmatprep.subr.bf16.mxu1 %v13693_v41  ;;  %v4540_v41 = vpack.c.bf16 %v4532_v26, %v16581_v43 }
 0x262   : > { %v16527_v24 = vadd.f32 %v2617_v7, %v2564_v34  ;;  %4406 = vmatpush1.bf16.msra.mxu0 %v13688_v0  ;;  %v13709_v7 = vld [vmem:[%s19489_s3 + $0xb28] ss:$16 sps:$4 sm:$0xff]  }
 0x263   : > { %v16532_v35 = vpop.f32.mrf.mxu0  ;;  %4407 = vmatprep.subr.bf16.mxu0 %v13696_v31  ;;  %v13715_v0 = vld [vmem:[%s19489_s3 + $0xb08] ss:$16 sps:$4 sm:$0xff]   ;;  %v4536_v31 = vpack.c.bf16 %v16143_v39, %v4528_v55  ;;  %v4730_v34 = vshrl.u32 %v4540_v41, 16  ;;  %v13729_v39 = vld [vmem:[%s19489_s3 + $0xec4] ss:$16 sps:$4 sm:$0xff]  }
 0x264   : > { %4479 = vmatpush2.bf16.msra.mxu1 %v13691_v33  ;;  %v13718_v33 = vld [vmem:[%s19489_s3 + $0x828] ss:$16 sps:$4 sm:$0xff]   ;;  %v2620_v57 = vadd.f32 %v16504_v19, %v16532_v35 }
 0x265   : > { %v2570_v27 = vpop.f32.mrf.mxu0  ;;  %4340 = vmatmul.mubr.bf16.gmra.mxu0 %v16484_v12  ;;  %4480 = vmatprep.subr.bf16.mxu1 %v13699_v18  ;;  %v4733_v18 = vshll.u32 %v4540_v41, 16  ;;  %v13742_v55 = vld [vmem:[%s19489_s3 + $0x9a8] ss:$16 sps:$4 sm:$0xff]   ;;  %v13745_v41 = vld [vmem:[%s19489_s3 + $0xe60] ss:$16 sps:$4 sm:$0xff]  }
 0x266   : > { %v16544_v13 = vadd.f32 %v2623_v56, %v2570_v27  ;;  %4408 = vmatpush1.bf16.msra.mxu0 %v13694_v1  ;;  %4435 = vmatprep.mubr.bf16.mxu0 %v16304_v5  ;;  %v13711_v5 = vld [vmem:[%s19489_s3 + $0xb2c] ss:$16 sps:$4 sm:$0xff]   ;;  %v13721_v1 = vld [vmem:[%s19489_s3 + $0xee0] ss:$16 sps:$4 sm:$0xff]  }
 0x267   : > { %v2572_v14 = vpop.f32.mrf.mxu0  ;;  %4409 = vmatprep.subr.bf16.mxu0 %v13702_v21  ;;  %v13726_v56 = vld [vmem:[%s19489_s3 + $0x80c] ss:$16 sps:$4 sm:$0xff]   ;;  %v4722_v21 = vshrl.u32 %v4536_v31, 16 }
 0x268   : > { %v16553_v51 = vadd.f32 %v2625_v16, %v2572_v14  ;;  %4481 = vmatpush2.bf16.msra.mxu1 %v13697_v32  ;;  %v4725_v32 = vshll.u32 %v4536_v31, 16  ;;  %v13724_v16 = vld [vmem:[%s19489_s3 + $0x808] ss:$16 sps:$4 sm:$0xff]   ;;  %v13732_v27 = vld [vmem:[%s19489_s3 + $0x9ec] ss:$16 sps:$4 sm:$0xff]  }
 0x269   : > { %v2574_v6 = vpop.f32.mrf.mxu0  ;;  %4482 = vmatprep.subr.bf16.mxu1 %v13705_v37  ;;  %v4732_v37 = vrot.slane %v4730_v34, 1  ;;  %v13727_v14 = vld [vmem:[%s19489_s3 + $0xec0] ss:$16 sps:$4 sm:$0xff]   ;;  %v13756_v31 = vld [vmem:[%s19489_s3 + $0x96c] ss:$16 sps:$4 sm:$0xff]  }
 0x26a   : > { %v16561_v58 = vadd.f32 %v2627_v42, %v2574_v6  ;;  %4410 = vmatpush1.bf16.msra.mxu0 %v13700_v29  ;;  %v4735_v29 = vrot.slane %v4733_v18, 2  ;;  %v13730_v42 = vld [vmem:[%s19489_s3 + $0x9e8] ss:$16 sps:$4 sm:$0xff]   ;;  %v13762_v18 = vld [vmem:[%s19489_s3 + $0x94c] ss:$16 sps:$4 sm:$0xff]  }
 0x26b   : > { %4411 = vmatprep.subr.bf16.mxu0 %v13708_v46  ;;  %v13735_v46 = vld [vmem:[%s19489_s3 + $0xea4] ss:$16 sps:$4 sm:$0xff]   ;;  %v13754_v34 = vld [vmem:[%s19489_s3 + $0x968] ss:$16 sps:$4 sm:$0xff]  }
 0x26c   : > { %4483 = vmatpush2.bf16.msra.mxu1 %v13703_v61  ;;  %v4727_v61 = vrot.slane %v4725_v32, 2  ;;  %v16623_v6 = vor.u32 %v4735_v29, %v4732_v37  ;;  %v13768_v32 = vld [vmem:[%s19489_s3 + $0x92c] ss:$16 sps:$4 sm:$0xff]   ;;  %v13771_v37 = vld [vmem:[%s19489_s3 + $0xfe4] ss:$16 sps:$4 sm:$0xff]  }
 0x26d   : > { %4484 = vmatprep.subr.bf16.mxu1 %v13711_v5  ;;  %v13733_v5 = vld [vmem:[%s19489_s3 + $0xea0] ss:$16 sps:$4 sm:$0xff]   ;;  %v13766_v29 = vld [vmem:[%s19489_s3 + $0x928] ss:$16 sps:$4 sm:$0xff]  }
 0x26e   : > { %4412 = vmatpush1.bf16.msra.mxu0 %v13706_v8 }
 0x26f   : > { %4413 = vmatprep.subr.bf16.mxu0 %v13714_v17  ;;  %v13741_v17 = vld [vmem:[%s19489_s3 + $0xe84] ss:$16 sps:$4 sm:$0xff]  }
 0x270   : > { %4485 = vmatpush2.bf16.msra.mxu1 %v13709_v7  ;;  %v13736_v7 = vld [vmem:[%s19489_s3 + $0x9c8] ss:$16 sps:$4 sm:$0xff]  }
 0x271   : > { %4486 = vmatprep.subr.bf16.mxu1 %v13717_v50  ;;  %v13744_v50 = vld [vmem:[%s19489_s3 + $0x9ac] ss:$16 sps:$4 sm:$0xff]  }
 0x272   : > { %4414 = vmatpush1.bf16.msra.mxu0 %v13712_v63  ;;  %v13739_v63 = vld [vmem:[%s19489_s3 + $0xe80] ss:$16 sps:$4 sm:$0xff]  }
 0x273   : > { %4415 = vmatprep.subr.bf16.mxu0 %v13720_v15  ;;  %v13750_v15 = vld [vmem:[%s19489_s3 + $0x98c] ss:$16 sps:$4 sm:$0xff]  }
 0x274   : > { %4487 = vmatpush2.bf16.msra.mxu1 %v13715_v0  ;;  %v13753_v0 = vld [vmem:[%s19489_s3 + $0xe44] ss:$16 sps:$4 sm:$0xff]  }
 0x275   : > { %5439 = vmatprep.subr.bf16.mxu1 %v13723_v10  ;;  %v13748_v10 = vld [vmem:[%s19489_s3 + $0x988] ss:$16 sps:$4 sm:$0xff]  }
 0x276   : > { %4416 = vmatpush1.bf16.msra.mxu0 %v13718_v33  ;;  %v13751_v33 = vld [vmem:[%s19489_s3 + $0xe40] ss:$16 sps:$4 sm:$0xff]  }
 0x277   : > { %4489 = vmatmul.mubr.bf16.vlgmr.msra.gmra.mxu1 %v16372_v22  ;;  %4417 = vmatprep.subr.bf16.mxu0 %v13726_v56  ;;  %v4724_v22 = vrot.slane %v4722_v21, 1  ;;  %v13759_v56 = vld [vmem:[%s19489_s3 + $0xe24] ss:$16 sps:$4 sm:$0xff]   ;;  %v13760_v21 = vld [vmem:[%s19489_s3 + $0x948] ss:$16 sps:$4 sm:$0xff]  }
 0x278   : > { %4498 = vmatprep.mubr.bf16.mxu1 %v16152_v47  ;;  %5440 = vmatpush1.bf16.msra.mxu1 %v13721_v1  ;;  %v13738_v47 = vld [vmem:[%s19489_s3 + $0x9cc] ss:$16 sps:$4 sm:$0xff]   ;;  %v13757_v1 = vld [vmem:[%s19489_s3 + $0xe20] ss:$16 sps:$4 sm:$0xff]  }
 0x279   : > { %5441 = vmatprep.subr.bf16.mxu1 %v13729_v39  ;;  %v4728_v8 = vor.u32 %v4727_v61, %v4724_v22  ;;  %v13765_v39 = vld [vmem:[%s19489_s3 + $0xe04] ss:$16 sps:$4 sm:$0xff]   ;;  %v13774_v22 = vld [vmem:[%s19489_s3 + $0x90c] ss:$16 sps:$4 sm:$0xff]   ;;  %v13769_v61 = vld [vmem:[%s19489_s3 + $0xfe0] ss:$16 sps:$4 sm:$0xff]  }
 0x27a   : > { %4418 = vmatpush1.bf16.msra.mxu0 %v13724_v16  ;;  %v13763_v16 = vld [vmem:[%s19489_s3 + $0xe00] ss:$16 sps:$4 sm:$0xff]  }
 0x27b   : > { %4419 = vmatprep.subr.bf16.mxu0 %v13732_v27  ;;  %v16637_v26 = vsel %vm919_vm3, %v4728_v8, %v16623_v6  ;;  %v16694_v27 = vpop.f32.mrf.mxu1 }
 0x27c   : > { %5442 = vmatpush1.bf16.msra.mxu1 %v13727_v14  ;;  %v4530_v14 = vld [vmem:[#allocation2 + $0x48] sm:$0x7f] }
 0x27d   : > { %5443 = vmatprep.subr.bf16.mxu1 %v13735_v46  ;;  %v3359_v46 = vpop.f32.mrf.mxu1 }
 0x27e   : > { %4420 = vmatpush2.bf16.msra.mxu0 %v13730_v42  ;;  %v4526_v42 = vld [vmem:[#allocation2] sm:$0xf8] }
 0x27f   : > { %4499 = vmatmul.mubr.bf16.gmra.mxu1 %v16353_v40  ;;  %4421 = vmatprep.subr.bf16.mxu0 %v13738_v47  ;;  %v13747_v40 = vld [vmem:[%s19489_s3 + $0xe64] ss:$16 sps:$4 sm:$0xff]  }
 0x280   : > { %5444 = vmatpush1.bf16.msra.mxu1 %v13733_v5  ;;  %5471 = vmatprep.mubr.bf16.mxu1 %v16637_v26  ;;  %v13777_v47 = vld [vmem:[%s19489_s3 + $0xfc4] ss:$16 sps:$4 sm:$0xff]  }
 0x281   : > { %5445 = vmatprep.subr.bf16.mxu1 %v13741_v17  ;;  %v16711_v5 = vld [vmem:[#allocation2 + $0x50] sm:$0xff]  ;;  %v13772_v17 = vld [vmem:[%s19489_s3 + $0x908] ss:$16 sps:$4 sm:$0xff]  }
 0x282   : > { %4422 = vmatpush2.bf16.msra.mxu0 %v13736_v7  ;;  %v4538_v8 = vpack.c.bf16 %v4530_v14, %v16711_v5  ;;  %v3361_v7 = vpop.f32.mrf.mxu1 }
 0x283   : > { %4423 = vmatprep.subr.bf16.mxu0 %v13744_v50  ;;  %v13780_v50 = vld [vmem:[%s19489_s3 + $0xce4] ss:$16 sps:$4 sm:$0xff]  }
 0x284   : > { %5446 = vmatpush1.bf16.msra.mxu1 %v13739_v63  ;;  %v4534_v63 = vpack.c.bf16 %v16272_v48, %v4526_v42  ;;  %v3363_v48 = vpop.f32.mrf.mxu1 }
 0x285   : > { %5447 = vmatprep.subr.bf16.mxu1 %v13747_v40  ;;  %v13775_v40 = vld [vmem:[%s19489_s3 + $0xfc0] ss:$16 sps:$4 sm:$0xff]  }
 0x286   : > { %4424 = vmatpush2.bf16.msra.mxu0 %v13742_v55  ;;  %v13783_v55 = vld [vmem:[%s19489_s3 + $0xfa4] ss:$16 sps:$4 sm:$0xff]  }
 0x287   : > { %4425 = vmatprep.subr.bf16.mxu0 %v13750_v15  ;;  %v4696_v15 = vshrl.u32 %v4538_v8, 16 }
 0x288   : > { %5448 = vmatpush1.bf16.msra.mxu1 %v13745_v41  ;;  %v4699_v41 = vshll.u32 %v4538_v8, 16  ;;  %v13795_v8 = vld [vmem:[%s19489_s3 + $0xf64] ss:$16 sps:$4 sm:$0xff]  }
 0x289   : > { %5449 = vmatprep.subr.bf16.mxu1 %v13753_v0  ;;  %v13778_v0 = vld [vmem:[%s19489_s3 + $0xce0] ss:$16 sps:$4 sm:$0xff]  }
 0x28a   : > { %4426 = vmatpush2.bf16.msra.mxu0 %v13748_v10  ;;  %v16730_v10 = vpop.f32.mrf.mxu0 }
 0x28b   : > { %4427 = vmatprep.subr.bf16.mxu0 %v13756_v31  ;;  %v13786_v31 = vld [vmem:[%s19489_s3 + $0xcc4] ss:$16 sps:$4 sm:$0xff]   ;;  %v2630_v19 = vadd.f32 %v16694_v27, %v16730_v10 }
 0x28c   : > { %5450 = vmatpush1.bf16.msra.mxu1 %v13751_v33  ;;  %v4688_v33 = vshrl.u32 %v4534_v63, 16  ;;  %v14224_v27 = vld [vmem:[%s19491_s5 + $0x2e4] ss:$8 sps:$4 sm:$0xff]  }
 0x28d   : > { %5451 = vmatprep.subr.bf16.mxu1 %v13759_v56  ;;  %v4691_v56 = vshll.u32 %v4534_v63, 16 }
 0x28e   : > { %4428 = vmatpush2.bf16.msra.mxu0 %v13754_v34  ;;  %v13781_v34 = vld [vmem:[%s19489_s3 + $0xfa0] ss:$16 sps:$4 sm:$0xff]   ;;  %v4690_v14 = vrot.slane %v4688_v33, 1  ;;  %v4527_v33 = vld [vmem:[#allocation2 + $0x38] sm:$0xf8] }
 0x28f   : > { %4429 = vmatprep.subr.bf16.mxu0 %v13762_v18 }
 0x290   : > { %5452 = vmatpush1.bf16.msra.mxu1 %v13757_v1  ;;  %v13789_v1 = vld [vmem:[%s19489_s3 + $0xf84] ss:$16 sps:$4 sm:$0xff]  }
 0x291   : > { %5453 = vmatprep.subr.bf16.mxu1 %v13765_v39  ;;  %v4698_v39 = vrot.slane %v4696_v15, 1  ;;  %v4531_v15 = vld [vmem:[#allocation2 + $0x8] sm:$0x7f] }
 0x292   : > { %4430 = vmatpush2.bf16.msra.mxu0 %v13760_v21  ;;  %v4701_v21 = vrot.slane %v4699_v41, 2 }
 0x293   : > { %4431 = vmatprep.subr.bf16.mxu0 %v13768_v32 }
 0x294   : > { %5454 = vmatpush1.bf16.msra.mxu1 %v13763_v16  ;;  %v13784_v16 = vld [vmem:[%s19489_s3 + $0xcc0] ss:$16 sps:$4 sm:$0xff]  }
 0x295   : > { %5455 = vmatprep.subr.bf16.mxu1 %v13771_v37  ;;  %v16747_v37 = vpop.f32.mrf.mxu1 }
 0x296   : > { %4432 = vmatpush2.bf16.msra.mxu0 %v13766_v29 }
 0x297   : > { %4433 = vmatprep.subr.bf16.mxu0 %v13774_v22  ;;  %v4693_v22 = vrot.slane %v4691_v56, 2  ;;  %v13796_v56 = vld [vmem:[%s19489_s3 + $0xc80] ss:$16 sps:$4 sm:$0xff]  }
 0x298   : > { %5456 = vmatpush2.bf16.msra.mxu1 %v13769_v61 }
 0x299   : > { %5457 = vmatprep.subr.bf16.mxu1 %v13777_v47  ;;  %v16758_v47 = vor.u32 %v4701_v21, %v4698_v39  ;;  %v13804_v39 = vld [vmem:[%s19489_s3 + $0xc64] ss:$16 sps:$4 sm:$0xff]  }
 0x29a   : > { %4434 = vmatpush2.bf16.msra.mxu0 %v13772_v17 }
 0x29b   : > { %5386 = vmatprep.subr.bf16.mxu0 %v13780_v50  ;;  %v3369_v50 = vpop.f32.mrf.mxu1 }
 0x29c   : > { %5458 = vmatpush2.bf16.msra.mxu1 %v13775_v40  ;;  %v4694_v40 = vor.u32 %v4693_v22, %v4690_v14 }
 0x29d   : > { %v3306_v18 = vpop.f32.mrf.mxu0  ;;  %4436 = vmatmul.mubr.bf16.vlgmr.msra.gmra.mxu0 %v16499_v36  ;;  %5459 = vmatprep.subr.bf16.mxu1 %v13783_v55  ;;  %v13792_v36 = vld [vmem:[%s19489_s3 + $0xca4] ss:$16 sps:$4 sm:$0xff]  }
 0x29e   : > { %v3307_v32 = vadd.f32 %v3306_v18, %v16269_v3  ;;  %4445 = vmatprep.mubr.bf16.mxu0 %v16283_v30  ;;  %5387 = vmatpush1.bf16.msra.mxu0 %v13778_v0  ;;  %v13787_v30 = vld [vmem:[%s19489_s3 + $0xf80] ss:$16 sps:$4 sm:$0xff]   ;;  %v13798_v55 = vld [vmem:[%s19489_s3 + $0xc84] ss:$16 sps:$4 sm:$0xff]   ;;  %v16782_v0 = vsel %vm919_vm3, %v4694_v40, %v16758_v47  ;;  %v3371_v18 = vpop.f32.mrf.mxu1 }
 0x29f   : > { %v3308_v29 = vpop.f32.mrf.mxu0  ;;  %5388 = vmatprep.subr.bf16.mxu0 %v13786_v31  ;;  %v13801_v31 = vld [vmem:[%s19489_s3 + $0xf44] ss:$16 sps:$4 sm:$0xff]   ;;  %v13808_v40 = vld [vmem:[%s19489_s3 + $0xc40] ss:$16 sps:$4 sm:$0xff]  }
 0x2a0   : > { %v16752_v61 = vadd.f32 %v3359_v46, %v3307_v32  ;;  %v3309_v3 = vadd.f32 %v3308_v29, %v16275_v54  ;;  %5460 = vmatpush2.bf16.msra.mxu1 %v13781_v34  ;;  %v13790_v54 = vld [vmem:[%s19489_s3 + $0xca0] ss:$16 sps:$4 sm:$0xff]  }
 0x2a1   : > { %v3310_v42 = vpop.f32.mrf.mxu0  ;;  %5461 = vmatprep.subr.bf16.mxu1 %v13789_v1  ;;  %v13799_v32 = vld [vmem:[%s19489_s3 + $0xf40] ss:$16 sps:$4 sm:$0xff]  }
 0x2a2   : > { %v16763_v17 = vadd.f32 %v3361_v7, %v3309_v3  ;;  %v3311_v46 = vadd.f32 %v3310_v42, %v16285_v4  ;;  %5389 = vmatpush1.bf16.msra.mxu0 %v13784_v16  ;;  %v13793_v4 = vld [vmem:[%s19489_s3 + $0xf60] ss:$16 sps:$4 sm:$0xff]   ;;  %v4535_v16 = vpack.c.bf16 %v16347_v11, %v4527_v33  ;;  %v3373_v42 = vpop.f32.mrf.mxu1  ;;  %v13810_v11 = vld [vmem:[%s19489_s3 + $0xc44] ss:$16 sps:$4 sm:$0xff]  }
 0x2a3   : > { %v16769_v63 = vpop.f32.mrf.mxu0  ;;  %5390 = vmatprep.subr.bf16.mxu0 %v13792_v36  ;;  %v13807_v36 = vld [vmem:[%s19489_s3 + $0xf24] ss:$16 sps:$4 sm:$0xff]  }
 0x2a4   : > { %v16774_v41 = vadd.f32 %v3363_v48, %v3311_v46  ;;  %5462 = vmatpush2.bf16.msra.mxu1 %v13787_v30  ;;  %v4705_v46 = vshrl.u32 %v4535_v16, 16 }
 0x2a5   : > { %v3316_v7 = vpop.f32.mrf.mxu0  ;;  %4446 = vmatmul.mubr.bf16.gmra.mxu0 %v16484_v12  ;;  %5463 = vmatprep.subr.bf16.mxu1 %v13795_v8  ;;  %v16792_v12 = vld [vmem:[#allocation2 + $0x58] sm:$0xff] }
 0x2a6   : > { %v3317_v48 = vadd.f32 %v3316_v7, %v16306_v59  ;;  %5391 = vmatpush1.bf16.msra.mxu0 %v13790_v54  ;;  %5418 = vmatprep.mubr.bf16.mxu0 %v16782_v0  ;;  %v4539_v34 = vpack.c.bf16 %v4531_v15, %v16792_v12  ;;  %v4708_v54 = vshll.u32 %v4535_v16, 16  ;;  %v13811_v7 = vld [vmem:[%s19489_s3 + $0xf00] ss:$16 sps:$4 sm:$0xff]  }
 0x2a7   : > { %v3318_v1 = vpop.f32.mrf.mxu0  ;;  %5392 = vmatprep.subr.bf16.mxu0 %v13798_v55  ;;  %v13820_v16 = vld [vmem:[%s19489_s3 + $0xc00] ss:$16 sps:$4 sm:$0xff]  }
 0x2a8   : > { %v16798_v21 = vadd.f32 %v3369_v50, %v3317_v48  ;;  %v3319_v59 = vadd.f32 %v3318_v1, %v16315_v9  ;;  %5464 = vmatpush2.bf16.msra.mxu1 %v13793_v4  ;;  %v13802_v9 = vld [vmem:[%s19489_s3 + $0xc60] ss:$16 sps:$4 sm:$0xff]   ;;  %v4713_v3 = vshrl.u32 %v4539_v34, 16  ;;  %v4716_v30 = vshll.u32 %v4539_v34, 16  ;;  %v13813_v50 = vld [vmem:[%s19489_s3 + $0xf04] ss:$16 sps:$4 sm:$0xff]  }
 0x2a9   : > { %v3320_v29 = vpop.f32.mrf.mxu0  ;;  %5465 = vmatprep.subr.bf16.mxu1 %v13801_v31  ;;  %v13816_v4 = vld [vmem:[%s19489_s3 + $0xc24] ss:$16 sps:$4 sm:$0xff]   ;;  %v4707_v31 = vrot.slane %v4705_v46, 1  ;;  %v4710_v33 = vrot.slane %v4708_v54, 2  ;;  %v13819_v48 = vld [vmem:[%s19489_s3 + $0xeec] ss:$16 sps:$4 sm:$0xff]  }
 0x2aa   : > { %v16808_v14 = vadd.f32 %v3371_v18, %v3319_v59  ;;  %v3321_v22 = vadd.f32 %v3320_v29, %v16323_v45  ;;  %5393 = vmatpush1.bf16.msra.mxu0 %v13796_v56  ;;  %v13805_v45 = vld [vmem:[%s19489_s3 + $0xf20] ss:$16 sps:$4 sm:$0xff]   ;;  %v4715_v55 = vrot.slane %v4713_v3, 1  ;;  %v4718_v15 = vrot.slane %v4716_v30, 2  ;;  %v13822_v18 = vld [vmem:[%s19489_s3 + $0xc04] ss:$16 sps:$4 sm:$0xff]  }
 0x2ab   : > { %5394 = vmatprep.subr.bf16.mxu0 %v13804_v39  ;;  %v13814_v56 = vld [vmem:[%s19489_s3 + $0xc20] ss:$16 sps:$4 sm:$0xff]   ;;  %v4711_v1 = vor.u32 %v4710_v33, %v4707_v31  ;;  %v13817_v39 = vld [vmem:[%s19489_s3 + $0xee8] ss:$16 sps:$4 sm:$0xff]   ;;  %v13825_v59 = vld [vmem:[%s19489_s3 + $0xecc] ss:$16 sps:$4 sm:$0xff]  }
 0x2ac   : > { %v16817_v8 = vadd.f32 %v3373_v42, %v3321_v22  ;;  %5466 = vmatpush2.bf16.msra.mxu1 %v13799_v32  ;;  %v16840_v34 = vor.u32 %v4718_v15, %v4715_v55  ;;  %v13828_v29 = vld [vmem:[%s19489_s3 + $0xde4] ss:$16 sps:$4 sm:$0xff]   ;;  %v13831_v22 = vld [vmem:[%s19489_s3 + $0xeac] ss:$16 sps:$4 sm:$0xff]   ;;  %v13829_v30 = vld [vmem:[%s19489_s3 + $0xea8] ss:$16 sps:$4 sm:$0xff]  }
 0x2ad   : > { %5467 = vmatprep.subr.bf16.mxu1 %v13807_v36  ;;  %v13823_v36 = vld [vmem:[%s19489_s3 + $0xec8] ss:$16 sps:$4 sm:$0xff]   ;;  %v13834_v3 = vld [vmem:[%s19489_s3 + $0xdc4] ss:$16 sps:$4 sm:$0xff]   ;;  %v13837_v42 = vld [vmem:[%s19489_s3 + $0xe8c] ss:$16 sps:$4 sm:$0xff]  }
 0x2ae   : > { %19515 = vst [vmem:[#allocation10_spill] sm:$0xff] %v16817_v8  ;;  %5395 = vmatpush1.bf16.msra.mxu0 %v13802_v9  ;;  %v16853_v32 = vsel %vm919_vm3, %v4711_v1, %v16840_v34  ;;  %v13826_v9 = vld [vmem:[%s19489_s3 + $0xde0] ss:$16 sps:$4 sm:$0xff]   ;;  %v13835_v46 = vld [vmem:[%s19489_s3 + $0xe88] ss:$16 sps:$4 sm:$0xff]  }
 0x2af   : > { %5396 = vmatprep.subr.bf16.mxu0 %v13810_v11  ;;  %v13832_v11 = vld [vmem:[%s19489_s3 + $0xdc0] ss:$16 sps:$4 sm:$0xff]   ;;  %v13843_v54 = vld [vmem:[%s19489_s3 + $0xe6c] ss:$16 sps:$4 sm:$0xff]   ;;  %v13853_v1 = vld [vmem:[%s19489_s3 + $0xe28] ss:$16 sps:$4 sm:$0xff]  }
 0x2b0   : > { %5468 = vmatpush2.bf16.msra.mxu1 %v13805_v45  ;;  %v13840_v45 = vld [vmem:[%s19489_s3 + $0xda4] ss:$16 sps:$4 sm:$0xff]   ;;  %v13849_v55 = vld [vmem:[%s19489_s3 + $0xe4c] ss:$16 sps:$4 sm:$0xff]   ;;  %v13844_v15 = vld [vmem:[%s19489_s3 + $0xd80] ss:$16 sps:$4 sm:$0xff]  }
 0x2b1   : > { %5469 = vmatprep.subr.bf16.mxu1 %v13813_v50  ;;  %v13838_v50 = vld [vmem:[%s19489_s3 + $0xda0] ss:$16 sps:$4 sm:$0xff]   ;;  %v13855_v31 = vld [vmem:[%s19489_s3 + $0xe2c] ss:$16 sps:$4 sm:$0xff]  }
 0x2b2   : > { %5397 = vmatpush1.bf16.msra.mxu0 %v13808_v40  ;;  %v13846_v40 = vld [vmem:[%s19489_s3 + $0xd84] ss:$16 sps:$4 sm:$0xff]  }
 0x2b3   : > { %5398 = vmatprep.subr.bf16.mxu0 %v13816_v4  ;;  %v13852_v4 = vld [vmem:[%s19489_s3 + $0xd64] ss:$16 sps:$4 sm:$0xff]  }
 0x2b4   : > { %5470 = vmatpush2.bf16.msra.mxu1 %v13811_v7  ;;  %v13847_v7 = vld [vmem:[%s19489_s3 + $0xe48] ss:$16 sps:$4 sm:$0xff]   ;;  %v4529_v33 = vld [vmem:[#allocation2 + $0x30] sm:$0x7f] }
 0x2b5   : > { %5545 = vmatprep.subr.bf16.mxu1 %v13819_v48  ;;  %v13850_v48 = vld [vmem:[%s19489_s3 + $0xd60] ss:$16 sps:$4 sm:$0xff]  }
 0x2b6   : > { %5399 = vmatpush1.bf16.msra.mxu0 %v13814_v56  ;;  %v13858_v56 = vld [vmem:[%s19489_s3 + $0xd44] ss:$16 sps:$4 sm:$0xff]  }
 0x2b7   : > { %5472 = vmatmul.mubr.bf16.vlgmr.msra.gmra.mxu1 %v16853_v32  ;;  %5400 = vmatprep.subr.bf16.mxu0 %v13822_v18  ;;  %v4525_v18 = vld [vmem:[#allocation2 + $0x70] sm:$0xf8] }
 0x2b8   : > { %5481 = vmatprep.mubr.bf16.mxu1 %v16623_v6  ;;  %5546 = vmatpush1.bf16.msra.mxu1 %v13817_v39  ;;  %v16928_v39 = vld [vmem:[#allocation2 + $0x40] sm:$0xff] }
 0x2b9   : > { %5547 = vmatprep.subr.bf16.mxu1 %v13825_v59  ;;  %v4537_v59 = vpack.c.bf16 %v4529_v33, %v16928_v39 }
 0x2ba   : > { %5401 = vmatpush1.bf16.msra.mxu0 %v13820_v16  ;;  %v13861_v16 = vld [vmem:[%s19489_s3 + $0xe0c] ss:$16 sps:$4 sm:$0xff]  }
 0x2bb   : > { %5402 = vmatprep.subr.bf16.mxu0 %v13828_v29  ;;  %v13856_v29 = vld [vmem:[%s19489_s3 + $0xd40] ss:$16 sps:$4 sm:$0xff]  }
 0x2bc   : > { %5548 = vmatpush1.bf16.msra.mxu1 %v13823_v36  ;;  %v16937_v36 = vld [vmem:[#allocation2 + $0x20] sm:$0xff] }
 0x2bd   : > { %5549 = vmatprep.subr.bf16.mxu1 %v13831_v22  ;;  %v4533_v22 = vpack.c.bf16 %v16937_v36, %v4525_v18  ;;  %v13876_v18 = vld [vmem:[%s19489_s3 + $0xcec] ss:$16 sps:$4 sm:$0xff]  }
 0x2be   : > { %5403 = vmatpush2.bf16.msra.mxu0 %v13826_v9  ;;  %v13864_v9 = vld [vmem:[%s19489_s3 + $0xd24] ss:$16 sps:$4 sm:$0xff]  }
 0x2bf   : > { %5482 = vmatmul.mubr.bf16.gmra.mxu1 %v16840_v34  ;;  %5404 = vmatprep.subr.bf16.mxu0 %v13834_v3  ;;  %v13859_v3 = vld [vmem:[%s19489_s3 + $0xe08] ss:$16 sps:$4 sm:$0xff]  }
 0x2c0   : > { %5550 = vmatpush1.bf16.msra.mxu1 %v13829_v30  ;;  %5577 = vmatprep.mubr.bf16.mxu1 %v16637_v26  ;;  %v13841_v26 = vld [vmem:[%s19489_s3 + $0xe68] ss:$16 sps:$4 sm:$0xff]   ;;  %v4679_v30 = vshrl.u32 %v4537_v59, 16 }
 0x2c1   : > { %5551 = vmatprep.subr.bf16.mxu1 %v13837_v42  ;;  %v4682_v42 = vshll.u32 %v4537_v59, 16 }
 0x2c2   : > { %5405 = vmatpush2.bf16.msra.mxu0 %v13832_v11  ;;  %v16946_v11 = vpop.f32.mrf.mxu1 }
 0x2c3   : > { %5406 = vmatprep.subr.bf16.mxu0 %v13840_v45  ;;  %v13867_v45 = vld [vmem:[%s19489_s3 + $0xfec] ss:$16 sps:$4 sm:$0xff]  }
 0x2c4   : > { %5552 = vmatpush1.bf16.msra.mxu1 %v13835_v46  ;;  %v13862_v46 = vld [vmem:[%s19489_s3 + $0xd20] ss:$16 sps:$4 sm:$0xff]  }
 0x2c5   : > { %5553 = vmatprep.subr.bf16.mxu1 %v13843_v54  ;;  %v4671_v54 = vshrl.u32 %v4533_v22, 16 }
 0x2c6   : > { %5407 = vmatpush2.bf16.msra.mxu0 %v13838_v50  ;;  %v4674_v50 = vshll.u32 %v4533_v22, 16  ;;  %v13874_v22 = vld [vmem:[%s19489_s3 + $0xce8] ss:$16 sps:$4 sm:$0xff]  }
 0x2c7   : > { %5408 = vmatprep.subr.bf16.mxu0 %v13846_v40  ;;  %v3465_v40 = vpop.f32.mrf.mxu1  ;;  %v4673_v33 = vrot.slane %v4671_v54, 1  ;;  %v13885_v54 = vld [vmem:[%s19489_s3 + $0xf8c] ss:$16 sps:$4 sm:$0xff]  }
 0x2c8   : > { %5554 = vmatpush1.bf16.msra.mxu1 %v13841_v26  ;;  %v13870_v26 = vld [vmem:[%s19489_s3 + $0xd04] ss:$16 sps:$4 sm:$0xff]  }
 0x2c9   : > { %5555 = vmatprep.subr.bf16.mxu1 %v13849_v55  ;;  %v13865_v55 = vld [vmem:[%s19489_s3 + $0xfe8] ss:$16 sps:$4 sm:$0xff]  }
 0x2ca   : > { %5409 = vmatpush2.bf16.msra.mxu0 %v13844_v15  ;;  %v4681_v15 = vrot.slane %v4679_v30, 1  ;;  %v13882_v30 = vld [vmem:[%s19489_s3 + $0xccc] ss:$16 sps:$4 sm:$0xff]  }
 0x2cb   : > { %5410 = vmatprep.subr.bf16.mxu0 %v13852_v4  ;;  %v4684_v4 = vrot.slane %v4682_v42, 2 }
 0x2cc   : > { %5556 = vmatpush1.bf16.msra.mxu1 %v13847_v7  ;;  %v13873_v7 = vld [vmem:[%s19489_s3 + $0xfcc] ss:$16 sps:$4 sm:$0xff]  }
 0x2cd   : > { %5557 = vmatprep.subr.bf16.mxu1 %v13855_v31  ;;  %v13868_v31 = vld [vmem:[%s19489_s3 + $0xd00] ss:$16 sps:$4 sm:$0xff]   ;;  %v16972_v59 = vor.u32 %v4684_v4, %v4681_v15  ;;  %v13888_v4 = vld [vmem:[%s19489_s3 + $0xcac] ss:$16 sps:$4 sm:$0xff]  }
 0x2ce   : > { %5411 = vmatpush2.bf16.msra.mxu0 %v13850_v48  ;;  %v4676_v48 = vrot.slane %v4674_v50, 2 }
 0x2cf   : > { %5412 = vmatprep.subr.bf16.mxu0 %v13858_v56  ;;  %v3467_v56 = vpop.f32.mrf.mxu1 }
 0x2d0   : > { %5558 = vmatpush1.bf16.msra.mxu1 %v13853_v1  ;;  %v13871_v1 = vld [vmem:[%s19489_s3 + $0xfc8] ss:$16 sps:$4 sm:$0xff]  }
 0x2d1   : > { %5559 = vmatprep.subr.bf16.mxu1 %v13861_v16  ;;  %v13879_v16 = vld [vmem:[%s19489_s3 + $0xfac] ss:$16 sps:$4 sm:$0xff]  }
 0x2d2   : > { %5413 = vmatpush2.bf16.msra.mxu0 %v13856_v29  ;;  %v4677_v29 = vor.u32 %v4676_v48, %v4673_v33  ;;  %v13891_v48 = vld [vmem:[%s19489_s3 + $0xf6c] ss:$16 sps:$4 sm:$0xff]  }
 0x2d3   : > { %5414 = vmatprep.subr.bf16.mxu0 %v13864_v9  ;;  %v16980_v9 = vpop.f32.mrf.mxu0 }
 0x2d4   : > { %5560 = vmatpush1.bf16.msra.mxu1 %v13859_v3  ;;  %v3469_v3 = vpop.f32.mrf.mxu1  ;;  %v16987_v42 = vsel %vm919_vm3, %v4677_v29, %v16972_v59  ;;  %v13894_v29 = vld [vmem:[%s19489_s3 + $0xc8c] ss:$16 sps:$4 sm:$0xff]  }
 0x2d5   : > { %5561 = vmatprep.subr.bf16.mxu1 %v13867_v45  ;;  %v13877_v45 = vld [vmem:[%s19489_s3 + $0xfa8] ss:$16 sps:$4 sm:$0xff]  }
 0x2d6   : > { %5415 = vmatpush2.bf16.msra.mxu0 %v13862_v46 }
 0x2d7   : > { %5416 = vmatprep.subr.bf16.mxu0 %v13870_v26  ;;  %v13880_v26 = vld [vmem:[%s19489_s3 + $0xcc8] ss:$16 sps:$4 sm:$0xff]  }
 0x2d8   : > { %5562 = vmatpush2.bf16.msra.mxu1 %v13865_v55  ;;  %v17001_v55 = vpop.f32.mrf.mxu1 }
 0x2d9   : > { %5563 = vmatprep.subr.bf16.mxu1 %v13873_v7 }
 0x2da   : > { %5417 = vmatpush2.bf16.msra.mxu0 %v13868_v31 }
 0x2db   : > { %5492 = vmatprep.subr.bf16.mxu0 %v13876_v18 }
 0x2dc   : > { %5564 = vmatpush2.bf16.msra.mxu1 %v13871_v1 }
 0x2dd   : > { %v3412_v46 = vpop.f32.mrf.mxu0  ;;  %5419 = vmatmul.mubr.bf16.vlgmr.msra.gmra.mxu0 %v16987_v42  ;;  %5565 = vmatprep.subr.bf16.mxu1 %v13879_v16 }
 0x2de   : > { %v3413_v50 = vadd.f32 %v3412_v46, %v16510_v44  ;;  %5428 = vmatprep.mubr.bf16.mxu0 %v16758_v47  ;;  %5493 = vmatpush1.bf16.msra.mxu0 %v13874_v22  ;;  %v13883_v44 = vld [vmem:[%s19489_s3 + $0xf88] ss:$16 sps:$4 sm:$0xff]  }
 0x2df   : > { %v3414_v15 = vpop.f32.mrf.mxu0  ;;  %5494 = vmatprep.subr.bf16.mxu0 %v13882_v30  ;;  %v13897_v30 = vld [vmem:[%s19489_s3 + $0xf4c] ss:$16 sps:$4 sm:$0xff]  }
 0x2e0   : > { %v17006_v7 = vadd.f32 %v3465_v40, %v3413_v50  ;;  %v3415_v31 = vadd.f32 %v3414_v15, %v16519_v53  ;;  %5566 = vmatpush2.bf16.msra.mxu1 %v13877_v45  ;;  %v13886_v53 = vld [vmem:[%s19489_s3 + $0xca8] ss:$16 sps:$4 sm:$0xff]   ;;  %v3475_v40 = vpop.f32.mrf.mxu1  ;;  %v13900_v50 = vld [vmem:[%s19489_s3 + $0xc6c] ss:$16 sps:$4 sm:$0xff]  }
 0x2e1   : > { %v3416_v33 = vpop.f32.mrf.mxu0  ;;  %5567 = vmatprep.subr.bf16.mxu1 %v13885_v54 }
 0x2e2   : > { %v17015_v18 = vadd.f32 %v3467_v56, %v3415_v31  ;;  %v3417_v1 = vadd.f32 %v3416_v33, %v16527_v24  ;;  %5495 = vmatpush1.bf16.msra.mxu0 %v13880_v26  ;;  %v13889_v24 = vld [vmem:[%s19489_s3 + $0xf68] ss:$16 sps:$4 sm:$0xff]   ;;  %v3477_v46 = vpop.f32.mrf.mxu1 }
 0x2e3   : > { %v17021_v16 = vpop.f32.mrf.mxu0  ;;  %5496 = vmatprep.subr.bf16.mxu0 %v13888_v4  ;;  %v13903_v4 = vld [vmem:[%s19489_s3 + $0xf2c] ss:$16 sps:$4 sm:$0xff]  }
 0x2e4   : > { %v17026_v22 = vadd.f32 %v3469_v3, %v3417_v1  ;;  %5568 = vmatpush2.bf16.msra.mxu1 %v13883_v44  ;;  %v13892_v3 = vld [vmem:[%s19489_s3 + $0xc88] ss:$16 sps:$4 sm:$0xff]   ;;  %v3479_v33 = vpop.f32.mrf.mxu1  ;;  %v3419_v8 = vadd.f32 %v17021_v16, %v2620_v57 }
 0x2e5   : > { %v3422_v56 = vpop.f32.mrf.mxu0  ;;  %5429 = vmatmul.mubr.bf16.gmra.mxu0 %v16972_v59  ;;  %5569 = vmatprep.subr.bf16.mxu1 %v13891_v48  ;;  %v13906_v48 = vld [vmem:[%s19489_s3 + $0xc4c] ss:$16 sps:$4 sm:$0xff]  }
 0x2e6   : > { %v3423_v45 = vadd.f32 %v3422_v56, %v16544_v13  ;;  %5497 = vmatpush1.bf16.msra.mxu0 %v13886_v53  ;;  %5524 = vmatprep.mubr.bf16.mxu0 %v16782_v0  ;;  %v13895_v13 = vld [vmem:[%s19489_s3 + $0xf48] ss:$16 sps:$4 sm:$0xff]   ;;  %v13915_v56 = vld [vmem:[%s19489_s3 + $0x12e4] ss:$16 sps:$4 sm:$0xff]  }
 0x2e7   : > { %v3424_v54 = vpop.f32.mrf.mxu0  ;;  %5498 = vmatprep.subr.bf16.mxu0 %v13894_v29  ;;  %v13901_v53 = vld [vmem:[%s19489_s3 + $0xf28] ss:$16 sps:$4 sm:$0xff]   ;;  %v13912_v29 = vld [vmem:[%s19489_s3 + $0xc2c] ss:$16 sps:$4 sm:$0xff]  }
 0x2e8   : > { %v17043_v26 = vadd.f32 %v3475_v40, %v3423_v45  ;;  %v3425_v15 = vadd.f32 %v3424_v54, %v16553_v51  ;;  %5570 = vmatpush2.bf16.msra.mxu1 %v13889_v24  ;;  %v13898_v51 = vld [vmem:[%s19489_s3 + $0xc68] ss:$16 sps:$4 sm:$0xff]   ;;  %v13918_v45 = vld [vmem:[%s19489_s3 + $0xc0c] ss:$16 sps:$4 sm:$0xff]   ;;  %v13921_v54 = vld [vmem:[%s19489_s3 + $0x12c4] ss:$16 sps:$4 sm:$0xff]  }
 0x2e9   : > { %v3426_v0 = vpop.f32.mrf.mxu0  ;;  %5571 = vmatprep.subr.bf16.mxu1 %v13897_v30  ;;  %v13904_v40 = vld [vmem:[%s19489_s3 + $0xc48] ss:$16 sps:$4 sm:$0xff]  }
 0x2ea   : > { %v17052_v31 = vadd.f32 %v3477_v46, %v3425_v15  ;;  %v3427_v44 = vadd.f32 %v3426_v0, %v16561_v58  ;;  %5499 = vmatpush1.bf16.msra.mxu0 %v13892_v3  ;;  %v13909_v58 = vld [vmem:[%s19489_s3 + $0xf0c] ss:$16 sps:$4 sm:$0xff]   ;;  %v13907_v24 = vld [vmem:[%s19489_s3 + $0xf08] ss:$16 sps:$4 sm:$0xff]   ;;  %v13913_v3 = vld [vmem:[%s19489_s3 + $0x12e0] ss:$16 sps:$4 sm:$0xff]  }
 0x2eb   : > { %5500 = vmatprep.subr.bf16.mxu0 %v13900_v50  ;;  %v13910_v30 = vld [vmem:[%s19489_s3 + $0xc28] ss:$16 sps:$4 sm:$0xff]   ;;  %v5617_v15 = vld [vmem:[#allocation2 + $0x18] sm:$0xf0] }
 0x2ec   : > { %v17061_v1 = vadd.f32 %v3479_v33, %v3427_v44  ;;  %5572 = vmatpush2.bf16.msra.mxu1 %v13895_v13  ;;  %v5621_v46 = vld [vmem:[#allocation2 + $0x28] sm:$0xff]  ;;  %v13927_v44 = vld [vmem:[%s19489_s3 + $0x12a4] ss:$16 sps:$4 sm:$0xff]  }
 0x2ed   : > { %5573 = vmatprep.subr.bf16.mxu1 %v13903_v4  ;;  %v13916_v50 = vld [vmem:[%s19489_s3 + $0xc08] ss:$16 sps:$4 sm:$0xff]   ;;  %v13924_v13 = vld [vmem:[%s19489_s3 + $0xdec] ss:$16 sps:$4 sm:$0xff]   ;;  %v5629_v0 = vpack.c.bf16 %v5621_v46, %v16581_v43  ;;  %v13919_v4 = vld [vmem:[%s19489_s3 + $0x12c0] ss:$16 sps:$4 sm:$0xff]  }
 0x2ee   : > { %5501 = vmatpush1.bf16.msra.mxu0 %v13898_v51  ;;  %v13922_v33 = vld [vmem:[%s19489_s3 + $0xde8] ss:$16 sps:$4 sm:$0xff]   ;;  %v13930_v43 = vld [vmem:[%s19489_s3 + $0xdcc] ss:$16 sps:$4 sm:$0xff]   ;;  %v13945_v46 = vld [vmem:[%s19489_s3 + $0x1244] ss:$16 sps:$4 sm:$0xff]  }
 0x2ef   : > { %5502 = vmatprep.subr.bf16.mxu0 %v13906_v48  ;;  %v13925_v48 = vld [vmem:[%s19489_s3 + $0x12a0] ss:$16 sps:$4 sm:$0xff]  }
 0x2f0   : > { %5574 = vmatpush2.bf16.msra.mxu1 %v13901_v53 }
 0x2f1   : > { %5575 = vmatprep.subr.bf16.mxu1 %v13909_v58  ;;  %v13933_v58 = vld [vmem:[%s19489_s3 + $0x1284] ss:$16 sps:$4 sm:$0xff]  }
 0x2f2   : > { %5503 = vmatpush1.bf16.msra.mxu0 %v13904_v40  ;;  %v13928_v40 = vld [vmem:[%s19489_s3 + $0xdc8] ss:$16 sps:$4 sm:$0xff]  }
 0x2f3   : > { %5504 = vmatprep.subr.bf16.mxu0 %v13912_v29 }
 0x2f4   : > { %5576 = vmatpush2.bf16.msra.mxu1 %v13907_v24  ;;  %v13936_v24 = vld [vmem:[%s19489_s3 + $0xdac] ss:$16 sps:$4 sm:$0xff]  }
 0x2f5   : > { %6480 = vmatprep.subr.bf16.mxu1 %v13915_v56  ;;  %v13931_v56 = vld [vmem:[%s19489_s3 + $0x1280] ss:$16 sps:$4 sm:$0xff]  }
 0x2f6   : > { %5505 = vmatpush1.bf16.msra.mxu0 %v13910_v30  ;;  %v13934_v30 = vld [vmem:[%s19489_s3 + $0xda8] ss:$16 sps:$4 sm:$0xff]  }
 0x2f7   : > { %5578 = vmatmul.mubr.bf16.vlgmr.msra.gmra.mxu1 %v16853_v32  ;;  %5506 = vmatprep.subr.bf16.mxu0 %v13918_v45  ;;  %v14782_v32 = vld [vmem:[#allocation2 + $0x78] sm:$0xff] }
 0x2f8   : > { %5587 = vmatprep.mubr.bf16.mxu1 %v16623_v6  ;;  %6481 = vmatpush1.bf16.msra.mxu1 %v13913_v3  ;;  %v5625_v51 = vpack.c.bf16 %v14782_v32, %v5617_v15  ;;  %v17114_v6 = vrot.slane %v5629_v0, 2  ;;  %v13942_v45 = vld [vmem:[%s19489_s3 + $0xd8c] ss:$16 sps:$4 sm:$0xff]   ;;  %v13937_v3 = vld [vmem:[%s19489_s3 + $0x1260] ss:$16 sps:$4 sm:$0xff]  }
 0x2f9   : > { %6482 = vmatprep.subr.bf16.mxu1 %v13921_v54  ;;  %v13940_v54 = vld [vmem:[%s19489_s3 + $0xd88] ss:$16 sps:$4 sm:$0xff]   ;;  %v13943_v15 = vld [vmem:[%s19489_s3 + $0x1240] ss:$16 sps:$4 sm:$0xff]   ;;  %v13957_v32 = vld [vmem:[%s19489_s3 + $0x1204] ss:$16 sps:$4 sm:$0xff]  }
 0x2fa   : > { %5507 = vmatpush1.bf16.msra.mxu0 %v13916_v50  ;;  %v5776_v53 = vrot.slane %v5625_v51, 2  ;;  %v13948_v50 = vld [vmem:[%s19489_s3 + $0xd6c] ss:$16 sps:$4 sm:$0xff]   ;;  %v13946_v0 = vld [vmem:[%s19489_s3 + $0xd68] ss:$16 sps:$4 sm:$0xff]  }
 0x2fb   : > { %5508 = vmatprep.subr.bf16.mxu0 %v13924_v13  ;;  %v13951_v13 = vld [vmem:[%s19489_s3 + $0x1224] ss:$16 sps:$4 sm:$0xff]   ;;  %v13952_v51 = vld [vmem:[%s19489_s3 + $0xd48] ss:$16 sps:$4 sm:$0xff]  }
 0x2fc   : > { %6483 = vmatpush1.bf16.msra.mxu1 %v13919_v4  ;;  %v17128_v29 = vsel %vm1104_vm4, %v5776_v53, %v17114_v6  ;;  %v13954_v4 = vld [vmem:[%s19489_s3 + $0xd4c] ss:$16 sps:$4 sm:$0xff]   ;;  %v13963_v53 = vld [vmem:[%s19489_s3 + $0x13e4] ss:$16 sps:$4 sm:$0xff]  }
 0x2fd   : > { %6484 = vmatprep.subr.bf16.mxu1 %v13927_v44  ;;  %v13949_v44 = vld [vmem:[%s19489_s3 + $0x1220] ss:$16 sps:$4 sm:$0xff]  }
 0x2fe   : > { %5509 = vmatpush2.bf16.msra.mxu0 %v13922_v33  ;;  %v13960_v33 = vld [vmem:[%s19489_s3 + $0xd2c] ss:$16 sps:$4 sm:$0xff]  }
 0x2ff   : > { %5588 = vmatmul.mubr.bf16.gmra.mxu1 %v16840_v34  ;;  %5510 = vmatprep.subr.bf16.mxu0 %v13930_v43  ;;  %v13939_v34 = vld [vmem:[%s19489_s3 + $0x1264] ss:$16 sps:$4 sm:$0xff]   ;;  %v13955_v43 = vld [vmem:[%s19489_s3 + $0x1200] ss:$16 sps:$4 sm:$0xff]  }
 0x300   : > { %6485 = vmatpush1.bf16.msra.mxu1 %v13925_v48  ;;  %6512 = vmatprep.mubr.bf16.mxu1 %v17128_v29  ;;  %v17185_v48 = vpop.f32.mrf.mxu1 }
 0x301   : > { %6486 = vmatprep.subr.bf16.mxu1 %v13933_v58  ;;  %v13958_v58 = vld [vmem:[%s19489_s3 + $0xd28] ss:$16 sps:$4 sm:$0xff]  }
 0x302   : > { %5511 = vmatpush2.bf16.msra.mxu0 %v13928_v40  ;;  %v4384_v40 = vpop.f32.mrf.mxu1 }
 0x303   : > { %5512 = vmatprep.subr.bf16.mxu0 %v13936_v24  ;;  %v13966_v24 = vld [vmem:[%s19489_s3 + $0xd0c] ss:$16 sps:$4 sm:$0xff]  }
 0x304   : > { %6487 = vmatpush1.bf16.msra.mxu1 %v13931_v56  ;;  %v13961_v56 = vld [vmem:[%s19489_s3 + $0x13e0] ss:$16 sps:$4 sm:$0xff]  }
 0x305   : > { %6488 = vmatprep.subr.bf16.mxu1 %v13939_v34  ;;  %v13969_v34 = vld [vmem:[%s19489_s3 + $0x13c4] ss:$16 sps:$4 sm:$0xff]  }
 0x306   : > { %5513 = vmatpush2.bf16.msra.mxu0 %v13934_v30  ;;  %v13964_v30 = vld [vmem:[%s19489_s3 + $0xd08] ss:$16 sps:$4 sm:$0xff]  }
 0x307   : > { %5514 = vmatprep.subr.bf16.mxu0 %v13942_v45  ;;  %v4386_v45 = vpop.f32.mrf.mxu1 }
 0x308   : > { %6489 = vmatpush1.bf16.msra.mxu1 %v13937_v3  ;;  %v13972_v3 = vld [vmem:[%s19489_s3 + $0x10e4] ss:$16 sps:$4 sm:$0xff]  }
 0x309   : > { %6490 = vmatprep.subr.bf16.mxu1 %v13945_v46  ;;  %v13967_v46 = vld [vmem:[%s19489_s3 + $0x13c0] ss:$16 sps:$4 sm:$0xff]  }
 0x30a   : > { %5515 = vmatpush2.bf16.msra.mxu0 %v13940_v54  ;;  %v13975_v54 = vld [vmem:[%s19489_s3 + $0x13a4] ss:$16 sps:$4 sm:$0xff]  }
 0x30b   : > { %5516 = vmatprep.subr.bf16.mxu0 %v13948_v50  ;;  %v13970_v50 = vld [vmem:[%s19489_s3 + $0x10e0] ss:$16 sps:$4 sm:$0xff]  }
 0x30c   : > { %6491 = vmatpush1.bf16.msra.mxu1 %v13943_v15  ;;  %v5619_v15 = vld [vmem:[#allocation2 + $0x48] sm:$0xff] }
 0x30d   : > { %6492 = vmatprep.subr.bf16.mxu1 %v13951_v13  ;;  %v17217_v13 = vpop.f32.mrf.mxu0 }
 0x30e   : > { %5517 = vmatpush2.bf16.msra.mxu0 %v13946_v0  ;;  %v4388_v0 = vpop.f32.mrf.mxu1 }
 0x30f   : > { %5518 = vmatprep.subr.bf16.mxu0 %v13954_v4  ;;  %v13978_v4 = vld [vmem:[%s19489_s3 + $0x10c4] ss:$16 sps:$4 sm:$0xff]  }
 0x310   : > { %6493 = vmatpush1.bf16.msra.mxu1 %v13949_v44  ;;  %v13973_v44 = vld [vmem:[%s19489_s3 + $0x13a0] ss:$16 sps:$4 sm:$0xff]  }
 0x311   : > { %6494 = vmatprep.subr.bf16.mxu1 %v13957_v32  ;;  %v5615_v32 = vld [vmem:[#allocation2] sm:$0xf0] }
 0x312   : > { %5519 = vmatpush2.bf16.msra.mxu0 %v13952_v51 }
 0x313   : > { %5520 = vmatprep.subr.bf16.mxu0 %v13960_v33  ;;  %v13981_v33 = vld [vmem:[%s19489_s3 + $0x1384] ss:$16 sps:$4 sm:$0xff]  }
 0x314   : > { %6495 = vmatpush1.bf16.msra.mxu1 %v13955_v43  ;;  %v5627_v43 = vpack.c.bf16 %v5619_v15, %v16711_v5 }
 0x315   : > { %6496 = vmatprep.subr.bf16.mxu1 %v13963_v53 }
 0x316   : > { %5521 = vmatpush2.bf16.msra.mxu0 %v13958_v58  ;;  %v13976_v58 = vld [vmem:[%s19489_s3 + $0x10c0] ss:$16 sps:$4 sm:$0xff]  }
 0x317   : > { %5522 = vmatprep.subr.bf16.mxu0 %v13966_v24  ;;  %v4390_v24 = vpop.f32.mrf.mxu1 }
 0x318   : > { %6497 = vmatpush2.bf16.msra.mxu1 %v13961_v56 }
 0x319   : > { %6498 = vmatprep.subr.bf16.mxu1 %v13969_v34  ;;  %v14783_v34 = vld [vmem:[#allocation2 + $0x60] sm:$0xff] }
 0x31a   : > { %5523 = vmatpush2.bf16.msra.mxu0 %v13964_v30  ;;  %v5623_v30 = vpack.c.bf16 %v14783_v34, %v5615_v32  ;;  %v13990_v32 = vld [vmem:[%s19489_s3 + $0x1084] ss:$16 sps:$4 sm:$0xff]  }
 0x31b   : > { %6427 = vmatprep.subr.bf16.mxu0 %v13972_v3 }
 0x31c   : > { %6499 = vmatpush2.bf16.msra.mxu1 %v13967_v46  ;;  %v17243_v46 = vrot.slane %v5627_v43, 2 }
 0x31d   : > { %v4331_v51 = vpop.f32.mrf.mxu0  ;;  %5525 = vmatmul.mubr.bf16.vlgmr.msra.gmra.mxu0 %v16987_v42  ;;  %6500 = vmatprep.subr.bf16.mxu1 %v13975_v54  ;;  %v13984_v42 = vld [vmem:[%s19489_s3 + $0x10a4] ss:$16 sps:$4 sm:$0xff]  }
 0x31e   : > { %v4385_v53 = vadd.f32 %v4384_v40, %v4331_v51  ;;  %5534 = vmatprep.mubr.bf16.mxu0 %v16758_v47  ;;  %6428 = vmatpush1.bf16.msra.mxu0 %v13970_v50  ;;  %v13979_v47 = vld [vmem:[%s19489_s3 + $0x1380] ss:$16 sps:$4 sm:$0xff]   ;;  %v13987_v54 = vld [vmem:[%s19489_s3 + $0x1364] ss:$16 sps:$4 sm:$0xff]  }
 0x31f   : > { %v4333_v56 = vpop.f32.mrf.mxu0  ;;  %6429 = vmatprep.subr.bf16.mxu0 %v13978_v4 }
 0x320   : > { %v17238_v3 = vadd.f32 %v4385_v53, %v16752_v61  ;;  %v4387_v5 = vadd.f32 %v4386_v45, %v4333_v56  ;;  %6501 = vmatpush2.bf16.msra.mxu1 %v13973_v44  ;;  %v13982_v61 = vld [vmem:[%s19489_s3 + $0x10a0] ss:$16 sps:$4 sm:$0xff]   ;;  %v4394_v45 = vpop.f32.mrf.mxu1  ;;  %v5770_v44 = vrot.slane %v5623_v30, 2 }
 0x321   : > { %v4335_v40 = vpop.f32.mrf.mxu0  ;;  %6502 = vmatprep.subr.bf16.mxu1 %v13981_v33  ;;  %v13991_v30 = vld [vmem:[%s19489_s3 + $0x1340] ss:$16 sps:$4 sm:$0xff]  }
 0x322   : > { %v17249_v50 = vadd.f32 %v4387_v5, %v16763_v17  ;;  %v4389_v15 = vadd.f32 %v4388_v0, %v4335_v40  ;;  %6430 = vmatpush1.bf16.msra.mxu0 %v13976_v58  ;;  %v13985_v17 = vld [vmem:[%s19489_s3 + $0x1360] ss:$16 sps:$4 sm:$0xff]   ;;  %v17268_v43 = vsel %vm1104_vm4, %v5770_v44, %v17243_v46  ;;  %v13999_v5 = vld [vmem:[%s19489_s3 + $0x1324] ss:$16 sps:$4 sm:$0xff]  }
 0x323   : > { %v4337_v4 = vpop.f32.mrf.mxu0  ;;  %6431 = vmatprep.subr.bf16.mxu0 %v13984_v42  ;;  %v13988_v58 = vld [vmem:[%s19489_s3 + $0x1080] ss:$16 sps:$4 sm:$0xff]   ;;  %v14002_v40 = vld [vmem:[%s19489_s3 + $0x1044] ss:$16 sps:$4 sm:$0xff]  }
 0x324   : > { %v17258_v51 = vadd.f32 %v4389_v15, %v16774_v41  ;;  %v17260_v33 = vadd.f32 %v4390_v24, %v4337_v4  ;;  %6503 = vmatpush2.bf16.msra.mxu1 %v13979_v47  ;;  %v13993_v41 = vld [vmem:[%s19489_s3 + $0x1344] ss:$16 sps:$4 sm:$0xff]   ;;  %v4396_v24 = vpop.f32.mrf.mxu1  ;;  %v13997_v15 = vld [vmem:[%s19489_s3 + $0x1320] ss:$16 sps:$4 sm:$0xff]  }
 0x325   : > { %v4341_v0 = vpop.f32.mrf.mxu0  ;;  %5535 = vmatmul.mubr.bf16.gmra.mxu0 %v16972_v59  ;;  %6504 = vmatprep.subr.bf16.mxu1 %v13987_v54  ;;  %v13996_v59 = vld [vmem:[%s19489_s3 + $0x1064] ss:$16 sps:$4 sm:$0xff]   ;;  %v5620_v54 = vld [vmem:[#allocation2 + $0x8] sm:$0xff] }
 0x326   : > { %v4395_v53 = vadd.f32 %v4394_v45, %v4341_v0  ;;  %6432 = vmatpush1.bf16.msra.mxu0 %v13982_v61  ;;  %6459 = vmatprep.mubr.bf16.mxu0 %v17268_v43  ;;  %v5616_v61 = vld [vmem:[#allocation2 + $0x38] sm:$0xf0]  ;;  %v14000_v45 = vld [vmem:[%s19489_s3 + $0x1040] ss:$16 sps:$4 sm:$0xff]   ;;  %v5628_v4 = vpack.c.bf16 %v5620_v54, %v16792_v12  ;;  %v14008_v44 = vld [vmem:[%s19489_s3 + $0x1024] ss:$16 sps:$4 sm:$0xff]  }
 0x327   : > { %v4343_v56 = vpop.f32.mrf.mxu0  ;;  %6433 = vmatprep.subr.bf16.mxu0 %v13990_v32  ;;  %v14003_v32 = vld [vmem:[%s19489_s3 + $0x1300] ss:$16 sps:$4 sm:$0xff]  }
 0x328   : > { %v17281_v42 = vadd.f32 %v4395_v53, %v16798_v21  ;;  %v4397_v34 = vadd.f32 %v4396_v24, %v4343_v56  ;;  %6505 = vmatpush2.bf16.msra.mxu1 %v13985_v17  ;;  %v13994_v21 = vld [vmem:[%s19489_s3 + $0x1060] ss:$16 sps:$4 sm:$0xff]   ;;  %v17320_v53 = vrot.slane %v5628_v4, 2  ;;  %v14009_v56 = vld [vmem:[%s19489_s3 + $0x12e8] ss:$16 sps:$4 sm:$0xff]  }
 0x329   : > { %6506 = vmatprep.subr.bf16.mxu1 %v13993_v41  ;;  %v14784_v17 = vld [vmem:[#allocation2 + $0x10] sm:$0xff]  ;;  %v14011_v41 = vld [vmem:[%s19489_s3 + $0x12ec] ss:$16 sps:$4 sm:$0xff]  }
 0x32a   : > { %19516 = vst [vmem:[#allocation11_spill] sm:$0xff] %v17281_v42  ;;  %v17290_v47 = vadd.f32 %v4397_v34, %v16808_v14  ;;  %6434 = vmatpush1.bf16.msra.mxu0 %v13988_v58  ;;  %v14005_v14 = vld [vmem:[%s19489_s3 + $0x1304] ss:$16 sps:$4 sm:$0xff]   ;;  %v5624_v0 = vpack.c.bf16 %v14784_v17, %v5616_v61  ;;  %v14006_v12 = vld [vmem:[%s19489_s3 + $0x1020] ss:$16 sps:$4 sm:$0xff]  }
 0x32b   : > { %6435 = vmatprep.subr.bf16.mxu0 %v13996_v59  ;;  %v14014_v58 = vld [vmem:[%s19489_s3 + $0x1004] ss:$16 sps:$4 sm:$0xff]   ;;  %v14017_v59 = vld [vmem:[%s19489_s3 + $0x12cc] ss:$16 sps:$4 sm:$0xff]   ;;  %v14018_v54 = vld [vmem:[%s19489_s3 + $0x11e0] ss:$16 sps:$4 sm:$0xff]  }
 0x32c   : > { %19517 = vst [vmem:[#allocation12_spill] sm:$0xff] %v17290_v47  ;;  %6507 = vmatpush2.bf16.msra.mxu1 %v13991_v30  ;;  %v5773_v24 = vrot.slane %v5624_v0, 2  ;;  %v14012_v30 = vld [vmem:[%s19489_s3 + $0x1000] ss:$16 sps:$4 sm:$0xff]   ;;  %v14029_v61 = vld [vmem:[%s19489_s3 + $0x128c] ss:$16 sps:$4 sm:$0xff]  }
 0x32d   : > { %6508 = vmatprep.subr.bf16.mxu1 %v13999_v5  ;;  %v14020_v5 = vld [vmem:[%s19489_s3 + $0x11e4] ss:$16 sps:$4 sm:$0xff]   ;;  %v14030_v17 = vld [vmem:[%s19489_s3 + $0x11a0] ss:$16 sps:$4 sm:$0xff]  }
 0x32e   : > { %6436 = vmatpush1.bf16.msra.mxu0 %v13994_v21  ;;  %v17333_v34 = vsel %vm1104_vm4, %v5773_v24, %v17320_v53  ;;  %v14015_v21 = vld [vmem:[%s19489_s3 + $0x12c8] ss:$16 sps:$4 sm:$0xff]   ;;  %v14032_v4 = vld [vmem:[%s19489_s3 + $0x11a4] ss:$16 sps:$4 sm:$0xff]  }
 0x32f   : > { %6437 = vmatprep.subr.bf16.mxu0 %v14002_v40  ;;  %v14023_v40 = vld [vmem:[%s19489_s3 + $0x12ac] ss:$16 sps:$4 sm:$0xff]   ;;  %v14038_v0 = vld [vmem:[%s19489_s3 + $0x1184] ss:$16 sps:$4 sm:$0xff]   ;;  %v14039_v24 = vld [vmem:[%s19489_s3 + $0x1248] ss:$16 sps:$4 sm:$0xff]  }
 0x330   : > { %6509 = vmatpush2.bf16.msra.mxu1 %v13997_v15  ;;  %v14026_v15 = vld [vmem:[%s19489_s3 + $0x11c4] ss:$16 sps:$4 sm:$0xff]  }
 0x331   : > { %6510 = vmatprep.subr.bf16.mxu1 %v14005_v14  ;;  %v14021_v14 = vld [vmem:[%s19489_s3 + $0x12a8] ss:$16 sps:$4 sm:$0xff]  }
 0x332   : > { %6438 = vmatpush1.bf16.msra.mxu0 %v14000_v45  ;;  %v14024_v45 = vld [vmem:[%s19489_s3 + $0x11c0] ss:$16 sps:$4 sm:$0xff]  }
 0x333   : > { %6439 = vmatprep.subr.bf16.mxu0 %v14008_v44  ;;  %v14027_v44 = vld [vmem:[%s19489_s3 + $0x1288] ss:$16 sps:$4 sm:$0xff]  }
 0x334   : > { %6511 = vmatpush2.bf16.msra.mxu1 %v14003_v32  ;;  %v14035_v32 = vld [vmem:[%s19489_s3 + $0x126c] ss:$16 sps:$4 sm:$0xff]  }
 0x335   : > { %6586 = vmatprep.subr.bf16.mxu1 %v14011_v41  ;;  %v14041_v41 = vld [vmem:[%s19489_s3 + $0x124c] ss:$16 sps:$4 sm:$0xff]  }
 0x336   : > { %6440 = vmatpush1.bf16.msra.mxu0 %v14006_v12  ;;  %v14036_v12 = vld [vmem:[%s19489_s3 + $0x1180] ss:$16 sps:$4 sm:$0xff]  }
 0x337   : > { %6513 = vmatmul.mubr.bf16.vlgmr.msra.gmra.mxu1 %v17333_v34  ;;  %6441 = vmatprep.subr.bf16.mxu0 %v14014_v58  ;;  %v14044_v58 = vld [vmem:[%s19489_s3 + $0x1164] ss:$16 sps:$4 sm:$0xff]  }
 0x338   : > { %6522 = vmatprep.mubr.bf16.mxu1 %v17114_v6  ;;  %6587 = vmatpush1.bf16.msra.mxu1 %v14009_v56  ;;  %v17396_v56 = vpop.f32.mrf.mxu1 }
 0x339   : > { %6588 = vmatprep.subr.bf16.mxu1 %v14017_v59  ;;  %v14047_v59 = vld [vmem:[%s19489_s3 + $0x122c] ss:$16 sps:$4 sm:$0xff]  }
 0x33a   : > { %6442 = vmatpush1.bf16.msra.mxu0 %v14012_v30  ;;  %v14042_v30 = vld [vmem:[%s19489_s3 + $0x1160] ss:$16 sps:$4 sm:$0xff]  }
 0x33b   : > { %6443 = vmatprep.subr.bf16.mxu0 %v14020_v5  ;;  %v14050_v5 = vld [vmem:[%s19489_s3 + $0x1144] ss:$16 sps:$4 sm:$0xff]  }
 0x33c   : > { %6589 = vmatpush1.bf16.msra.mxu1 %v14015_v21  ;;  %v14045_v21 = vld [vmem:[%s19489_s3 + $0x1228] ss:$16 sps:$4 sm:$0xff]  }
 0x33d   : > { %6590 = vmatprep.subr.bf16.mxu1 %v14023_v40  ;;  %v17410_v40 = vpop.f32.mrf.mxu1 }
 0x33e   : > { %6444 = vmatpush2.bf16.msra.mxu0 %v14018_v54  ;;  %v14053_v54 = vld [vmem:[%s19489_s3 + $0x120c] ss:$16 sps:$4 sm:$0xff]  }
 0x33f   : > { %6523 = vmatmul.mubr.bf16.gmra.mxu1 %v17320_v53  ;;  %6445 = vmatprep.subr.bf16.mxu0 %v14026_v15  ;;  %v14048_v15 = vld [vmem:[%s19489_s3 + $0x1140] ss:$16 sps:$4 sm:$0xff]  }
 0x340   : > { %6591 = vmatpush1.bf16.msra.mxu1 %v14021_v14  ;;  %6618 = vmatprep.mubr.bf16.mxu1 %v17128_v29  ;;  %v14033_v29 = vld [vmem:[%s19489_s3 + $0x1268] ss:$16 sps:$4 sm:$0xff]   ;;  %v4490_v14 = vpop.f32.mrf.mxu1 }
 0x341   : > { %6592 = vmatprep.subr.bf16.mxu1 %v14029_v61  ;;  %v14056_v61 = vld [vmem:[%s19489_s3 + $0x1124] ss:$16 sps:$4 sm:$0xff]  }
 0x342   : > { %6446 = vmatpush2.bf16.msra.mxu0 %v14024_v45  ;;  %v14051_v45 = vld [vmem:[%s19489_s3 + $0x1208] ss:$16 sps:$4 sm:$0xff]  }
 0x343   : > { %6447 = vmatprep.subr.bf16.mxu0 %v14032_v4  ;;  %v14059_v4 = vld [vmem:[%s19489_s3 + $0x13ec] ss:$16 sps:$4 sm:$0xff]  }
 0x344   : > { %6593 = vmatpush1.bf16.msra.mxu1 %v14027_v44  ;;  %v5618_v44 = vld [vmem:[#allocation2 + $0x30] sm:$0xff] }
 0x345   : > { %6594 = vmatprep.subr.bf16.mxu1 %v14035_v32  ;;  %v14054_v32 = vld [vmem:[%s19489_s3 + $0x1120] ss:$16 sps:$4 sm:$0xff]  }
 0x346   : > { %6448 = vmatpush2.bf16.msra.mxu0 %v14030_v17  ;;  %v4492_v17 = vpop.f32.mrf.mxu1 }
 0x347   : > { %6449 = vmatprep.subr.bf16.mxu0 %v14038_v0  ;;  %v14062_v0 = vld [vmem:[%s19489_s3 + $0x1104] ss:$16 sps:$4 sm:$0xff]  }
 0x348   : > { %6595 = vmatpush1.bf16.msra.mxu1 %v14033_v29  ;;  %v5614_v29 = vld [vmem:[#allocation2 + $0x70] sm:$0xf0] }
 0x349   : > { %6596 = vmatprep.subr.bf16.mxu1 %v14041_v41  ;;  %v14057_v41 = vld [vmem:[%s19489_s3 + $0x13e8] ss:$16 sps:$4 sm:$0xff]  }
 0x34a   : > { %6450 = vmatpush2.bf16.msra.mxu0 %v14036_v12  ;;  %v5626_v12 = vpack.c.bf16 %v5618_v44, %v16928_v39  ;;  %v14068_v39 = vld [vmem:[%s19489_s3 + $0x10ec] ss:$16 sps:$4 sm:$0xff]  }
 0x34b   : > { %6451 = vmatprep.subr.bf16.mxu0 %v14044_v58  ;;  %v14065_v58 = vld [vmem:[%s19489_s3 + $0x13cc] ss:$16 sps:$4 sm:$0xff]  }
 0x34c   : > { %6597 = vmatpush1.bf16.msra.mxu1 %v14039_v24  ;;  %v14060_v24 = vld [vmem:[%s19489_s3 + $0x1100] ss:$16 sps:$4 sm:$0xff]   ;;  %v14074_v44 = vld [vmem:[%s19489_s3 + $0x10cc] ss:$16 sps:$4 sm:$0xff]  }
 0x34d   : > { %6598 = vmatprep.subr.bf16.mxu1 %v14047_v59  ;;  %v5622_v59 = vpack.c.bf16 %v16937_v36, %v5614_v29  ;;  %v14071_v36 = vld [vmem:[%s19489_s3 + $0x13ac] ss:$16 sps:$4 sm:$0xff]  }
 0x34e   : > { %6452 = vmatpush2.bf16.msra.mxu0 %v14042_v30  ;;  %v17444_v30 = vpop.f32.mrf.mxu0 }
 0x34f   : > { %6453 = vmatprep.subr.bf16.mxu0 %v14050_v5  ;;  %v4494_v5 = vpop.f32.mrf.mxu1 }
 0x350   : > { %6599 = vmatpush1.bf16.msra.mxu1 %v14045_v21  ;;  %v14063_v21 = vld [vmem:[%s19489_s3 + $0x13c8] ss:$16 sps:$4 sm:$0xff]  }
 0x351   : > { %6600 = vmatprep.subr.bf16.mxu1 %v14053_v54  ;;  %v17452_v54 = vrot.slane %v5626_v12, 2 }
 0x352   : > { %6454 = vmatpush2.bf16.msra.mxu0 %v14048_v15  ;;  %v5767_v15 = vrot.slane %v5622_v59, 2 }
 0x353   : > { %6455 = vmatprep.subr.bf16.mxu0 %v14056_v61  ;;  %v14066_v61 = vld [vmem:[%s19489_s3 + $0x10e8] ss:$16 sps:$4 sm:$0xff]  }
 0x354   : > { %6601 = vmatpush1.bf16.msra.mxu1 %v14051_v45  ;;  %v17460_v45 = vpop.f32.mrf.mxu0 }
 0x355   : > { %6602 = vmatprep.subr.bf16.mxu1 %v14059_v4  ;;  %v4496_v4 = vpop.f32.mrf.mxu1 }
 0x356   : > { %6456 = vmatpush2.bf16.msra.mxu0 %v14054_v32  ;;  %v17467_v32 = vsel %vm1104_vm4, %v5767_v15, %v17452_v54 }
 0x357   : > { %6457 = vmatprep.subr.bf16.mxu0 %v14062_v0  ;;  %v14069_v0 = vld [vmem:[%s19489_s3 + $0x13a8] ss:$16 sps:$4 sm:$0xff]  }
 0x358   : > { %6603 = vmatpush2.bf16.msra.mxu1 %v14057_v41  ;;  %v14077_v41 = vld [vmem:[%s19489_s3 + $0x138c] ss:$16 sps:$4 sm:$0xff]  }
 0x359   : > { %6604 = vmatprep.subr.bf16.mxu1 %v14065_v58  ;;  %v14072_v58 = vld [vmem:[%s19489_s3 + $0x10c8] ss:$16 sps:$4 sm:$0xff]  }
 0x35a   : > { %6458 = vmatpush2.bf16.msra.mxu0 %v14060_v24  ;;  %v4500_v24 = vpop.f32.mrf.mxu1 }
 0x35b   : > { %6533 = vmatprep.subr.bf16.mxu0 %v14068_v39  ;;  %v14080_v39 = vld [vmem:[%s19489_s3 + $0x10ac] ss:$16 sps:$4 sm:$0xff]  }
 0x35c   : > { %6605 = vmatpush2.bf16.msra.mxu1 %v14063_v21 }
 0x35d   : > { %v4437_v29 = vpop.f32.mrf.mxu0  ;;  %6460 = vmatmul.mubr.bf16.vlgmr.msra.gmra.mxu0 %v17467_v32  ;;  %6606 = vmatprep.subr.bf16.mxu1 %v14071_v36 }
 0x35e   : > { %v4491_v12 = vadd.f32 %v4490_v14, %v4437_v29  ;;  %6469 = vmatprep.mubr.bf16.mxu0 %v17243_v46  ;;  %6534 = vmatpush1.bf16.msra.mxu0 %v14066_v61  ;;  %v14075_v14 = vld [vmem:[%s19489_s3 + $0x1388] ss:$16 sps:$4 sm:$0xff]   ;;  %v14083_v61 = vld [vmem:[%s19489_s3 + $0x136c] ss:$16 sps:$4 sm:$0xff]  }
 0x35f   : > { %v4439_v59 = vpop.f32.mrf.mxu0  ;;  %6535 = vmatprep.subr.bf16.mxu0 %v14074_v44 }
 0x360   : > { %v17484_v21 = vadd.f32 %v4491_v12, %v17006_v7  ;;  %v4493_v36 = vadd.f32 %v4492_v17, %v4439_v59  ;;  %6607 = vmatpush2.bf16.msra.mxu1 %v14069_v0  ;;  %v14078_v7 = vld [vmem:[%s19489_s3 + $0x10a8] ss:$16 sps:$4 sm:$0xff]   ;;  %v4502_v17 = vpop.f32.mrf.mxu1 }
 0x361   : > { %v4441_v15 = vpop.f32.mrf.mxu0  ;;  %6608 = vmatprep.subr.bf16.mxu1 %v14077_v41  ;;  %v14086_v41 = vld [vmem:[%s19489_s3 + $0x108c] ss:$16 sps:$4 sm:$0xff]  }
 0x362   : > { %v17493_v44 = vadd.f32 %v4493_v36, %v17015_v18  ;;  %v4495_v29 = vadd.f32 %v4494_v5, %v4441_v15  ;;  %6536 = vmatpush1.bf16.msra.mxu0 %v14072_v58  ;;  %v14081_v18 = vld [vmem:[%s19489_s3 + $0x1368] ss:$16 sps:$4 sm:$0xff]   ;;  %v14089_v58 = vld [vmem:[%s19489_s3 + $0x134c] ss:$16 sps:$4 sm:$0xff]  }
 0x363   : > { %v4443_v0 = vpop.f32.mrf.mxu0  ;;  %6537 = vmatprep.subr.bf16.mxu0 %v14080_v39 }
 0x364   : > { %v17502_v12 = vadd.f32 %v4495_v29, %v17026_v22  ;;  %v17504_v59 = vadd.f32 %v4496_v4, %v4443_v0  ;;  %6609 = vmatpush2.bf16.msra.mxu1 %v14075_v14  ;;  %v14084_v22 = vld [vmem:[%s19489_s3 + $0x1088] ss:$16 sps:$4 sm:$0xff]   ;;  %v4504_v4 = vpop.f32.mrf.mxu1  ;;  %v14092_v14 = vld [vmem:[%s19489_s3 + $0x106c] ss:$16 sps:$4 sm:$0xff]  }
 0x365   : > { %v4447_v5 = vpop.f32.mrf.mxu0  ;;  %6470 = vmatmul.mubr.bf16.gmra.mxu0 %v17452_v54  ;;  %6610 = vmatprep.subr.bf16.mxu1 %v14083_v61  ;;  %v14095_v29 = vld [vmem:[%s19489_s3 + $0x132c] ss:$16 sps:$4 sm:$0xff]  }
 0x366   : > { %v4501_v39 = vadd.f32 %v4500_v24, %v4447_v5  ;;  %6538 = vmatpush1.bf16.msra.mxu0 %v14078_v7  ;;  %6565 = vmatprep.mubr.bf16.mxu0 %v17268_v43  ;;  %v14087_v43 = vld [vmem:[%s19489_s3 + $0x1348] ss:$16 sps:$4 sm:$0xff]  }
 0x367   : > { %v4449_v36 = vpop.f32.mrf.mxu0  ;;  %6539 = vmatprep.subr.bf16.mxu0 %v14086_v41 }
 0x368   : > { %v17521_v15 = vadd.f32 %v4501_v39, %v17043_v26  ;;  %v4503_v61 = vadd.f32 %v4502_v17, %v4449_v36  ;;  %6611 = vmatpush2.bf16.msra.mxu1 %v14081_v18  ;;  %v14090_v26 = vld [vmem:[%s19489_s3 + $0x1068] ss:$16 sps:$4 sm:$0xff]   ;;  %v4506_v17 = vpop.f32.mrf.mxu1  ;;  %v14098_v18 = vld [vmem:[%s19489_s3 + $0x104c] ss:$16 sps:$4 sm:$0xff]  }
 0x369   : > { %v4451_v24 = vpop.f32.mrf.mxu0  ;;  %6612 = vmatprep.subr.bf16.mxu1 %v14089_v58  ;;  %v14101_v39 = vld [vmem:[%s19489_s3 + $0x130c] ss:$16 sps:$4 sm:$0xff]   ;;  %v14102_v36 = vld [vmem:[%s19489_s3 + $0x1028] ss:$16 sps:$4 sm:$0xff]  }
 0x36a   : > { %v17530_v7 = vadd.f32 %v4503_v61, %v17052_v31  ;;  %v4505_v0 = vadd.f32 %v4504_v4, %v4451_v24  ;;  %6540 = vmatpush1.bf16.msra.mxu0 %v14084_v22  ;;  %v14093_v31 = vld [vmem:[%s19489_s3 + $0x1328] ss:$16 sps:$4 sm:$0xff]  }
 0x36b   : > { %v4453_v41 = vpop.f32.mrf.mxu0  ;;  %6541 = vmatprep.subr.bf16.mxu0 %v14092_v14  ;;  %v14096_v22 = vld [vmem:[%s19489_s3 + $0x1048] ss:$16 sps:$4 sm:$0xff]   ;;  %v14107_v14 = vld [vmem:[%s19489_s3 + $0x100c] ss:$16 sps:$4 sm:$0xff]  }
 0x36c   : > { %v17539_v5 = vadd.f32 %v4505_v0, %v17061_v1  ;;  %v17541_v58 = vadd.f32 %v4506_v17, %v4453_v41  ;;  %6613 = vmatpush2.bf16.msra.mxu1 %v14087_v43  ;;  %v14104_v1 = vld [vmem:[%s19489_s3 + $0x102c] ss:$16 sps:$4 sm:$0xff]   ;;  %v14099_v4 = vld [vmem:[%s19489_s3 + $0x1308] ss:$16 sps:$4 sm:$0xff]  }
 0x36d   : > { %6614 = vmatprep.subr.bf16.mxu1 %v14095_v29  ;;  %v14105_v61 = vld [vmem:[%s19489_s3 + $0x1008] ss:$16 sps:$4 sm:$0xff]   ;;  %v14110_v43 = vld [vmem:[%s19489_s3 + $0x11ec] ss:$16 sps:$4 sm:$0xff]  }
 0x36e   : > { %6542 = vmatpush1.bf16.msra.mxu0 %v14090_v26  ;;  %v14108_v24 = vld [vmem:[%s19489_s3 + $0x11e8] ss:$16 sps:$4 sm:$0xff]   ;;  %v14113_v29 = vld [vmem:[%s19489_s3 + $0x11cc] ss:$16 sps:$4 sm:$0xff]  }
 0x36f   : > { %6543 = vmatprep.subr.bf16.mxu0 %v14098_v18  ;;  %v14114_v0 = vld [vmem:[%s19489_s3 + $0x11a8] ss:$16 sps:$4 sm:$0xff]   ;;  %v14119_v26 = vld [vmem:[%s19489_s3 + $0x118c] ss:$16 sps:$4 sm:$0xff]  }
 0x370   : > { %6615 = vmatpush2.bf16.msra.mxu1 %v14093_v31  ;;  %v14122_v17 = vld [vmem:[%s19489_s3 + $0x116c] ss:$16 sps:$4 sm:$0xff]   ;;  %v14120_v41 = vld [vmem:[%s19489_s3 + $0x1168] ss:$16 sps:$4 sm:$0xff]  }
 0x371   : > { %6616 = vmatprep.subr.bf16.mxu1 %v14101_v39  ;;  %v14125_v18 = vld [vmem:[%s19489_s3 + $0x114c] ss:$16 sps:$4 sm:$0xff]   ;;  %v14123_v31 = vld [vmem:[%s19489_s3 + $0x1148] ss:$16 sps:$4 sm:$0xff]  }
 0x372   : > { %6544 = vmatpush1.bf16.msra.mxu0 %v14096_v22  ;;  %v14128_v39 = vld [vmem:[%s19489_s3 + $0x112c] ss:$16 sps:$4 sm:$0xff]   ;;  %v14126_v22 = vld [vmem:[%s19489_s3 + $0x1128] ss:$16 sps:$4 sm:$0xff]  }
 0x373   : > { %6545 = vmatprep.subr.bf16.mxu0 %v14104_v1  ;;  %v14131_v1 = vld [vmem:[%s19489_s3 + $0x110c] ss:$16 sps:$4 sm:$0xff]  }
 0x374   : > { %6617 = vmatpush2.bf16.msra.mxu1 %v14099_v4  ;;  %v14129_v4 = vld [vmem:[%s19489_s3 + $0x1108] ss:$16 sps:$4 sm:$0xff]  }
 0x376   : > { %6546 = vmatpush1.bf16.msra.mxu0 %v14102_v36  ;;  %v14134_v36 = vld [vmem:[%s19491_s5 + $0x234] ss:$8 sps:$4 sm:$0xff]  }
 0x377   : > { %6619 = vmatmul.mubr.bf16.vlgmr.msra.gmra.mxu1 %v17333_v34  ;;  %6547 = vmatprep.subr.bf16.mxu0 %v14107_v14  ;;  %v14111_v34 = vld [vmem:[%s19489_s3 + $0x11c8] ss:$16 sps:$4 sm:$0xff]  }
 0x378   : > { %6628 = vmatprep.mubr.bf16.mxu1 %v17114_v6  ;;  %v14116_v6 = vld [vmem:[%s19489_s3 + $0x11ac] ss:$16 sps:$4 sm:$0xff]   ;;  %v14132_v14 = vld [vmem:[%s19491_s5 + $0x230] ss:$8 sps:$4 sm:$0xff]  }
 0x37a   : > { %6548 = vmatpush1.bf16.msra.mxu0 %v14105_v61  ;;  %v14137_v61 = vld [vmem:[%s19491_s5 + $0x224] ss:$8 sps:$4 sm:$0xff]  }
 0x37b   : > { %6549 = vmatprep.subr.bf16.mxu0 %v14110_v43  ;;  %v14135_v43 = vld [vmem:[%s19491_s5 + $0x220] ss:$8 sps:$4 sm:$0xff]  }
 0x37e   : > { %6550 = vmatpush2.bf16.msra.mxu0 %v14108_v24  ;;  %v14140_v24 = vld [vmem:[%s19491_s5 + $0x214] ss:$8 sps:$4 sm:$0xff]  }
 0x37f   : > { %6629 = vmatmul.mubr.bf16.gmra.mxu1 %v17320_v53  ;;  %6551 = vmatprep.subr.bf16.mxu0 %v14113_v29  ;;  %v14117_v53 = vld [vmem:[%s19489_s3 + $0x1188] ss:$16 sps:$4 sm:$0xff]  }
 0x380   : > { %v14138_v29 = vld [vmem:[%s19491_s5 + $0x210] ss:$8 sps:$4 sm:$0xff]  }
 0x382   : > { %6552 = vmatpush2.bf16.msra.mxu0 %v14111_v34  ;;  %v14146_v34 = vld [vmem:[%s19491_s5 + $0x1f4] ss:$8 sps:$4 sm:$0xff]  }
 0x383   : > { %6553 = vmatprep.subr.bf16.mxu0 %v14116_v6  ;;  %v14144_v6 = vld [vmem:[%s19491_s5 + $0x1f0] ss:$8 sps:$4 sm:$0xff]  }
 0x386   : > { %6554 = vmatpush2.bf16.msra.mxu0 %v14114_v0  ;;  %v14147_v0 = vld [vmem:[%s19491_s5 + $0x1e0] ss:$8 sps:$4 sm:$0xff]  }
 0x387   : > { %6555 = vmatprep.subr.bf16.mxu0 %v14119_v26  ;;  %v14152_v26 = vld [vmem:[%s19491_s5 + $0x1d4] ss:$8 sps:$4 sm:$0xff]  }
 0x38a   : > { %6556 = vmatpush2.bf16.msra.mxu0 %v14117_v53  ;;  %v17660_v53 = vpop.f32.mrf.mxu1 }
 0x38b   : > { %6557 = vmatprep.subr.bf16.mxu0 %v14122_v17  ;;  %v14150_v17 = vld [vmem:[%s19491_s5 + $0x1d0] ss:$8 sps:$4 sm:$0xff]  }
 0x38e   : > { %6558 = vmatpush2.bf16.msra.mxu0 %v14120_v41  ;;  %v14155_v41 = vld [vmem:[%s19491_s5 + $0x1c4] ss:$8 sps:$4 sm:$0xff]  }
 0x38f   : > { %6559 = vmatprep.subr.bf16.mxu0 %v14125_v18  ;;  %v17668_v18 = vpop.f32.mrf.mxu1 }
 0x392   : > { %6560 = vmatpush2.bf16.msra.mxu0 %v14123_v31  ;;  %v14153_v31 = vld [vmem:[%s19491_s5 + $0x1c0] ss:$8 sps:$4 sm:$0xff]  }
 0x393   : > { %6561 = vmatprep.subr.bf16.mxu0 %v14128_v39  ;;  %v14158_v39 = vld [vmem:[%s19491_s5 + $0x2b4] ss:$8 sps:$4 sm:$0xff]  }
 0x396   : > { %6562 = vmatpush2.bf16.msra.mxu0 %v14126_v22  ;;  %v17676_v22 = vpop.f32.mrf.mxu1 }
 0x397   : > { %6563 = vmatprep.subr.bf16.mxu0 %v14131_v1  ;;  %v14156_v1 = vld [vmem:[%s19491_s5 + $0x2b0] ss:$8 sps:$4 sm:$0xff]  }
 0x39a   : > { %6564 = vmatpush2.bf16.msra.mxu0 %v14129_v4  ;;  %v14161_v4 = vld [vmem:[%s19491_s5 + $0x2a4] ss:$8 sps:$4 sm:$0xff]  }
 0x39b   : > { %7183 = vmatprep.subr.bf16.mxu0 %v14134_v36  ;;  %v17684_v36 = vpop.f32.mrf.mxu1 }
 0x39d   : > { %6566 = vmatmul.mubr.bf16.vlgmr.msra.gmra.mxu0 %v17467_v32  ;;  %v14141_v32 = vld [vmem:[%s19491_s5 + $0x200] ss:$8 sps:$4 sm:$0xff]  }
 0x39e   : > { %6575 = vmatprep.mubr.bf16.mxu0 %v17243_v46  ;;  %7184 = vmatpush1.bf16.msra.mxu0 %v14132_v14  ;;  %v14143_v46 = vld [vmem:[%s19491_s5 + $0x204] ss:$8 sps:$4 sm:$0xff]   ;;  %v14159_v14 = vld [vmem:[%s19491_s5 + $0x2a0] ss:$8 sps:$4 sm:$0xff]  }
 0x39f   : > { %7185 = vmatprep.subr.bf16.mxu0 %v14137_v61  ;;  %v17689_v61 = vpop.f32.mrf.mxu0 }
 0x3a2   : > { %7186 = vmatpush1.bf16.msra.mxu0 %v14135_v43  ;;  %v14164_v43 = vld [vmem:[%s19491_s5 + $0x294] ss:$8 sps:$4 sm:$0xff]  }
 0x3a3   : > { %7187 = vmatprep.subr.bf16.mxu0 %v14140_v24  ;;  %v17694_v24 = vpop.f32.mrf.mxu1 }
 0x3a5   : > { %6576 = vmatmul.mubr.bf16.gmra.mxu0 %v17452_v54  ;;  %v14149_v54 = vld [vmem:[%s19491_s5 + $0x1e4] ss:$8 sps:$4 sm:$0xff]  }
 0x3a6   : > { %7188 = vmatpush1.bf16.msra.mxu0 %v14138_v29  ;;  %v14162_v29 = vld [vmem:[%s19491_s5 + $0x290] ss:$8 sps:$4 sm:$0xff]  }
 0x3a7   : > { %7189 = vmatprep.subr.bf16.mxu0 %v14143_v46  ;;  %v17699_v46 = vpop.f32.mrf.mxu0 }
 0x3aa   : > { %7190 = vmatpush1.bf16.msra.mxu0 %v14141_v32  ;;  %v14167_v32 = vld [vmem:[%s19491_s5 + $0x284] ss:$8 sps:$4 sm:$0xff]  }
 0x3ab   : > { %7191 = vmatprep.subr.bf16.mxu0 %v14146_v34  ;;  %v17704_v34 = vpop.f32.mrf.mxu1 }
 0x3ae   : > { %7192 = vmatpush1.bf16.msra.mxu0 %v14144_v6  ;;  %v14165_v6 = vld [vmem:[%s19491_s5 + $0x280] ss:$8 sps:$4 sm:$0xff]  }
 0x3af   : > { %7193 = vmatprep.subr.bf16.mxu0 %v14149_v54  ;;  %v14192_v54 = vld [vmem:[%s19491_s5 + $0x330] ss:$8 sps:$4 sm:$0xff]  }
 0x3b2   : > { %7194 = vmatpush1.bf16.msra.mxu0 %v14147_v0  ;;  %v14194_v0 = vld [vmem:[%s19491_s5 + $0x334] ss:$8 sps:$4 sm:$0xff]  }
 0x3b3   : > { %7195 = vmatprep.subr.bf16.mxu0 %v14152_v26  ;;  %v17715_v26 = vpop.f32.mrf.mxu0  ;;  %7234 = vmatprep.subr.bf16.mxu1 %v14194_v0 }
 0x3b4   : > { %7235 = vmatpush1.bf16.msra.mxu1 %v14192_v54 }
 0x3b6   : > { %7196 = vmatpush1.bf16.msra.mxu0 %v14150_v17  ;;  %v14170_v17 = vld [vmem:[%s19491_s5 + $0x274] ss:$8 sps:$4 sm:$0xff]  }
 0x3b7   : > { %7197 = vmatprep.subr.bf16.mxu0 %v14155_v41  ;;  %v17720_v41 = vpop.f32.mrf.mxu1 }
 0x3b8   : > { %19518 = vst [vmem:[#allocation13_spill] sm:$0xff] %v17720_v41 }
 0x3ba   : > { %7198 = vmatpush1.bf16.msra.mxu0 %v14153_v31  ;;  %v14168_v31 = vld [vmem:[%s19491_s5 + $0x270] ss:$8 sps:$4 sm:$0xff]  }
 0x3bb   : > { %7199 = vmatprep.subr.bf16.mxu0 %v14158_v39  ;;  %v14198_v39 = vld [vmem:[%s19491_s5 + $0x320] ss:$8 sps:$4 sm:$0xff]  }
 0x3be   : > { %7200 = vmatpush2.bf16.msra.mxu0 %v14156_v1  ;;  %v14200_v1 = vld [vmem:[%s19491_s5 + $0x324] ss:$8 sps:$4 sm:$0xff]  }
 0x3bf   : > { %7201 = vmatprep.subr.bf16.mxu0 %v14161_v4  ;;  %v17731_v4 = vpop.f32.mrf.mxu0  ;;  %7236 = vmatprep.subr.bf16.mxu1 %v14200_v1  ;;  %v14212_v1 = vld [vmem:[%s19491_s5 + $0x304] ss:$8 sps:$4 sm:$0xff]  }
 0x3c0   : > { %7237 = vmatpush1.bf16.msra.mxu1 %v14198_v39  ;;  %v14210_v39 = vld [vmem:[%s19491_s5 + $0x300] ss:$8 sps:$4 sm:$0xff]  }
 0x3c1   : > { %v17747_v54 = vpop.f32.mrf.mxu0 }
 0x3c2   : > { %7202 = vmatpush2.bf16.msra.mxu0 %v14159_v14  ;;  %v14173_v14 = vld [vmem:[%s19491_s5 + $0x264] ss:$8 sps:$4 sm:$0xff]  }
 0x3c3   : > { %7203 = vmatprep.subr.bf16.mxu0 %v14164_v43  ;;  %v17736_v43 = vpop.f32.mrf.mxu1 }
 0x3c4   : > { %19519 = vst [vmem:[#allocation14_spill] sm:$0xff] %v17736_v43 }
 0x3c5   : > { %v5579_v0 = vpop.f32.mrf.mxu1 }
 0x3c6   : > { %7204 = vmatpush2.bf16.msra.mxu0 %v14162_v29  ;;  %v14171_v29 = vld [vmem:[%s19491_s5 + $0x260] ss:$8 sps:$4 sm:$0xff]  }
 0x3c7   : > { %7205 = vmatprep.subr.bf16.mxu0 %v14167_v32  ;;  %v14204_v32 = vld [vmem:[%s19491_s5 + $0x310] ss:$8 sps:$4 sm:$0xff]   ;;  %v5581_v25 = vpop.f32.mrf.mxu1 }
 0x3c9   : > { %v5583_v60 = vpop.f32.mrf.mxu1 }
 0x3ca   : > { %7206 = vmatpush2.bf16.msra.mxu0 %v14165_v6  ;;  %v14206_v6 = vld [vmem:[%s19491_s5 + $0x314] ss:$8 sps:$4 sm:$0xff]  }
 0x3cb   : > { %7207 = vmatprep.subr.bf16.mxu0 %v14170_v17  ;;  %v14176_v17 = vld [vmem:[%s19491_s5 + $0x254] ss:$8 sps:$4 sm:$0xff]   ;;  %7238 = vmatprep.subr.bf16.mxu1 %v14206_v6  ;;  %v14216_v6 = vld [vmem:[%s19491_s5 + $0x2f0] ss:$8 sps:$4 sm:$0xff]  }
 0x3cc   : > { %7239 = vmatpush1.bf16.msra.mxu1 %v14204_v32  ;;  %v14177_v32 = vld [vmem:[%s19491_s5 + $0x240] ss:$8 sps:$4 sm:$0xff]  }
 0x3cd   : > { %7240 = vmatprep.subr.bf16.mxu1 %v14212_v1  ;;  %v5585_v1 = vpop.f32.mrf.mxu1 }
 0x3ce   : > { %7208 = vmatpush2.bf16.msra.mxu0 %v14168_v31  ;;  %v14174_v31 = vld [vmem:[%s19491_s5 + $0x250] ss:$8 sps:$4 sm:$0xff]  }
 0x3cf   : > { %7209 = vmatprep.subr.bf16.mxu0 %v14173_v14  ;;  %v17761_v14 = vpop.f32.mrf.mxu0  ;;  %v5589_v41 = vpop.f32.mrf.mxu1 }
 0x3d0   : > { %7241 = vmatpush1.bf16.msra.mxu1 %v14210_v39 }
 0x3d1   : > { %7242 = vmatprep.subr.bf16.mxu1 %v14218_v2 }
 0x3d2   : > { %7210 = vmatpush2.bf16.msra.mxu0 %v14171_v29  ;;  %v14179_v29 = vld [vmem:[%s19491_s5 + $0x244] ss:$8 sps:$4 sm:$0xff]  }
 0x3d3   : > { %7211 = vmatprep.subr.bf16.mxu0 %v14176_v17  ;;  %v17775_v17 = vpop.f32.mrf.mxu0 }
 0x3d4   : > { %19520 = vst [vmem:[#allocation15_spill] sm:$0xff] %v17775_v17  ;;  %7243 = vmatpush1.bf16.msra.mxu1 %v14216_v6 }
 0x3d5   : > { %v17780_v39 = vpop.f32.mrf.mxu0  ;;  %7244 = vmatprep.subr.bf16.mxu1 %v14224_v27 }
 0x3d6   : > { %7212 = vmatpush2.bf16.msra.mxu0 %v14174_v31  ;;  %v14182_v31 = vld [vmem:[%s19491_s5 + $0x174] ss:$8 sps:$4 sm:$0xff]   ;;  %19521 = vst [vmem:[#allocation16_spill] sm:$0xff] %v17780_v39  ;;  %v5591_v39 = vpop.f32.mrf.mxu1 }
 0x3d7   : > { %7213 = vmatprep.subr.bf16.mxu0 %v14179_v29 }
 0x3d8   : > { %v5593_v10 = vpop.f32.mrf.mxu1 }
 0x3da   : > { %7214 = vmatpush2.bf16.msra.mxu0 %v14177_v32  ;;  %v3472_v32 = vadd.f32 %v17001_v55, %v3419_v8 }
 0x3db   : > { %7620 = vmatprep.subr.bf16.mxu0 %v14182_v31 }
 0x3dd   : > { %v5526_v49 = vpop.f32.mrf.mxu0 }
 0x3de   : > { %v5580_v43 = vadd.f32 %v5579_v0, %v5526_v49  ;;  %v4516_v49 = vadd.f32 %v17504_v59, %v3472_v32  ;;  %v14246_v32 = vld [vmem:[%s19491_s5 + $0x360] ss:$8 sps:$4 sm:$0xff]  }
 0x3df   : > { %v5528_v29 = vpop.f32.mrf.mxu0 }
 0x3e0   : > { %v17786_v17 = vadd.f32 %v5580_v43, %v17484_v21  ;;  %v5582_v47 = vadd.f32 %v5581_v25, %v5528_v29  ;;  %v3429_v25 = vadd.f32 %v17217_v13, %v2630_v19  ;;  %v5595_v43 = vpop.f32.mrf.mxu1  ;;  %v14234_v29 = vld [vmem:[%s19491_s5 + $0x2c0] ss:$8 sps:$4 sm:$0xff]   ;;  %v14254_v19 = vld [vmem:[%s19491_s5 + $0x354] ss:$8 sps:$4 sm:$0xff]  }
 0x3e1   : > { %v5530_v2 = vpop.f32.mrf.mxu0 }
 0x3e2   : > { %v17790_v6 = vadd.f32 %v5582_v47, %v17493_v44  ;;  %v5584_v31 = vadd.f32 %v5583_v60, %v5530_v2  ;;  %v14222_v60 = vld [vmem:[%s19491_s5 + $0x2e0] ss:$8 sps:$4 sm:$0xff]   ;;  %v3482_v13 = vadd.f32 %v17185_v48, %v3429_v25  ;;  %v14236_v2 = vld [vmem:[%s19491_s5 + $0x2c4] ss:$8 sps:$4 sm:$0xff]   ;;  %v14266_v25 = vld [vmem:[%s19491_s5 + $0x74] ss:$8 sps:$4 sm:$0xff]  }
 0x3e3   : > { %v5532_v42 = vpop.f32.mrf.mxu0  ;;  %7245 = vmatpush1.bf16.msra.mxu1 %v14222_v60 }
 0x3e4   : > { %v17796_v57 = vadd.f32 %v5584_v31, %v17502_v12  ;;  %v5586_v35 = vadd.f32 %v5585_v1, %v5532_v42  ;;  %v14248_v31 = vld [vmem:[%s19491_s5 + $0x364] ss:$8 sps:$4 sm:$0xff]  }
 0x3e5   : > { %v5536_v16 = vpop.f32.mrf.mxu0 }
 0x3e6   : > { %v17799_v21 = vadd.f32 %v5586_v35, %v4516_v49  ;;  %v5590_v8 = vadd.f32 %v5589_v41, %v5536_v16  ;;  %v14230_v41 = vld [vmem:[%s19491_s5 + $0x2d4] ss:$8 sps:$4 sm:$0xff]   ;;  %v14252_v49 = vld [vmem:[%s19491_s5 + $0x350] ss:$8 sps:$4 sm:$0xff]   ;;  %v14260_v35 = vld [vmem:[%s19491_s5 + $0x344] ss:$8 sps:$4 sm:$0xff]  }
 0x3e7   : > { %v5538_v55 = vpop.f32.mrf.mxu0  ;;  %7246 = vmatprep.subr.bf16.mxu1 %v14230_v41  ;;  %v14258_v16 = vld [vmem:[%s19491_s5 + $0x340] ss:$8 sps:$4 sm:$0xff]  }
 0x3e8   : > { %v17808_v47 = vadd.f32 %v5590_v8, %v17521_v15  ;;  %v5592_v42 = vadd.f32 %v5591_v39, %v5538_v55  ;;  %v14228_v15 = vld [vmem:[%s19491_s5 + $0x2d0] ss:$8 sps:$4 sm:$0xff]   ;;  %v4524_v39 = vadd.f32 %v17541_v58, %v3482_v13  ;;  %v5474_v55 = vadd.f32 %v17660_v53, %v17689_v61 }
 0x3e9   : > { %v5540_v44 = vpop.f32.mrf.mxu0  ;;  %7247 = vmatpush1.bf16.msra.mxu1 %v14228_v15  ;;  %v14240_v58 = vld [vmem:[%s19491_s5 + $0x370] ss:$8 sps:$4 sm:$0xff]   ;;  %v5476_v13 = vadd.f32 %v17668_v18, %v17699_v46  ;;  %v2524_v53 = vadd.f32 %v16450_v62, %v16492_v28  ;;  %v5480_v15 = vadd.f32 %v17684_v36, %v17731_v4  ;;  %v5486_v36 = vadd.f32 %v17704_v34, %v17761_v14 }
 0x3ea   : > { %v17812_v12 = vadd.f32 %v5592_v42, %v17530_v7  ;;  %v5594_v59 = vadd.f32 %v5593_v10, %v5540_v44  ;;  %7248 = vmatprep.subr.bf16.mxu1 %v14236_v2  ;;  %v2514_v10 = vadd.f32 %v16262_v23, %v16293_v20  ;;  %v5478_v23 = vadd.f32 %v17676_v22, %v17715_v26  ;;  %v19522_v34 = vld [vmem:[#allocation11_spill] sm:$0xff] }
 0x3eb   : > { %v5542_v0 = vpop.f32.mrf.mxu0  ;;  %v3323_v22 = vadd.f32 %v16980_v9, %v2524_v53 }
 0x3ec   : > { %v17822_v1 = vadd.f32 %v5594_v59, %v17539_v5  ;;  %v5596_v48 = vadd.f32 %v5595_v43, %v5542_v0  ;;  %v14242_v5 = vld [vmem:[%s19491_s5 + $0x374] ss:$8 sps:$4 sm:$0xff]   ;;  %v3313_v42 = vadd.f32 %v16769_v63, %v2514_v10  ;;  %v17869_v59 = vld [vmem:[%s19490_s4] sm:$0xf]  ;;  %v5598_v43 = vadd.f32 %v5474_v55, %v17238_v3 }
 0x3ed   : > { %7249 = vmatpush1.bf16.msra.mxu1 %v14234_v29  ;;  %v6660_v18 = vrot.slane %v17869_v59, %v15462_v52  ;;  %v5599_v0 = vadd.f32 %v5476_v13, %v17249_v50  ;;  %v5602_v62 = vadd.f32 %v5478_v23, %v17258_v51  ;;  %v5484_v50 = vadd.f32 %v17694_v24, %v17747_v54  ;;  %v19526_v10 = vld [vmem:[#allocation16_spill] sm:$0xff]  ;;  %v19528_v13 = vld [vmem:[#allocation10_spill] sm:$0xff] }
 0x3ee   : > { %v17824_v7 = vadd.f32 %v5596_v48, %v4524_v39  ;;  %7258 = vmatprep.subr.bf16.mxu1 %v14242_v5  ;;  %v3366_v63 = vadd.f32 %v16747_v37, %v3313_v42  ;;  %v6664_v37 = vrot.slane %v17869_v59, %v15470_v38  ;;  %v4399_v51 = vadd.f32 %v17396_v56, %v17444_v30 }
 0x3ef   : > { %v5606_v14 = vadd.f32 %v5484_v50, %v19522_v34 }
 0x3f0   : > { %v4514_v26 = vadd.f32 %v17260_v33, %v3366_v63 }
 0x3f1   : > { %7259 = vmatpush2.bf16.msra.mxu1 %v14240_v58 }
 0x3f2   : > { %7260 = vmatprep.subr.bf16.mxu1 %v14248_v31  ;;  %v5603_v5 = vadd.f32 %v5480_v15, %v4514_v26  ;;  %v4401_v31 = vadd.f32 %v17410_v40, %v17460_v45 }
 0x3f5   : > { %7261 = vmatpush2.bf16.msra.mxu1 %v14246_v32  ;;  %v3376_v32 = vadd.f32 %v16946_v11, %v3323_v22  ;;  %v19527_v11 = vld [vmem:[#allocation14_spill] sm:$0xff] }
 0x3f6   : > { %7262 = vmatprep.subr.bf16.mxu1 %v14254_v19  ;;  %v5490_v55 = vadd.f32 %v19527_v11, %v19526_v10 }
 0x3f7   : > { %v6514_v8 = vpop.f32.mrf.mxu1 }
 0x3f9   : > { %7263 = vmatpush2.bf16.msra.mxu1 %v14252_v49  ;;  %v6516_v60 = vpop.f32.mrf.mxu1 }
 0x3fa   : > { %7264 = vmatprep.subr.bf16.mxu1 %v14260_v35 }
 0x3fb   : > { %v6518_v27 = vpop.f32.mrf.mxu1 }
 0x3fd   : > { %7265 = vmatpush2.bf16.msra.mxu1 %v14258_v16  ;;  %v6520_v44 = vpop.f32.mrf.mxu1  ;;  %v19523_v16 = vld [vmem:[#allocation12_spill] sm:$0xff] }
 0x3fe   : > { %7569 = vmatprep.subr.bf16.mxu1 %v14266_v25  ;;  %v5607_v25 = vadd.f32 %v5486_v36, %v19523_v16 }
 0x3ff   : > { %v6524_v61 = vpop.f32.mrf.mxu1 }
 0x401   : > { %v6526_v4 = vpop.f32.mrf.mxu1 }
 0x403   : > { %v6528_v42 = vpop.f32.mrf.mxu1 }
 0x405   : > { %v6530_v15 = vpop.f32.mrf.mxu1 }
 0x41d   : > { %v6461_v41 = vpop.f32.mrf.mxu0 }
 0x41e   : > { %v6515_v20 = vadd.f32 %v6514_v8, %v6461_v41  ;;  %v19524_v8 = vld [vmem:[#allocation15_spill] sm:$0xff]  ;;  %v4521_v41 = vadd.f32 %v4399_v51, %v19528_v13 }
 0x41f   : > { %v6463_v46 = vpop.f32.mrf.mxu0 }
 0x420   : > { %v6639_v3 = vadd.f32 %v6515_v20, %v5598_v43  ;;  %v6517_v39 = vadd.f32 %v6516_v60, %v6463_v46  ;;  %v19525_v60 = vld [vmem:[#allocation13_spill] sm:$0xff]  ;;  %v4522_v43 = vadd.f32 %v4401_v31, %v3376_v32 }
 0x421   : > { %v6465_v48 = vpop.f32.mrf.mxu0 }
 0x422   : > { %v6640_v28 = vadd.f32 %v6517_v39, %v5599_v0  ;;  %v6519_v29 = vadd.f32 %v6518_v27, %v6465_v48  ;;  %v6677_v9 = vadd.f32 %v6660_v18, %v6639_v3  ;;  %v5488_v27 = vadd.f32 %v19525_v60, %v19524_v8 }
 0x423   : > { %v6467_v2 = vpop.f32.mrf.mxu0  ;;  %v5611_v22 = vadd.f32 %v5490_v55, %v4522_v43 }
 0x424   : > { %v6643_v58 = vadd.f32 %v6519_v29, %v5602_v62  ;;  %v6521_v33 = vadd.f32 %v6520_v44, %v6467_v2  ;;  %v6678_v49 = vadd.f32 %v6664_v37, %v6640_v28  ;;  %v6693_v30 = vmax.f32 %v6677_v9, 0.0 }
 0x425   : > { %v6471_v19 = vpop.f32.mrf.mxu0  ;;  %v5610_v0 = vadd.f32 %v5488_v27, %v4521_v41  ;;  %v14185_v41 = vld [vmem:[%s19491_s5 + $0x164] ss:$8 sps:$4 sm:$0xff]  }
 0x426   : > { %v6681_v24 = vadd.f32 %v6660_v18, %v6643_v58  ;;  %v6644_v54 = vadd.f32 %v6521_v33, %v5603_v5  ;;  %v6525_v35 = vadd.f32 %v6524_v61, %v6471_v19  ;;  %v6694_v53 = vmax.f32 %v6678_v49, 0.0 }
 0x427   : > { %v6473_v56 = vpop.f32.mrf.mxu0 }
 0x428   : > { %v6697_v44 = vmax.f32 %v6681_v24, 0.0  ;;  %v6682_v40 = vadd.f32 %v6664_v37, %v6644_v54  ;;  %v6527_v45 = vadd.f32 %v6526_v4, %v6473_v56  ;;  %v6647_v23 = vadd.f32 %v6525_v35, %v5606_v14 }
 0x429   : > { %v6475_v20 = vpop.f32.mrf.mxu0 }
 0x42a   : > { %v17903_v63 = vpack.c.bf16 %v6697_v44, %v6693_v30  ;;  %v6698_v61 = vmax.f32 %v6682_v40, 0.0  ;;  %v6648_v46 = vadd.f32 %v6527_v45, %v5607_v25  ;;  %v6529_v3 = vadd.f32 %v6528_v42, %v6475_v20  ;;  %v14180_v30 = vld [vmem:[%s19491_s5 + $0x170] ss:$8 sps:$4 sm:$0xff]  }
 0x42b   : > { %v6477_v39 = vpop.f32.mrf.mxu0  ;;  %v6685_v62 = vadd.f32 %v6660_v18, %v6647_v23 }
 0x42c   : > { %v17905_v26 = vpack.c.bf16 %v6698_v61, %v6694_v53  ;;  %v6531_v48 = vadd.f32 %v6530_v15, %v6477_v39  ;;  %v6651_v28 = vadd.f32 %v6529_v3, %v5610_v0  ;;  %v6686_v29 = vadd.f32 %v6664_v37, %v6648_v46  ;;  %v14183_v61 = vld [vmem:[%s19491_s5 + $0x160] ss:$8 sps:$4 sm:$0xff]   ;;  %v14188_v0 = vld [vmem:[%s19491_s5 + $0x154] ss:$8 sps:$4 sm:$0xff]   ;;  %v14186_v3 = vld [vmem:[%s19491_s5 + $0x150] ss:$8 sps:$4 sm:$0xff]  }
 0x42d   : > { %v6833_v9 = vshll.u32 %v17903_v63, 16  ;;  %v6701_v58 = vmax.f32 %v6685_v62, 0.0  ;;  %v6831_v32 = vshrl.u32 %v17903_v63, 16  ;;  %v14197_v62 = vld [vmem:[%s19491_s5 + $0x134] ss:$8 sps:$4 sm:$0xff]  }
 0x42e   : > { %v6652_v50 = vadd.f32 %v6531_v48, %v5611_v22  ;;  %v6843_v36 = vshrl.u32 %v17905_v26, 16  ;;  %v6845_v4 = vshll.u32 %v17905_v26, 16  ;;  %v6689_v2 = vadd.f32 %v6660_v18, %v6651_v28  ;;  %v14191_v22 = vld [vmem:[%s19491_s5 + $0x144] ss:$8 sps:$4 sm:$0xff]   ;;  %v14189_v48 = vld [vmem:[%s19491_s5 + $0x140] ss:$8 sps:$4 sm:$0xff]  }
 0x42f   : > { %v6702_v31 = vmax.f32 %v6686_v29, 0.0  ;;  %v6835_v34 = vrot.slane %v6833_v9, 1  ;;  %v8205_v16 = vrot.slane %v6831_v32, 1  ;;  %v8206_v25 = vrot.slane %v6833_v9, 2  ;;  %v14195_v28 = vld [vmem:[%s19491_s5 + $0x130] ss:$8 sps:$4 sm:$0xff]  }
 0x430   : > { %v6690_v5 = vadd.f32 %v6664_v37, %v6652_v50  ;;  %v6705_v33 = vmax.f32 %v6689_v2, 0.0  ;;  %v8212_v51 = vrot.slane %v6843_v36, 1  ;;  %v8213_v49 = vrot.slane %v6845_v4, 2  ;;  %v14203_v29 = vld [vmem:[%s19491_s5 + $0x124] ss:$8 sps:$4 sm:$0xff]  }
 0x431   : > { %v6847_v35 = vrot.slane %v6845_v4, 1  ;;  %v6836_v56 = vor.u32 %v6835_v34, %v6831_v32  ;;  %v8207_v40 = vor.u32 %v8206_v25, %v8205_v16  ;;  %v14201_v50 = vld [vmem:[%s19491_s5 + $0x120] ss:$8 sps:$4 sm:$0xff]   ;;  %v14207_v2 = vld [vmem:[%s19491_s5 + $0x110] ss:$8 sps:$4 sm:$0xff]  }
 0x432   : > { %v6706_v19 = vmax.f32 %v6690_v5, 0.0  ;;  %v17911_v24 = vpack.c.bf16 %v6705_v33, %v6701_v58  ;;  %v8214_v14 = vor.u32 %v8213_v49, %v8212_v51  ;;  %v14215_v5 = vld [vmem:[%s19491_s5 + $0x104] ss:$8 sps:$4 sm:$0xff]   ;;  %v14213_v58 = vld [vmem:[%s19491_s5 + $0x100] ss:$8 sps:$4 sm:$0xff]  }
 0x433   : > { %v6848_v10 = vor.u32 %v6847_v35, %v6843_v36  ;;  %v14209_v36 = vld [vmem:[%s19491_s5 + $0x114] ss:$8 sps:$4 sm:$0xff]   ;;  %v14219_v51 = vld [vmem:[%s19491_s5 + $0x1b0] ss:$8 sps:$4 sm:$0xff]   ;;  %v14225_v35 = vld [vmem:[%s19491_s5 + $0x1a0] ss:$8 sps:$4 sm:$0xff]  }
 0x434   : > { %v17913_v54 = vpack.c.bf16 %v6706_v19, %v6702_v31  ;;  %v6838_v18 = vshll.u32 %v17911_v24, 16  ;;  %v6878_v37 = vshrl.u32 %v17911_v24, 16  ;;  %v14221_v33 = vld [vmem:[%s19491_s5 + $0x1b4] ss:$8 sps:$4 sm:$0xff]   ;;  %v14227_v31 = vld [vmem:[%s19491_s5 + $0x1a4] ss:$8 sps:$4 sm:$0xff]  }
 0x435   : > { %v19529_v25 = vld [vmem:[#allocation9_spill] sm:$0xff] }
 0x436   : > { %v6850_v8 = vshll.u32 %v17913_v54, 16  ;;  %v6881_v60 = vshrl.u32 %v17913_v54, 16  ;;  %v6840_v27 = vrot.slane %v6838_v18, 1  ;;  %v8208_v42 = vrot.slane %v6878_v37, 1 }
 0x437   : > { %v8209_v43 = vrot.slane %v6838_v18, 2  ;;  %v6620_v4 = vpop.f32.mrf.mxu1 }
 0x438   : > { %v6852_v11 = vrot.slane %v6850_v8, 1  ;;  %v8215_v55 = vrot.slane %v6881_v60, 1  ;;  %v8216_v44 = vrot.slane %v6850_v8, 2  ;;  %v6841_v23 = vsel %vm408_vm1, %v6836_v56, %v6840_v27 }
 0x439   : > { %v17929_v53 = vor.u32 %v8209_v43, %v8208_v42  ;;  %v6880_v39 = vor.u32 %v6878_v37, %v6840_v27  ;;  %v6622_v9 = vpop.f32.mrf.mxu1  ;;  %v19530_v8 = vsub.s32 2, %v19529_v25  ;;  %v19531_v42 = vsub.s32 3, %v19529_v25 }
 0x43a   : > { %v6853_v45 = vsel %vm408_vm1, %v6848_v10, %v6852_v11  ;;  %v6883_v13 = vor.u32 %v6881_v60, %v6852_v11  ;;  %v17927_v20 = vor.u32 %v8216_v44, %v8215_v55  ;;  %v14231_v11 = vld [vmem:[%s19491_s5 + $0x190] ss:$8 sps:$4 sm:$0xff]  }
 0x43b   : > { %7215 = vmatprep.mubr.bf16.mxu0 %v6853_v45  ;;  %v17943_v15 = vsel %vm919_vm3, %v8207_v40, %v17929_v53  ;;  %v6624_v32 = vpop.f32.mrf.mxu1  ;;  %v6668_v60 = vrot.slane %v17869_v59, %v19530_v8  ;;  %v6672_v56 = vrot.slane %v17869_v59, %v19531_v42 }
 0x43c   : > { %7216 = vmatmul.mubr.bf16.vlgmr.msra.gmra.mxu0 %v6841_v23  ;;  %v17936_v46 = vsel %vm919_vm3, %v8214_v14, %v17927_v20  ;;  %v14233_v14 = vld [vmem:[%s19491_s5 + $0x194] ss:$8 sps:$4 sm:$0xff]  }
 0x43d   : > { %7225 = vmatprep.mubr.bf16.mxu0 %v6883_v13  ;;  %7621 = vmatpush1.bf16.msra.mxu0 %v14180_v30  ;;  %v6626_v19 = vpop.f32.mrf.mxu1 }
 0x43e   : > { %7622 = vmatprep.subr.bf16.mxu0 %v14185_v41 }
 0x43f   : > { %v6630_v18 = vpop.f32.mrf.mxu1 }
 0x441   : > { %7623 = vmatpush1.bf16.msra.mxu0 %v14183_v61  ;;  %v6632_v44 = vpop.f32.mrf.mxu1 }
 0x442   : > { %7624 = vmatprep.subr.bf16.mxu0 %v14188_v0 }
 0x444   : > { %7226 = vmatmul.mubr.bf16.gmra.mxu0 %v6880_v39  ;;  %v6634_v39 = vpop.f32.mrf.mxu1 }
 0x445   : > { %7625 = vmatpush1.bf16.msra.mxu0 %v14186_v3  ;;  %v14245_v3 = vld [vmem:[%s19491_s5 + $0x3f4] ss:$8 sps:$4 sm:$0xff]  }
 0x446   : > { %7626 = vmatprep.subr.bf16.mxu0 %v14191_v22 }
 0x449   : > { %7627 = vmatpush1.bf16.msra.mxu0 %v14189_v48 }
 0x44a   : > { %7628 = vmatprep.subr.bf16.mxu0 %v14197_v62 }
 0x44d   : > { %7629 = vmatpush1.bf16.msra.mxu0 %v14195_v28 }
 0x44e   : > { %7630 = vmatprep.subr.bf16.mxu0 %v14203_v29 }
 0x451   : > { %7631 = vmatpush1.bf16.msra.mxu0 %v14201_v50 }
 0x452   : > { %7632 = vmatprep.subr.bf16.mxu0 %v14209_v36 }
 0x455   : > { %7633 = vmatpush1.bf16.msra.mxu0 %v14207_v2 }
 0x456   : > { %7634 = vmatprep.subr.bf16.mxu0 %v14215_v5  ;;  %v6636_v5 = vpop.f32.mrf.mxu1 }
 0x459   : > { %7635 = vmatpush1.bf16.msra.mxu0 %v14213_v58 }
 0x45a   : > { %7644 = vmatprep.subr.bf16.mxu0 %v14221_v33 }
 0x45d   : > { %v6567_v49 = vpop.f32.mrf.mxu0  ;;  %7645 = vmatpush2.bf16.msra.mxu0 %v14219_v51  ;;  %v7739_v51 = vrot.slane %v17905_v26, 1 }
 0x45e   : > { %v6621_v34 = vadd.f32 %v6620_v4, %v6567_v49  ;;  %7646 = vmatprep.subr.bf16.mxu0 %v14227_v31  ;;  %v7740_v31 = vrot.slane %v17913_v54, 1 }
 0x45f   : > { %v6569_v37 = vpop.f32.mrf.mxu0 }
 0x460   : > { %v6641_v16 = vadd.f32 %v6621_v34, %v17786_v17  ;;  %v6623_v27 = vadd.f32 %v6622_v9, %v6569_v37  ;;  %v14239_v17 = vld [vmem:[%s19491_s5 + $0x184] ss:$8 sps:$4 sm:$0xff]  }
 0x461   : > { %v6571_v10 = vpop.f32.mrf.mxu0  ;;  %7647 = vmatpush2.bf16.msra.mxu0 %v14225_v35 }
 0x462   : > { %v6642_v55 = vadd.f32 %v6623_v27, %v17790_v6  ;;  %v6625_v30 = vadd.f32 %v6624_v32, %v6571_v10  ;;  %7648 = vmatprep.subr.bf16.mxu0 %v14233_v14  ;;  %v6679_v45 = vadd.f32 %v6668_v60, %v6641_v16  ;;  %v14237_v6 = vld [vmem:[%s19491_s5 + $0x180] ss:$8 sps:$4 sm:$0xff]  }
 0x463   : > { %v6573_v40 = vpop.f32.mrf.mxu0 }
 0x464   : > { %v6645_v13 = vadd.f32 %v6625_v30, %v17796_v57  ;;  %v6627_v41 = vadd.f32 %v6626_v19, %v6573_v40  ;;  %v6680_v23 = vadd.f32 %v6672_v56, %v6642_v55  ;;  %v6695_v57 = vmax.f32 %v6679_v45, 0.0 }
 0x465   : > { %v6577_v43 = vpop.f32.mrf.mxu0  ;;  %7649 = vmatpush2.bf16.msra.mxu0 %v14231_v11  ;;  %v14249_v11 = vld [vmem:[%s19491_s5 + $0x3e0] ss:$8 sps:$4 sm:$0xff]  }
 0x466   : > { %v6683_v59 = vadd.f32 %v6668_v60, %v6645_v13  ;;  %v6646_v61 = vadd.f32 %v6627_v41, %v17799_v21  ;;  %v6631_v0 = vadd.f32 %v6630_v18, %v6577_v43  ;;  %7650 = vmatprep.subr.bf16.mxu0 %v14239_v17  ;;  %v6696_v36 = vmax.f32 %v6680_v23, 0.0 }
 0x467   : > { %v6579_v22 = vpop.f32.mrf.mxu0 }
 0x468   : > { %v6699_v48 = vmax.f32 %v6683_v59, 0.0  ;;  %v6684_v62 = vadd.f32 %v6672_v56, %v6646_v61  ;;  %v6633_v28 = vadd.f32 %v6632_v44, %v6579_v22  ;;  %v6649_v29 = vadd.f32 %v6631_v0, %v17808_v47  ;;  %v14243_v47 = vld [vmem:[%s19491_s5 + $0x3f0] ss:$8 sps:$4 sm:$0xff]   ;;  %v14263_v22 = vld [vmem:[%s19491_s5 + $0x3c4] ss:$8 sps:$4 sm:$0xff]  }
 0x469   : > { %v6581_v50 = vpop.f32.mrf.mxu0  ;;  %7651 = vmatpush2.bf16.msra.mxu0 %v14237_v6  ;;  %v14255_v61 = vld [vmem:[%s19491_s5 + $0x3d0] ss:$8 sps:$4 sm:$0xff]  }
 0x46a   : > { %v18016_v4 = vpack.c.bf16 %v6699_v48, %v6695_v57  ;;  %v6700_v21 = vmax.f32 %v6684_v62, 0.0  ;;  %v6650_v2 = vadd.f32 %v6633_v28, %v17812_v12  ;;  %8040 = vmatprep.subr.bf16.mxu0 %v14245_v3  ;;  %v6635_v9 = vadd.f32 %v6634_v39, %v6581_v50  ;;  %v14251_v12 = vld [vmem:[%s19491_s5 + $0x3e4] ss:$8 sps:$4 sm:$0xff]  }
 0x46b   : > { %v6583_v58 = vpop.f32.mrf.mxu0  ;;  %v6687_v19 = vadd.f32 %v6668_v60, %v6649_v29 }
 0x46c   : > { %v18019_v33 = vpack.c.bf16 %v6700_v21, %v6696_v36  ;;  %v6637_v32 = vadd.f32 %v6636_v5, %v6583_v58  ;;  %v6653_v49 = vadd.f32 %v6635_v9, %v17822_v1  ;;  %v6855_v35 = vshrl.u32 %v18016_v4, 16  ;;  %v14261_v58 = vld [vmem:[%s19491_s5 + $0x3c0] ss:$8 sps:$4 sm:$0xff]  }
 0x46d   : > { %v6857_v34 = vshll.u32 %v18016_v4, 16  ;;  %v6688_v14 = vadd.f32 %v6672_v56, %v6650_v2  ;;  %v6703_v42 = vmax.f32 %v6687_v19, 0.0  ;;  %v8696_v39 = vrot.slane %v18016_v4, 2  ;;  %v14264_v19 = vld [vmem:[%s19491_s5 + $0x70] ss:$8 sps:$4 sm:$0xff]  }
 0x46e   : > { %v6654_v18 = vadd.f32 %v6637_v32, %v17824_v7  ;;  %12417 = vmatprep.mubr.msk.bf16.mxu0 %vm7176_vm6, %v18019_v33  ;;  %v6867_v37 = vshrl.u32 %v18019_v33, 16  ;;  %v6869_v16 = vshll.u32 %v18019_v33, 16  ;;  %v6691_v8 = vadd.f32 %v6668_v60, %v6653_v49  ;;  %v14257_v60 = vld [vmem:[%s19491_s5 + $0x3d4] ss:$8 sps:$4 sm:$0xff]  }
 0x46f   : > { %7653 = vmatmul.mubr.bf16.vlgmr.msra.gmra.mxu0 %v18016_v4  ;;  %v6859_v1 = vrot.slane %v6857_v34, 1  ;;  %v18038_v27 = vrot.slane %v6855_v35, 1  ;;  %v7741_v7 = vsel %vm738_vm2, %v7739_v51, %v7740_v31  ;;  %v8220_v17 = vrot.slane %v6857_v34, 2 }
 0x470   : > { %v6692_v10 = vadd.f32 %v6672_v56, %v6654_v18  ;;  %8041 = vmatpush1.bf16.msra.mxu0 %v14243_v47  ;;  %v6871_v55 = vrot.slane %v6869_v16, 1  ;;  %v6707_v30 = vmax.f32 %v6691_v8, 0.0  ;;  %v7742_v56 = vrot.slane %v18016_v4, 1 }
 0x471   : > { %8042 = vmatprep.subr.bf16.mxu0 %v14251_v12  ;;  %v6704_v44 = vmax.f32 %v6688_v14, 0.0  ;;  %v8226_v45 = vrot.slane %v6867_v37, 1  ;;  %v7745_v13 = vrot.slane %v18019_v33, 1  ;;  %v6860_v43 = vor.u32 %v6859_v1, %v6855_v35 }
 0x472   : > { %v6708_v40 = vmax.f32 %v6692_v10, 0.0  ;;  %v18051_v41 = vpack.c.bf16 %v6707_v30, %v6703_v42  ;;  %v8227_v6 = vrot.slane %v6869_v16, 2  ;;  %v8221_v23 = vor.u32 %v8220_v17, %v18038_v27  ;;  %v14272_v16 = vld [vmem:[%s19491_s5 + $0x64] ss:$8 sps:$4 sm:$0xff]   ;;  %v14267_v10 = vld [vmem:[%s19491_s5 + $0x3b0] ss:$8 sps:$4 sm:$0xff]  }
 0x473   : > { %v6872_v0 = vor.u32 %v6871_v55, %v6867_v37  ;;  %v8699_v3 = vrot.slane %v18019_v33, 2  ;;  %v14269_v37 = vld [vmem:[%s19491_s5 + $0x3b4] ss:$8 sps:$4 sm:$0xff]   ;;  %v14275_v55 = vld [vmem:[%s19491_s5 + $0x3a4] ss:$8 sps:$4 sm:$0xff]  }
 0x474   : > { %v18054_v59 = vpack.c.bf16 %v6708_v40, %v6704_v44  ;;  %8043 = vmatpush1.bf16.msra.mxu0 %v14249_v11  ;;  %v6862_v57 = vshll.u32 %v18051_v41, 16  ;;  %v6884_v48 = vshrl.u32 %v18051_v41, 16  ;;  %v7743_v62 = vrot.slane %v18051_v41, 1  ;;  %v14278_v42 = vld [vmem:[%s19491_s5 + $0x54] ss:$8 sps:$4 sm:$0xff]  }
 0x475   : > { %8044 = vmatprep.subr.bf16.mxu0 %v14257_v60  ;;  %v8697_v28 = vrot.slane %v18051_v41, 2  ;;  %v8228_v12 = vor.u32 %v8227_v6, %v8226_v45  ;;  %v14273_v30 = vld [vmem:[%s19491_s5 + $0x3a0] ss:$8 sps:$4 sm:$0xff]   ;;  %v14276_v60 = vld [vmem:[%s19491_s5 + $0x50] ss:$8 sps:$4 sm:$0xff]  }
 0x476   : > { %12418 = vmatprep.mubr.msk.bf16.mxu0 %vm7176_vm6, %v18054_v59  ;;  %v6874_v29 = vshll.u32 %v18054_v59, 16  ;;  %v6887_v50 = vshrl.u32 %v18054_v59, 16  ;;  %v7746_v36 = vrot.slane %v18054_v59, 1  ;;  %v8700_v4 = vrot.slane %v18054_v59, 2  ;;  %v14284_v44 = vld [vmem:[%s19491_s5 + $0x44] ss:$8 sps:$4 sm:$0xff]  }
 0x477   : > { %7663 = vmatmul.mubr.bf16.gmra.mxu0 %v18051_v41  ;;  %v6864_v21 = vrot.slane %v6862_v57, 1  ;;  %v8222_v2 = vrot.slane %v6884_v48, 1  ;;  %v8223_v5 = vrot.slane %v6862_v57, 2  ;;  %v18078_v9 = vsel %vm738_vm2, %v7742_v56, %v7743_v62  ;;  %v14281_v56 = vld [vmem:[%s19491_s5 + $0x394] ss:$8 sps:$4 sm:$0xff]  }
 0x478   : > { %8045 = vmatpush1.bf16.msra.mxu0 %v14255_v61  ;;  %8072 = vmatprep.mubr.bf16.mxu0 %v7741_v7  ;;  %v6876_v33 = vrot.slane %v6874_v29, 1  ;;  %v8229_v32 = vrot.slane %v6887_v50, 1  ;;  %v8230_v47 = vrot.slane %v6874_v29, 2  ;;  %v18086_v51 = vsel %vm738_vm2, %v7745_v13, %v7746_v36  ;;  %v14270_v7 = vld [vmem:[%s19491_s5 + $0x60] ss:$8 sps:$4 sm:$0xff]  }
 0x479   : > { %8046 = vmatprep.subr.bf16.mxu0 %v14263_v22  ;;  %v6865_v49 = vsel %vm408_vm1, %v6860_v43, %v6864_v21  ;;  %v18092_v35 = vor.u32 %v8223_v5, %v8222_v2  ;;  %v18097_v34 = vsel %vm1104_vm4, %v8699_v3, %v8700_v4  ;;  %v18111_v1 = vsel %vm1104_vm4, %v8696_v39, %v8697_v28  ;;  %v14279_v40 = vld [vmem:[%s19491_s5 + $0x390] ss:$8 sps:$4 sm:$0xff]   ;;  %v14282_v45 = vld [vmem:[%s19491_s5 + $0x40] ss:$8 sps:$4 sm:$0xff]   ;;  %v14287_v13 = vld [vmem:[%s19491_s5 + $0x384] ss:$8 sps:$4 sm:$0xff]  }
 0x47a   : > { %v6877_v14 = vsel %vm408_vm1, %v6872_v0, %v6876_v33  ;;  %v6889_v18 = vor.u32 %v6887_v50, %v6876_v33  ;;  %v18106_v8 = vor.u32 %v8230_v47, %v8229_v32  ;;  %v6886_v17 = vor.u32 %v6884_v48, %v6864_v21  ;;  %v14290_v43 = vld [vmem:[%s19491_s5 + $0x34] ss:$8 sps:$4 sm:$0xff]   ;;  %v14285_v6 = vld [vmem:[%s19491_s5 + $0x380] ss:$8 sps:$4 sm:$0xff]   ;;  %v14296_v0 = vld [vmem:[%s19491_s5 + $0x24] ss:$8 sps:$4 sm:$0xff]  }
 0x47b   : > { %12359 = vmatprep.mubr.msk.bf16.mxu1 %vm7176_vm6, %v6877_v14  ;;  %v18116_v27 = vsel %vm919_vm3, %v8221_v23, %v18092_v35  ;;  %v14288_v23 = vld [vmem:[%s19491_s5 + $0x30] ss:$8 sps:$4 sm:$0xff]   ;;  %v14293_v61 = vld [vmem:[%s19491_s5 + $0x474] ss:$8 sps:$4 sm:$0xff]   ;;  %v14294_v39 = vld [vmem:[%s19491_s5 + $0x20] ss:$8 sps:$4 sm:$0xff]  }
 0x47c   : > { %8047 = vmatpush1.bf16.msra.mxu0 %v14261_v58  ;;  %7267 = vmatmul.mubr.bf16.vlgmr.msra.gmra.mxu1 %v6865_v49  ;;  %v18123_v11 = vsel %vm919_vm3, %v8228_v12, %v18106_v8  ;;  %v14291_v3 = vld [vmem:[%s19491_s5 + $0x470] ss:$8 sps:$4 sm:$0xff]   ;;  %v14299_v22 = vld [vmem:[%s19491_s5 + $0x464] ss:$8 sps:$4 sm:$0xff]   ;;  %v14302_v57 = vld [vmem:[%s19491_s5 + $0x14] ss:$8 sps:$4 sm:$0xff]  }
 0x47d   : > { %7570 = vmatpush1.bf16.msra.mxu1 %v14264_v19  ;;  %12360 = vmatprep.mubr.msk.bf16.mxu1 %vm7176_vm6, %v6889_v18  ;;  %v14297_v48 = vld [vmem:[%s19491_s5 + $0x460] ss:$8 sps:$4 sm:$0xff]   ;;  %v14300_v29 = vld [vmem:[%s19491_s5 + $0x10] ss:$8 sps:$4 sm:$0xff]   ;;  %v14305_v50 = vld [vmem:[%s19491_s5 + $0x454] ss:$8 sps:$4 sm:$0xff]  }
 0x47e   : > { %8048 = vmatprep.subr.bf16.mxu0 %v14269_v37  ;;  %7571 = vmatprep.subr.bf16.mxu1 %v14272_v16  ;;  %v14308_v21 = vld [vmem:[%s19491_s5 + $0x4] ss:$8 sps:$4 sm:$0xff]   ;;  %v14303_v2 = vld [vmem:[%s19491_s5 + $0x450] ss:$8 sps:$4 sm:$0xff]   ;;  %v14306_v5 = vld [vmem:[%s19491_s5] ss:$8 sps:$4 sm:$0xff]  }
 0x47f   : > { %v14311_v58 = vld [vmem:[%s19491_s5 + $0x444] ss:$8 sps:$4 sm:$0xff]   ;;  %v14314_v33 = vld [vmem:[%s19491_s5 + $0xf4] ss:$8 sps:$4 sm:$0xff]   ;;  %v14309_v32 = vld [vmem:[%s19491_s5 + $0x440] ss:$8 sps:$4 sm:$0xff]  }
 0x480   : > { %8049 = vmatpush1.bf16.msra.mxu0 %v14267_v10  ;;  %v14312_v47 = vld [vmem:[%s19491_s5 + $0xf0] ss:$8 sps:$4 sm:$0xff]   ;;  %v14317_v19 = vld [vmem:[%s19491_s5 + $0x434] ss:$8 sps:$4 sm:$0xff]   ;;  %v14320_v49 = vld [vmem:[%s19491_s5 + $0xe4] ss:$8 sps:$4 sm:$0xff]  }
 0x481   : > { %7572 = vmatpush1.bf16.msra.mxu1 %v14270_v7  ;;  %8050 = vmatprep.subr.bf16.mxu0 %v14275_v55  ;;  %v14315_v12 = vld [vmem:[%s19491_s5 + $0x430] ss:$8 sps:$4 sm:$0xff]   ;;  %v14318_v14 = vld [vmem:[%s19491_s5 + $0xe0] ss:$8 sps:$4 sm:$0xff]   ;;  %v14323_v18 = vld [vmem:[%s19491_s5 + $0x424] ss:$8 sps:$4 sm:$0xff]  }
 0x482   : > { %7573 = vmatprep.subr.bf16.mxu1 %v14278_v42  ;;  %v14326_v37 = vld [vmem:[%s19491_s5 + $0xd4] ss:$8 sps:$4 sm:$0xff]   ;;  %v14321_v16 = vld [vmem:[%s19491_s5 + $0x420] ss:$8 sps:$4 sm:$0xff]   ;;  %v14324_v10 = vld [vmem:[%s19491_s5 + $0xd0] ss:$8 sps:$4 sm:$0xff]  }
 0x483   : > { %v14329_v7 = vld [vmem:[%s19491_s5 + $0x414] ss:$8 sps:$4 sm:$0xff]   ;;  %v14332_v55 = vld [vmem:[%s19491_s5 + $0xc4] ss:$8 sps:$4 sm:$0xff]   ;;  %v14327_v42 = vld [vmem:[%s19491_s5 + $0x410] ss:$8 sps:$4 sm:$0xff]  }
 0x484   : > { %8051 = vmatpush1.bf16.msra.mxu0 %v14273_v30  ;;  %7277 = vmatmul.mubr.bf16.gmra.mxu1 %v6886_v17  ;;  %v14330_v30 = vld [vmem:[%s19491_s5 + $0xc0] ss:$8 sps:$4 sm:$0xff]   ;;  %v14338_v17 = vld [vmem:[%s19491_s5 + $0xb4] ss:$8 sps:$4 sm:$0xff]  }
 0x485   : > { %7574 = vmatpush1.bf16.msra.mxu1 %v14276_v60  ;;  %7601 = vmatprep.mubr.bf16.mxu1 %v17905_v26  ;;  %v14335_v60 = vld [vmem:[%s19491_s5 + $0x404] ss:$8 sps:$4 sm:$0xff]  }
 0x486   : > { %8052 = vmatprep.subr.bf16.mxu0 %v14281_v56  ;;  %7575 = vmatprep.subr.bf16.mxu1 %v14284_v44  ;;  %v14333_v56 = vld [vmem:[%s19491_s5 + $0x400] ss:$8 sps:$4 sm:$0xff]   ;;  %v14336_v44 = vld [vmem:[%s19491_s5 + $0xb0] ss:$8 sps:$4 sm:$0xff]  }
 0x488   : > { %8053 = vmatpush1.bf16.msra.mxu0 %v14279_v40  ;;  %v14341_v40 = vld [vmem:[%s19491_s5 + $0x6b4] ss:$8 sps:$4 sm:$0xff]  }
 0x489   : > { %7576 = vmatpush1.bf16.msra.mxu1 %v14282_v45  ;;  %8054 = vmatprep.subr.bf16.mxu0 %v14287_v13  ;;  %v7737_v45 = vrot.slane %v17911_v24, 1  ;;  %v14344_v13 = vld [vmem:[%s19491_s5 + $0xa4] ss:$8 sps:$4 sm:$0xff]  }
 0x48a   : > { %7577 = vmatprep.subr.bf16.mxu1 %v14290_v43  ;;  %v7736_v43 = vrot.slane %v17903_v63, 1 }
 0x48c   : > { %8055 = vmatpush1.bf16.msra.mxu0 %v14285_v6  ;;  %v14339_v6 = vld [vmem:[%s19491_s5 + $0x6b0] ss:$8 sps:$4 sm:$0xff]  }
 0x48d   : > { %7578 = vmatpush1.bf16.msra.mxu1 %v14288_v23  ;;  %8056 = vmatprep.subr.bf16.mxu0 %v14293_v61  ;;  %v14342_v23 = vld [vmem:[%s19491_s5 + $0xa0] ss:$8 sps:$4 sm:$0xff]   ;;  %v14347_v61 = vld [vmem:[%s19491_s5 + $0x6a4] ss:$8 sps:$4 sm:$0xff]  }
 0x48e   : > { %7579 = vmatprep.subr.bf16.mxu1 %v14296_v0  ;;  %v7738_v0 = vsel %vm738_vm2, %v7736_v43, %v7737_v45  ;;  %v14404_v43 = vld [vmem:[%s19491_s5 + $0x484] ss:$8 sps:$4 sm:$0xff]  }
 0x490   : > { %8057 = vmatpush2.bf16.msra.mxu0 %v14291_v3  ;;  %v14350_v3 = vld [vmem:[%s19491_s5 + $0x94] ss:$8 sps:$4 sm:$0xff]  }
 0x491   : > { %7580 = vmatpush1.bf16.msra.mxu1 %v14294_v39  ;;  %8058 = vmatprep.subr.bf16.mxu0 %v14299_v22  ;;  %v14345_v39 = vld [vmem:[%s19491_s5 + $0x6a0] ss:$8 sps:$4 sm:$0xff]   ;;  %v14348_v22 = vld [vmem:[%s19491_s5 + $0x90] ss:$8 sps:$4 sm:$0xff]  }
 0x492   : > { %7581 = vmatprep.subr.bf16.mxu1 %v14302_v57  ;;  %v14353_v57 = vld [vmem:[%s19491_s5 + $0x694] ss:$8 sps:$4 sm:$0xff]  }
 0x494   : > { %8059 = vmatpush2.bf16.msra.mxu0 %v14297_v48  ;;  %v14351_v48 = vld [vmem:[%s19491_s5 + $0x690] ss:$8 sps:$4 sm:$0xff]  }
 0x495   : > { %7582 = vmatpush1.bf16.msra.mxu1 %v14300_v29  ;;  %8060 = vmatprep.subr.bf16.mxu0 %v14305_v50  ;;  %v14354_v29 = vld [vmem:[%s19491_s5 + $0x80] ss:$8 sps:$4 sm:$0xff]   ;;  %v14359_v50 = vld [vmem:[%s19491_s5 + $0x684] ss:$8 sps:$4 sm:$0xff]  }
 0x496   : > { %7583 = vmatprep.subr.bf16.mxu1 %v14308_v21  ;;  %v14362_v21 = vld [vmem:[%s19491_s5 + $0x4f4] ss:$8 sps:$4 sm:$0xff]  }
 0x498   : > { %8061 = vmatpush2.bf16.msra.mxu0 %v14303_v2  ;;  %v14357_v2 = vld [vmem:[%s19491_s5 + $0x680] ss:$8 sps:$4 sm:$0xff]  }
 0x499   : > { %7584 = vmatpush1.bf16.msra.mxu1 %v14306_v5  ;;  %8062 = vmatprep.subr.bf16.mxu0 %v14311_v58  ;;  %v14360_v5 = vld [vmem:[%s19491_s5 + $0x4f0] ss:$8 sps:$4 sm:$0xff]   ;;  %v14365_v58 = vld [vmem:[%s19491_s5 + $0x674] ss:$8 sps:$4 sm:$0xff]  }
 0x49a   : > { %7585 = vmatprep.subr.bf16.mxu1 %v14314_v33  ;;  %v14368_v33 = vld [vmem:[%s19491_s5 + $0x4e4] ss:$8 sps:$4 sm:$0xff]  }
 0x49c   : > { %8063 = vmatpush2.bf16.msra.mxu0 %v14309_v32  ;;  %v14366_v32 = vld [vmem:[%s19491_s5 + $0x4e0] ss:$8 sps:$4 sm:$0xff]  }
 0x49d   : > { %7586 = vmatpush2.bf16.msra.mxu1 %v14312_v47  ;;  %8064 = vmatprep.subr.bf16.mxu0 %v14317_v19  ;;  %v14371_v47 = vld [vmem:[%s19491_s5 + $0x664] ss:$8 sps:$4 sm:$0xff]   ;;  %v14374_v19 = vld [vmem:[%s19491_s5 + $0x4d4] ss:$8 sps:$4 sm:$0xff]  }
 0x49e   : > { %7587 = vmatprep.subr.bf16.mxu1 %v14320_v49  ;;  %v14369_v49 = vld [vmem:[%s19491_s5 + $0x660] ss:$8 sps:$4 sm:$0xff]  }
 0x4a0   : > { %8065 = vmatpush2.bf16.msra.mxu0 %v14315_v12  ;;  %v14372_v12 = vld [vmem:[%s19491_s5 + $0x4d0] ss:$8 sps:$4 sm:$0xff]  }
 0x4a1   : > { %7588 = vmatpush2.bf16.msra.mxu1 %v14318_v14  ;;  %8066 = vmatprep.subr.bf16.mxu0 %v14323_v18  ;;  %v14377_v14 = vld [vmem:[%s19491_s5 + $0x654] ss:$8 sps:$4 sm:$0xff]   ;;  %v14380_v18 = vld [vmem:[%s19491_s5 + $0x4c4] ss:$8 sps:$4 sm:$0xff]  }
 0x4a2   : > { %7589 = vmatprep.subr.bf16.mxu1 %v14326_v37  ;;  %v14375_v37 = vld [vmem:[%s19491_s5 + $0x650] ss:$8 sps:$4 sm:$0xff]  }
 0x4a4   : > { %8067 = vmatpush2.bf16.msra.mxu0 %v14321_v16  ;;  %v14378_v16 = vld [vmem:[%s19491_s5 + $0x4c0] ss:$8 sps:$4 sm:$0xff]  }
 0x4a5   : > { %7590 = vmatpush2.bf16.msra.mxu1 %v14324_v10  ;;  %8068 = vmatprep.subr.bf16.mxu0 %v14329_v7  ;;  %v14383_v10 = vld [vmem:[%s19491_s5 + $0x644] ss:$8 sps:$4 sm:$0xff]   ;;  %v14386_v7 = vld [vmem:[%s19491_s5 + $0x4b4] ss:$8 sps:$4 sm:$0xff]  }
 0x4a6   : > { %7591 = vmatprep.subr.bf16.mxu1 %v14332_v55  ;;  %v14381_v55 = vld [vmem:[%s19491_s5 + $0x640] ss:$8 sps:$4 sm:$0xff]  }
 0x4a8   : > { %8069 = vmatpush2.bf16.msra.mxu0 %v14327_v42  ;;  %v14389_v42 = vld [vmem:[%s19491_s5 + $0x6f4] ss:$8 sps:$4 sm:$0xff]  }
 0x4a9   : > { %7592 = vmatpush2.bf16.msra.mxu1 %v14330_v30  ;;  %8070 = vmatprep.subr.bf16.mxu0 %v14335_v60  ;;  %v14392_v30 = vld [vmem:[%s19491_s5 + $0x4a4] ss:$8 sps:$4 sm:$0xff]   ;;  %v14387_v60 = vld [vmem:[%s19491_s5 + $0x6f0] ss:$8 sps:$4 sm:$0xff]  }
 0x4aa   : > { %7593 = vmatprep.subr.bf16.mxu1 %v14338_v17  ;;  %v14390_v17 = vld [vmem:[%s19491_s5 + $0x4a0] ss:$8 sps:$4 sm:$0xff]  }
 0x4ac   : > { %8071 = vmatpush2.bf16.msra.mxu0 %v14333_v56  ;;  %v14395_v56 = vld [vmem:[%s19491_s5 + $0x6e4] ss:$8 sps:$4 sm:$0xff]  }
 0x4ad   : > { %7594 = vmatpush2.bf16.msra.mxu1 %v14336_v44  ;;  %8576 = vmatprep.subr.bf16.mxu0 %v14341_v40  ;;  %v14398_v44 = vld [vmem:[%s19491_s5 + $0x494] ss:$8 sps:$4 sm:$0xff]   ;;  %v14393_v40 = vld [vmem:[%s19491_s5 + $0x6e0] ss:$8 sps:$4 sm:$0xff]  }
 0x4ae   : > { %7595 = vmatprep.subr.bf16.mxu1 %v14344_v13  ;;  %v14401_v13 = vld [vmem:[%s19491_s5 + $0x6d4] ss:$8 sps:$4 sm:$0xff]  }
 0x4af   : > { %8073 = vmatmul.mubr.bf16.vlgmr.msra.gmra.mxu0 %v7738_v0  ;;  %v14410_v0 = vld [vmem:[%s19491_s5 + $0x534] ss:$8 sps:$4 sm:$0xff]  }
 0x4b0   : > { %8082 = vmatprep.mubr.bf16.mxu0 %v7740_v31  ;;  %8577 = vmatpush1.bf16.msra.mxu0 %v14339_v6  ;;  %v14356_v31 = vld [vmem:[%s19491_s5 + $0x84] ss:$8 sps:$4 sm:$0xff]   ;;  %v14399_v6 = vld [vmem:[%s19491_s5 + $0x6d0] ss:$8 sps:$4 sm:$0xff]  }
 0x4b1   : > { %7596 = vmatpush2.bf16.msra.mxu1 %v14342_v23  ;;  %8578 = vmatprep.subr.bf16.mxu0 %v14347_v61  ;;  %v14402_v23 = vld [vmem:[%s19491_s5 + $0x480] ss:$8 sps:$4 sm:$0xff]   ;;  %v14407_v61 = vld [vmem:[%s19491_s5 + $0x6c4] ss:$8 sps:$4 sm:$0xff]  }
 0x4b2   : > { %7597 = vmatprep.subr.bf16.mxu1 %v14350_v3  ;;  %v14405_v3 = vld [vmem:[%s19491_s5 + $0x6c0] ss:$8 sps:$4 sm:$0xff]  }
 0x4b4   : > { %8579 = vmatpush1.bf16.msra.mxu0 %v14345_v39  ;;  %v14408_v39 = vld [vmem:[%s19491_s5 + $0x530] ss:$8 sps:$4 sm:$0xff]  }
 0x4b5   : > { %7598 = vmatpush2.bf16.msra.mxu1 %v14348_v22  ;;  %8580 = vmatprep.subr.bf16.mxu0 %v14353_v57  ;;  %v14413_v22 = vld [vmem:[%s19491_s5 + $0x774] ss:$8 sps:$4 sm:$0xff]   ;;  %v14416_v57 = vld [vmem:[%s19491_s5 + $0x524] ss:$8 sps:$4 sm:$0xff]  }
 0x4b6   : > { %7599 = vmatprep.subr.bf16.mxu1 %v14356_v31  ;;  %v14411_v31 = vld [vmem:[%s19491_s5 + $0x770] ss:$8 sps:$4 sm:$0xff]  }
 0x4b7   : > { %8083 = vmatmul.mubr.bf16.gmra.mxu0 %v7737_v45  ;;  %v14396_v45 = vld [vmem:[%s19491_s5 + $0x490] ss:$8 sps:$4 sm:$0xff]  }
 0x4b8   : > { %8581 = vmatpush1.bf16.msra.mxu0 %v14351_v48  ;;  %12645 = vmatprep.mubr.msk.bf16.mxu0 %vm7176_vm6, %v18123_v11  ;;  %v14363_v11 = vld [vmem:[%s19491_s5 + $0x670] ss:$8 sps:$4 sm:$0xff]   ;;  %v14414_v48 = vld [vmem:[%s19491_s5 + $0x520] ss:$8 sps:$4 sm:$0xff]  }
 0x4b9   : > { %7600 = vmatpush2.bf16.msra.mxu1 %v14354_v29  ;;  %8582 = vmatprep.subr.bf16.mxu0 %v14359_v50  ;;  %v14419_v29 = vld [vmem:[%s19491_s5 + $0x764] ss:$8 sps:$4 sm:$0xff]   ;;  %v14422_v50 = vld [vmem:[%s19491_s5 + $0x514] ss:$8 sps:$4 sm:$0xff]  }
 0x4ba   : > { %8091 = vmatprep.subr.bf16.mxu1 %v14362_v21  ;;  %v14417_v21 = vld [vmem:[%s19491_s5 + $0x760] ss:$8 sps:$4 sm:$0xff]  }
 0x4bc   : > { %7602 = vmatmul.mubr.bf16.vlgmr.msra.gmra.mxu1 %v17903_v63  ;;  %8583 = vmatpush1.bf16.msra.mxu0 %v14357_v2  ;;  %v14420_v2 = vld [vmem:[%s19491_s5 + $0x510] ss:$8 sps:$4 sm:$0xff]  }
 0x4bd   : > { %7611 = vmatprep.mubr.bf16.mxu1 %v17913_v54  ;;  %8092 = vmatpush1.bf16.msra.mxu1 %v14360_v5  ;;  %v14425_v5 = vld [vmem:[%s19491_s5 + $0x754] ss:$8 sps:$4 sm:$0xff]  }
 0x4be   : > { %8584 = vmatprep.subr.bf16.mxu0 %v14365_v58  ;;  %8093 = vmatprep.subr.bf16.mxu1 %v14368_v33  ;;  %v14423_v58 = vld [vmem:[%s19491_s5 + $0x750] ss:$8 sps:$4 sm:$0xff]   ;;  %v14426_v33 = vld [vmem:[%s19491_s5 + $0x500] ss:$8 sps:$4 sm:$0xff]  }
 0x4c0   : > { %8585 = vmatpush1.bf16.msra.mxu0 %v14363_v11  ;;  %v8693_v11 = vrot.slane %v17905_v26, 2  ;;  %v14429_v26 = vld [vmem:[%s19491_s5 + $0x740] ss:$8 sps:$4 sm:$0xff]  }
 0x4c1   : > { %8094 = vmatpush1.bf16.msra.mxu1 %v14366_v32  ;;  %8586 = vmatprep.subr.bf16.mxu0 %v14371_v47  ;;  %v14431_v32 = vld [vmem:[%s19491_s5 + $0x744] ss:$8 sps:$4 sm:$0xff]   ;;  %v14434_v47 = vld [vmem:[%s19491_s5 + $0x5b4] ss:$8 sps:$4 sm:$0xff]  }
 0x4c2   : > { %8095 = vmatprep.subr.bf16.mxu1 %v14374_v19 }
 0x4c4   : > { %7612 = vmatmul.mubr.bf16.gmra.mxu1 %v17911_v24  ;;  %8587 = vmatpush1.bf16.msra.mxu0 %v14369_v49  ;;  %v14432_v49 = vld [vmem:[%s19491_s5 + $0x5b0] ss:$8 sps:$4 sm:$0xff]  }
 0x4c5   : > { %8096 = vmatpush1.bf16.msra.mxu1 %v14372_v12  ;;  %12531 = vmatprep.mubr.msk.bf16.mxu1 %vm7176_vm6, %v18086_v51  ;;  %v14384_v51 = vld [vmem:[%s19491_s5 + $0x4b0] ss:$8 sps:$4 sm:$0xff]   ;;  %v14440_v12 = vld [vmem:[%s19491_s5 + $0x5a4] ss:$8 sps:$4 sm:$0xff]  }
 0x4c6   : > { %8588 = vmatprep.subr.bf16.mxu0 %v14377_v14  ;;  %8097 = vmatprep.subr.bf16.mxu1 %v14380_v18  ;;  %v14435_v14 = vld [vmem:[%s19491_s5 + $0x730] ss:$8 sps:$4 sm:$0xff]   ;;  %v14438_v18 = vld [vmem:[%s19491_s5 + $0x5a0] ss:$8 sps:$4 sm:$0xff]  }
 0x4c8   : > { %8589 = vmatpush1.bf16.msra.mxu0 %v14375_v37  ;;  %v14443_v37 = vld [vmem:[%s19491_s5 + $0x724] ss:$8 sps:$4 sm:$0xff]  }
 0x4c9   : > { %8098 = vmatpush1.bf16.msra.mxu1 %v14378_v16  ;;  %8590 = vmatprep.subr.bf16.mxu0 %v14383_v10  ;;  %v14444_v16 = vld [vmem:[%s19491_s5 + $0x590] ss:$8 sps:$4 sm:$0xff]   ;;  %v14449_v10 = vld [vmem:[%s19491_s5 + $0x714] ss:$8 sps:$4 sm:$0xff]  }
 0x4ca   : > { %8099 = vmatprep.subr.bf16.mxu1 %v14386_v7  ;;  %v14452_v7 = vld [vmem:[%s19491_s5 + $0x584] ss:$8 sps:$4 sm:$0xff]  }
 0x4cc   : > { %8591 = vmatpush1.bf16.msra.mxu0 %v14381_v55  ;;  %v14447_v55 = vld [vmem:[%s19491_s5 + $0x710] ss:$8 sps:$4 sm:$0xff]  }
 0x4cd   : > { %8100 = vmatpush1.bf16.msra.mxu1 %v14384_v51  ;;  %8600 = vmatprep.subr.bf16.mxu0 %v14389_v42  ;;  %v14450_v51 = vld [vmem:[%s19491_s5 + $0x580] ss:$8 sps:$4 sm:$0xff]   ;;  %v14455_v42 = vld [vmem:[%s19491_s5 + $0x704] ss:$8 sps:$4 sm:$0xff]  }
 0x4ce   : > { %8101 = vmatprep.subr.bf16.mxu1 %v14392_v30  ;;  %v14453_v30 = vld [vmem:[%s19491_s5 + $0x700] ss:$8 sps:$4 sm:$0xff]  }
 0x4d0   : > { %8601 = vmatpush2.bf16.msra.mxu0 %v14387_v60  ;;  %v14461_v60 = vld [vmem:[%s19491_s5 + $0x7f4] ss:$8 sps:$4 sm:$0xff]  }
 0x4d1   : > { %8102 = vmatpush1.bf16.msra.mxu1 %v14390_v17  ;;  %8602 = vmatprep.subr.bf16.mxu0 %v14395_v56  ;;  %v14464_v17 = vld [vmem:[%s19491_s5 + $0x564] ss:$8 sps:$4 sm:$0xff]  }
 0x4d2   : > { %8103 = vmatprep.subr.bf16.mxu1 %v14398_v44  ;;  %v14459_v44 = vld [vmem:[%s19491_s5 + $0x7f0] ss:$8 sps:$4 sm:$0xff]  }
 0x4d4   : > { %8603 = vmatpush2.bf16.msra.mxu0 %v14393_v40  ;;  %v14462_v40 = vld [vmem:[%s19491_s5 + $0x560] ss:$8 sps:$4 sm:$0xff]  }
 0x4d5   : > { %8104 = vmatpush1.bf16.msra.mxu1 %v14396_v45  ;;  %8604 = vmatprep.subr.bf16.mxu0 %v14401_v13  ;;  %v14467_v45 = vld [vmem:[%s19491_s5 + $0x7e4] ss:$8 sps:$4 sm:$0xff]  }
 0x4d6   : > { %8105 = vmatprep.subr.bf16.mxu1 %v14404_v43  ;;  %v14470_v43 = vld [vmem:[%s19491_s5 + $0x554] ss:$8 sps:$4 sm:$0xff]  }
 0x4d8   : > { %8605 = vmatpush2.bf16.msra.mxu0 %v14399_v6 }
 0x4d9   : > { %8106 = vmatpush1.bf16.msra.mxu1 %v14402_v23  ;;  %8606 = vmatprep.subr.bf16.mxu0 %v14407_v61  ;;  %v14465_v23 = vld [vmem:[%s19491_s5 + $0x7e0] ss:$8 sps:$4 sm:$0xff]   ;;  %v14468_v61 = vld [vmem:[%s19491_s5 + $0x550] ss:$8 sps:$4 sm:$0xff]  }
 0x4da   : > { %8115 = vmatprep.subr.bf16.mxu1 %v14410_v0  ;;  %v14473_v0 = vld [vmem:[%s19491_s5 + $0x7d4] ss:$8 sps:$4 sm:$0xff]  }
 0x4dc   : > { %8607 = vmatpush2.bf16.msra.mxu0 %v14405_v3 }
 0x4dd   : > { %8116 = vmatpush2.bf16.msra.mxu1 %v14408_v39  ;;  %8994 = vmatprep.subr.bf16.mxu0 %v14413_v22  ;;  %v14476_v39 = vld [vmem:[%s19491_s5 + $0x544] ss:$8 sps:$4 sm:$0xff]  }
 0x4de   : > { %8117 = vmatprep.subr.bf16.mxu1 %v14416_v57  ;;  %v14471_v57 = vld [vmem:[%s19491_s5 + $0x7d0] ss:$8 sps:$4 sm:$0xff]  }
 0x4df   : > { %8609 = vmatmul.mubr.bf16.vlgmr.msra.gmra.mxu0 %v18116_v27  ;;  %v8694_v27 = vrot.slane %v17913_v54, 2  ;;  %v14518_v54 = vld [vmem:[%s19491_s5 + $0x874] ss:$8 sps:$4 sm:$0xff]  }
 0x4e0   : > { %12646 = vmatprep.mubr.msk.bf16.mxu0 %vm7176_vm6, %v18106_v8  ;;  %8995 = vmatpush1.bf16.msra.mxu0 %v14411_v31  ;;  %v14428_v8 = vld [vmem:[%s19491_s5 + $0x504] ss:$8 sps:$4 sm:$0xff]   ;;  %v14474_v31 = vld [vmem:[%s19491_s5 + $0x540] ss:$8 sps:$4 sm:$0xff]  }
 0x4e1   : > { %8118 = vmatpush2.bf16.msra.mxu1 %v14414_v48  ;;  %8996 = vmatprep.subr.bf16.mxu0 %v14419_v29  ;;  %v8695_v19 = vsel %vm1104_vm4, %v8693_v11, %v8694_v27  ;;  %v14479_v48 = vld [vmem:[%s19491_s5 + $0x7c4] ss:$8 sps:$4 sm:$0xff]   ;;  %v14483_v11 = vld [vmem:[%s19491_s5 + $0x7b0] ss:$8 sps:$4 sm:$0xff]  }
 0x4e2   : > { %8119 = vmatprep.subr.bf16.mxu1 %v14422_v50  ;;  %v14482_v50 = vld [vmem:[%s19491_s5 + $0x634] ss:$8 sps:$4 sm:$0xff]  }
 0x4e4   : > { %8997 = vmatpush1.bf16.msra.mxu0 %v14417_v21 }
 0x4e5   : > { %8120 = vmatpush2.bf16.msra.mxu1 %v14420_v2  ;;  %8998 = vmatprep.subr.bf16.mxu0 %v14425_v5  ;;  %v14477_v2 = vld [vmem:[%s19491_s5 + $0x7c0] ss:$8 sps:$4 sm:$0xff]   ;;  %v14480_v5 = vld [vmem:[%s19491_s5 + $0x630] ss:$8 sps:$4 sm:$0xff]  }
 0x4e6   : > { %8121 = vmatprep.subr.bf16.mxu1 %v14428_v8  ;;  %v14485_v8 = vld [vmem:[%s19491_s5 + $0x7b4] ss:$8 sps:$4 sm:$0xff]  }
 0x4e7   : > { %8619 = vmatmul.mubr.bf16.gmra.mxu0 %v18092_v35  ;;  %v14437_v35 = vld [vmem:[%s19491_s5 + $0x734] ss:$8 sps:$4 sm:$0xff]  }
 0x4e8   : > { %8999 = vmatpush1.bf16.msra.mxu0 %v14423_v58  ;;  %9026 = vmatprep.mubr.bf16.mxu0 %v8695_v19  ;;  %v14494_v19 = vld [vmem:[%s19491_s5 + $0x614] ss:$8 sps:$4 sm:$0xff]  }
 0x4e9   : > { %8122 = vmatpush2.bf16.msra.mxu1 %v14426_v33  ;;  %9000 = vmatprep.subr.bf16.mxu0 %v14431_v32  ;;  %v14488_v33 = vld [vmem:[%s19491_s5 + $0x624] ss:$8 sps:$4 sm:$0xff]   ;;  %v14486_v32 = vld [vmem:[%s19491_s5 + $0x620] ss:$8 sps:$4 sm:$0xff]  }
 0x4ea   : > { %8525 = vmatprep.subr.bf16.mxu1 %v14434_v47  ;;  %v14491_v47 = vld [vmem:[%s19491_s5 + $0x7a4] ss:$8 sps:$4 sm:$0xff]  }
 0x4ec   : > { %8124 = vmatmul.mubr.bf16.vlgmr.msra.gmra.mxu1 %v18078_v9  ;;  %9001 = vmatpush1.bf16.msra.mxu0 %v14429_v26  ;;  %v14446_v9 = vld [vmem:[%s19491_s5 + $0x594] ss:$8 sps:$4 sm:$0xff]   ;;  %v14489_v26 = vld [vmem:[%s19491_s5 + $0x7a0] ss:$8 sps:$4 sm:$0xff]  }
 0x4ed   : > { %12532 = vmatprep.mubr.msk.bf16.mxu1 %vm7176_vm6, %v7746_v36  ;;  %8526 = vmatpush1.bf16.msra.mxu1 %v14432_v49  ;;  %v14441_v36 = vld [vmem:[%s19491_s5 + $0x720] ss:$8 sps:$4 sm:$0xff]   ;;  %v14492_v49 = vld [vmem:[%s19491_s5 + $0x610] ss:$8 sps:$4 sm:$0xff]  }
 0x4ee   : > { %9002 = vmatprep.subr.bf16.mxu0 %v14437_v35  ;;  %8527 = vmatprep.subr.bf16.mxu1 %v14440_v12  ;;  %v14497_v35 = vld [vmem:[%s19491_s5 + $0x794] ss:$8 sps:$4 sm:$0xff]   ;;  %v14500_v12 = vld [vmem:[%s19491_s5 + $0x604] ss:$8 sps:$4 sm:$0xff]  }
 0x4f0   : > { %9003 = vmatpush1.bf16.msra.mxu0 %v14435_v14  ;;  %v14495_v14 = vld [vmem:[%s19491_s5 + $0x790] ss:$8 sps:$4 sm:$0xff]  }
 0x4f1   : > { %8528 = vmatpush1.bf16.msra.mxu1 %v14438_v18  ;;  %9004 = vmatprep.subr.bf16.mxu0 %v14443_v37  ;;  %v14498_v18 = vld [vmem:[%s19491_s5 + $0x600] ss:$8 sps:$4 sm:$0xff]   ;;  %v14503_v37 = vld [vmem:[%s19491_s5 + $0x784] ss:$8 sps:$4 sm:$0xff]  }
 0x4f2   : > { %8529 = vmatprep.subr.bf16.mxu1 %v14446_v9  ;;  %v14506_v9 = vld [vmem:[%s19491_s5 + $0x5f4] ss:$8 sps:$4 sm:$0xff]  }
 0x4f4   : > { %8134 = vmatmul.mubr.bf16.gmra.mxu1 %v7743_v62  ;;  %9005 = vmatpush1.bf16.msra.mxu0 %v14441_v36  ;;  %v14458_v62 = vld [vmem:[%s19491_s5 + $0x574] ss:$8 sps:$4 sm:$0xff]   ;;  %v14501_v36 = vld [vmem:[%s19491_s5 + $0x780] ss:$8 sps:$4 sm:$0xff]  }
 0x4f5   : > { %8530 = vmatpush1.bf16.msra.mxu1 %v14444_v16  ;;  %8557 = vmatprep.mubr.bf16.mxu1 %v17936_v46  ;;  %v14456_v46 = vld [vmem:[%s19491_s5 + $0x570] ss:$8 sps:$4 sm:$0xff]  }
 0x4f6   : > { %9006 = vmatprep.subr.bf16.mxu0 %v14449_v10  ;;  %8531 = vmatprep.subr.bf16.mxu1 %v14452_v7  ;;  %v14504_v16 = vld [vmem:[%s19491_s5 + $0x5f0] ss:$8 sps:$4 sm:$0xff]   ;;  %v8691_v10 = vrot.slane %v17911_v24, 2  ;;  %v14509_v7 = vld [vmem:[%s19491_s5 + $0x5e4] ss:$8 sps:$4 sm:$0xff]  }
 0x4f7   : > { %v14515_v24 = vld [vmem:[%s19491_s5 + $0x5c4] ss:$8 sps:$4 sm:$0xff]  }
 0x4f8   : > { %9007 = vmatpush1.bf16.msra.mxu0 %v14447_v55  ;;  %v8690_v55 = vrot.slane %v17903_v63, 2  ;;  %v14510_v63 = vld [vmem:[%s19491_s5 + $0x5d0] ss:$8 sps:$4 sm:$0xff]  }
 0x4f9   : > { %8532 = vmatpush1.bf16.msra.mxu1 %v14450_v51  ;;  %9008 = vmatprep.subr.bf16.mxu0 %v14455_v42  ;;  %v14507_v51 = vld [vmem:[%s19491_s5 + $0x5e0] ss:$8 sps:$4 sm:$0xff]  }
 0x4fa   : > { %8533 = vmatprep.subr.bf16.mxu1 %v14458_v62  ;;  %v8692_v42 = vsel %vm1104_vm4, %v8690_v55, %v8691_v10  ;;  %v14512_v62 = vld [vmem:[%s19491_s5 + $0x5d4] ss:$8 sps:$4 sm:$0xff]  }
 0x4fc   : > { %9009 = vmatpush1.bf16.msra.mxu0 %v14453_v30  ;;  %v18536_v56 = vpop.f32.mrf.mxu0  ;;  %v14513_v30 = vld [vmem:[%s19491_s5 + $0x5c0] ss:$8 sps:$4 sm:$0xff]  }
 0x4fd   : > { %8534 = vmatpush1.bf16.msra.mxu1 %v14456_v46  ;;  %9010 = vmatprep.subr.bf16.mxu0 %v14461_v60  ;;  %v14516_v46 = vld [vmem:[%s19491_s5 + $0x870] ss:$8 sps:$4 sm:$0xff]   ;;  %v14521_v60 = vld [vmem:[%s19491_s5 + $0x864] ss:$8 sps:$4 sm:$0xff]  }
 0x4fe   : > { %v18547_v13 = vpop.f32.mrf.mxu0  ;;  %8535 = vmatprep.subr.bf16.mxu1 %v14464_v17  ;;  %v14519_v17 = vld [vmem:[%s19491_s5 + $0x860] ss:$8 sps:$4 sm:$0xff]  }
 0x500   : > { %9011 = vmatpush2.bf16.msra.mxu0 %v14459_v44  ;;  %v18552_v6 = vpop.f32.mrf.mxu0  ;;  %v14524_v44 = vld [vmem:[%s19491_s5 + $0x854] ss:$8 sps:$4 sm:$0xff]  }
 0x501   : > { %8536 = vmatpush1.bf16.msra.mxu1 %v14462_v40  ;;  %9012 = vmatprep.subr.bf16.mxu0 %v14467_v45 }
 0x502   : > { %v18563_v3 = vpop.f32.mrf.mxu0  ;;  %8537 = vmatprep.subr.bf16.mxu1 %v14470_v43 }
 0x504   : > { %9013 = vmatpush2.bf16.msra.mxu0 %v14465_v23  ;;  %v18568_v22 = vpop.f32.mrf.mxu0 }
 0x505   : > { %8538 = vmatpush1.bf16.msra.mxu1 %v14468_v61  ;;  %9014 = vmatprep.subr.bf16.mxu0 %v14473_v0  ;;  %v14525_v61 = vld [vmem:[%s19491_s5 + $0x840] ss:$8 sps:$4 sm:$0xff]   ;;  %v14530_v0 = vld [vmem:[%s19491_s5 + $0x834] ss:$8 sps:$4 sm:$0xff]  }
 0x506   : > { %v18579_v29 = vpop.f32.mrf.mxu0  ;;  %8539 = vmatprep.subr.bf16.mxu1 %v14476_v39 }
 0x508   : > { %9015 = vmatpush2.bf16.msra.mxu0 %v14471_v57  ;;  %v7231_v21 = vpop.f32.mrf.mxu0 }
 0x509   : > { %8540 = vmatpush1.bf16.msra.mxu1 %v14474_v31  ;;  %9016 = vmatprep.subr.bf16.mxu0 %v14479_v48 }
 0x50a   : > { %v7232_v58 = vpop.f32.mrf.mxu0  ;;  %8541 = vmatprep.subr.bf16.mxu1 %v14482_v50 }
 0x50c   : > { %9017 = vmatpush2.bf16.msra.mxu0 %v14477_v2  ;;  %v14531_v2 = vld [vmem:[%s19491_s5 + $0x820] ss:$8 sps:$4 sm:$0xff]  }
 0x50d   : > { %8542 = vmatpush2.bf16.msra.mxu1 %v14480_v5  ;;  %9018 = vmatprep.subr.bf16.mxu0 %v14485_v8  ;;  %v14536_v8 = vld [vmem:[%s19491_s5 + $0x814] ss:$8 sps:$4 sm:$0xff]  }
 0x50e   : > { %8543 = vmatprep.subr.bf16.mxu1 %v14488_v33 }
 0x510   : > { %9019 = vmatpush2.bf16.msra.mxu0 %v14483_v11 }
 0x511   : > { %8544 = vmatpush2.bf16.msra.mxu1 %v14486_v32  ;;  %9020 = vmatprep.subr.bf16.mxu0 %v14491_v47  ;;  %v14539_v47 = vld [vmem:[%s19491_s5 + $0x804] ss:$8 sps:$4 sm:$0xff]  }
 0x512   : > { %8545 = vmatprep.subr.bf16.mxu1 %v14494_v19 }
 0x514   : > { %9021 = vmatpush2.bf16.msra.mxu0 %v14489_v26 }
 0x515   : > { %8546 = vmatpush2.bf16.msra.mxu1 %v14492_v49  ;;  %9022 = vmatprep.subr.bf16.mxu0 %v14497_v35  ;;  %v14542_v35 = vld [vmem:[%s19491_s5 + $0x8b4] ss:$8 sps:$4 sm:$0xff]  }
 0x516   : > { %8547 = vmatprep.subr.bf16.mxu1 %v14500_v12 }
 0x518   : > { %9023 = vmatpush2.bf16.msra.mxu0 %v14495_v14 }
 0x519   : > { %8548 = vmatpush2.bf16.msra.mxu1 %v14498_v18  ;;  %9024 = vmatprep.subr.bf16.mxu0 %v14503_v37  ;;  %v14545_v18 = vld [vmem:[%s19491_s5 + $0x8a4] ss:$8 sps:$4 sm:$0xff]   ;;  %v14543_v37 = vld [vmem:[%s19491_s5 + $0x8a0] ss:$8 sps:$4 sm:$0xff]  }
 0x51a   : > { %8549 = vmatprep.subr.bf16.mxu1 %v14506_v9  ;;  %v14546_v9 = vld [vmem:[%s19491_s5 + $0x890] ss:$8 sps:$4 sm:$0xff]  }
 0x51c   : > { %9025 = vmatpush2.bf16.msra.mxu0 %v14501_v36  ;;  %v14551_v36 = vld [vmem:[%s19491_s5 + $0x884] ss:$8 sps:$4 sm:$0xff]  }
 0x51d   : > { %8550 = vmatpush2.bf16.msra.mxu1 %v14504_v16  ;;  %v14549_v16 = vld [vmem:[%s19491_s5 + $0x880] ss:$8 sps:$4 sm:$0xff]  }
 0x51e   : > { %8551 = vmatprep.subr.bf16.mxu1 %v14509_v7 }
 0x51f   : > { %9027 = vmatmul.mubr.bf16.vlgmr.msra.gmra.mxu0 %v8692_v42 }
 0x520   : > { %9036 = vmatprep.mubr.bf16.mxu0 %v8694_v27  ;;  %v19532_v27 = vmov 0  }
 0x521   : > { %8552 = vmatpush2.bf16.msra.mxu1 %v14507_v51 }
 0x522   : > { %8553 = vmatprep.subr.bf16.mxu1 %v14512_v62 }
 0x525   : > { %8554 = vmatpush2.bf16.msra.mxu1 %v14510_v63 }
 0x526   : > { %8555 = vmatprep.subr.bf16.mxu1 %v14515_v24 }
 0x527   : > { %9037 = vmatmul.mubr.bf16.gmra.mxu0 %v8691_v10 }
 0x528   : > { %9405 = vmatprep.mubr.bf16.mxu0 %v19532_v27 }
 0x529   : > { %8556 = vmatpush2.bf16.msra.mxu1 %v14513_v30 }
 0x52a   : > { %9045 = vmatprep.subr.bf16.mxu1 %v14518_v54 }
 0x52c   : > { %8558 = vmatmul.mubr.bf16.vlgmr.msra.gmra.mxu1 %v17943_v15  ;;  %v14522_v15 = vld [vmem:[%s19491_s5 + $0x850] ss:$8 sps:$4 sm:$0xff]  }
 0x52d   : > { %8567 = vmatprep.mubr.bf16.mxu1 %v17927_v20  ;;  %9046 = vmatpush1.bf16.msra.mxu1 %v14516_v46  ;;  %v14527_v20 = vld [vmem:[%s19491_s5 + $0x844] ss:$8 sps:$4 sm:$0xff]  }
 0x52e   : > { %9047 = vmatprep.subr.bf16.mxu1 %v14521_v60 }
 0x52f   : > { %v18679_v40 = vpop.f32.mrf.mxu0 }
 0x531   : > { %9048 = vmatpush1.bf16.msra.mxu1 %v14519_v17  ;;  %v18681_v45 = vpop.f32.mrf.mxu0 }
 0x532   : > { %9049 = vmatprep.subr.bf16.mxu1 %v14524_v44 }
 0x533   : > { %v18689_v43 = vpop.f32.mrf.mxu0 }
 0x534   : > { %8568 = vmatmul.mubr.bf16.gmra.mxu1 %v17929_v53  ;;  %v14528_v53 = vld [vmem:[%s19491_s5 + $0x830] ss:$8 sps:$4 sm:$0xff]  }
 0x535   : > { %9050 = vmatpush1.bf16.msra.mxu1 %v14522_v15  ;;  %12759 = vmatprep.mubr.msk.bf16.mxu1 %vm7176_vm6, %v18097_v34  ;;  %v18694_v23 = vpop.f32.mrf.mxu0  ;;  %v14533_v34 = vld [vmem:[%s19491_s5 + $0x824] ss:$8 sps:$4 sm:$0xff]  }
 0x536   : > { %9051 = vmatprep.subr.bf16.mxu1 %v14527_v20 }
 0x537   : > { %v18702_v39 = vpop.f32.mrf.mxu0 }
 0x539   : > { %9052 = vmatpush1.bf16.msra.mxu1 %v14525_v61  ;;  %v18704_v57 = vpop.f32.mrf.mxu0 }
 0x53a   : > { %9053 = vmatprep.subr.bf16.mxu1 %v14530_v0 }
 0x53b   : > { %v7668_v31 = vpop.f32.mrf.mxu0 }
 0x53c   : > { %v7268_v48 = vpop.f32.mrf.mxu1 }
 0x53d   : > { %v7269_v50 = vadd.f32 %v7268_v48, %v18536_v56  ;;  %9054 = vmatpush1.bf16.msra.mxu1 %v14528_v53  ;;  %v7669_v21 = vpop.f32.mrf.mxu0  ;;  %v14534_v56 = vld [vmem:[%s19491_s5 + $0x810] ss:$8 sps:$4 sm:$0xff]  }
 0x53e   : > { %v7270_v5 = vpop.f32.mrf.mxu1  ;;  %9055 = vmatprep.subr.bf16.mxu1 %v14533_v34 }
 0x53f   : > { %v7271_v58 = vadd.f32 %v7270_v5, %v18547_v13  ;;  %v14537_v13 = vld [vmem:[%s19491_s5 + $0x800] ss:$8 sps:$4 sm:$0xff]  }
 0x540   : > { %v7272_v33 = vpop.f32.mrf.mxu1 }
 0x541   : > { %v7273_v11 = vadd.f32 %v7272_v33, %v18552_v6  ;;  %9056 = vmatpush1.bf16.msra.mxu1 %v14531_v2 }
 0x542   : > { %v7274_v32 = vpop.f32.mrf.mxu1  ;;  %9057 = vmatprep.subr.bf16.mxu1 %v14536_v8 }
 0x543   : > { %v7275_v19 = vadd.f32 %v7274_v32, %v18563_v3  ;;  %v14540_v3 = vld [vmem:[%s19491_s5 + $0x8b0] ss:$8 sps:$4 sm:$0xff]  }
 0x544   : > { %v7278_v26 = vpop.f32.mrf.mxu1 }
 0x545   : > { %v7279_v49 = vadd.f32 %v7278_v26, %v18568_v22  ;;  %9058 = vmatpush1.bf16.msra.mxu1 %v14534_v56 }
 0x546   : > { %v7280_v6 = vpop.f32.mrf.mxu1  ;;  %9059 = vmatprep.subr.bf16.mxu1 %v14539_v47 }
 0x547   : > { %v7281_v12 = vadd.f32 %v7280_v6, %v18579_v29  ;;  %v14548_v29 = vld [vmem:[%s19491_s5 + $0x894] ss:$8 sps:$4 sm:$0xff]  }
 0x548   : > { %v7282_v14 = vpop.f32.mrf.mxu1 }
 0x549   : > { %9060 = vmatpush1.bf16.msra.mxu1 %v14537_v13  ;;  %v14552_v13 = vld [vmem:[%s19493_s7 + $0x50] ss:$8 sps:$4 sm:$0xff]  }
 0x54a   : > { %v7283_v22 = vpop.f32.mrf.mxu1  ;;  %9069 = vmatprep.subr.bf16.mxu1 %v14542_v35  ;;  %v14560_v35 = vld [vmem:[%s19493_s7 + $0x44] ss:$8 sps:$4 sm:$0xff]  }
 0x54b   : > { %v14563_v22 = vld [vmem:[%s19493_s7 + $0xa4] ss:$8 sps:$4 sm:$0xff]  }
 0x54d   : > { %9070 = vmatpush2.bf16.msra.mxu1 %v14540_v3 }
 0x54e   : > { %9071 = vmatprep.subr.bf16.mxu1 %v14545_v18 }
 0x551   : > { %9072 = vmatpush2.bf16.msra.mxu1 %v14543_v37  ;;  %v14558_v37 = vld [vmem:[%s19493_s7 + $0x40] ss:$8 sps:$4 sm:$0xff]  }
 0x552   : > { %9073 = vmatprep.subr.bf16.mxu1 %v14548_v29 }
 0x555   : > { %9074 = vmatpush2.bf16.msra.mxu1 %v14546_v9 }
 0x556   : > { %9075 = vmatprep.subr.bf16.mxu1 %v14551_v36 }
 0x559   : > { %9076 = vmatpush2.bf16.msra.mxu1 %v14549_v16  ;;  %v14566_v16 = vld [vmem:[%s19493_s7 + $0x34] ss:$8 sps:$4 sm:$0xff]  }
 0x55c   : > { %9078 = vmatmul.mubr.bf16.vlgmr.msra.gmra.mxu1 %v18111_v1 }
 0x55d   : > { %12760 = vmatprep.mubr.msk.bf16.mxu1 %vm7176_vm6, %v8700_v4 }
 0x564   : > { %9088 = vmatmul.mubr.bf16.gmra.mxu1 %v8697_v28 }
 0x565   : > { %9267 = vmatprep.mubr.bf16.mxu1 %v19532_v27 }
 0x56f   : > { %v8074_v10 = vpop.f32.mrf.mxu0 }
 0x571   : > { %v8076_v7 = vpop.f32.mrf.mxu0 }
 0x573   : > { %v8078_v55 = vpop.f32.mrf.mxu0 }
 0x575   : > { %v8080_v51 = vpop.f32.mrf.mxu0 }
 0x577   : > { %v8084_v42 = vpop.f32.mrf.mxu0 }
 0x579   : > { %v18764_v62 = vpop.f32.mrf.mxu0 }
 0x57b   : > { %v8088_v63 = vpop.f32.mrf.mxu0 }
 0x57c   : > { %v7603_v24 = vpop.f32.mrf.mxu1  ;;  %v14564_v63 = vld [vmem:[%s19493_s7 + $0x30] ss:$8 sps:$4 sm:$0xff]  }
 0x57d   : > { %v7604_v30 = vadd.f32 %v7603_v24, %v7269_v50  ;;  %v8089_v1 = vpop.f32.mrf.mxu0 }
 0x57e   : > { %v7605_v54 = vpop.f32.mrf.mxu1 }
 0x57f   : > { %v7606_v59 = vadd.f32 %v7605_v54, %v7271_v58  ;;  %v7655_v5 = vadd.f32 %v18679_v40, %v7604_v30  ;;  %v14554_v40 = vld [vmem:[%s19493_s7 + $0x54] ss:$8 sps:$4 sm:$0xff]   ;;  %v14567_v30 = vld [vmem:[%s19493_s7 + $0x90] ss:$8 sps:$4 sm:$0xff]  }
 0x580   : > { %v7607_v46 = vpop.f32.mrf.mxu1  ;;  %9239 = vmatprep.subr.bf16.mxu1 %v14554_v40 }
 0x581   : > { %v7608_v4 = vadd.f32 %v7607_v46, %v7273_v11  ;;  %v7657_v11 = vadd.f32 %v18681_v45, %v7606_v59  ;;  %v14555_v45 = vld [vmem:[%s19493_s7 + $0xb0] ss:$8 sps:$4 sm:$0xff]   ;;  %9240 = vmatpush1.bf16.msra.mxu1 %v14552_v13 }
 0x582   : > { %v7609_v60 = vpop.f32.mrf.mxu1  ;;  %9241 = vmatprep.subr.bf16.mxu1 %v14560_v35 }
 0x583   : > { %v7610_v41 = vadd.f32 %v7609_v60, %v7275_v19  ;;  %v7659_v19 = vadd.f32 %v18689_v43, %v7608_v4  ;;  %v14557_v43 = vld [vmem:[%s19493_s7 + $0xb4] ss:$8 sps:$4 sm:$0xff]  }
 0x584   : > { %v7613_v28 = vpop.f32.mrf.mxu1  ;;  %9377 = vmatprep.subr.bf16.mxu0 %v14557_v43 }
 0x585   : > { %v7614_v17 = vadd.f32 %v7613_v28, %v7279_v49  ;;  %9378 = vmatpush1.bf16.msra.mxu0 %v14555_v45  ;;  %9242 = vmatpush1.bf16.msra.mxu1 %v14558_v37 }
 0x586   : > { %v7615_v44 = vpop.f32.mrf.mxu1  ;;  %9379 = vmatprep.subr.bf16.mxu0 %v14563_v22  ;;  %9243 = vmatprep.subr.bf16.mxu1 %v14566_v16 }
 0x587   : > { %v7616_v15 = vadd.f32 %v7615_v44, %v7281_v12  ;;  %v7661_v12 = vadd.f32 %v18694_v23, %v7610_v41  ;;  %v7665_v29 = vadd.f32 %v18702_v39, %v7614_v17  ;;  %v14561_v23 = vld [vmem:[%s19493_s7 + $0xa0] ss:$8 sps:$4 sm:$0xff]  }
 0x588   : > { %v7617_v20 = vpop.f32.mrf.mxu1 }
 0x589   : > { %v7667_v39 = vadd.f32 %v18704_v57, %v7616_v15  ;;  %9380 = vmatpush1.bf16.msra.mxu0 %v14561_v23  ;;  %v14572_v57 = vld [vmem:[%s19493_s7 + $0x24] ss:$8 sps:$4 sm:$0xff]   ;;  %9244 = vmatpush1.bf16.msra.mxu1 %v14564_v63 }
 0x58a   : > { %v7618_v61 = vpop.f32.mrf.mxu1  ;;  %9245 = vmatprep.subr.bf16.mxu1 %v14572_v57 }
 0x59f   : > { %v18766_v0 = vpop.f32.mrf.mxu0 }
 0x5a1   : > { %v18768_v53 = vpop.f32.mrf.mxu0 }
 0x5a3   : > { %v18770_v34 = vpop.f32.mrf.mxu0 }
 0x5a5   : > { %v18772_v31 = vpop.f32.mrf.mxu0 }
 0x5a7   : > { %v18774_v48 = vpop.f32.mrf.mxu0 }
 0x5a9   : > { %v18776_v50 = vpop.f32.mrf.mxu0 }
 0x5ab   : > { %v8624_v21 = vpop.f32.mrf.mxu0 }
 0x5ac   : > { %v8125_v2 = vpop.f32.mrf.mxu1 }
 0x5ad   : > { %v8126_v8 = vadd.f32 %v8125_v2, %v8074_v10  ;;  %v8625_v58 = vpop.f32.mrf.mxu0 }
 0x5ae   : > { %v8127_v33 = vpop.f32.mrf.mxu1 }
 0x5af   : > { %v18780_v56 = vadd.f32 %v8126_v8, %v7655_v5  ;;  %v8128_v32 = vadd.f32 %v8127_v33, %v8076_v7  ;;  %v14569_v7 = vld [vmem:[%s19493_s7 + $0x94] ss:$8 sps:$4 sm:$0xff]  }
 0x5b0   : > { %v8129_v47 = vpop.f32.mrf.mxu1  ;;  %9381 = vmatprep.subr.bf16.mxu0 %v14569_v7 }
 0x5b1   : > { %v18783_v26 = vadd.f32 %v8128_v32, %v7657_v11  ;;  %v8130_v49 = vadd.f32 %v8129_v47, %v8078_v55  ;;  %9382 = vmatpush1.bf16.msra.mxu0 %v14567_v30  ;;  %v9102_v11 = vld [vmem:[%s19492_s6] sm:$0x3] }
 0x5b2   : > { %v8131_v6 = vpop.f32.mrf.mxu1  ;;  %v9107_v45 = vrot.slane %v9102_v11, %v15462_v52 }
 0x5b3   : > { %v18801_v14 = vadd.f32 %v8130_v49, %v7659_v19  ;;  %v8132_v3 = vadd.f32 %v8131_v6, %v8080_v51 }
 0x5b4   : > { %v8135_v18 = vpop.f32.mrf.mxu1 }
 0x5b5   : > { %v8145_v9 = vadd.f32 %v8132_v3, %v7661_v12  ;;  %v8136_v36 = vadd.f32 %v8135_v18, %v8084_v42 }
 0x5b6   : > { %v8137_v10 = vpop.f32.mrf.mxu1 }
 0x5b7   : > { %v8146_v55 = vadd.f32 %v8136_v36, %v7665_v29  ;;  %v8138_v51 = vadd.f32 %v8137_v10, %v18764_v62  ;;  %v14570_v62 = vld [vmem:[%s19493_s7 + $0x20] ss:$8 sps:$4 sm:$0xff]  }
 0x5b8   : > { %v8139_v42 = vpop.f32.mrf.mxu1  ;;  %9246 = vmatpush1.bf16.msra.mxu1 %v14570_v62 }
 0x5b9   : > { %v18824_v24 = vadd.f32 %v8138_v51, %v7667_v39 }
 0x5ba   : > { %v8140_v1 = vpop.f32.mrf.mxu1 }
 0x5df   : > { %v9028_v54 = vpop.f32.mrf.mxu0 }
 0x5e1   : > { %v9030_v59 = vpop.f32.mrf.mxu0 }
 0x5e3   : > { %v9032_v46 = vpop.f32.mrf.mxu0 }
 0x5e5   : > { %v9034_v4 = vpop.f32.mrf.mxu0 }
 0x5e7   : > { %v9038_v60 = vpop.f32.mrf.mxu0 }
 0x5e9   : > { %v9040_v41 = vpop.f32.mrf.mxu0 }
 0x5eb   : > { %v9042_v28 = vpop.f32.mrf.mxu0 }
 0x5ec   : > { %v8559_v17 = vpop.f32.mrf.mxu1 }
 0x5ed   : > { %v9043_v44 = vpop.f32.mrf.mxu0  ;;  %v8611_v58 = vadd.f32 %v18766_v0, %v8559_v17 }
 0x5ee   : > { %v8561_v15 = vpop.f32.mrf.mxu1 }
 0x5ef   : > { %v8613_v33 = vadd.f32 %v18768_v53, %v8561_v15  ;;  %v8627_v47 = vadd.f32 %v8611_v58, %v18780_v56  ;;  %v9111_v53 = vrot.slane %v9102_v11, %v15470_v38  ;;  %v14587_v15 = vld [vmem:[%s19493_s7 + $0x64] ss:$8 sps:$4 sm:$0xff]   ;;  %v14593_v58 = vld [vmem:[%s19493_s7 + $0x174] ss:$8 sps:$4 sm:$0xff]  }
 0x5f0   : > { %v8563_v20 = vpop.f32.mrf.mxu1 }
 0x5f1   : > { %v8615_v19 = vadd.f32 %v18770_v34, %v8563_v20  ;;  %v8628_v6 = vadd.f32 %v8613_v33, %v18783_v26 }
 0x5f2   : > { %v8565_v61 = vpop.f32.mrf.mxu1 }
 0x5f3   : > { %v8617_v13 = vadd.f32 %v18772_v31, %v8565_v61  ;;  %v8629_v3 = vadd.f32 %v8615_v19, %v18801_v14  ;;  %v14575_v31 = vld [vmem:[%s19493_s7 + $0x84] ss:$8 sps:$4 sm:$0xff]  }
 0x5f4   : > { %v8569_v21 = vpop.f32.mrf.mxu1  ;;  %9383 = vmatprep.subr.bf16.mxu0 %v14575_v31  ;;  %v14611_v31 = vld [vmem:[%s19493_s7 + $0x144] ss:$8 sps:$4 sm:$0xff]  }
 0x5f5   : > { %v8621_v35 = vadd.f32 %v18774_v48, %v8569_v21  ;;  %v8630_v34 = vadd.f32 %v8617_v13, %v8145_v9  ;;  %v14573_v48 = vld [vmem:[%s19493_s7 + $0x80] ss:$8 sps:$4 sm:$0xff]   ;;  %v14578_v9 = vld [vmem:[%s19493_s7 + $0x14] ss:$8 sps:$4 sm:$0xff]  }
 0x5f6   : > { %v8571_v2 = vpop.f32.mrf.mxu1  ;;  %9384 = vmatpush1.bf16.msra.mxu0 %v14573_v48  ;;  %9247 = vmatprep.subr.bf16.mxu1 %v14578_v9  ;;  %v14585_v21 = vld [vmem:[%s19493_s7 + $0x60] ss:$8 sps:$4 sm:$0xff]   ;;  %v14612_v48 = vld [vmem:[%s19493_s7 + $0xd0] ss:$8 sps:$4 sm:$0xff]   ;;  %v14623_v9 = vld [vmem:[%s19493_s7 + $0x124] ss:$8 sps:$4 sm:$0xff]  }
 0x5f7   : > { %v8623_v26 = vadd.f32 %v18776_v50, %v8571_v2  ;;  %v8631_v16 = vadd.f32 %v8621_v35, %v8146_v55  ;;  %v14576_v50 = vld [vmem:[%s19493_s7 + $0x10] ss:$8 sps:$4 sm:$0xff]   ;;  %v14581_v55 = vld [vmem:[%s19493_s7 + $0x74] ss:$8 sps:$4 sm:$0xff]   ;;  %v14599_v35 = vld [vmem:[%s19493_s7 + $0x164] ss:$8 sps:$4 sm:$0xff]  }
 0x5f8   : > { %v8573_v5 = vpop.f32.mrf.mxu1  ;;  %9248 = vmatpush1.bf16.msra.mxu1 %v14576_v50  ;;  %9385 = vmatprep.subr.bf16.mxu0 %v14581_v55  ;;  %v14590_v2 = vld [vmem:[%s19493_s7 + $0x114] ss:$8 sps:$4 sm:$0xff]  }
 0x5f9   : > { %v8632_v30 = vadd.f32 %v8623_v26, %v18824_v24  ;;  %v14606_v26 = vld [vmem:[%s19493_s7 + $0xe0] ss:$8 sps:$4 sm:$0xff]   ;;  %v14629_v50 = vld [vmem:[%s19493_s7 + $0x234] ss:$8 sps:$4 sm:$0xff]  }
 0x5fa   : > { %v8574_v8 = vpop.f32.mrf.mxu1 }
 0x61c   : > { %v9079_v32 = vpop.f32.mrf.mxu1 }
 0x61d   : > { %v9080_v49 = vadd.f32 %v9079_v32, %v9028_v54  ;;  %v14579_v54 = vld [vmem:[%s19493_s7 + $0x70] ss:$8 sps:$4 sm:$0xff]  }
 0x61e   : > { %v9081_v40 = vpop.f32.mrf.mxu1  ;;  %9386 = vmatpush1.bf16.msra.mxu0 %v14579_v54 }
 0x61f   : > { %v9096_v0 = vadd.f32 %v9080_v49, %v8627_v47  ;;  %v9082_v43 = vadd.f32 %v9081_v40, %v9030_v59  ;;  %9387 = vmatprep.subr.bf16.mxu0 %v14587_v15  ;;  %v14644_v15 = vld [vmem:[%s19493_s7 + $0x1a4] ss:$8 sps:$4 sm:$0xff]  }
 0x620   : > { %v9083_v12 = vpop.f32.mrf.mxu1 }
 0x621   : > { %v9097_v56 = vadd.f32 %v9082_v43, %v8628_v6  ;;  %v9084_v22 = vadd.f32 %v9083_v12, %v9032_v46  ;;  %v9114_v37 = vadd.f32 %v9107_v45, %v9096_v0  ;;  %v14596_v0 = vld [vmem:[%s19493_s7 + $0x104] ss:$8 sps:$4 sm:$0xff]   ;;  %v14591_v43 = vld [vmem:[%s19493_s7 + $0x170] ss:$8 sps:$4 sm:$0xff]   ;;  %v14594_v12 = vld [vmem:[%s19493_s7 + $0x100] ss:$8 sps:$4 sm:$0xff]  }
 0x622   : > { %v9085_v18 = vpop.f32.mrf.mxu1  ;;  %9388 = vmatpush1.bf16.msra.mxu0 %v14585_v21  ;;  %v14647_v21 = vld [vmem:[%s19493_s7 + $0x204] ss:$8 sps:$4 sm:$0xff]  }
 0x623   : > { %v9098_v29 = vadd.f32 %v9084_v22, %v8629_v3  ;;  %v9086_v36 = vadd.f32 %v9085_v18, %v9034_v4  ;;  %v9115_v23 = vadd.f32 %v9111_v53, %v9097_v56  ;;  %v9120_v63 = vmax.f32 %v9114_v37, 0.0  ;;  %v14584_v4 = vld [vmem:[%s19493_s7 + $0x4] ss:$8 sps:$4 sm:$0xff]   ;;  %9651 = vmatprep.subr.bf16.mxu0 %v14593_v58  ;;  %v14602_v3 = vld [vmem:[%s19493_s7 + $0xf4] ss:$8 sps:$4 sm:$0xff]  }
 0x624   : > { %v9089_v14 = vpop.f32.mrf.mxu1  ;;  %9249 = vmatprep.subr.bf16.mxu1 %v14584_v4  ;;  %v14597_v56 = vld [vmem:[%s19493_s7 + $0x160] ss:$8 sps:$4 sm:$0xff]   ;;  %v14605_v22 = vld [vmem:[%s19493_s7 + $0x154] ss:$8 sps:$4 sm:$0xff]   ;;  %v14608_v18 = vld [vmem:[%s19493_s7 + $0xe4] ss:$8 sps:$4 sm:$0xff]  }
 0x625   : > { %v18858_v10 = vadd.f32 %v9107_v45, %v9098_v29  ;;  %v9099_v7 = vadd.f32 %v9086_v36, %v8630_v34  ;;  %v9090_v39 = vadd.f32 %v9089_v14, %v9038_v60  ;;  %v9121_v51 = vmax.f32 %v9115_v23, 0.0  ;;  %v14600_v34 = vld [vmem:[%s19493_s7 + $0xf0] ss:$8 sps:$4 sm:$0xff]   ;;  %v14614_v29 = vld [vmem:[%s19493_s7 + $0xd4] ss:$8 sps:$4 sm:$0xff]  }
 0x626   : > { %v9091_v42 = vpop.f32.mrf.mxu1  ;;  %v14603_v37 = vld [vmem:[%s19493_s7 + $0x150] ss:$8 sps:$4 sm:$0xff]   ;;  %v14609_v36 = vld [vmem:[%s19493_s7 + $0x140] ss:$8 sps:$4 sm:$0xff]   ;;  %v14617_v23 = vld [vmem:[%s19493_s7 + $0x134] ss:$8 sps:$4 sm:$0xff]  }
 0x627   : > { %v9117_v57 = vadd.f32 %v9111_v53, %v9099_v7  ;;  %v9100_v1 = vadd.f32 %v9090_v39, %v8631_v16  ;;  %v9092_v62 = vadd.f32 %v9091_v42, %v9040_v41  ;;  %v13097_v46 = vpack.i.bf16 %v9121_v51, %v9120_v63  ;;  %v14582_v41 = vld [vmem:[%s19493_s7] ss:$8 sps:$4 sm:$0xff]   ;;  %v14620_v16 = vld [vmem:[%s19493_s7 + $0xc4] ss:$8 sps:$4 sm:$0xff]   ;;  %v14615_v14 = vld [vmem:[%s19493_s7 + $0x130] ss:$8 sps:$4 sm:$0xff]  }
 0x628   : > { %v9093_v59 = vpop.f32.mrf.mxu1  ;;  %v9122_v60 = vmax.f32 %v18858_v10, 0.0  ;;  %9250 = vmatpush1.bf16.msra.mxu1 %v14582_v41  ;;  %v14618_v7 = vld [vmem:[%s19493_s7 + $0xc0] ss:$8 sps:$4 sm:$0xff]   ;;  %v14626_v39 = vld [vmem:[%s19493_s7 + $0x1d4] ss:$8 sps:$4 sm:$0xff]  }
 0x629   : > { %v9123_v28 = vmax.f32 %v9117_v57, 0.0  ;;  %v9101_v17 = vadd.f32 %v9092_v62, %v8632_v30  ;;  %v18874_v24 = vadd.f32 %v9107_v45, %v9100_v1  ;;  %13098 = vrot.lane.b32.xlu0 %v13097_v46, %s14849_s23  ;;  %9514 = vmatprep.subr.bf16.mxu1 %v14590_v2  ;;  %v14588_v45 = vld [vmem:[%s19493_s7 + $0x110] ss:$8 sps:$4 sm:$0xff]   ;;  %v14621_v51 = vld [vmem:[%s19493_s7 + $0x120] ss:$8 sps:$4 sm:$0xff]  }
 0x62a   : > { %v9094_v44 = vpop.f32.mrf.mxu1  ;;  %v14624_v42 = vld [vmem:[%s19493_s7 + $0x1d0] ss:$8 sps:$4 sm:$0xff]   ;;  %v14632_v30 = vld [vmem:[%s19493_s7 + $0x1c4] ss:$8 sps:$4 sm:$0xff]   ;;  %v14630_v46 = vld [vmem:[%s19493_s7 + $0x1c0] ss:$8 sps:$4 sm:$0xff]  }
 0x62b   : > { %v13102_v20 = vpack.i.bf16 %v9123_v28, %v9122_v60  ;;  %v9119_v61 = vadd.f32 %v9111_v53, %v9101_v17  ;;  %v9124_v5 = vmax.f32 %v18874_v24, 0.0  ;;  %v14627_v57 = vld [vmem:[%s19493_s7 + $0x230] ss:$8 sps:$4 sm:$0xff]   ;;  %v14635_v62 = vld [vmem:[%s19493_s7 + $0x224] ss:$8 sps:$4 sm:$0xff]  }
 0x62c   : > { %v14638_v4 = vld [vmem:[%s19493_s7 + $0x1b4] ss:$8 sps:$4 sm:$0xff]   ;;  %v14633_v28 = vld [vmem:[%s19493_s7 + $0x220] ss:$8 sps:$4 sm:$0xff]   ;;  %v14636_v44 = vld [vmem:[%s19493_s7 + $0x1b0] ss:$8 sps:$4 sm:$0xff]  }
 0x62d   : > { %v9125_v8 = vmax.f32 %v9119_v61, 0.0  ;;  %13103 = vrot.lane.b32.xlu0 %v13102_v20, %s14849_s23  ;;  %v14641_v17 = vld [vmem:[%s19493_s7 + $0x214] ss:$8 sps:$4 sm:$0xff]   ;;  %v14639_v20 = vld [vmem:[%s19493_s7 + $0x210] ss:$8 sps:$4 sm:$0xff]  }
 0x62e   : > { %v14642_v2 = vld [vmem:[%s19493_s7 + $0x1a0] ss:$8 sps:$4 sm:$0xff]   ;;  %v14653_v58 = vld [vmem:[%s19493_s7 + $0x1f4] ss:$8 sps:$4 sm:$0xff]  }
 0x62f   : > { %v13107_v33 = vpack.i.bf16 %v9125_v8, %v9124_v5  ;;  %v14650_v8 = vld [vmem:[%s19493_s7 + $0x194] ss:$8 sps:$4 sm:$0xff]   ;;  %v14645_v10 = vld [vmem:[%s19493_s7 + $0x200] ss:$8 sps:$4 sm:$0xff]  }
 0x630   : > { %v14717_v24 = vld [vmem:[%s19493_s7 + $0x380] ss:$8 sps:$4 sm:$0xff]  }
 0x631   : > { %13108 = vrot.lane.b32.xlu1 %v13107_v33, %s14849_s23  ;;  %v14648_v33 = vld [vmem:[%s19493_s7 + $0x190] ss:$8 sps:$4 sm:$0xff]   ;;  %s10942_s23 = sshll.u32 %s378_s25, 4  ;;  %s10943_s23 = int_to_ptr.vmem [resolvable:$true] %s10942_s23 }
 0x632   : > { %s14785_s14 = scalar_lea.vmem %s10943_s23, 16  ;;  %p14792_p0 = scmp.lt.s32.totalorder %s10943_s23, %s14790_s15 }
 0x633   : > { %p14786_p11 = scmp.ne.s32.totalorder %s10943_s23, %s14785_s14  ;;  %p14793_p1 = scmp.lt.s32.totalorder %s14791_s22, %s14785_s14 }
 0x635   : > { %p14787_p12 = pnand %p14786_p11, %p14950_p5  ;;  %p14794_p2 = por %p14793_p1, %p14792_p0 }
 0x637   : > { %p14788_p13 = pneg %p14787_p12 }
 0x639   : > { %p14795_p3 = pnand %p14794_p2, %p14788_p13 }
 0x69b   : > { %v13099_v11 = vpop.permute.xlu0 %13098 }
 0x69c   : > { %v13101_v32 = vunpack.i.h.bf16 %v13099_v11  ;;  %v13100_v47 = vunpack.i.l.bf16 %v13099_v11  ;;  %v14656_v11 = vld [vmem:[%s19493_s7 + $0x184] ss:$8 sps:$4 sm:$0xff]  }
 0x69e   : > { %v9144_v19 = vsel %vm464_vm0, %v13100_v47, %v13101_v32  ;;  %v14651_v32 = vld [vmem:[%s19493_s7 + $0x1f0] ss:$8 sps:$4 sm:$0xff]  }
 0x69f   : > { %v9150_v49 = vmax.f32 %v9120_v63, %v9144_v19  ;;  %v13104_v63 = vpop.permute.xlu0 %13103  ;;  %v14659_v19 = vld [vmem:[%s19493_s7 + $0x1e4] ss:$8 sps:$4 sm:$0xff]  }
 0x6a0   : > { %v13106_v54 = vunpack.i.h.bf16 %v13104_v63  ;;  %v13105_v59 = vunpack.i.l.bf16 %v13104_v63  ;;  %v14696_v63 = vld [vmem:[%s19493_s7 + $0x350] ss:$8 sps:$4 sm:$0xff]  }
 0x6a1   : > { %v9155_v13 = vrot.slane %v9150_v49, 1 }
 0x6a2   : > { %v9145_v41 = vsel %vm464_vm0, %v13105_v59, %v13106_v54  ;;  %v14707_v54 = vld [vmem:[%s19493_s7 + $0x3a4] ss:$8 sps:$4 sm:$0xff]  }
 0x6a3   : > { %v9157_v40 = vmax.f32 %v9150_v49, %v9155_v13  ;;  %v9151_v61 = vmax.f32 %v9122_v60, %v9145_v41  ;;  %v14654_v49 = vld [vmem:[%s19493_s7 + $0x180] ss:$8 sps:$4 sm:$0xff]   ;;  %v14662_v13 = vld [vmem:[%s19493_s7 + $0x294] ss:$8 sps:$4 sm:$0xff]  }
 0x6a4   : > { %v14713_v41 = vld [vmem:[%s19493_s7 + $0x394] ss:$8 sps:$4 sm:$0xff]  }
 0x6a5   : > { %v18900_v6 = vpack.c.bf16 %v9157_v40, %v9157_v40  ;;  %v9708_v60 = vrot.slane %v9151_v61, 1  ;;  %v14657_v40 = vld [vmem:[%s19493_s7 + $0x1e0] ss:$8 sps:$4 sm:$0xff]  }
 0x6a7   : > { %v9309_v53 = vrot.slane %v18900_v6, 1  ;;  %12773 = vmatmul.mubr.msk.bf16.vlgmr.msra.gmra.mxu1 %vm9231_vm7, %v18900_v6  ;;  %v9446_v55 = vrot.slane %v18900_v6, 2  ;;  %v9583_v1 = vrot.slane %v18900_v6, 3  ;;  %v9710_v47 = vmax.f32 %v9151_v61, %v9708_v60  ;;  %v14665_v6 = vld [vmem:[%s19493_s7 + $0x2f4] ss:$8 sps:$4 sm:$0xff]  }
 0x6a8   : > { %9515 = vmatpush1.bf16.msra.mxu1 %v14588_v45  ;;  %9542 = vmatprep.mubr.bf16.mxu1 %v19532_v27  ;;  %v14711_v61 = vld [vmem:[%s19493_s7 + $0x390] ss:$8 sps:$4 sm:$0xff]   ;;  %v14725_v60 = vld [vmem:[%s19493_s7 + $0x374] ss:$8 sps:$4 sm:$0xff]  }
 0x6a9   : > { %12798 = vmatmul.mubr.msk.bf16.vlgmr.msra.gmra.mxu0 %vm9231_vm7, %v9309_v53  ;;  %9516 = vmatprep.subr.bf16.mxu1 %v14596_v0  ;;  %v19055_v45 = vpack.c.bf16 %v9710_v47, %v9710_v47  ;;  %v14660_v0 = vld [vmem:[%s19493_s7 + $0x290] ss:$8 sps:$4 sm:$0xff]   ;;  %v14731_v47 = vld [vmem:[%s19493_s7 + $0x364] ss:$8 sps:$4 sm:$0xff]  }
 0x6aa   : > { %9652 = vmatpush1.bf16.msra.mxu0 %v14591_v43  ;;  %9679 = vmatprep.mubr.bf16.mxu0 %v19532_v27  ;;  %v14668_v43 = vld [vmem:[%s19493_s7 + $0x284] ss:$8 sps:$4 sm:$0xff]   ;;  %v14663_v53 = vld [vmem:[%s19493_s7 + $0x2f0] ss:$8 sps:$4 sm:$0xff]  }
 0x6ab   : > { %9653 = vmatprep.subr.bf16.mxu0 %v14599_v35  ;;  %v9862_v35 = vrot.slane %v19055_v45, 1 }
 0x6ac   : > { %9517 = vmatpush1.bf16.msra.mxu1 %v14594_v12  ;;  %v14671_v12 = vld [vmem:[%s19493_s7 + $0x2e4] ss:$8 sps:$4 sm:$0xff]  }
 0x6ad   : > { %9518 = vmatprep.subr.bf16.mxu1 %v14602_v3  ;;  %v14666_v3 = vld [vmem:[%s19493_s7 + $0x280] ss:$8 sps:$4 sm:$0xff]  }
 0x6ae   : > { %9654 = vmatpush1.bf16.msra.mxu0 %v14597_v56  ;;  %v14674_v56 = vld [vmem:[%s19493_s7 + $0x274] ss:$8 sps:$4 sm:$0xff]  }
 0x6af   : > { %9655 = vmatprep.subr.bf16.mxu0 %v14605_v22  ;;  %v14669_v22 = vld [vmem:[%s19493_s7 + $0x2e0] ss:$8 sps:$4 sm:$0xff]  }
 0x6b0   : > { %9519 = vmatpush1.bf16.msra.mxu1 %v14600_v34  ;;  %v14677_v34 = vld [vmem:[%s19493_s7 + $0x2d4] ss:$8 sps:$4 sm:$0xff]  }
 0x6b1   : > { %9520 = vmatprep.subr.bf16.mxu1 %v14608_v18  ;;  %v14672_v18 = vld [vmem:[%s19493_s7 + $0x270] ss:$8 sps:$4 sm:$0xff]  }
 0x6b2   : > { %9656 = vmatpush1.bf16.msra.mxu0 %v14603_v37  ;;  %v14680_v37 = vld [vmem:[%s19493_s7 + $0x264] ss:$8 sps:$4 sm:$0xff]  }
 0x6b3   : > { %9657 = vmatprep.subr.bf16.mxu0 %v14611_v31  ;;  %v14675_v31 = vld [vmem:[%s19493_s7 + $0x2d0] ss:$8 sps:$4 sm:$0xff]  }
 0x6b4   : > { %9521 = vmatpush1.bf16.msra.mxu1 %v14606_v26  ;;  %v14683_v26 = vld [vmem:[%s19493_s7 + $0x2c4] ss:$8 sps:$4 sm:$0xff]  }
 0x6b5   : > { %9522 = vmatprep.subr.bf16.mxu1 %v14614_v29  ;;  %v14678_v29 = vld [vmem:[%s19493_s7 + $0x260] ss:$8 sps:$4 sm:$0xff]  }
 0x6b6   : > { %9658 = vmatpush1.bf16.msra.mxu0 %v14609_v36  ;;  %v14686_v36 = vld [vmem:[%s19493_s7 + $0x254] ss:$8 sps:$4 sm:$0xff]  }
 0x6b7   : > { %9659 = vmatprep.subr.bf16.mxu0 %v14617_v23  ;;  %v14681_v23 = vld [vmem:[%s19493_s7 + $0x2c0] ss:$8 sps:$4 sm:$0xff]  }
 0x6b8   : > { %9523 = vmatpush1.bf16.msra.mxu1 %v14612_v48  ;;  %v14689_v48 = vld [vmem:[%s19493_s7 + $0x2b4] ss:$8 sps:$4 sm:$0xff]  }
 0x6b9   : > { %9524 = vmatprep.subr.bf16.mxu1 %v14620_v16  ;;  %v14684_v16 = vld [vmem:[%s19493_s7 + $0x250] ss:$8 sps:$4 sm:$0xff]  }
 0x6ba   : > { %9660 = vmatpush1.bf16.msra.mxu0 %v14615_v14  ;;  %v14692_v14 = vld [vmem:[%s19493_s7 + $0x244] ss:$8 sps:$4 sm:$0xff]  }
 0x6bb   : > { %9661 = vmatprep.subr.bf16.mxu0 %v14623_v9  ;;  %v14687_v9 = vld [vmem:[%s19493_s7 + $0x2b0] ss:$8 sps:$4 sm:$0xff]  }
 0x6bc   : > { %9525 = vmatpush1.bf16.msra.mxu1 %v14618_v7  ;;  %v14695_v7 = vld [vmem:[%s19493_s7 + $0x2a4] ss:$8 sps:$4 sm:$0xff]  }
 0x6bd   : > { %9792 = vmatprep.subr.bf16.mxu1 %v14626_v39  ;;  %v14690_v39 = vld [vmem:[%s19493_s7 + $0x240] ss:$8 sps:$4 sm:$0xff]  }
 0x6be   : > { %9662 = vmatpush1.bf16.msra.mxu0 %v14621_v51  ;;  %v14698_v51 = vld [vmem:[%s19493_s7 + $0x354] ss:$8 sps:$4 sm:$0xff]  }
 0x6bf   : > { %12823 = vmatmul.mubr.msk.bf16.vlgmr.msra.gmra.mxu1 %vm9231_vm7, %v9446_v55  ;;  %9930 = vmatprep.subr.bf16.mxu0 %v14629_v50  ;;  %v14693_v50 = vld [vmem:[%s19493_s7 + $0x2a0] ss:$8 sps:$4 sm:$0xff]   ;;  %v9999_v55 = vrot.slane %v19055_v45, 2 }
 0x6c0   : > { %9793 = vmatpush1.bf16.msra.mxu1 %v14624_v42  ;;  %9820 = vmatprep.mubr.bf16.mxu1 %v19532_v27  ;;  %v14701_v42 = vld [vmem:[%s19493_s7 + $0x3b4] ss:$8 sps:$4 sm:$0xff]  }
 0x6c1   : > { %12848 = vmatmul.mubr.msk.bf16.vlgmr.msra.gmra.mxu0 %vm9231_vm7, %v9583_v1  ;;  %9794 = vmatprep.subr.bf16.mxu1 %v14632_v30  ;;  %v13109_v30 = vpop.permute.xlu1 %13108  ;;  %v14699_v1 = vld [vmem:[%s19493_s7 + $0x3b0] ss:$8 sps:$4 sm:$0xff]  }
 0x6c2   : > { %9931 = vmatpush1.bf16.msra.mxu0 %v14627_v57  ;;  %9958 = vmatprep.mubr.bf16.mxu0 %v19532_v27  ;;  %v14704_v57 = vld [vmem:[%s19493_s7 + $0x344] ss:$8 sps:$4 sm:$0xff]   ;;  %v13111_v59 = vunpack.i.h.bf16 %v13109_v30 }
 0x6c3   : > { %9932 = vmatprep.subr.bf16.mxu0 %v14635_v62  ;;  %v10136_v62 = vrot.slane %v19055_v45, 3 }
 0x6c4   : > { %9795 = vmatpush1.bf16.msra.mxu1 %v14630_v46  ;;  %v13110_v46 = vunpack.i.l.bf16 %v13109_v30  ;;  %v10825_v30 = vld [vmem:[%s19495_s9 + $0x60] sm:$0xff] }
 0x6c5   : > { %9796 = vmatprep.subr.bf16.mxu1 %v14638_v4  ;;  %v14702_v4 = vld [vmem:[%s19493_s7 + $0x340] ss:$8 sps:$4 sm:$0xff]  }
 0x6c6   : > { %9933 = vmatpush1.bf16.msra.mxu0 %v14633_v28  ;;  %v14710_v28 = vld [vmem:[%s19493_s7 + $0x334] ss:$8 sps:$4 sm:$0xff]  }
 0x6c7   : > { %9934 = vmatprep.subr.bf16.mxu0 %v14641_v17  ;;  %v14705_v17 = vld [vmem:[%s19493_s7 + $0x3a0] ss:$8 sps:$4 sm:$0xff]  }
 0x6c8   : > { %9797 = vmatpush1.bf16.msra.mxu1 %v14636_v44  ;;  %v9146_v44 = vsel %vm464_vm0, %v13110_v46, %v13111_v59  ;;  %v10820_v59 = vld [vmem:[%s19495_s9 + $0x38] sm:$0xff]  ;;  %v10819_v46 = vld [vmem:[%s19495_s9 + $0x30] sm:$0xff] }
 0x6c9   : > { %9798 = vmatprep.subr.bf16.mxu1 %v14644_v15  ;;  %v14708_v15 = vld [vmem:[%s19493_s7 + $0x330] ss:$8 sps:$4 sm:$0xff]  }
 0x6ca   : > { %9935 = vmatpush1.bf16.msra.mxu0 %v14639_v20  ;;  %v14716_v20 = vld [vmem:[%s19493_s7 + $0x324] ss:$8 sps:$4 sm:$0xff]  }
 0x6cb   : > { %9936 = vmatprep.subr.bf16.mxu0 %v14647_v21  ;;  %v9152_v21 = vmax.f32 %v9124_v5, %v9146_v44  ;;  %v10814_v44 = vld [vmem:[%s19495_s9 + $0x8] sm:$0xff] }
 0x6cc   : > { %9799 = vmatpush1.bf16.msra.mxu1 %v14642_v2  ;;  %v14719_v2 = vld [vmem:[%s19493_s7 + $0x384] ss:$8 sps:$4 sm:$0xff]  }
 0x6cd   : > { %9800 = vmatprep.subr.bf16.mxu1 %v14650_v8  ;;  %v14714_v8 = vld [vmem:[%s19493_s7 + $0x320] ss:$8 sps:$4 sm:$0xff]   ;;  %v10261_v5 = vrot.slane %v9152_v21, 1 }
 0x6ce   : > { %9937 = vmatpush1.bf16.msra.mxu0 %v14645_v10  ;;  %v14722_v10 = vld [vmem:[%s19493_s7 + $0x314] ss:$8 sps:$4 sm:$0xff]  }
 0x6cf   : > { %9938 = vmatprep.subr.bf16.mxu0 %v14653_v58  ;;  %v14720_v58 = vld [vmem:[%s19493_s7 + $0x310] ss:$8 sps:$4 sm:$0xff]  }
 0x6d0   : > { %9801 = vmatpush1.bf16.msra.mxu1 %v14648_v33  ;;  %v14728_v33 = vld [vmem:[%s19493_s7 + $0x304] ss:$8 sps:$4 sm:$0xff]  }
 0x6d1   : > { %9802 = vmatprep.subr.bf16.mxu1 %v14656_v11  ;;  %v14723_v11 = vld [vmem:[%s19493_s7 + $0x370] ss:$8 sps:$4 sm:$0xff]  }
 0x6d2   : > { %9939 = vmatpush1.bf16.msra.mxu0 %v14651_v32  ;;  %v10263_v32 = vmax.f32 %v9152_v21, %v10261_v5  ;;  %v10840_v21 = vld [vmem:[%s19495_s9 + $0xd8] sm:$0xff]  ;;  %v10837_v5 = vld [vmem:[%s19495_s9 + $0xc0] sm:$0xff] }
 0x6d3   : > { %9940 = vmatprep.subr.bf16.mxu0 %v14659_v19  ;;  %v14726_v19 = vld [vmem:[%s19493_s7 + $0x300] ss:$8 sps:$4 sm:$0xff]  }
 0x6d4   : > { %9803 = vmatpush1.bf16.msra.mxu1 %v14654_v49  ;;  %v14734_v49 = vld [vmem:[%s19493_s7 + $0x414] ss:$8 sps:$4 sm:$0xff]  }
 0x6d5   : > { %10067 = vmatprep.subr.bf16.mxu1 %v14662_v13  ;;  %v14729_v13 = vld [vmem:[%s19493_s7 + $0x360] ss:$8 sps:$4 sm:$0xff]  }
 0x6d6   : > { %9941 = vmatpush1.bf16.msra.mxu0 %v14657_v40  ;;  %v10264_v40 = vpack.c.bf16 %v10263_v32, %v10263_v32 }
 0x6d7   : > { %12873 = vmatmul.mubr.msk.bf16.vlgmr.msra.gmra.mxu1 %vm9231_vm7, %v19055_v45  ;;  %10204 = vmatprep.subr.bf16.mxu0 %v14665_v6  ;;  %v14737_v45 = vld [vmem:[%s19493_s7 + $0x474] ss:$8 sps:$4 sm:$0xff]   ;;  %v14732_v6 = vld [vmem:[%s19493_s7 + $0x410] ss:$8 sps:$4 sm:$0xff]  }
 0x6d8   : > { %10068 = vmatpush1.bf16.msra.mxu1 %v14660_v0  ;;  %10095 = vmatprep.mubr.bf16.mxu1 %v19532_v27  ;;  %v14740_v0 = vld [vmem:[%s19493_s7 + $0x404] ss:$8 sps:$4 sm:$0xff]  }
 0x6d9   : > { %12898 = vmatmul.mubr.msk.bf16.vlgmr.msra.gmra.mxu0 %vm9231_vm7, %v9862_v35  ;;  %10069 = vmatprep.subr.bf16.mxu1 %v14668_v43  ;;  %v14735_v43 = vld [vmem:[%s19493_s7 + $0x470] ss:$8 sps:$4 sm:$0xff]   ;;  %v14743_v35 = vld [vmem:[%s19493_s7 + $0x464] ss:$8 sps:$4 sm:$0xff]  }
 0x6da   : > { %10205 = vmatpush1.bf16.msra.mxu0 %v14663_v53  ;;  %10232 = vmatprep.mubr.bf16.mxu0 %v19532_v27  ;;  %v10415_v53 = vrot.slane %v10264_v40, 1 }
 0x6db   : > { %10206 = vmatprep.subr.bf16.mxu0 %v14671_v12  ;;  %v14738_v12 = vld [vmem:[%s19493_s7 + $0x400] ss:$8 sps:$4 sm:$0xff]  }
 0x6dc   : > { %10070 = vmatpush1.bf16.msra.mxu1 %v14666_v3  ;;  %v14746_v3 = vld [vmem:[%s19493_s7 + $0x3f4] ss:$8 sps:$4 sm:$0xff]  }
 0x6dd   : > { %10071 = vmatprep.subr.bf16.mxu1 %v14674_v56  ;;  %v14741_v56 = vld [vmem:[%s19493_s7 + $0x460] ss:$8 sps:$4 sm:$0xff]  }
 0x6de   : > { %10207 = vmatpush1.bf16.msra.mxu0 %v14669_v22  ;;  %v14749_v22 = vld [vmem:[%s19493_s7 + $0x454] ss:$8 sps:$4 sm:$0xff]  }
 0x6df   : > { %10208 = vmatprep.subr.bf16.mxu0 %v14677_v34  ;;  %v14744_v34 = vld [vmem:[%s19493_s7 + $0x3f0] ss:$8 sps:$4 sm:$0xff]  }
 0x6e0   : > { %10072 = vmatpush1.bf16.msra.mxu1 %v14672_v18  ;;  %v14752_v18 = vld [vmem:[%s19493_s7 + $0x3e4] ss:$8 sps:$4 sm:$0xff]  }
 0x6e1   : > { %10073 = vmatprep.subr.bf16.mxu1 %v14680_v37  ;;  %v14755_v37 = vld [vmem:[%s19493_s7 + $0x444] ss:$8 sps:$4 sm:$0xff]  }
 0x6e2   : > { %10209 = vmatpush1.bf16.msra.mxu0 %v14675_v31  ;;  %v14750_v31 = vld [vmem:[%s19493_s7 + $0x3e0] ss:$8 sps:$4 sm:$0xff]  }
 0x6e3   : > { %10210 = vmatprep.subr.bf16.mxu0 %v14683_v26  ;;  %v14758_v26 = vld [vmem:[%s19493_s7 + $0x3d4] ss:$8 sps:$4 sm:$0xff]  }
 0x6e4   : > { %10074 = vmatpush1.bf16.msra.mxu1 %v14678_v29  ;;  %v14753_v29 = vld [vmem:[%s19493_s7 + $0x440] ss:$8 sps:$4 sm:$0xff]  }
 0x6e5   : > { %10075 = vmatprep.subr.bf16.mxu1 %v14686_v36  ;;  %v14761_v36 = vld [vmem:[%s19493_s7 + $0x434] ss:$8 sps:$4 sm:$0xff]  }
 0x6e6   : > { %10211 = vmatpush1.bf16.msra.mxu0 %v14681_v23  ;;  %v14756_v23 = vld [vmem:[%s19493_s7 + $0x3d0] ss:$8 sps:$4 sm:$0xff]  }
 0x6e7   : > { %10212 = vmatprep.subr.bf16.mxu0 %v14689_v48  ;;  %v14764_v48 = vld [vmem:[%s19493_s7 + $0x3c4] ss:$8 sps:$4 sm:$0xff]  }
 0x6e8   : > { %10076 = vmatpush1.bf16.msra.mxu1 %v14684_v16  ;;  %v14759_v16 = vld [vmem:[%s19493_s7 + $0x430] ss:$8 sps:$4 sm:$0xff]  }
 0x6e9   : > { %10077 = vmatprep.subr.bf16.mxu1 %v14692_v14  ;;  %v14767_v14 = vld [vmem:[%s19493_s7 + $0x424] ss:$8 sps:$4 sm:$0xff]  }
 0x6ea   : > { %10213 = vmatpush1.bf16.msra.mxu0 %v14687_v9  ;;  %v14762_v9 = vld [vmem:[%s19493_s7 + $0x3c0] ss:$8 sps:$4 sm:$0xff]  }
 0x6eb   : > { %10214 = vmatprep.subr.bf16.mxu0 %v14695_v7  ;;  %v14765_v7 = vld [vmem:[%s19493_s7 + $0x420] ss:$8 sps:$4 sm:$0xff]  }
 0x6ec   : > { %10078 = vmatpush1.bf16.msra.mxu1 %v14690_v39  ;;  %v10552_v39 = vrot.slane %v10264_v40, 2 }
 0x6ed   : > { %10345 = vmatprep.subr.bf16.mxu1 %v14698_v51  ;;  %v19533_v51 = vmov 0.0  }
 0x6ee   : > { %10215 = vmatpush1.bf16.msra.mxu0 %v14693_v50  ;;  %v10689_v50 = vrot.slane %v10264_v40, 3 }
 0x6ef   : > { %12923 = vmatmul.mubr.msk.bf16.vlgmr.msra.gmra.mxu1 %vm9231_vm7, %v9999_v55  ;;  %10483 = vmatprep.subr.bf16.mxu0 %v14701_v42  ;;  %v10828_v42 = vld [vmem:[%s19495_s9 + $0x78] sm:$0xff]  ;;  %v10826_v55 = vld [vmem:[%s19495_s9 + $0x68] sm:$0xff] }
 0x6f0   : > { %10346 = vmatpush1.bf16.msra.mxu1 %v14696_v63  ;;  %10373 = vmatprep.mubr.bf16.mxu1 %v19532_v27  ;;  %v10827_v63 = vld [vmem:[%s19495_s9 + $0x70] sm:$0xff] }
 0x6f1   : > { %12948 = vmatmul.mubr.msk.bf16.vlgmr.msra.gmra.mxu0 %vm9231_vm7, %v10136_v62  ;;  %10347 = vmatprep.subr.bf16.mxu1 %v14704_v57  ;;  %v10824_v57 = vld [vmem:[%s19495_s9 + $0x58] sm:$0xff]  ;;  %v10822_v62 = vld [vmem:[%s19495_s9 + $0x48] sm:$0xff] }
 0x6f2   : > { %10484 = vmatpush1.bf16.msra.mxu0 %v14699_v1  ;;  %10511 = vmatprep.mubr.bf16.mxu0 %v19532_v27  ;;  %v10823_v1 = vld [vmem:[%s19495_s9 + $0x50] sm:$0xff] }
 0x6f3   : > { %10485 = vmatprep.subr.bf16.mxu0 %v14707_v54  ;;  %v10821_v54 = vld [vmem:[%s19495_s9 + $0x40] sm:$0xff] }
 0x6f4   : > { %10348 = vmatpush1.bf16.msra.mxu1 %v14702_v4  ;;  %v10818_v4 = vld [vmem:[%s19495_s9 + $0x28] sm:$0xff] }
 0x6f5   : > { %10349 = vmatprep.subr.bf16.mxu1 %v14710_v28  ;;  %v10817_v28 = vld [vmem:[%s19495_s9 + $0x20] sm:$0xff] }
 0x6f6   : > { %10486 = vmatpush1.bf16.msra.mxu0 %v14705_v17  ;;  %v10816_v17 = vld [vmem:[%s19495_s9 + $0x18] sm:$0xff] }
 0x6f7   : > { %10487 = vmatprep.subr.bf16.mxu0 %v14713_v41  ;;  %v10815_v41 = vld [vmem:[%s19495_s9 + $0x10] sm:$0xff] }
 0x6f8   : > { %10350 = vmatpush1.bf16.msra.mxu1 %v14708_v15  ;;  %v10813_v15 = vld [vmem:[%s19495_s9] sm:$0xff] }
 0x6f9   : > { %10351 = vmatprep.subr.bf16.mxu1 %v14716_v20  ;;  %v10842_v20 = vld [vmem:[%s19495_s9 + $0xe8] sm:$0xff] }
 0x6fa   : > { %10488 = vmatpush1.bf16.msra.mxu0 %v14711_v61  ;;  %v10841_v61 = vld [vmem:[%s19495_s9 + $0xe0] sm:$0xff] }
 0x6fb   : > { %10489 = vmatprep.subr.bf16.mxu0 %v14719_v2  ;;  %v10839_v2 = vld [vmem:[%s19495_s9 + $0xd0] sm:$0xff] }
 0x6fc   : > { %10352 = vmatpush1.bf16.msra.mxu1 %v14714_v8  ;;  %v10838_v8 = vld [vmem:[%s19495_s9 + $0xc8] sm:$0xff] }
 0x6fd   : > { %10353 = vmatprep.subr.bf16.mxu1 %v14722_v10  ;;  %v14850_v10 = vmov 1966171168  }
 0x6fe   : > { %10490 = vmatpush1.bf16.msra.mxu0 %v14717_v24  ;;  %v9280_v24 = vunpack.c.l.s4 %v14850_v10 }
 0x6ff   : > { %10491 = vmatprep.subr.bf16.mxu0 %v14725_v60  ;;  %v10836_v60 = vld [vmem:[%s19495_s9 + $0xb8] sm:$0xff] }
 0x700   : > { %10354 = vmatpush1.bf16.msra.mxu1 %v14720_v58  ;;  %v9281_v58 = vunpack.c.0.s8 %v9280_v24 }
 0x701   : > { %10355 = vmatprep.subr.bf16.mxu1 %v14728_v33 }
 0x702   : > { %10492 = vmatpush1.bf16.msra.mxu0 %v14723_v11  ;;  %v10835_v11 = vld [vmem:[%s19495_s9 + $0xb0] sm:$0xff]  ;;  %v19388_v32 = vsub.s32 %v9281_v58, %v19529_v25  ;;  %v10833_v25 = vld [vmem:[%s19495_s9 + $0xa0] sm:$0xff] }
 0x703   : > { %10493 = vmatprep.subr.bf16.mxu0 %v14731_v47 }
 0x704   : > { %10356 = vmatpush1.bf16.msra.mxu1 %v14726_v19 }
 0x705   : > { %10620 = vmatprep.subr.bf16.mxu1 %v14734_v49  ;;  %v10834_v49 = vld [vmem:[%s19495_s9 + $0xa8] sm:$0xff] }
 0x706   : > { %10494 = vmatpush1.bf16.msra.mxu0 %v14729_v13 }
 0x707   : > { %12973 = vmatmul.mubr.msk.bf16.vlgmr.msra.gmra.mxu1 %vm9231_vm7, %v10264_v40  ;;  %10757 = vmatprep.subr.bf16.mxu0 %v14737_v45 }
 0x708   : > { %10621 = vmatpush1.bf16.msra.mxu1 %v14732_v6  ;;  %10648 = vmatprep.mubr.bf16.mxu1 %v19532_v27 }
 0x709   : > { %12998 = vmatmul.mubr.msk.bf16.vlgmr.msra.gmra.mxu0 %vm9231_vm7, %v10415_v53  ;;  %10622 = vmatprep.subr.bf16.mxu1 %v14740_v0  ;;  %v9153_v53 = vld [vmem:[%s19494_s8] sm:$0x3] }
 0x70a   : > { %10758 = vmatpush1.bf16.msra.mxu0 %v14735_v43  ;;  %10785 = vmatprep.mubr.bf16.mxu0 %v19532_v27  ;;  %v14747_v27 = vld [vmem:[%s19493_s7 + $0x450] ss:$8 sps:$4 sm:$0xff]  }
 0x70b   : > { %10759 = vmatprep.subr.bf16.mxu0 %v14743_v35  ;;  %v10832_v43 = vld [vmem:[%s19495_s9 + $0x98] sm:$0xff] }
 0x70c   : > { %10623 = vmatpush1.bf16.msra.mxu1 %v14738_v12 }
 0x70d   : > { %10624 = vmatprep.subr.bf16.mxu1 %v14746_v3  ;;  %v10831_v3 = vld [vmem:[%s19495_s9 + $0x90] sm:$0xff] }
 0x70e   : > { %10760 = vmatpush1.bf16.msra.mxu0 %v14741_v56 }
 0x70f   : > { %10761 = vmatprep.subr.bf16.mxu0 %v14749_v22 }
 0x710   : > { %10625 = vmatpush1.bf16.msra.mxu1 %v14744_v34 }
 0x711   : > { %10626 = vmatprep.subr.bf16.mxu1 %v14752_v18  ;;  %v10830_v18 = vld [vmem:[%s19495_s9 + $0x88] sm:$0xff] }
 0x712   : > { %10762 = vmatpush1.bf16.msra.mxu0 %v14747_v27 }
 0x713   : > { %10763 = vmatprep.subr.bf16.mxu0 %v14755_v37 }
 0x714   : > { %10627 = vmatpush1.bf16.msra.mxu1 %v14750_v31  ;;  %v10829_v31 = vld [vmem:[%s19495_s9 + $0x80] sm:$0xff] }
 0x715   : > { %10628 = vmatprep.subr.bf16.mxu1 %v14758_v26 }
 0x716   : > { %10764 = vmatpush1.bf16.msra.mxu0 %v14753_v29 }
 0x717   : > { %10765 = vmatprep.subr.bf16.mxu0 %v14761_v36 }
 0x718   : > { %10629 = vmatpush1.bf16.msra.mxu1 %v14756_v23 }
 0x719   : > { %10630 = vmatprep.subr.bf16.mxu1 %v14764_v48 }
 0x71a   : > { %10766 = vmatpush1.bf16.msra.mxu0 %v14759_v16 }
 0x71b   : > { %10767 = vmatprep.subr.bf16.mxu0 %v14767_v14 }
 0x71c   : > { %10631 = vmatpush1.bf16.msra.mxu1 %v14762_v9 }
 0x71d   : > { %10857 = vmatprep.subr.mxu1 %v19533_v51 }
 0x71e   : > { %10768 = vmatpush1.bf16.msra.mxu0 %v14765_v7 }
 0x71f   : > { %13023 = vmatmul.mubr.msk.bf16.vlgmr.msra.gmra.mxu1 %vm9231_vm7, %v10552_v39 }
 0x720   : > { %10858 = vmatpush1.msra.mxu1 %v10828_v42 }
 0x721   : > { %13048 = vmatmul.mubr.msk.bf16.vlgmr.msra.gmra.mxu0 %vm9231_vm7, %v10689_v50  ;;  %10859 = vmatprep.subr.mxu1 %v19533_v51 }
 0x722   : > { %10860 = vmatpush1.msra.mxu1 %v10827_v63 }
 0x723   : > { %10861 = vmatprep.subr.mxu1 %v19533_v51 }
 0x724   : > { %10862 = vmatpush1.msra.mxu1 %v10826_v55 }
 0x725   : > { %10863 = vmatprep.subr.mxu1 %v19533_v51 }
 0x726   : > { %10864 = vmatpush1.msra.mxu1 %v10825_v30 }
 0x727   : > { %10865 = vmatprep.subr.mxu1 %v19533_v51 }
 0x728   : > { %10866 = vmatpush1.msra.mxu1 %v10824_v57 }
 0x729   : > { %10867 = vmatprep.subr.mxu1 %v19533_v51 }
 0x72a   : > { %10868 = vmatpush1.msra.mxu1 %v10823_v1 }
 0x72b   : > { %10869 = vmatprep.subr.mxu1 %v19533_v51 }
 0x72c   : > { %10870 = vmatpush1.msra.mxu1 %v10822_v62 }
 0x72d   : > { %10871 = vmatprep.subr.mxu1 %v19533_v51 }
 0x72e   : > { %10872 = vmatpush1.msra.mxu1 %v10821_v54 }
 0x72f   : > { %10873 = vmatprep.subr.mxu1 %v19533_v51 }
 0x730   : > { %10874 = vmatpush1.msra.mxu1 %v10820_v59 }
 0x731   : > { %10875 = vmatprep.subr.mxu1 %v19533_v51 }
 0x732   : > { %10876 = vmatpush1.msra.mxu1 %v10819_v46 }
 0x733   : > { %10877 = vmatprep.subr.mxu1 %v19533_v51 }
 0x734   : > { %10878 = vmatpush1.msra.mxu1 %v10818_v4 }
 0x735   : > { %10879 = vmatprep.subr.mxu1 %v19533_v51 }
 0x736   : > { %10880 = vmatpush1.msra.mxu1 %v10817_v28 }
 0x737   : > { %10881 = vmatprep.subr.mxu1 %v19533_v51 }
 0x738   : > { %10882 = vmatpush1.msra.mxu1 %v10816_v17 }
 0x739   : > { %10883 = vmatprep.subr.mxu1 %v19533_v51 }
 0x73a   : > { %10884 = vmatpush1.msra.mxu1 %v10815_v41 }
 0x73b   : > { %10885 = vmatprep.subr.mxu1 %v19533_v51 }
 0x73c   : > { %10886 = vmatpush1.msra.mxu1 %v10814_v44 }
 0x73d   : > { %10887 = vmatprep.subr.mxu1 %v19533_v51 }
 0x73e   : > { %10888 = vmatpush1.msra.mxu1 %v10813_v15 }
 0x73f   : > { %10893 = vmatprep.subr.mxu1 %v19533_v51 }
 0x740   : > { %10894 = vmatpush2.msra.mxu1 %v10842_v20 }
 0x741   : > { %10895 = vmatprep.subr.mxu1 %v19533_v51 }
 0x742   : > { %10896 = vmatpush2.msra.mxu1 %v10841_v61 }
 0x743   : > { %10897 = vmatprep.subr.mxu1 %v19533_v51 }
 0x744   : > { %10898 = vmatpush2.msra.mxu1 %v10840_v21 }
 0x745   : > { %10899 = vmatprep.subr.mxu1 %v19533_v51 }
 0x746   : > { %10900 = vmatpush2.msra.mxu1 %v10839_v2 }
 0x747   : > { %10901 = vmatprep.subr.mxu1 %v19533_v51 }
 0x748   : > { %10902 = vmatpush2.msra.mxu1 %v10838_v8 }
 0x749   : > { %10903 = vmatprep.subr.mxu1 %v19533_v51 }
 0x74a   : > { %10904 = vmatpush2.msra.mxu1 %v10837_v5 }
 0x74b   : > { %10905 = vmatprep.subr.mxu1 %v19533_v51 }
 0x74c   : > { %10906 = vmatpush2.msra.mxu1 %v10836_v60 }
 0x74d   : > { %10907 = vmatprep.subr.mxu1 %v19533_v51 }
 0x74e   : > { %10908 = vmatpush2.msra.mxu1 %v10835_v11 }
 0x74f   : > { %10909 = vmatprep.subr.mxu1 %v19533_v51 }
 0x750   : > { %10910 = vmatpush2.msra.mxu1 %v10834_v49 }
 0x751   : > { %10911 = vmatprep.subr.mxu1 %v19533_v51 }
 0x752   : > { %10912 = vmatpush2.msra.mxu1 %v10833_v25 }
 0x753   : > { %10913 = vmatprep.subr.mxu1 %v19533_v51 }
 0x754   : > { %10914 = vmatpush2.msra.mxu1 %v10832_v43 }
 0x755   : > { %10915 = vmatprep.subr.mxu1 %v19533_v51 }
 0x756   : > { %10916 = vmatpush2.msra.mxu1 %v10831_v3 }
 0x757   : > { %10917 = vmatprep.subr.mxu1 %v19533_v51 }
 0x758   : > { %10918 = vmatpush2.msra.mxu1 %v10830_v18 }
 0x759   : > { %10919 = vmatprep.subr.mxu1 %v19533_v51 }
 0x75a   : > { %10920 = vmatpush2.msra.mxu1 %v10829_v31 }
 0x767   : > { %v9269_v33 = vpop.f32.mrf.mxu1 }
 0x769   : > { %v9271_v47 = vpop.f32.mrf.mxu1  ;;  %v9407_v19 = vpop.f32.mrf.mxu0 }
 0x76a   : > { %v9278_v13 = vcombine.low %v9269_v33, %v9271_v47 }
 0x76b   : > { %v9273_v40 = vpop.f32.mrf.mxu1  ;;  %v9409_v45 = vpop.f32.mrf.mxu0 }
 0x76c   : > { %v9285_v6 = vrot.slane %v9278_v13, %v19388_v32  ;;  %v9416_v0 = vcombine.low %v9407_v19, %v9409_v45 }
 0x76d   : > { %v9274_v35 = vpop.f32.mrf.mxu1  ;;  %v9411_v12 = vpop.f32.mrf.mxu0 }
 0x76e   : > { %v9292_v56 = vrot.slane %v9285_v6, %v19388_v32  ;;  %v9423_v22 = vrot.slane %v9416_v0, %v19388_v32 }
 0x76f   : > { %v9412_v34 = vpop.f32.mrf.mxu0 }
 0x770   : > { %v9294_v27 = vadd.f32 %v9292_v56, %v9153_v53  ;;  %v9430_v37 = vrot.slane %v9423_v22, %v19388_v32 }
 0x772   : > { %v9432_v26 = vadd.f32 %v9430_v37, %v9294_v27 }
 0x77f   : > { %v9544_v29 = vpop.f32.mrf.mxu1 }
 0x781   : > { %v9546_v36 = vpop.f32.mrf.mxu1  ;;  %v9681_v23 = vpop.f32.mrf.mxu0 }
 0x782   : > { %v9553_v48 = vcombine.low %v9544_v29, %v9546_v36 }
 0x783   : > { %v9548_v16 = vpop.f32.mrf.mxu1  ;;  %v9683_v14 = vpop.f32.mrf.mxu0 }
 0x784   : > { %v9560_v9 = vrot.slane %v9553_v48, %v19388_v32  ;;  %v9690_v7 = vcombine.low %v9681_v23, %v9683_v14 }
 0x785   : > { %v9549_v39 = vpop.f32.mrf.mxu1  ;;  %v9685_v50 = vpop.f32.mrf.mxu0 }
 0x786   : > { %v9567_v42 = vrot.slane %v9560_v9, %v19388_v32  ;;  %v9697_v63 = vrot.slane %v9690_v7, %v19388_v32 }
 0x787   : > { %v9686_v55 = vpop.f32.mrf.mxu0 }
 0x788   : > { %v9569_v30 = vadd.f32 %v9567_v42, %v9432_v26  ;;  %v9704_v51 = vrot.slane %v9697_v63, %v19388_v32 }
 0x78a   : > { %v9706_v57 = vadd.f32 %v9704_v51, %v9569_v30 }
 0x797   : > { %v9822_v1 = vpop.f32.mrf.mxu1 }
 0x799   : > { %v9824_v62 = vpop.f32.mrf.mxu1  ;;  %v9960_v54 = vpop.f32.mrf.mxu0 }
 0x79a   : > { %v9831_v59 = vcombine.low %v9822_v1, %v9824_v62 }
 0x79b   : > { %v9826_v46 = vpop.f32.mrf.mxu1  ;;  %v9962_v4 = vpop.f32.mrf.mxu0 }
 0x79c   : > { %v9838_v28 = vrot.slane %v9831_v59, %v19388_v32  ;;  %v9969_v17 = vcombine.low %v9960_v54, %v9962_v4  ;;  %v10843_v4 = vld [vmem:[%s19496_s10] sm:$0x1] }
 0x79d   : > { %v9827_v41 = vpop.f32.mrf.mxu1  ;;  %v9964_v44 = vpop.f32.mrf.mxu0 }
 0x79e   : > { %v9845_v15 = vrot.slane %v9838_v28, %v19388_v32  ;;  %v9976_v20 = vrot.slane %v9969_v17, %v19388_v32 }
 0x79f   : > { %v9965_v61 = vpop.f32.mrf.mxu0 }
 0x7a0   : > { %v9847_v21 = vadd.f32 %v9845_v15, %v9706_v57  ;;  %v9983_v2 = vrot.slane %v9976_v20, %v19388_v32 }
 0x7a2   : > { %v9985_v8 = vadd.f32 %v9983_v2, %v9847_v21 }
 0x7af   : > { %v10097_v10 = vpop.f32.mrf.mxu1 }
 0x7b1   : > { %v10099_v24 = vpop.f32.mrf.mxu1  ;;  %v10234_v5 = vpop.f32.mrf.mxu0 }
 0x7b2   : > { %v10106_v60 = vcombine.low %v10097_v10, %v10099_v24 }
 0x7b3   : > { %v10101_v58 = vpop.f32.mrf.mxu1  ;;  %v10236_v33 = vpop.f32.mrf.mxu0 }
 0x7b4   : > { %v10113_v11 = vrot.slane %v10106_v60, %v19388_v32  ;;  %v10243_v47 = vcombine.low %v10234_v5, %v10236_v33 }
 0x7b5   : > { %v10102_v19 = vpop.f32.mrf.mxu1  ;;  %v10238_v49 = vpop.f32.mrf.mxu0 }
 0x7b6   : > { %v10120_v13 = vrot.slane %v10113_v11, %v19388_v32  ;;  %v10250_v40 = vrot.slane %v10243_v47, %v19388_v32 }
 0x7b7   : > { %v10239_v45 = vpop.f32.mrf.mxu0 }
 0x7b8   : > { %v10122_v25 = vadd.f32 %v10120_v13, %v9985_v8  ;;  %v10257_v6 = vrot.slane %v10250_v40, %v19388_v32 }
 0x7ba   : > { %v10259_v0 = vadd.f32 %v10257_v6, %v10122_v25 }
 0x7c7   : > { %v10375_v43 = vpop.f32.mrf.mxu1 }
 0x7c9   : > { %v10377_v53 = vpop.f32.mrf.mxu1  ;;  %v10513_v35 = vpop.f32.mrf.mxu0 }
 0x7ca   : > { %v10384_v12 = vcombine.low %v10375_v43, %v10377_v53 }
 0x7cb   : > { %v10379_v3 = vpop.f32.mrf.mxu1  ;;  %v10515_v56 = vpop.f32.mrf.mxu0 }
 0x7cc   : > { %v10391_v22 = vrot.slane %v10384_v12, %v19388_v32  ;;  %v10522_v34 = vcombine.low %v10513_v35, %v10515_v56 }
 0x7cd   : > { %v10380_v18 = vpop.f32.mrf.mxu1  ;;  %v10517_v27 = vpop.f32.mrf.mxu0 }
 0x7ce   : > { %v10398_v37 = vrot.slane %v10391_v22, %v19388_v32  ;;  %v10529_v31 = vrot.slane %v10522_v34, %v19388_v32 }
 0x7cf   : > { %v10518_v26 = vpop.f32.mrf.mxu0 }
 0x7d0   : > { %v10400_v29 = vadd.f32 %v10398_v37, %v10259_v0  ;;  %v10536_v36 = vrot.slane %v10529_v31, %v19388_v32 }
 0x7d2   : > { %v10538_v23 = vadd.f32 %v10536_v36, %v10400_v29 }
 0x7df   : > { %v10650_v48 = vpop.f32.mrf.mxu1 }
 0x7e1   : > { %v10652_v16 = vpop.f32.mrf.mxu1  ;;  %v10787_v14 = vpop.f32.mrf.mxu0 }
 0x7e2   : > { %v10659_v9 = vcombine.low %v10650_v48, %v10652_v16 }
 0x7e3   : > { %v10654_v7 = vpop.f32.mrf.mxu1  ;;  %v10789_v39 = vpop.f32.mrf.mxu0 }
 0x7e4   : > { %v10666_v50 = vrot.slane %v10659_v9, %v19388_v32  ;;  %v10796_v42 = vcombine.low %v10787_v14, %v10789_v39 }
 0x7e5   : > { %v10655_v63 = vpop.f32.mrf.mxu1  ;;  %v10791_v55 = vpop.f32.mrf.mxu0 }
 0x7e6   : > { %v10673_v30 = vrot.slane %v10666_v50, %v19388_v32  ;;  %v10803_v51 = vrot.slane %v10796_v42, %v19388_v32 }
 0x7e7   : > { %v10792_v57 = vpop.f32.mrf.mxu0 }
 0x7e8   : > { %v10675_v1 = vadd.f32 %v10673_v30, %v10538_v23  ;;  %v10810_v62 = vrot.slane %v10803_v51, %v19388_v32 }
 0x7ea   : > { %v10812_v54 = vadd.f32 %v10810_v62, %v10675_v1 }
 0x7ec   : > { %v10848_v59 = vrot.slane %v10812_v54, %v15462_v52  ;;  %v10852_v46 = vrot.slane %v10812_v54, %v15470_v38 }
 0x7ee   : > { %13049 = vmatprep.mubr.msk.f32.mxu1 %vm10854_vm8, %v10852_v46 }
 0x7ef   : > { %10922 = vmatmul.mubr.f32.vlgmr.msra.gmra.mxu1 %v10848_v59 }
 0x8af   : > { %v10923_v28 = vpop.f32.mrf.mxu1 }
 0x8b0   : > { %v10924_v32 = vadd.f32 %v10923_v28, %v10843_v4 }
 0x8b1   : > { %v10925_v52 = vpop.f32.mrf.mxu1 }
 0x8b2   : > { %10928 = vst.msk [vmem:[%s378_s25] sm:$0x1] %vm10927_vm9, %v10924_v32 }
 0x8b3   : > { %14798 = shalt.err (!%p14795_p3)
}
 0x8b4   : > { %s14799_s26 = scalar_lea.hbm %s19451_s12, 16  ;;  %s14803_s19 = scalar_lea.hbm %s19497_s11, 32 }
 0x8b5   : > { %p14800_p4 = scmp.ne.s32.totalorder %s19451_s12, %s14799_s26  ;;  %p14804_p9 = scmp.lt.s32.totalorder %s19451_s12, %s19497_s11 }
 0x8b6   : > { %p14805_p10 = scmp.lt.s32.totalorder %s14803_s19, %s14799_s26 }
 0x8b7   : > { %p14801_p7 = pnand %p14800_p4, %p14950_p5 }
 0x8b8   : > { %p14806_p11 = por %p14805_p10, %p14804_p9 }
 0x8b9   : > { %p14802_p8 = pneg %p14801_p7 }
 0x8bb   : > { %p14807_p12 = pnand %p14806_p11, %p14802_p8 }
 0x8bd   : > { %14810 = shalt.err (!%p14807_p12)
}
 0x8be   : > { %13054 = dma.vmem_to_hbm [thread:$0]  (%p14950_p5), %s10943_s23, 16, %s19451_s12, %s10930_s13  }
 0x8bf PF: > { %p13060_p13 = scmp.ge.s32.totalorder %s14845_s20, 2  ;;  %s10954_s30 = sand.u32 1, %s14833_s17  }
 0x8c0   : > { %s10955_s14 = scalar_lea.sflag [#allocation4], %s10954_s30 }
 0x8c1   : > { %p13057_p0 = pnand %p13060_p13, %p14954_p6 }
 0x8c3   : > { %p13058_p1 = pneg %p13057_p0 }
 0x8c5   : > { %14828 = dma.done.wait (%p13058_p1), %s10955_s14, 16  }
 0x8c6   : > { %14830 = vsyncadd (%p13058_p1), %s10955_s14, 4294967280  ;;  %s19534_s20 = sld [smem:[#allocation7_spill]]  ;;  %s19537_s17 = smov %s14837_s18 }
 0x8c7   : > { %s19535_s21 = sld [smem:[#allocation6_spill]] }
 0x8c8   : > { %s19536_s19 = sld [smem:[#allocation8_spill]] }
 0x8cc   : > { %p21_p2 = scmp.ge.s32.totalorder %s19534_s20, 4  }
 0x8cd   : > { %s19538_s18 = smov %s19535_s21 }
 0x8ce   :  { %23 = sbr.rel (!%p21_p2) target bundleno = 3 (0x3), region = 122 }
 0x8d3   :  { %10959 = vsyncpa [#allocation4], 1 }
 0x8d4   :  { %10961 = vsyncpa [#allocation4 + $0x1], 1 }

</bundles_post_ra>
